<compile_context>
chip_gen: v7x
topology: tpu7x:2x2x1
jax: 0.10.0
libtpu: 0.0.40
codegen_flags: <defaults>
</compile_context>

<pallas_src>
import functools

import jax
import jax.numpy as jnp
from jax.experimental import pallas as pl
from jax.experimental.pallas import tpu as pltpu


# ----------------------------------------------------------------------------
# Single fused kernel: frontend + both GATs + tail
# ----------------------------------------------------------------------------

def _gat_block(x3d, w, b):
    """Single-head scaled-dot-product spatial self-attention with residual.
       x3d:(B,N,C) f32, w:(C,3C) bf16 (Wq|Wk|Wv), b:(1,3C) f32 -> (B,N,C) f32."""
    B, N, C = x3d.shape
    x2d = x3d.reshape(B * N, C)
    qkv = jnp.dot(x2d.astype(jnp.bfloat16), w,
                  preferred_element_type=jnp.float32) + b              # (B*N,3C)
    q = qkv[:, :C].reshape(B, N, C)
    k = qkv[:, C:2 * C].reshape(B, N, C)
    v = qkv[:, 2 * C:].reshape(B, N, C)
    scale = 1.0 / float(C) ** 0.5
    s = jnp.einsum('bqd,bkd->bqk', q.astype(jnp.bfloat16), k.astype(jnp.bfloat16),
                   preferred_element_type=jnp.float32) * scale         # (B,N,N)
    s = s - jnp.max(s, axis=-1, keepdims=True)
    p = jnp.exp(s)
    p = p * pl.reciprocal(jnp.sum(p, axis=-1, keepdims=True), approx=True)
    attn = jnp.einsum('bqk,bkd->bqd', p.astype(jnp.bfloat16), v.astype(jnp.bfloat16),
                      preferred_element_type=jnp.float32)              # (B,N,C)
    return attn + x3d                                                  # residual


def _fused_kernel(xlf_ref, wlf_ref, blf_ref, xhf_ref, whfcc_ref, bhfcc_ref,
                  gatw_ref, gatb_ref, gatew_ref, gateb_ref, solo_ref, text_ref,
                  o_ref, cbuf):
    """Shapes (all blocks == full arrays, grid=(1,)):
       xlf:(M,Kp) bf16, wlf:(Kp,256) bf16, blf:(1,256) f32,
       xhf:(M,384) bf16, whfcc:(384,768) bf16 (cols 0:256=HF_conv,
       256:768=visual_conv), bhfcc:(1,768) f32,
       gatw:(2,512,1536) bf16 (0: VSA concat_attention, 1: CA visual_attention),
       gatb:(2,1,1536) f32, gatew:(512,512) bf16, gateb:(1,512) f32,
       solo:(B,512) f32, text:(T,512) f32 -> o:(B,T) f32.
       cbuf:(M,512) f32 VMEM scratch for the concat feature."""
    M, C = cbuf.shape
    B = solo_ref.shape[0]
    N = M // B

    # ---- frontend: LF_conv + merged {HF_conv | visual_conv} + concat + mean
    lf = jnp.dot(xlf_ref[...], wlf_ref[...],
                 preferred_element_type=jnp.float32) + blf_ref[...]      # (M,256)
    hfcc = jnp.dot(xhf_ref[...], whfcc_ref[...],
                   preferred_element_type=jnp.float32) + bhfcc_ref[...]  # (M,768)
    hf = hfcc[:, :256]
    vis = hfcc[:, 256:]                                                  # (M,512)
    # NOTE: in the PyTorch VSA_Module, `higher_feature` has already been
    # reassigned to the HF_conv output before `.mean(dim=1)`, so the mean is
    # over the 256 HF_conv channels (matches this).
    m = jnp.mean(hf, axis=-1, keepdims=True)                             # (M,1)
    cbuf[:, :256] = lf + m
    cbuf[:, 256:] = hf + m
    concat = cbuf[...]                                                   # (M,512)

    # ---- the two GAT blocks (fused QKV projections, f32 softmax) -----------
    attent = _gat_block(concat.reshape(B, N, C), gatw_ref[0], gatb_ref[0])
    cross = _gat_block(vis.reshape(B, N, C), gatw_ref[1], gatb_ref[1])

    # ---- VSA tail: adaptive_avg_pool2d(1) -> sigmoid -> * solo -> l2norm ----
    pooled_att = jnp.mean(attent, axis=1)                                # (B,C)
    vf = solo_ref[...] * jax.nn.sigmoid(pooled_att)
    vf = vf / (jnp.sqrt(jnp.sum(vf * vf, axis=-1, keepdims=True)) + 1e-8)

    # ---- CrossAttention (soft_att) tail: pool -> Linear+Sigmoid gate --------
    pooled_cross = jnp.mean(cross, axis=1)                               # (B,C)
    gate = jax.nn.sigmoid(
        jnp.dot(pooled_cross.astype(jnp.bfloat16), gatew_ref[...],
                preferred_element_type=jnp.float32) + gateb_ref[...])    # (B,C)
    dual_text = gate[:, None, :] * text_ref[...][None, :, :]             # (B,T,C)

    # ---- cosine_similarity(dual_visual, dual_text, dim=-1) ------------------
    num = jnp.sum(vf[:, None, :] * dual_text, axis=-1)                   # (B,T)
    w1 = jnp.sqrt(jnp.sum(vf * vf, axis=-1, keepdims=True))              # (B,1)
    w2 = jnp.sqrt(jnp.sum(dual_text * dual_text, axis=-1))               # (B,T)
    o_ref[...] = num * pl.reciprocal(jnp.maximum(w1 * w2, 1e-8), approx=True)


def fused_forward(x_lf, w_lf, b_lf, x_hf, w_hfcc, b_hfcc, gat_w, gat_b,
                  gate_w, gate_b, solo, text):
    M, Kp = x_lf.shape
    K2 = x_hf.shape[1]
    B, C = solo.shape
    T = text.shape[0]
    N = M // B
    cost = pl.CostEstimate(
        flops=(2 * M * Kp * 256 + 2 * M * K2 * 768
               + 2 * (2 * M * C * 3 * C + 4 * B * N * N * C)
               + 2 * B * C * C + 8 * B * T * C + 8 * B * N * C),
        transcendentals=2 * B * N * N + 4 * B * C + 2 * B * T,
        bytes_accessed=((x_lf.size + x_hf.size + w_lf.size + w_hfcc.size
                         + gat_w.size + gate_w.size) * 2
                        + (b_lf.size + b_hfcc.size + gat_b.size + gate_b.size
                           + solo.size + text.size + B * T) * 4))
    return pl.pallas_call(
        _fused_kernel,
        out_shape=jax.ShapeDtypeStruct((B, T), jnp.float32),
        grid=(1,),
        in_specs=[pl.BlockSpec((M, Kp), lambda i: (0, 0)),
                  pl.BlockSpec((Kp, 256), lambda i: (0, 0)),
                  pl.BlockSpec((1, 256), lambda i: (0, 0)),
                  pl.BlockSpec((M, K2), lambda i: (0, 0)),
                  pl.BlockSpec((K2, 768), lambda i: (0, 0)),
                  pl.BlockSpec((1, 768), lambda i: (0, 0)),
                  pl.BlockSpec((2, C, 3 * C), lambda i: (0, 0, 0)),
                  pl.BlockSpec((2, 1, 3 * C), lambda i: (0, 0, 0)),
                  pl.BlockSpec((C, C), lambda i: (0, 0)),
                  pl.BlockSpec((1, C), lambda i: (0, 0)),
                  pl.BlockSpec((B, C), lambda i: (0, 0)),
                  pl.BlockSpec((T, C), lambda i: (0, 0))],
        out_specs=pl.BlockSpec((B, T), lambda i: (0, 0)),
        scratch_shapes=[pltpu.VMEM((M, C), jnp.float32)],
        compiler_params=pltpu.CompilerParams(
            dimension_semantics=("arbitrary",)),
        cost_estimate=cost,
    )(x_lf, w_lf, b_lf, x_hf, w_hfcc, b_hfcc, gat_w, gat_b, gate_w, gate_b,
      solo, text)


# ----------------------------------------------------------------------------
# Parameter construction (deterministic, synthetic) + packing for the kernel
# ----------------------------------------------------------------------------

def _normal(key, shape, scale=0.02):
    return (scale * jax.random.normal(key, shape)).astype(jnp.float32)


def _pack_gat(key, dim):
    """Wq|Wk|Wv stacked -> (dim, 3*dim), bq|bk|bv -> (3*dim,)."""
    ks = jax.random.split(key, 6)
    wq, bq = _normal(ks[0], (dim, dim)), _normal(ks[1], (dim,))
    wk, bk = _normal(ks[2], (dim, dim)), _normal(ks[3], (dim,))
    wv, bv = _normal(ks[4], (dim, dim)), _normal(ks[5], (dim,))
    return jnp.concatenate([wq, wk, wv], axis=1), jnp.concatenate([bq, bk, bv])


def make_params(key):
    ks = jax.random.split(key, 10)
    # Raw per-layer weights (same shapes as the PyTorch module).
    lf_w = _normal(ks[0], (256, 240, 2, 2))          # VSA_Module.LF_conv
    lf_b = _normal(ks[1], (256,))
    hf_w = _normal(ks[2], (256, 384, 1, 1))          # VSA_Module.HF_conv
    hf_b = _normal(ks[3], (256,))
    cc_w = _normal(ks[5], (512, 384, 1, 1))          # CrossAttention.visual_conv
    cc_b = _normal(ks[6], (512,))
    gate_w = _normal(ks[8], (512, 512))              # CrossAttention Linear
    gate_b = _normal(ks[9], (512,))
    vsa_w, vsa_b = _pack_gat(ks[4], 512)             # concat_attention QKV
    ca_w, ca_b = _pack_gat(ks[7], 512)               # visual_attention QKV

    p = {}
    # LF_conv 2x2/s2 packed as (kh*kw*Cin, Cout), K zero-padded 960 -> 1024.
    wlf = jnp.transpose(lf_w, (2, 3, 1, 0)).reshape(4 * 240, 256)
    p['lf_w'] = jnp.pad(wlf, ((0, 1024 - 960), (0, 0))).astype(jnp.bfloat16)
    p['lf_b'] = lf_b.reshape(1, 256)
    # HF_conv (384->256) and visual_conv (384->512) share the same activation:
    # merged into one (384, 768) weight.
    p['hfcc_w'] = jnp.concatenate([hf_w[:, :, 0, 0].T, cc_w[:, :, 0, 0].T],
                                  axis=1).astype(jnp.bfloat16)
    p['hfcc_b'] = jnp.concatenate([hf_b, cc_b]).reshape(1, 768)
    # The two GATs stacked along a leading axis.
    p['gat_w'] = jnp.stack([vsa_w, ca_w], axis=0).astype(jnp.bfloat16)   # (2,512,1536)
    p['gat_b'] = jnp.stack([vsa_b.reshape(1, -1), ca_b.reshape(1, -1)], axis=0)
    p['gate_w'] = gate_w.astype(jnp.bfloat16)
    p['gate_b'] = gate_b.reshape(1, 512)
    return p


# ----------------------------------------------------------------------------
# BaseModel.forward
# ----------------------------------------------------------------------------

def base_model_forward(params, lower_feature, higher_feature, solo_feature,
                       text_feature):
    B, C_lo, H, W = lower_feature.shape
    _, C_hi, h, w = higher_feature.shape
    N = h * w
    M = B * N

    # ---- layout plumbing (XLA): NCHW -> channels-last matmul operands (bf16)
    # 2x2/stride-2 space-to-depth of lower_feature; flattened K padded 960->1024.
    x = jnp.transpose(lower_feature, (0, 2, 3, 1))                    # (B,H,W,240)
    x = x.reshape(B, H // 2, 2, W // 2, 2, C_lo)
    x = jnp.transpose(x, (0, 1, 3, 2, 4, 5)).reshape(M, 4 * C_lo)     # (M,960)
    Kp = params['lf_w'].shape[0]
    x_lf = jnp.pad(x, ((0, 0), (0, Kp - 4 * C_lo))).astype(jnp.bfloat16)
    x_hf = jnp.transpose(higher_feature, (0, 2, 3, 1)).reshape(M, C_hi)
    x_hf = x_hf.astype(jnp.bfloat16)

    # ---- single fused kernel: convs + both GATs + gates + cosine similarity
    sims = fused_forward(x_lf, params['lf_w'], params['lf_b'],
                         x_hf, params['hfcc_w'], params['hfcc_b'],
                         params['gat_w'], params['gat_b'],
                         params['gate_w'], params['gate_b'],
                         solo_feature.astype(jnp.float32),
                         text_feature.astype(jnp.float32))            # (B,T)
    return sims


# ----------------------------------------------------------------------------
# Driver
# ----------------------------------------------------------------------------

if __name__ == "__main__":
    key = jax.random.PRNGKey(0)
    k_lo, k_hi, k_solo, k_txt = jax.random.split(key, 4)

    B = 2          # image batch
    T = 3          # caption batch
    # Backbone outputs (pvig_ti_224_gelu) at small spatial sizes:
    lower_feature = jax.random.normal(k_lo, (B, 240, 8, 8), jnp.float32)
    higher_feature = jax.random.normal(k_hi, (B, 384, 4, 4), jnp.float32)
    solo_feature = jax.random.normal(k_solo, (B, 512), jnp.float32)
    # Skipthoughts text embedding output:
    text_feature = jax.random.normal(k_txt, (T, 512), jnp.float32)

    params = make_params(jax.random.PRNGKey(42))

    fwd = jax.jit(functools.partial(base_model_forward, params))
    sims = fwd(lower_feature, higher_feature, solo_feature, text_feature)
    sims = jax.block_until_ready(sims)
    assert sims.shape == (B, T)
    assert bool(jnp.all(jnp.isfinite(sims)))
    print("KERNEL_OK")
</pallas_src>

<mosaic_0001>
module attributes {stable_mosaic.version = 11 : i64} {
  func.func @_fused_kernel(%arg0: i32, %arg1: memref<32x1024xbf16, #tpu.memory_space<vmem>>, %arg2: memref<1024x256xbf16, #tpu.memory_space<vmem>>, %arg3: memref<1x256xf32, #tpu.memory_space<vmem>>, %arg4: memref<32x384xbf16, #tpu.memory_space<vmem>>, %arg5: memref<384x768xbf16, #tpu.memory_space<vmem>>, %arg6: memref<1x768xf32, #tpu.memory_space<vmem>>, %arg7: memref<2x512x1536xbf16, #tpu.memory_space<vmem>>, %arg8: memref<2x1x1536xf32, #tpu.memory_space<vmem>>, %arg9: memref<512x512xbf16, #tpu.memory_space<vmem>>, %arg10: memref<1x512xf32, #tpu.memory_space<vmem>>, %arg11: memref<2x512xf32, #tpu.memory_space<vmem>>, %arg12: memref<3x512xf32, #tpu.memory_space<vmem>>, %arg13: memref<2x3xf32, #tpu.memory_space<vmem>>, %arg14: memref<32x512xf32, #tpu.memory_space<vmem>>) attributes {dimension_semantics = [#tpu.dimension_semantics<arbitrary>], iteration_bounds = array<i64: 1>, scalar_prefetch = 0 : i64, scratch_operands = 1 : i64, tpu.core_type = #tpu.core_type<tc>, window_params = [{pipeline_mode = #tpu.pipeline_mode<synchronous>, transform_indices = @transform_0, window_bounds = array<i64: 32, 1024>}, {pipeline_mode = #tpu.pipeline_mode<synchronous>, transform_indices = @transform_1, window_bounds = array<i64: 1024, 256>}, {pipeline_mode = #tpu.pipeline_mode<synchronous>, transform_indices = @transform_2, window_bounds = array<i64: 1, 256>}, {pipeline_mode = #tpu.pipeline_mode<synchronous>, transform_indices = @transform_3, window_bounds = array<i64: 32, 384>}, {pipeline_mode = #tpu.pipeline_mode<synchronous>, transform_indices = @transform_4, window_bounds = array<i64: 384, 768>}, {pipeline_mode = #tpu.pipeline_mode<synchronous>, transform_indices = @transform_5, window_bounds = array<i64: 1, 768>}, {pipeline_mode = #tpu.pipeline_mode<synchronous>, transform_indices = @transform_6, window_bounds = array<i64: 2, 512, 1536>}, {pipeline_mode = #tpu.pipeline_mode<synchronous>, transform_indices = @transform_7, window_bounds = array<i64: 2, 1, 1536>}, {pipeline_mode = #tpu.pipeline_mode<synchronous>, transform_indices = @transform_8, window_bounds = array<i64: 512, 512>}, {pipeline_mode = #tpu.pipeline_mode<synchronous>, transform_indices = @transform_9, window_bounds = array<i64: 1, 512>}, {pipeline_mode = #tpu.pipeline_mode<synchronous>, transform_indices = @transform_10, window_bounds = array<i64: 2, 512>}, {pipeline_mode = #tpu.pipeline_mode<synchronous>, transform_indices = @transform_11, window_bounds = array<i64: 3, 512>}, {pipeline_mode = #tpu.pipeline_mode<synchronous>, transform_indices = @transform_12, window_bounds = array<i64: 2, 3>}]} {
    %c0 = arith.constant 0 : index
    %c0_0 = arith.constant 0 : index
    %0 = vector.load %arg1[%c0, %c0_0] : memref<32x1024xbf16, #tpu.memory_space<vmem>>, vector<32x1024xbf16>
    %c0_1 = arith.constant 0 : index
    %c0_2 = arith.constant 0 : index
    %1 = vector.load %arg2[%c0_1, %c0_2] : memref<1024x256xbf16, #tpu.memory_space<vmem>>, vector<1024x256xbf16>
    %cst = arith.constant dense<0.000000e+00> : vector<32x256xf32>
    %2 = tpu.matmul %0, %1, %cst {dimension_numbers = #tpu.dot_dimension_numbers<[1], [0], [0], [1], [0, 0, 1, 1], [], []>} : vector<32x1024xbf16>, vector<1024x256xbf16>, vector<32x256xf32> -> vector<32x256xf32>
    %c0_3 = arith.constant 0 : index
    %c0_4 = arith.constant 0 : index
    %3 = vector.load %arg3[%c0_3, %c0_4] : memref<1x256xf32, #tpu.memory_space<vmem>>, vector<1x256xf32>
    %4 = vector.broadcast %3 : vector<1x256xf32> to vector<32x256xf32>
    %5 = arith.addf %2, %4 : vector<32x256xf32>
    %c0_5 = arith.constant 0 : index
    %c0_6 = arith.constant 0 : index
    %6 = vector.load %arg4[%c0_5, %c0_6] : memref<32x384xbf16, #tpu.memory_space<vmem>>, vector<32x384xbf16>
    %c0_7 = arith.constant 0 : index
    %c0_8 = arith.constant 0 : index
    %7 = vector.load %arg5[%c0_7, %c0_8] : memref<384x768xbf16, #tpu.memory_space<vmem>>, vector<384x768xbf16>
    %cst_9 = arith.constant dense<0.000000e+00> : vector<32x768xf32>
    %8 = tpu.matmul %6, %7, %cst_9 {dimension_numbers = #tpu.dot_dimension_numbers<[1], [0], [0], [1], [0, 0, 1, 1], [], []>} : vector<32x384xbf16>, vector<384x768xbf16>, vector<32x768xf32> -> vector<32x768xf32>
    %c0_10 = arith.constant 0 : index
    %c0_11 = arith.constant 0 : index
    %9 = vector.load %arg6[%c0_10, %c0_11] : memref<1x768xf32, #tpu.memory_space<vmem>>, vector<1x768xf32>
    %10 = vector.broadcast %9 : vector<1x768xf32> to vector<32x768xf32>
    %11 = arith.addf %8, %10 : vector<32x768xf32>
    %12 = vector.extract_strided_slice %11 {offsets = [0, 0], sizes = [32, 256], strides = [1, 1]} : vector<32x768xf32> to vector<32x256xf32>
    %13 = vector.extract_strided_slice %11 {offsets = [0, 256], sizes = [32, 512], strides = [1, 1]} : vector<32x768xf32> to vector<32x512xf32>
    %cst_12 = arith.constant dense<0.000000e+00> : vector<32xf32>
    %14 = vector.multi_reduction <add>, %12, %cst_12 [1] : vector<32x256xf32> to vector<32xf32>
    %15 = vector.shape_cast %14 : vector<32xf32> to vector<32x1xf32>
    %cst_13 = arith.constant 2.560000e+02 : f32
    %16 = vector.broadcast %cst_13 : f32 to vector<32x1xf32>
    %17 = arith.divf %15, %16 : vector<32x1xf32>
    %18 = vector.broadcast %17 : vector<32x1xf32> to vector<32x256xf32>
    %19 = arith.addf %5, %18 : vector<32x256xf32>
    %c0_14 = arith.constant 0 : index
    %c0_15 = arith.constant 0 : index
    %20 = vector.load %arg14[%c0_14, %c0_15] : memref<32x512xf32, #tpu.memory_space<vmem>>, vector<32x256xf32>
    tpu.vector_store %arg14[%c0_14, %c0_15], %19 {strides = array<i32>} : memref<32x512xf32, #tpu.memory_space<vmem>>, vector<32x256xf32>,
    %21 = vector.broadcast %17 : vector<32x1xf32> to vector<32x256xf32>
    %22 = arith.addf %12, %21 : vector<32x256xf32>
    %c0_16 = arith.constant 0 : index
    %c256 = arith.constant 256 : index
    %23 = vector.load %arg14[%c0_16, %c256] : memref<32x512xf32, #tpu.memory_space<vmem>>, vector<32x256xf32>
    tpu.vector_store %arg14[%c0_16, %c256], %22 {strides = array<i32>} : memref<32x512xf32, #tpu.memory_space<vmem>>, vector<32x256xf32>,
    %c0_17 = arith.constant 0 : index
    %c0_18 = arith.constant 0 : index
    %24 = vector.load %arg14[%c0_17, %c0_18] : memref<32x512xf32, #tpu.memory_space<vmem>>, vector<32x512xf32>
    %25 = vector.shape_cast %24 : vector<32x512xf32> to vector<2x16x512xf32>
    %c0_19 = arith.constant 0 : index
    %c0_20 = arith.constant 0 : index
    %c0_21 = arith.constant 0 : index
    %26 = vector.load %arg7[%c0_19, %c0_20, %c0_21] : memref<2x512x1536xbf16, #tpu.memory_space<vmem>>, vector<1x512x1536xbf16>
    %27 = vector.shape_cast %26 : vector<1x512x1536xbf16> to vector<512x1536xbf16>
    %c0_22 = arith.constant 0 : index
    %c0_23 = arith.constant 0 : index
    %c0_24 = arith.constant 0 : index
    %28 = vector.load %arg8[%c0_22, %c0_23, %c0_24] : memref<2x1x1536xf32, #tpu.memory_space<vmem>>, vector<1x1x1536xf32>
    %29 = vector.shape_cast %28 : vector<1x1x1536xf32> to vector<1x1536xf32>
    %30 = vector.shape_cast %25 : vector<2x16x512xf32> to vector<32x512xf32>
    %31 = arith.truncf %30 : vector<32x512xf32> to vector<32x512xbf16>
    %cst_25 = arith.constant dense<0.000000e+00> : vector<32x1536xf32>
    %32 = tpu.matmul %31, %27, %cst_25 {dimension_numbers = #tpu.dot_dimension_numbers<[1], [0], [0], [1], [0, 0, 1, 1], [], []>} : vector<32x512xbf16>, vector<512x1536xbf16>, vector<32x1536xf32> -> vector<32x1536xf32>
    %33 = vector.broadcast %29 : vector<1x1536xf32> to vector<32x1536xf32>
    %34 = arith.addf %32, %33 : vector<32x1536xf32>
    %35 = vector.extract_strided_slice %34 {offsets = [0, 0], sizes = [32, 512], strides = [1, 1]} : vector<32x1536xf32> to vector<32x512xf32>
    %36 = vector.shape_cast %35 : vector<32x512xf32> to vector<2x16x512xf32>
    %37 = vector.extract_strided_slice %34 {offsets = [0, 512], sizes = [32, 512], strides = [1, 1]} : vector<32x1536xf32> to vector<32x512xf32>
    %38 = vector.shape_cast %37 : vector<32x512xf32> to vector<2x16x512xf32>
    %39 = vector.extract_strided_slice %34 {offsets = [0, 1024], sizes = [32, 512], strides = [1, 1]} : vector<32x1536xf32> to vector<32x512xf32>
    %40 = vector.shape_cast %39 : vector<32x512xf32> to vector<2x16x512xf32>
    %41 = arith.truncf %36 : vector<2x16x512xf32> to vector<2x16x512xbf16>
    %42 = arith.truncf %38 : vector<2x16x512xf32> to vector<2x16x512xbf16>
    "tpu.trace_start"() <{level = 10 : i32, message = "bqd,bkd->bqk"}> : () -> ()
    %cst_26 = arith.constant dense<0.000000e+00> : vector<2x16x16xf32>
    %43 = tpu.matmul %41, %42, %cst_26 {dimension_numbers = #tpu.dot_dimension_numbers<[2], [2], [1], [1], [0, 0, 0, 1, 1, 1], [0], [0]>} : vector<2x16x512xbf16>, vector<2x16x512xbf16>, vector<2x16x16xf32> -> vector<2x16x16xf32>
    "tpu.trace_stop"() : () -> ()
    %cst_27 = arith.constant 0.0441941731 : f32
    %44 = vector.broadcast %cst_27 : f32 to vector<2x16x16xf32>
    %45 = arith.mulf %43, %44 : vector<2x16x16xf32>
    %cst_28 = arith.constant dense<0xFF800000> : vector<2x16xf32>
    %46 = vector.multi_reduction <maximumf>, %45, %cst_28 [2] : vector<2x16x16xf32> to vector<2x16xf32>
    %47 = vector.shape_cast %46 : vector<2x16xf32> to vector<2x16x1xf32>
    %48 = vector.broadcast %47 : vector<2x16x1xf32> to vector<2x16x16xf32>
    %49 = arith.subf %45, %48 : vector<2x16x16xf32>
    %50 = math.exp %49 : vector<2x16x16xf32>
    %cst_29 = arith.constant dense<0.000000e+00> : vector<2x16xf32>
    %51 = vector.multi_reduction <add>, %50, %cst_29 [2] : vector<2x16x16xf32> to vector<2x16xf32>
    %52 = vector.shape_cast %51 : vector<2x16xf32> to vector<2x16x1xf32>
    %53 = tpu.reciprocal %52 {approx = true} : vector<2x16x1xf32> -> vector<2x16x1xf32>
    %54 = vector.broadcast %53 : vector<2x16x1xf32> to vector<2x16x16xf32>
    %55 = arith.mulf %50, %54 : vector<2x16x16xf32>
    %56 = arith.truncf %55 : vector<2x16x16xf32> to vector<2x16x16xbf16>
    %57 = arith.truncf %40 : vector<2x16x512xf32> to vector<2x16x512xbf16>
    "tpu.trace_start"() <{level = 10 : i32, message = "bqk,bkd->bqd"}> : () -> ()
    %cst_30 = arith.constant dense<0.000000e+00> : vector<2x16x512xf32>
    %58 = tpu.matmul %56, %57, %cst_30 {dimension_numbers = #tpu.dot_dimension_numbers<[2], [1], [1], [2], [0, 0, 0, 1, 1, 2], [0], [0]>} : vector<2x16x16xbf16>, vector<2x16x512xbf16>, vector<2x16x512xf32> -> vector<2x16x512xf32>
    "tpu.trace_stop"() : () -> ()
    %59 = arith.addf %58, %25 : vector<2x16x512xf32>
    %60 = vector.shape_cast %13 : vector<32x512xf32> to vector<2x16x512xf32>
    %c1 = arith.constant 1 : index
    %c0_31 = arith.constant 0 : index
    %c0_32 = arith.constant 0 : index
    %61 = vector.load %arg7[%c1, %c0_31, %c0_32] : memref<2x512x1536xbf16, #tpu.memory_space<vmem>>, vector<1x512x1536xbf16>
    %62 = vector.shape_cast %61 : vector<1x512x1536xbf16> to vector<512x1536xbf16>
    %c1_33 = arith.constant 1 : index
    %c0_34 = arith.constant 0 : index
    %c0_35 = arith.constant 0 : index
    %63 = vector.load %arg8[%c1_33, %c0_34, %c0_35] : memref<2x1x1536xf32, #tpu.memory_space<vmem>>, vector<1x1x1536xf32>
    %64 = vector.shape_cast %63 : vector<1x1x1536xf32> to vector<1x1536xf32>
    %65 = vector.shape_cast %60 : vector<2x16x512xf32> to vector<32x512xf32>
    %66 = arith.truncf %65 : vector<32x512xf32> to vector<32x512xbf16>
    %cst_36 = arith.constant dense<0.000000e+00> : vector<32x1536xf32>
    %67 = tpu.matmul %66, %62, %cst_36 {dimension_numbers = #tpu.dot_dimension_numbers<[1], [0], [0], [1], [0, 0, 1, 1], [], []>} : vector<32x512xbf16>, vector<512x1536xbf16>, vector<32x1536xf32> -> vector<32x1536xf32>
    %68 = vector.broadcast %64 : vector<1x1536xf32> to vector<32x1536xf32>
    %69 = arith.addf %67, %68 : vector<32x1536xf32>
    %70 = vector.extract_strided_slice %69 {offsets = [0, 0], sizes = [32, 512], strides = [1, 1]} : vector<32x1536xf32> to vector<32x512xf32>
    %71 = vector.shape_cast %70 : vector<32x512xf32> to vector<2x16x512xf32>
    %72 = vector.extract_strided_slice %69 {offsets = [0, 512], sizes = [32, 512], strides = [1, 1]} : vector<32x1536xf32> to vector<32x512xf32>
    %73 = vector.shape_cast %72 : vector<32x512xf32> to vector<2x16x512xf32>
    %74 = vector.extract_strided_slice %69 {offsets = [0, 1024], sizes = [32, 512], strides = [1, 1]} : vector<32x1536xf32> to vector<32x512xf32>
    %75 = vector.shape_cast %74 : vector<32x512xf32> to vector<2x16x512xf32>
    %76 = arith.truncf %71 : vector<2x16x512xf32> to vector<2x16x512xbf16>
    %77 = arith.truncf %73 : vector<2x16x512xf32> to vector<2x16x512xbf16>
    "tpu.trace_start"() <{level = 10 : i32, message = "bqd,bkd->bqk"}> : () -> ()
    %cst_37 = arith.constant dense<0.000000e+00> : vector<2x16x16xf32>
    %78 = tpu.matmul %76, %77, %cst_37 {dimension_numbers = #tpu.dot_dimension_numbers<[2], [2], [1], [1], [0, 0, 0, 1, 1, 1], [0], [0]>} : vector<2x16x512xbf16>, vector<2x16x512xbf16>, vector<2x16x16xf32> -> vector<2x16x16xf32>
    "tpu.trace_stop"() : () -> ()
    %cst_38 = arith.constant 0.0441941731 : f32
    %79 = vector.broadcast %cst_38 : f32 to vector<2x16x16xf32>
    %80 = arith.mulf %78, %79 : vector<2x16x16xf32>
    %cst_39 = arith.constant dense<0xFF800000> : vector<2x16xf32>
    %81 = vector.multi_reduction <maximumf>, %80, %cst_39 [2] : vector<2x16x16xf32> to vector<2x16xf32>
    %82 = vector.shape_cast %81 : vector<2x16xf32> to vector<2x16x1xf32>
    %83 = vector.broadcast %82 : vector<2x16x1xf32> to vector<2x16x16xf32>
    %84 = arith.subf %80, %83 : vector<2x16x16xf32>
    %85 = math.exp %84 : vector<2x16x16xf32>
    %cst_40 = arith.constant dense<0.000000e+00> : vector<2x16xf32>
    %86 = vector.multi_reduction <add>, %85, %cst_40 [2] : vector<2x16x16xf32> to vector<2x16xf32>
    %87 = vector.shape_cast %86 : vector<2x16xf32> to vector<2x16x1xf32>
    %88 = tpu.reciprocal %87 {approx = true} : vector<2x16x1xf32> -> vector<2x16x1xf32>
    %89 = vector.broadcast %88 : vector<2x16x1xf32> to vector<2x16x16xf32>
    %90 = arith.mulf %85, %89 : vector<2x16x16xf32>
    %91 = arith.truncf %90 : vector<2x16x16xf32> to vector<2x16x16xbf16>
    %92 = arith.truncf %75 : vector<2x16x512xf32> to vector<2x16x512xbf16>
    "tpu.trace_start"() <{level = 10 : i32, message = "bqk,bkd->bqd"}> : () -> ()
    %cst_41 = arith.constant dense<0.000000e+00> : vector<2x16x512xf32>
    %93 = tpu.matmul %91, %92, %cst_41 {dimension_numbers = #tpu.dot_dimension_numbers<[2], [1], [1], [2], [0, 0, 0, 1, 1, 2], [0], [0]>} : vector<2x16x16xbf16>, vector<2x16x512xbf16>, vector<2x16x512xf32> -> vector<2x16x512xf32>
    "tpu.trace_stop"() : () -> ()
    %94 = arith.addf %93, %60 : vector<2x16x512xf32>
    %cst_42 = arith.constant dense<0.000000e+00> : vector<2x512xf32>
    %95 = vector.multi_reduction <add>, %59, %cst_42 [1] : vector<2x16x512xf32> to vector<2x512xf32>
    %cst_43 = arith.constant 1.600000e+01 : f32
    %96 = vector.broadcast %cst_43 : f32 to vector<2x512xf32>
    %97 = arith.divf %95, %96 : vector<2x512xf32>
    %c0_44 = arith.constant 0 : index
    %c0_45 = arith.constant 0 : index
    %98 = vector.load %arg11[%c0_44, %c0_45] : memref<2x512xf32, #tpu.memory_space<vmem>>, vector<2x512xf32>
    %99 = arith.negf %97 : vector<2x512xf32>
    %100 = math.exp %99 : vector<2x512xf32>
    %cst_46 = arith.constant 1.000000e+00 : f32
    %101 = vector.broadcast %cst_46 : f32 to vector<2x512xf32>
    %102 = arith.addf %101, %100 : vector<2x512xf32>
    %103 = arith.divf %101, %102 : vector<2x512xf32>
    %104 = arith.mulf %98, %103 : vector<2x512xf32>
    %105 = arith.mulf %104, %104 : vector<2x512xf32>
    %cst_47 = arith.constant dense<0.000000e+00> : vector<2xf32>
    %106 = vector.multi_reduction <add>, %105, %cst_47 [1] : vector<2x512xf32> to vector<2xf32>
    %107 = vector.shape_cast %106 : vector<2xf32> to vector<2x1xf32>
    %108 = math.sqrt %107 : vector<2x1xf32>
    %cst_48 = arith.constant 9.99999993E-9 : f32
    %109 = vector.broadcast %cst_48 : f32 to vector<2x1xf32>
    %110 = arith.addf %108, %109 : vector<2x1xf32>
    %111 = vector.broadcast %110 : vector<2x1xf32> to vector<2x512xf32>
    %112 = arith.divf %104, %111 : vector<2x512xf32>
    %cst_49 = arith.constant dense<0.000000e+00> : vector<2x512xf32>
    %113 = vector.multi_reduction <add>, %94, %cst_49 [1] : vector<2x16x512xf32> to vector<2x512xf32>
    %cst_50 = arith.constant 1.600000e+01 : f32
    %114 = vector.broadcast %cst_50 : f32 to vector<2x512xf32>
    %115 = arith.divf %113, %114 : vector<2x512xf32>
    %116 = arith.truncf %115 : vector<2x512xf32> to vector<2x512xbf16>
    %c0_51 = arith.constant 0 : index
    %c0_52 = arith.constant 0 : index
    %117 = vector.load %arg9[%c0_51, %c0_52] : memref<512x512xbf16, #tpu.memory_space<vmem>>, vector<512x512xbf16>
    %cst_53 = arith.constant dense<0.000000e+00> : vector<2x512xf32>
    %118 = tpu.matmul %116, %117, %cst_53 {dimension_numbers = #tpu.dot_dimension_numbers<[1], [0], [0], [1], [0, 0, 1, 1], [], []>} : vector<2x512xbf16>, vector<512x512xbf16>, vector<2x512xf32> -> vector<2x512xf32>
    %c0_54 = arith.constant 0 : index
    %c0_55 = arith.constant 0 : index
    %119 = vector.load %arg10[%c0_54, %c0_55] : memref<1x512xf32, #tpu.memory_space<vmem>>, vector<1x512xf32>
    %120 = vector.broadcast %119 : vector<1x512xf32> to vector<2x512xf32>
    %121 = arith.addf %118, %120 : vector<2x512xf32>
    %122 = arith.negf %121 : vector<2x512xf32>
    %123 = math.exp %122 : vector<2x512xf32>
    %cst_56 = arith.constant 1.000000e+00 : f32
    %124 = vector.broadcast %cst_56 : f32 to vector<2x512xf32>
    %125 = arith.addf %124, %123 : vector<2x512xf32>
    %126 = arith.divf %124, %125 : vector<2x512xf32>
    %127 = vector.shape_cast %126 : vector<2x512xf32> to vector<2x1x512xf32>
    %c0_57 = arith.constant 0 : index
    %c0_58 = arith.constant 0 : index
    %128 = vector.load %arg12[%c0_57, %c0_58] : memref<3x512xf32, #tpu.memory_space<vmem>>, vector<3x512xf32>
    %129 = vector.shape_cast %128 : vector<3x512xf32> to vector<1x3x512xf32>
    %130 = vector.broadcast %127 : vector<2x1x512xf32> to vector<2x3x512xf32>
    %131 = vector.broadcast %129 : vector<1x3x512xf32> to vector<2x3x512xf32>
    %132 = arith.mulf %130, %131 : vector<2x3x512xf32>
    %133 = vector.shape_cast %112 : vector<2x512xf32> to vector<2x1x512xf32>
    %134 = vector.broadcast %133 : vector<2x1x512xf32> to vector<2x3x512xf32>
    %135 = arith.mulf %134, %132 : vector<2x3x512xf32>
    %cst_59 = arith.constant dense<0.000000e+00> : vector<2x3xf32>
    %136 = vector.multi_reduction <add>, %135, %cst_59 [2] : vector<2x3x512xf32> to vector<2x3xf32>
    %137 = arith.mulf %112, %112 : vector<2x512xf32>
    %cst_60 = arith.constant dense<0.000000e+00> : vector<2xf32>
    %138 = vector.multi_reduction <add>, %137, %cst_60 [1] : vector<2x512xf32> to vector<2xf32>
    %139 = vector.shape_cast %138 : vector<2xf32> to vector<2x1xf32>
    %140 = math.sqrt %139 : vector<2x1xf32>
    %141 = arith.mulf %132, %132 : vector<2x3x512xf32>
    %cst_61 = arith.constant dense<0.000000e+00> : vector<2x3xf32>
    %142 = vector.multi_reduction <add>, %141, %cst_61 [2] : vector<2x3x512xf32> to vector<2x3xf32>
    %143 = math.sqrt %142 : vector<2x3xf32>
    %144 = vector.broadcast %140 : vector<2x1xf32> to vector<2x3xf32>
    %145 = arith.mulf %144, %143 : vector<2x3xf32>
    %cst_62 = arith.constant 9.99999993E-9 : f32
    %146 = vector.broadcast %cst_62 : f32 to vector<2x3xf32>
    %147 = arith.maximumf %145, %146 : vector<2x3xf32>
    %148 = tpu.reciprocal %147 {approx = true} : vector<2x3xf32> -> vector<2x3xf32>
    %149 = arith.mulf %136, %148 : vector<2x3xf32>
    %c0_63 = arith.constant 0 : index
    %c0_64 = arith.constant 0 : index
    %150 = vector.load %arg13[%c0_63, %c0_64] : memref<2x3xf32, #tpu.memory_space<vmem>>, vector<2x3xf32>
    tpu.vector_store %arg13[%c0_63, %c0_64], %149 {strides = array<i32>} : memref<2x3xf32, #tpu.memory_space<vmem>>, vector<2x3xf32>,
    return
  }
  func.func @transform_0(%arg0: i32) -> (i32, i32) {
    %c0_i32 = arith.constant 0 : i32
    %c0_i32_0 = arith.constant 0 : i32
    %c0_i32_1 = arith.constant 0 : i32
    return %c0_i32, %c0_i32_0 : i32, i32
  }
  func.func @transform_1(%arg0: i32) -> (i32, i32) {
    %c0_i32 = arith.constant 0 : i32
    %c0_i32_0 = arith.constant 0 : i32
    %c0_i32_1 = arith.constant 0 : i32
    return %c0_i32, %c0_i32_0 : i32, i32
  }
  func.func @transform_2(%arg0: i32) -> (i32, i32) {
    %c0_i32 = arith.constant 0 : i32
    %c0_i32_0 = arith.constant 0 : i32
    %c0_i32_1 = arith.constant 0 : i32
    return %c0_i32, %c0_i32_0 : i32, i32
  }
  func.func @transform_3(%arg0: i32) -> (i32, i32) {
    %c0_i32 = arith.constant 0 : i32
    %c0_i32_0 = arith.constant 0 : i32
    %c0_i32_1 = arith.constant 0 : i32
    return %c0_i32, %c0_i32_0 : i32, i32
  }
  func.func @transform_4(%arg0: i32) -> (i32, i32) {
    %c0_i32 = arith.constant 0 : i32
    %c0_i32_0 = arith.constant 0 : i32
    %c0_i32_1 = arith.constant 0 : i32
    return %c0_i32, %c0_i32_0 : i32, i32
  }
  func.func @transform_5(%arg0: i32) -> (i32, i32) {
    %c0_i32 = arith.constant 0 : i32
    %c0_i32_0 = arith.constant 0 : i32
    %c0_i32_1 = arith.constant 0 : i32
    return %c0_i32, %c0_i32_0 : i32, i32
  }
  func.func @transform_6(%arg0: i32) -> (i32, i32, i32) {
    %c0_i32 = arith.constant 0 : i32
    %c0_i32_0 = arith.constant 0 : i32
    %c0_i32_1 = arith.constant 0 : i32
    %c0_i32_2 = arith.constant 0 : i32
    return %c0_i32, %c0_i32_0, %c0_i32_1 : i32, i32, i32
  }
  func.func @transform_7(%arg0: i32) -> (i32, i32, i32) {
    %c0_i32 = arith.constant 0 : i32
    %c0_i32_0 = arith.constant 0 : i32
    %c0_i32_1 = arith.constant 0 : i32
    %c0_i32_2 = arith.constant 0 : i32
    return %c0_i32, %c0_i32_0, %c0_i32_1 : i32, i32, i32
  }
  func.func @transform_8(%arg0: i32) -> (i32, i32) {
    %c0_i32 = arith.constant 0 : i32
    %c0_i32_0 = arith.constant 0 : i32
    %c0_i32_1 = arith.constant 0 : i32
    return %c0_i32, %c0_i32_0 : i32, i32
  }
  func.func @transform_9(%arg0: i32) -> (i32, i32) {
    %c0_i32 = arith.constant 0 : i32
    %c0_i32_0 = arith.constant 0 : i32
    %c0_i32_1 = arith.constant 0 : i32
    return %c0_i32, %c0_i32_0 : i32, i32
  }
  func.func @transform_10(%arg0: i32) -> (i32, i32) {
    %c0_i32 = arith.constant 0 : i32
    %c0_i32_0 = arith.constant 0 : i32
    %c0_i32_1 = arith.constant 0 : i32
    return %c0_i32, %c0_i32_0 : i32, i32
  }
  func.func @transform_11(%arg0: i32) -> (i32, i32) {
    %c0_i32 = arith.constant 0 : i32
    %c0_i32_0 = arith.constant 0 : i32
    %c0_i32_1 = arith.constant 0 : i32
    return %c0_i32, %c0_i32_0 : i32, i32
  }
  func.func @transform_12(%arg0: i32) -> (i32, i32) {
    %c0_i32 = arith.constant 0 : i32
    %c0_i32_0 = arith.constant 0 : i32
    %c0_i32_1 = arith.constant 0 : i32
    return %c0_i32, %c0_i32_0 : i32, i32
  }
}

</mosaic_0001>

<bundles_post_ra>
// kernel: base_model_forward.1
= control target key start
LH: loop header
LB: loop body
LE: loop exit
PB: predicated region body
PF: predicated region fallthrough
CT: control target
= control target key end

     0   :  { %v19266_v2 = vmov 0   ;;  %s19252_s0 = inlined_call_operand.vmem [shape: bf16[32,1024], index: 0, kind: input, shape index: {}]   ;;  %s19253_s1 = inlined_call_operand.vmem [shape: bf16[1024,256], index: 1, kind: input, shape index: {}]   ;;  %s19254_s2 = inlined_call_operand.vmem [shape: f32[1,256], index: 2, kind: input, shape index: {}]   ;;  %s19255_s3 = inlined_call_operand.vmem [shape: bf16[32,384], index: 3, kind: input, shape index: {}]   ;;  %s19256_s4 = inlined_call_operand.vmem [shape: bf16[384,768], index: 4, kind: input, shape index: {}]   ;;  %s19257_s5 = inlined_call_operand.vmem [shape: f32[1,768], index: 5, kind: input, shape index: {}]   ;;  %s19258_s6 = inlined_call_operand.vmem [shape: bf16[2,512,1536], index: 6, kind: input, shape index: {}]   ;;  %s19259_s7 = inlined_call_operand.vmem [shape: f32[2,1,1536], index: 7, kind: input, shape index: {}]   ;;  %s19260_s8 = inlined_call_operand.vmem [shape: bf16[512,512], index: 8, kind: input, shape index: {}]   ;;  %s19261_s9 = inlined_call_operand.vmem [shape: f32[1,512], index: 9, kind: input, shape index: {}]   ;;  %s19262_s10 = inlined_call_operand.vmem [shape: f32[2,512], index: 10, kind: input, shape index: {}]   ;;  %s19263_s11 = inlined_call_operand.vmem [shape: f32[3,512], index: 11, kind: input, shape index: {}]   ;;  %s19264_s12 = inlined_call_operand.hbm [shape: f32[2,3], index: 12, kind: output, shape index: {}]  }
   0x1   :  { %v12830_v0 = vld [vmem:[%s19253_s1 + $0x4] ss:$8 sps:$4 sm:$0xff]   ;;  %12828 = vset.pattern.permute.xlu1 %v19266_v2  ;;  %12829 = vset.pattern.permute.xlu0 %v19266_v2  ;;  %v12834_v3 = vld [vmem:[%s19253_s1] ss:$8 sps:$4 sm:$0xff]   ;;  %v12836_v5 = vld [vmem:[%s19253_s1 + $0x14] ss:$8 sps:$4 sm:$0xff]  }
   0x2   :  { %v12832_v1 = vld [vmem:[%s19256_s4 + $0x4] ss:$24 sps:$4 sm:$0xff]   ;;  %919 = vmatprep.subr.bf16.mxu0 %v12830_v0  ;;  %v12835_v4 = vld [vmem:[%s19256_s4] ss:$24 sps:$4 sm:$0xff]   ;;  %v12838_v6 = vld [vmem:[%s19256_s4 + $0x34] ss:$24 sps:$4 sm:$0xff]  }
   0x3   :  { %2067 = vmatprep.subr.bf16.mxu1 %v12832_v1  ;;  %920 = vmatpush1.bf16.msra.mxu0 %v12834_v3  ;;  %v12840_v7 = vld [vmem:[%s19253_s1 + $0x10] ss:$8 sps:$4 sm:$0xff]   ;;  %v12842_v9 = vld [vmem:[%s19253_s1 + $0x24] ss:$8 sps:$4 sm:$0xff]   ;;  %v12846_v11 = vld [vmem:[%s19253_s1 + $0x20] ss:$8 sps:$4 sm:$0xff]  }
   0x4   :  { %2068 = vmatpush1.bf16.msra.mxu1 %v12835_v4  ;;  %921 = vmatprep.subr.bf16.mxu0 %v12836_v5  ;;  %v12841_v8 = vld [vmem:[%s19256_s4 + $0x30] ss:$24 sps:$4 sm:$0xff]   ;;  %v12844_v10 = vld [vmem:[%s19256_s4 + $0x64] ss:$24 sps:$4 sm:$0xff]   ;;  %v12847_v12 = vld [vmem:[%s19256_s4 + $0x60] ss:$24 sps:$4 sm:$0xff]  }
   0x5   :  { %2069 = vmatprep.subr.bf16.mxu1 %v12838_v6  ;;  %v12848_v13 = vld [vmem:[%s19253_s1 + $0x34] ss:$8 sps:$4 sm:$0xff]   ;;  %v12852_v15 = vld [vmem:[%s19253_s1 + $0x30] ss:$8 sps:$4 sm:$0xff]   ;;  %v12854_v17 = vld [vmem:[%s19253_s1 + $0x44] ss:$8 sps:$4 sm:$0xff]  }
   0x6   :  { %v12850_v14 = vld [vmem:[%s19256_s4 + $0x94] ss:$24 sps:$4 sm:$0xff]   ;;  %v12853_v16 = vld [vmem:[%s19256_s4 + $0x90] ss:$24 sps:$4 sm:$0xff]   ;;  %v12856_v18 = vld [vmem:[%s19256_s4 + $0xc4] ss:$24 sps:$4 sm:$0xff]  }
   0x7   :  { %922 = vmatpush1.bf16.msra.mxu0 %v12840_v7  ;;  %v12858_v19 = vld [vmem:[%s19253_s1 + $0x40] ss:$8 sps:$4 sm:$0xff]   ;;  %v12860_v21 = vld [vmem:[%s19253_s1 + $0x54] ss:$8 sps:$4 sm:$0xff]   ;;  %v12864_v23 = vld [vmem:[%s19253_s1 + $0x50] ss:$8 sps:$4 sm:$0xff]  }
   0x8   :  { %2070 = vmatpush1.bf16.msra.mxu1 %v12841_v8  ;;  %923 = vmatprep.subr.bf16.mxu0 %v12842_v9  ;;  %v12859_v20 = vld [vmem:[%s19256_s4 + $0xc0] ss:$24 sps:$4 sm:$0xff]   ;;  %v12862_v22 = vld [vmem:[%s19256_s4 + $0xf4] ss:$24 sps:$4 sm:$0xff]   ;;  %v12865_v24 = vld [vmem:[%s19256_s4 + $0xf0] ss:$24 sps:$4 sm:$0xff]  }
   0x9   :  { %2071 = vmatprep.subr.bf16.mxu1 %v12844_v10  ;;  %v12866_v25 = vld [vmem:[%s19253_s1 + $0x64] ss:$8 sps:$4 sm:$0xff]   ;;  %v12870_v27 = vld [vmem:[%s19253_s1 + $0x60] ss:$8 sps:$4 sm:$0xff]   ;;  %v12872_v29 = vld [vmem:[%s19253_s1 + $0x74] ss:$8 sps:$4 sm:$0xff]  }
   0xa   :  { %v12868_v26 = vld [vmem:[%s19256_s4 + $0x124] ss:$24 sps:$4 sm:$0xff]   ;;  %v12871_v28 = vld [vmem:[%s19256_s4 + $0x120] ss:$24 sps:$4 sm:$0xff]   ;;  %v12874_v30 = vld [vmem:[%s19256_s4 + $0x154] ss:$24 sps:$4 sm:$0xff]  }
   0xb   :  { %924 = vmatpush1.bf16.msra.mxu0 %v12846_v11  ;;  %v12876_v31 = vld [vmem:[%s19253_s1 + $0x70] ss:$8 sps:$4 sm:$0xff]   ;;  %v12878_v33 = vld [vmem:[%s19253_s1 + $0x84] ss:$8 sps:$4 sm:$0xff]   ;;  %v12882_v35 = vld [vmem:[%s19253_s1 + $0x80] ss:$8 sps:$4 sm:$0xff]  }
   0xc   :  { %2072 = vmatpush1.bf16.msra.mxu1 %v12847_v12  ;;  %925 = vmatprep.subr.bf16.mxu0 %v12848_v13  ;;  %v12877_v32 = vld [vmem:[%s19256_s4 + $0x150] ss:$24 sps:$4 sm:$0xff]   ;;  %v12880_v34 = vld [vmem:[%s19256_s4 + $0x184] ss:$24 sps:$4 sm:$0xff]   ;;  %v12883_v36 = vld [vmem:[%s19256_s4 + $0x180] ss:$24 sps:$4 sm:$0xff]  }
   0xd   :  { %2073 = vmatprep.subr.bf16.mxu1 %v12850_v14  ;;  %v12884_v37 = vld [vmem:[%s19253_s1 + $0x94] ss:$8 sps:$4 sm:$0xff]   ;;  %v12888_v39 = vld [vmem:[%s19253_s1 + $0x90] ss:$8 sps:$4 sm:$0xff]   ;;  %v12890_v41 = vld [vmem:[%s19253_s1 + $0xa4] ss:$8 sps:$4 sm:$0xff]  }
   0xe   :  { %v12886_v38 = vld [vmem:[%s19256_s4 + $0x1b4] ss:$24 sps:$4 sm:$0xff]   ;;  %v12889_v40 = vld [vmem:[%s19256_s4 + $0x1b0] ss:$24 sps:$4 sm:$0xff]   ;;  %v12892_v42 = vld [vmem:[%s19256_s4 + $0x1e4] ss:$24 sps:$4 sm:$0xff]  }
   0xf   :  { %926 = vmatpush1.bf16.msra.mxu0 %v12852_v15  ;;  %v12894_v43 = vld [vmem:[%s19253_s1 + $0xa0] ss:$8 sps:$4 sm:$0xff]   ;;  %v12896_v45 = vld [vmem:[%s19253_s1 + $0xb4] ss:$8 sps:$4 sm:$0xff]   ;;  %v12900_v47 = vld [vmem:[%s19253_s1 + $0xb0] ss:$8 sps:$4 sm:$0xff]  }
  0x10   :  { %2074 = vmatpush1.bf16.msra.mxu1 %v12853_v16  ;;  %927 = vmatprep.subr.bf16.mxu0 %v12854_v17  ;;  %v12895_v44 = vld [vmem:[%s19256_s4 + $0x1e0] ss:$24 sps:$4 sm:$0xff]   ;;  %v12898_v46 = vld [vmem:[%s19256_s4 + $0x214] ss:$24 sps:$4 sm:$0xff]   ;;  %v12901_v48 = vld [vmem:[%s19256_s4 + $0x210] ss:$24 sps:$4 sm:$0xff]  }
  0x11   :  { %2075 = vmatprep.subr.bf16.mxu1 %v12856_v18  ;;  %v43_v49 = vld [vmem:[%s19252_s0] sm:$0xff]  ;;  %v12908_v57 = vld [vmem:[%s19253_s1 + $0xd4] ss:$8 sps:$4 sm:$0xff]   ;;  %v12912_v59 = vld [vmem:[%s19253_s1 + $0xd0] ss:$8 sps:$4 sm:$0xff]  }
  0x12   :  { %v47_v50 = vld [vmem:[%s19252_s0 + $0x20] sm:$0xff]  ;;  %v12910_v58 = vld [vmem:[%s19256_s4 + $0x274] ss:$24 sps:$4 sm:$0xff]   ;;  %v12913_v60 = vld [vmem:[%s19256_s4 + $0x270] ss:$24 sps:$4 sm:$0xff]  }
  0x13   :  { %928 = vmatpush1.bf16.msra.mxu0 %v12858_v19  ;;  %v12902_v51 = vld [vmem:[%s19253_s1 + $0xc4] ss:$8 sps:$4 sm:$0xff]   ;;  %v10928_v53 = vcombine.high %v43_v49, %v47_v50  ;;  %v12906_v55 = vld [vmem:[%s19253_s1 + $0xc0] ss:$8 sps:$4 sm:$0xff]   ;;  %v12920_v1 = vld [vmem:[%s19253_s1 + $0xf4] ss:$8 sps:$4 sm:$0xff]   ;;  %v10927_v8 = vcombine.low %v43_v49, %v47_v50 }
  0x14   :  { %2076 = vmatpush1.bf16.msra.mxu1 %v12859_v20  ;;  %929 = vmatprep.subr.bf16.mxu0 %v12860_v21  ;;  %v12904_v52 = vld [vmem:[%s19256_s4 + $0x244] ss:$24 sps:$4 sm:$0xff]   ;;  %v12907_v56 = vld [vmem:[%s19256_s4 + $0x240] ss:$24 sps:$4 sm:$0xff]   ;;  %v12922_v3 = vld [vmem:[%s19256_s4 + $0x2d4] ss:$24 sps:$4 sm:$0xff]  }
  0x15   :  { %2077 = vmatprep.subr.bf16.mxu1 %v12862_v22  ;;  %v14946_v54 = vld [vmem:[%s19255_s3 + $0x4] ss:$12 sps:$4 sm:$0xff]   ;;  %951 = vmatprep.mubr.bf16.mxu0 %v10928_v53  ;;  %v12918_v63 = vld [vmem:[%s19253_s1 + $0xe0] ss:$8 sps:$4 sm:$0xff]   ;;  %v12937_v12 = vld [vmem:[%s19253_s1 + $0x114] ss:$8 sps:$4 sm:$0xff]  }
  0x16   :  { %2099 = vmatprep.mubr.bf16.mxu1 %v14946_v54  ;;  %v12914_v61 = vld [vmem:[%s19253_s1 + $0xe4] ss:$8 sps:$4 sm:$0xff]   ;;  %v12919_v0 = vld [vmem:[%s19256_s4 + $0x2a0] ss:$24 sps:$4 sm:$0xff]   ;;  %v12925_v5 = vld [vmem:[%s19256_s4 + $0x2d0] ss:$24 sps:$4 sm:$0xff]  }
  0x17   :  { %930 = vmatpush1.bf16.msra.mxu0 %v12864_v23  ;;  %v12916_v62 = vld [vmem:[%s19256_s4 + $0x2a4] ss:$24 sps:$4 sm:$0xff]   ;;  %v12924_v4 = vld [vmem:[%s19253_s1 + $0xf0] ss:$8 sps:$4 sm:$0xff]   ;;  %v15000_v9 = vld [vmem:[%s19255_s3] ss:$12 sps:$4 sm:$0xff]  }
  0x18   :  { %2078 = vmatpush1.bf16.msra.mxu1 %v12865_v24  ;;  %931 = vmatprep.subr.bf16.mxu0 %v12866_v25  ;;  %v12928_v6 = vld [vmem:[%s19253_s1 + $0x104] ss:$8 sps:$4 sm:$0xff]   ;;  %v12926_v10 = vld [vmem:[%s19253_s1 + $0x100] ss:$8 sps:$4 sm:$0xff]   ;;  %v12935_v15 = vld [vmem:[%s19253_s1 + $0x110] ss:$8 sps:$4 sm:$0xff]  }
  0x19   :  { %2079 = vmatprep.subr.bf16.mxu1 %v12868_v26  ;;  %v12933_v7 = vld [vmem:[%s19256_s4 + $0x304] ss:$24 sps:$4 sm:$0xff]   ;;  %v12931_v11 = vld [vmem:[%s19256_s4 + $0x300] ss:$24 sps:$4 sm:$0xff]   ;;  %v12940_v13 = vld [vmem:[%s19256_s4 + $0x334] ss:$24 sps:$4 sm:$0xff]  }
  0x1a   :  { %v15017_v14 = vld [vmem:[%s19255_s3 + $0x1c] ss:$12 sps:$4 sm:$0xff]   ;;  %v12943_v17 = vld [vmem:[%s19253_s1 + $0x124] ss:$8 sps:$4 sm:$0xff]   ;;  %v12944_v20 = vld [vmem:[%s19256_s4 + $0x360] ss:$24 sps:$4 sm:$0xff]  }
  0x1b   :  { %932 = vmatpush1.bf16.msra.mxu0 %v12870_v27  ;;  %v12938_v16 = vld [vmem:[%s19256_s4 + $0x330] ss:$24 sps:$4 sm:$0xff]   ;;  %v12946_v18 = vld [vmem:[%s19256_s4 + $0x364] ss:$24 sps:$4 sm:$0xff]   ;;  %v12952_v23 = vld [vmem:[%s19256_s4 + $0x394] ss:$24 sps:$4 sm:$0xff]  }
  0x1c   :  { %2080 = vmatpush1.bf16.msra.mxu1 %v12871_v28  ;;  %933 = vmatprep.subr.bf16.mxu0 %v12872_v29  ;;  %v12941_v19 = vld [vmem:[%s19253_s1 + $0x120] ss:$8 sps:$4 sm:$0xff]   ;;  %v15042_v21 = vld [vmem:[%s19255_s3 + $0x18] ss:$12 sps:$4 sm:$0xff]   ;;  %v12949_v22 = vld [vmem:[%s19253_s1 + $0x134] ss:$8 sps:$4 sm:$0xff]  }
  0x1d   :  { %2081 = vmatprep.subr.bf16.mxu1 %v12874_v30  ;;  %v12947_v24 = vld [vmem:[%s19253_s1 + $0x130] ss:$8 sps:$4 sm:$0xff]   ;;  %v12955_v26 = vld [vmem:[%s19253_s1 + $0x144] ss:$8 sps:$4 sm:$0xff]   ;;  %v12953_v30 = vld [vmem:[%s19253_s1 + $0x140] ss:$8 sps:$4 sm:$0xff]  }
  0x1e   :  { %v12950_v25 = vld [vmem:[%s19256_s4 + $0x390] ss:$24 sps:$4 sm:$0xff]   ;;  %v12958_v27 = vld [vmem:[%s19256_s4 + $0x3c4] ss:$24 sps:$4 sm:$0xff]  }
  0x1f   :  { %934 = vmatpush1.bf16.msra.mxu0 %v12876_v31  ;;  %v51_v28 = vld [vmem:[%s19252_s0 + $0x40] sm:$0xff]  ;;  %v15130_v50 = vld [vmem:[%s19255_s3 + $0x8] ss:$12 sps:$4 sm:$0xff]   ;;  %v12984_v53 = vld [vmem:[%s19253_s1 + $0x190] ss:$8 sps:$4 sm:$0xff]  }
  0x20   :  { %2082 = vmatpush1.bf16.msra.mxu1 %v12877_v32  ;;  %935 = vmatprep.subr.bf16.mxu0 %v12878_v33  ;;  %v55_v29 = vld [vmem:[%s19252_s0 + $0x60] sm:$0xff] }
  0x21   :  { %2083 = vmatprep.subr.bf16.mxu1 %v12880_v34  ;;  %v10936_v31 = vcombine.high %v51_v28, %v55_v29  ;;  %v12956_v32 = vld [vmem:[%s19256_s4 + $0x3c0] ss:$24 sps:$4 sm:$0xff]   ;;  %v10935_v33 = vcombine.low %v51_v28, %v55_v29  ;;  %v12961_v34 = vld [vmem:[%s19253_s1 + $0x154] ss:$8 sps:$4 sm:$0xff]   ;;  %v12982_v49 = vld [vmem:[%s19253_s1 + $0x184] ss:$8 sps:$4 sm:$0xff]  }
  0x22   :  { %v13096_v28 = vld [vmem:[%s19256_s4 + $0x128] ss:$24 sps:$4 sm:$0xff]   ;;  %v13014_v29 = vld [vmem:[%s19253_s1 + $0x224] ss:$8 sps:$4 sm:$0xff]  }
  0x23   :  { %936 = vmatpush1.bf16.msra.mxu0 %v12882_v35  ;;  %v12964_v35 = vld [vmem:[%s19256_s4 + $0x3f4] ss:$24 sps:$4 sm:$0xff]  }
  0x24   :  { %2084 = vmatpush1.bf16.msra.mxu1 %v12883_v36  ;;  %937 = vmatprep.subr.bf16.mxu0 %v12884_v37  ;;  %v15085_v36 = vld [vmem:[%s19252_s0 + $0x8] sm:$0xff] }
  0x25   :  { %2085 = vmatprep.subr.bf16.mxu1 %v12886_v38  ;;  %v15090_v37 = vld [vmem:[%s19252_s0 + $0x28] sm:$0xff] }
  0x26   :  { %v10930_v38 = vcombine.high %v15085_v36, %v15090_v37 }
  0x27   :  { %938 = vmatpush1.bf16.msra.mxu0 %v12888_v39  ;;  %v12959_v39 = vld [vmem:[%s19253_s1 + $0x150] ss:$8 sps:$4 sm:$0xff]  }
  0x28   :  { %2086 = vmatpush1.bf16.msra.mxu1 %v12889_v40  ;;  %939 = vmatprep.subr.bf16.mxu0 %v12890_v41  ;;  %v12962_v40 = vld [vmem:[%s19256_s4 + $0x3f0] ss:$24 sps:$4 sm:$0xff]   ;;  %v12969_v41 = vld [vmem:[%s19253_s1 + $0x164] ss:$8 sps:$4 sm:$0xff]  }
  0x29   :  { %2087 = vmatprep.subr.bf16.mxu1 %v12892_v42  ;;  %v12973_v42 = vld [vmem:[%s19256_s4 + $0x424] ss:$24 sps:$4 sm:$0xff]  }
  0x2b   :  { %940 = vmatpush1.bf16.msra.mxu0 %v12894_v43  ;;  %v12967_v43 = vld [vmem:[%s19253_s1 + $0x160] ss:$8 sps:$4 sm:$0xff]  }
  0x2c   :  { %2088 = vmatpush1.bf16.msra.mxu1 %v12895_v44  ;;  %941 = vmatprep.subr.bf16.mxu0 %v12896_v45  ;;  %v12971_v44 = vld [vmem:[%s19256_s4 + $0x420] ss:$24 sps:$4 sm:$0xff]   ;;  %v12976_v45 = vld [vmem:[%s19253_s1 + $0x174] ss:$8 sps:$4 sm:$0xff]  }
  0x2d   :  { %2089 = vmatprep.subr.bf16.mxu1 %v12898_v46  ;;  %v12979_v46 = vld [vmem:[%s19256_s4 + $0x454] ss:$24 sps:$4 sm:$0xff]  }
  0x2f   :  { %942 = vmatpush1.bf16.msra.mxu0 %v12900_v47  ;;  %v12974_v47 = vld [vmem:[%s19253_s1 + $0x170] ss:$8 sps:$4 sm:$0xff]  }
  0x30   :  { %2090 = vmatpush1.bf16.msra.mxu1 %v12901_v48  ;;  %943 = vmatprep.subr.bf16.mxu0 %v12902_v51  ;;  %v12977_v48 = vld [vmem:[%s19256_s4 + $0x450] ss:$24 sps:$4 sm:$0xff]  }
  0x31   :  { %2091 = vmatprep.subr.bf16.mxu1 %v12904_v52  ;;  %v12980_v51 = vld [vmem:[%s19253_s1 + $0x180] ss:$8 sps:$4 sm:$0xff]   ;;  %v12986_v52 = vld [vmem:[%s19253_s1 + $0x194] ss:$8 sps:$4 sm:$0xff]  }
  0x33   :  { %944 = vmatpush1.bf16.msra.mxu0 %v12906_v55  ;;  %v12989_v55 = vld [vmem:[%s19253_s1 + $0x1a4] ss:$8 sps:$4 sm:$0xff]  }
  0x34   :  { %2092 = vmatpush1.bf16.msra.mxu1 %v12907_v56  ;;  %945 = vmatprep.subr.bf16.mxu0 %v12908_v57  ;;  %v15149_v56 = vld [vmem:[%s19255_s3 + $0x20] ss:$12 sps:$4 sm:$0xff]  }
  0x35   :  { %2093 = vmatprep.subr.bf16.mxu1 %v12910_v58  ;;  %v12987_v57 = vld [vmem:[%s19253_s1 + $0x1a0] ss:$8 sps:$4 sm:$0xff]   ;;  %v12993_v58 = vld [vmem:[%s19253_s1 + $0x1b4] ss:$8 sps:$4 sm:$0xff]  }
  0x37   :  { %946 = vmatpush1.bf16.msra.mxu0 %v12912_v59  ;;  %v13060_v59 = vld [vmem:[%s19256_s4 + $0x8] ss:$24 sps:$4 sm:$0xff]  }
  0x38   :  { %2094 = vmatpush1.bf16.msra.mxu1 %v12913_v60  ;;  %947 = vmatprep.subr.bf16.mxu0 %v12914_v61  ;;  %v13062_v60 = vld [vmem:[%s19256_s4 + $0xc] ss:$24 sps:$4 sm:$0xff]   ;;  %v12991_v61 = vld [vmem:[%s19253_s1 + $0x1b0] ss:$8 sps:$4 sm:$0xff]  }
  0x39   :  { %2095 = vmatprep.subr.bf16.mxu1 %v12916_v62  ;;  %v12996_v62 = vld [vmem:[%s19253_s1 + $0x1c4] ss:$8 sps:$4 sm:$0xff]  }
  0x3b   :  { %948 = vmatpush1.bf16.msra.mxu0 %v12918_v63  ;;  %v13066_v63 = vld [vmem:[%s19256_s4 + $0x38] ss:$24 sps:$4 sm:$0xff]  }
  0x3c   :  { %2096 = vmatpush1.bf16.msra.mxu1 %v12919_v0  ;;  %949 = vmatprep.subr.bf16.mxu0 %v12920_v1  ;;  %v13068_v0 = vld [vmem:[%s19256_s4 + $0x3c] ss:$24 sps:$4 sm:$0xff]   ;;  %v12994_v1 = vld [vmem:[%s19253_s1 + $0x1c0] ss:$8 sps:$4 sm:$0xff]  }
  0x3d   :  { %2097 = vmatprep.subr.bf16.mxu1 %v12922_v3  ;;  %v13074_v3 = vld [vmem:[%s19256_s4 + $0x6c] ss:$24 sps:$4 sm:$0xff]  }
  0x3f   :  { %950 = vmatpush1.bf16.msra.mxu0 %v12924_v4  ;;  %v13072_v4 = vld [vmem:[%s19256_s4 + $0x68] ss:$24 sps:$4 sm:$0xff]  }
  0x40   :  { %2098 = vmatpush1.bf16.msra.mxu1 %v12925_v5  ;;  %972 = vmatprep.subr.bf16.mxu0 %v12928_v6  ;;  %v13080_v5 = vld [vmem:[%s19256_s4 + $0x9c] ss:$24 sps:$4 sm:$0xff]   ;;  %v12997_v6 = vld [vmem:[%s19253_s1 + $0x1d0] ss:$8 sps:$4 sm:$0xff]  }
  0x41   :  { %2120 = vmatprep.subr.bf16.mxu1 %v12933_v7  ;;  %v13002_v7 = vld [vmem:[%s19253_s1 + $0x1e4] ss:$8 sps:$4 sm:$0xff]  }
  0x42   :  { %952 = vmatmul.mubr.bf16.vlgmr.msra.gmra.mrb[0].mxu0 %v10927_v8  ;;  %v13078_v8 = vld [vmem:[%s19256_s4 + $0x98] ss:$24 sps:$4 sm:$0xff]  }
  0x43   :  { %2100 = vmatmul.mubr.bf16.vlgmr.msra.gmra.mrb[0].mxu1 %v15000_v9  ;;  %973 = vmatpush1.bf16.msra.mxu0 %v12926_v10  ;;  %v13086_v10 = vld [vmem:[%s19256_s4 + $0xcc] ss:$24 sps:$4 sm:$0xff]  }
  0x44   :  { %2121 = vmatpush1.bf16.msra.mxu1 %v12931_v11  ;;  %974 = vmatprep.subr.bf16.mxu0 %v12937_v12  ;;  %v13000_v11 = vld [vmem:[%s19253_s1 + $0x1e0] ss:$8 sps:$4 sm:$0xff]   ;;  %v13005_v12 = vld [vmem:[%s19253_s1 + $0x1f4] ss:$8 sps:$4 sm:$0xff]  }
  0x45   :  { %2122 = vmatprep.subr.bf16.mxu1 %v12940_v13  ;;  %2109 = vmatprep.mubr.bf16.mxu1 %v15017_v14  ;;  %v13003_v13 = vld [vmem:[%s19253_s1 + $0x1f0] ss:$8 sps:$4 sm:$0xff]  }
  0x46   :  { %961 = vmatprep.mubr.bf16.mxu0 %v10936_v31  ;;  %v15257_v31 = vld [vmem:[%s19252_s0 + $0x10] sm:$0xff] }
  0x47   :  { %975 = vmatpush1.bf16.msra.mxu0 %v12935_v15  ;;  %v13084_v15 = vld [vmem:[%s19256_s4 + $0xc8] ss:$24 sps:$4 sm:$0xff]  }
  0x48   :  { %2123 = vmatpush1.bf16.msra.mxu1 %v12938_v16  ;;  %976 = vmatprep.subr.bf16.mxu0 %v12943_v17  ;;  %v13008_v16 = vld [vmem:[%s19253_s1 + $0x204] ss:$8 sps:$4 sm:$0xff]   ;;  %v13092_v17 = vld [vmem:[%s19256_s4 + $0xfc] ss:$24 sps:$4 sm:$0xff]  }
  0x49   :  { %2124 = vmatprep.subr.bf16.mxu1 %v12946_v18  ;;  %v52_v18 = vld [vmem:[%s19252_s0 + $0x48] sm:$0xff] }
  0x4a   :  { %962 = vmatmul.mubr.bf16.gmra.mrb[4].mxu0 %v10935_v33  ;;  %v13102_v33 = vld [vmem:[%s19256_s4 + $0x158] ss:$24 sps:$4 sm:$0xff]  }
  0x4b   :  { %2110 = vmatmul.mubr.bf16.gmra.mrb[4].mxu1 %v15042_v21  ;;  %977 = vmatpush1.bf16.msra.mxu0 %v12941_v19  ;;  %v56_v19 = vld [vmem:[%s19252_s0 + $0x68] sm:$0xff] }
  0x4c   :  { %2125 = vmatpush1.bf16.msra.mxu1 %v12944_v20  ;;  %978 = vmatprep.subr.bf16.mxu0 %v12949_v22  ;;  %v13090_v20 = vld [vmem:[%s19256_s4 + $0xf8] ss:$24 sps:$4 sm:$0xff]   ;;  %v10929_v22 = vcombine.low %v15085_v36, %v15090_v37  ;;  %v13012_v36 = vld [vmem:[%s19253_s1 + $0x220] ss:$8 sps:$4 sm:$0xff]  }
  0x4d   :  { %2126 = vmatprep.subr.bf16.mxu1 %v12952_v23  ;;  %2152 = vmatprep.mubr.bf16.mxu1 %v19266_v2  ;;  %v13098_v23 = vld [vmem:[%s19256_s4 + $0x12c] ss:$24 sps:$4 sm:$0xff]  }
  0x4e   :  { %1004 = vmatprep.mubr.bf16.mxu0 %v10930_v38  ;;  %v13017_v38 = vld [vmem:[%s19253_s1 + $0x234] ss:$8 sps:$4 sm:$0xff]  }
  0x4f   :  { %979 = vmatpush1.bf16.msra.mxu0 %v12947_v24  ;;  %v13006_v24 = vld [vmem:[%s19253_s1 + $0x200] ss:$8 sps:$4 sm:$0xff]  }
  0x50   :  { %2127 = vmatpush1.bf16.msra.mxu1 %v12950_v25  ;;  %980 = vmatprep.subr.bf16.mxu0 %v12955_v26  ;;  %v10938_v25 = vcombine.high %v52_v18, %v56_v19  ;;  %v13011_v26 = vld [vmem:[%s19253_s1 + $0x214] ss:$8 sps:$4 sm:$0xff]  }
  0x51   :  { %2128 = vmatprep.subr.bf16.mxu1 %v12958_v27  ;;  %v13009_v27 = vld [vmem:[%s19253_s1 + $0x210] ss:$8 sps:$4 sm:$0xff]  }
  0x53   :  { %981 = vmatpush1.bf16.msra.mxu0 %v12953_v30  ;;  %v13104_v30 = vld [vmem:[%s19256_s4 + $0x15c] ss:$24 sps:$4 sm:$0xff]  }
  0x54   :  { %2129 = vmatpush1.bf16.msra.mxu1 %v12956_v32  ;;  %982 = vmatprep.subr.bf16.mxu0 %v12961_v34  ;;  %v15262_v32 = vld [vmem:[%s19252_s0 + $0x30] sm:$0xff]  ;;  %v10937_v34 = vcombine.low %v52_v18, %v56_v19  ;;  %v13042_v18 = vld [vmem:[%s19253_s1 + $0x2c0] ss:$8 sps:$4 sm:$0xff]  }
  0x55   :  { %2130 = vmatprep.subr.bf16.mxu1 %v12964_v35  ;;  %v13110_v35 = vld [vmem:[%s19256_s4 + $0x18c] ss:$24 sps:$4 sm:$0xff]   ;;  %v10932_v37 = vcombine.high %v15257_v31, %v15262_v32  ;;  %v13047_v19 = vld [vmem:[%s19253_s1 + $0x2d4] ss:$8 sps:$4 sm:$0xff]  }
  0x57   :  { %983 = vmatpush1.bf16.msra.mxu0 %v12959_v39  ;;  %v13108_v39 = vld [vmem:[%s19256_s4 + $0x188] ss:$24 sps:$4 sm:$0xff]  }
  0x58   :  { %2131 = vmatpush1.bf16.msra.mxu1 %v12962_v40  ;;  %984 = vmatprep.subr.bf16.mxu0 %v12969_v41  ;;  %v13116_v40 = vld [vmem:[%s19256_s4 + $0x1bc] ss:$24 sps:$4 sm:$0xff]   ;;  %v13015_v41 = vld [vmem:[%s19253_s1 + $0x230] ss:$8 sps:$4 sm:$0xff]  }
  0x59   :  { %2132 = vmatprep.subr.bf16.mxu1 %v12973_v42  ;;  %v13020_v42 = vld [vmem:[%s19253_s1 + $0x244] ss:$8 sps:$4 sm:$0xff]  }
  0x5b   :  { %985 = vmatpush1.bf16.msra.mxu0 %v12967_v43  ;;  %v13114_v43 = vld [vmem:[%s19256_s4 + $0x1b8] ss:$24 sps:$4 sm:$0xff]  }
  0x5c   :  { %2133 = vmatpush1.bf16.msra.mxu1 %v12971_v44  ;;  %986 = vmatprep.subr.bf16.mxu0 %v12976_v45  ;;  %v13122_v44 = vld [vmem:[%s19256_s4 + $0x1ec] ss:$24 sps:$4 sm:$0xff]   ;;  %v13018_v45 = vld [vmem:[%s19253_s1 + $0x240] ss:$8 sps:$4 sm:$0xff]  }
  0x5d   :  { %2134 = vmatprep.subr.bf16.mxu1 %v12979_v46  ;;  %v13023_v46 = vld [vmem:[%s19253_s1 + $0x254] ss:$8 sps:$4 sm:$0xff]  }
  0x5f   :  { %987 = vmatpush1.bf16.msra.mxu0 %v12974_v47  ;;  %v13120_v47 = vld [vmem:[%s19256_s4 + $0x1e8] ss:$24 sps:$4 sm:$0xff]  }
  0x60   :  { %2135 = vmatpush1.bf16.msra.mxu1 %v12977_v48  ;;  %988 = vmatprep.subr.bf16.mxu0 %v12982_v49  ;;  %v13128_v48 = vld [vmem:[%s19256_s4 + $0x21c] ss:$24 sps:$4 sm:$0xff]   ;;  %v13021_v49 = vld [vmem:[%s19253_s1 + $0x250] ss:$8 sps:$4 sm:$0xff]  }
  0x61   :  { %2173 = vmatprep.subr.bf16.mxu1 %v13062_v60  ;;  %v13027_v60 = vld [vmem:[%s19253_s1 + $0x270] ss:$8 sps:$4 sm:$0xff]  }
  0x63   :  { %2153 = vmatmul.mubr.bf16.vlgmr.msra.gmra.mrb[0].mxu1 %v15130_v50  ;;  %989 = vmatpush1.bf16.msra.mxu0 %v12980_v51  ;;  %v13026_v51 = vld [vmem:[%s19253_s1 + $0x264] ss:$8 sps:$4 sm:$0xff]  }
  0x64   :  { %2162 = vmatprep.mubr.bf16.mxu1 %v19266_v2  ;;  %990 = vmatprep.subr.bf16.mxu0 %v12986_v52  ;;  %v13126_v52 = vld [vmem:[%s19256_s4 + $0x218] ss:$24 sps:$4 sm:$0xff]  }
  0x65   :  { %2174 = vmatpush1.bf16.msra.mxu1 %v13060_v59  ;;  %v13140_v59 = vld [vmem:[%s19256_s4 + $0x27c] ss:$24 sps:$4 sm:$0xff]  }
  0x66   :  { %2175 = vmatprep.subr.bf16.mxu1 %v13068_v0  ;;  %v13030_v0 = vld [vmem:[%s19253_s1 + $0x280] ss:$8 sps:$4 sm:$0xff]  }
  0x67   :  { %991 = vmatpush1.bf16.msra.mxu0 %v12984_v53  ;;  %v13134_v53 = vld [vmem:[%s19256_s4 + $0x24c] ss:$24 sps:$4 sm:$0xff]  }
  0x68   :  { %992 = vmatprep.subr.bf16.mxu0 %v12989_v55  ;;  %v13024_v55 = vld [vmem:[%s19253_s1 + $0x260] ss:$8 sps:$4 sm:$0xff]  }
  0x69   :  { %2176 = vmatpush1.bf16.msra.mxu1 %v13066_v63  ;;  %v13146_v63 = vld [vmem:[%s19256_s4 + $0x2ac] ss:$24 sps:$4 sm:$0xff]  }
  0x6a   :  { %2177 = vmatprep.subr.bf16.mxu1 %v13074_v3  ;;  %v13144_v3 = vld [vmem:[%s19256_s4 + $0x2a8] ss:$24 sps:$4 sm:$0xff]  }
  0x6b   :  { %2163 = vmatmul.mubr.bf16.gmra.mrb[4].mxu1 %v15149_v56  ;;  %993 = vmatpush1.bf16.msra.mxu0 %v12987_v57  ;;  %v13029_v57 = vld [vmem:[%s19253_s1 + $0x274] ss:$8 sps:$4 sm:$0xff]  }
  0x6c   :  { %2205 = vmatprep.mubr.bf16.mxu1 %v14946_v54  ;;  %994 = vmatprep.subr.bf16.mxu0 %v12993_v58  ;;  %v12999_v54 = vld [vmem:[%s19253_s1 + $0x1d4] ss:$8 sps:$4 sm:$0xff]   ;;  %v13132_v58 = vld [vmem:[%s19256_s4 + $0x248] ss:$24 sps:$4 sm:$0xff]  }
  0x6d   :  { %2178 = vmatpush1.bf16.msra.mxu1 %v13072_v4  ;;  %v13038_v4 = vld [vmem:[%s19253_s1 + $0x2a4] ss:$8 sps:$4 sm:$0xff]  }
  0x6e   :  { %2179 = vmatprep.subr.bf16.mxu1 %v13080_v5  ;;  %v13149_v5 = vld [vmem:[%s19256_s4 + $0x2dc] ss:$24 sps:$4 sm:$0xff]  }
  0x6f   :  { %995 = vmatpush1.bf16.msra.mxu0 %v12991_v61  ;;  %v13032_v61 = vld [vmem:[%s19253_s1 + $0x284] ss:$8 sps:$4 sm:$0xff]  }
  0x70   :  { %996 = vmatprep.subr.bf16.mxu0 %v12996_v62  ;;  %v13138_v62 = vld [vmem:[%s19256_s4 + $0x278] ss:$24 sps:$4 sm:$0xff]  }
  0x71   :  { %2180 = vmatpush1.bf16.msra.mxu1 %v13078_v8  ;;  %v13036_v8 = vld [vmem:[%s19253_s1 + $0x2a0] ss:$8 sps:$4 sm:$0xff]  }
  0x72   :  { %2181 = vmatprep.subr.bf16.mxu1 %v13086_v10  ;;  %v13041_v10 = vld [vmem:[%s19253_s1 + $0x2b4] ss:$8 sps:$4 sm:$0xff]  }
  0x73   :  { %997 = vmatpush1.bf16.msra.mxu0 %v12994_v1  ;;  %v13035_v1 = vld [vmem:[%s19253_s1 + $0x294] ss:$8 sps:$4 sm:$0xff]  }
  0x74   :  { %998 = vmatprep.subr.bf16.mxu0 %v12999_v54  ;;  %v13033_v54 = vld [vmem:[%s19253_s1 + $0x290] ss:$8 sps:$4 sm:$0xff]  }
  0x75   :  { %2182 = vmatpush1.bf16.msra.mxu1 %v13084_v15  ;;  %v13044_v15 = vld [vmem:[%s19253_s1 + $0x2c4] ss:$8 sps:$4 sm:$0xff]  }
  0x76   :  { %2183 = vmatprep.subr.bf16.mxu1 %v13092_v17  ;;  %v13158_v17 = vld [vmem:[%s19256_s4 + $0x36c] ss:$24 sps:$4 sm:$0xff]  }
  0x77   :  { %999 = vmatpush1.bf16.msra.mxu0 %v12997_v6  ;;  %v13147_v6 = vld [vmem:[%s19256_s4 + $0x2d8] ss:$24 sps:$4 sm:$0xff]  }
  0x78   :  { %1000 = vmatprep.subr.bf16.mxu0 %v13002_v7  ;;  %v13152_v7 = vld [vmem:[%s19256_s4 + $0x30c] ss:$24 sps:$4 sm:$0xff]  }
  0x79   :  { %2184 = vmatpush1.bf16.msra.mxu1 %v13090_v20  ;;  %v13161_v20 = vld [vmem:[%s19256_s4 + $0x39c] ss:$24 sps:$4 sm:$0xff]  }
  0x7a   :  { %2185 = vmatprep.subr.bf16.mxu1 %v13098_v23  ;;  %v13159_v23 = vld [vmem:[%s19256_s4 + $0x398] ss:$24 sps:$4 sm:$0xff]  }
  0x7b   :  { %1001 = vmatpush1.bf16.msra.mxu0 %v13000_v11  ;;  %v13150_v11 = vld [vmem:[%s19256_s4 + $0x308] ss:$24 sps:$4 sm:$0xff]  }
  0x7c   :  { %1002 = vmatprep.subr.bf16.mxu0 %v13005_v12  ;;  %v13155_v12 = vld [vmem:[%s19256_s4 + $0x33c] ss:$24 sps:$4 sm:$0xff]  }
  0x7d   :  { %2186 = vmatpush1.bf16.msra.mxu1 %v13096_v28  ;;  %v13051_v28 = vld [vmem:[%s19253_s1 + $0x2f0] ss:$8 sps:$4 sm:$0xff]  }
  0x7e   :  { %2187 = vmatprep.subr.bf16.mxu1 %v13104_v30  ;;  %v53_v30 = vld [vmem:[%s19252_s0 + $0x50] sm:$0xff] }
  0x7f   :  { %1003 = vmatpush1.bf16.msra.mxu0 %v13003_v13  ;;  %v13039_v13 = vld [vmem:[%s19253_s1 + $0x2b0] ss:$8 sps:$4 sm:$0xff]  }
  0x80   :  { %1025 = vmatprep.subr.bf16.mxu0 %v13008_v16  ;;  %v13153_v16 = vld [vmem:[%s19256_s4 + $0x338] ss:$24 sps:$4 sm:$0xff]  }
  0x81   :  { %2188 = vmatpush1.bf16.msra.mxu1 %v13102_v33  ;;  %v57_v33 = vld [vmem:[%s19252_s0 + $0x70] sm:$0xff] }
  0x82   :  { %1005 = vmatmul.mubr.bf16.vlgmr.msra.gmra.mrb[0].mxu0 %v10929_v22  ;;  %2189 = vmatprep.subr.bf16.mxu1 %v13110_v35  ;;  %v13045_v22 = vld [vmem:[%s19253_s1 + $0x2d0] ss:$8 sps:$4 sm:$0xff]   ;;  %v13170_v35 = vld [vmem:[%s19256_s4 + $0x42c] ss:$24 sps:$4 sm:$0xff]  }
  0x83   :  { %1026 = vmatpush1.bf16.msra.mxu0 %v13006_v24  ;;  %1014 = vmatprep.mubr.bf16.mxu0 %v10938_v25  ;;  %v13164_v24 = vld [vmem:[%s19256_s4 + $0x3cc] ss:$24 sps:$4 sm:$0xff]   ;;  %v13048_v25 = vld [vmem:[%s19253_s1 + $0x2e0] ss:$8 sps:$4 sm:$0xff]  }
  0x84   :  { %1027 = vmatprep.subr.bf16.mxu0 %v13011_v26  ;;  %v13053_v26 = vld [vmem:[%s19253_s1 + $0x2f4] ss:$8 sps:$4 sm:$0xff]  }
  0x85   :  { %2190 = vmatpush1.bf16.msra.mxu1 %v13108_v39  ;;  %v10940_v39 = vcombine.high %v53_v30, %v57_v33 }
  0x86   :  { %2191 = vmatprep.subr.bf16.mxu1 %v13116_v40  ;;  %v13168_v40 = vld [vmem:[%s19256_s4 + $0x428] ss:$24 sps:$4 sm:$0xff]  }
  0x87   :  { %1028 = vmatpush1.bf16.msra.mxu0 %v13009_v27  ;;  %v13162_v27 = vld [vmem:[%s19256_s4 + $0x3c8] ss:$24 sps:$4 sm:$0xff]  }
  0x88   :  { %1029 = vmatprep.subr.bf16.mxu0 %v13014_v29  ;;  %v13056_v29 = vld [vmem:[%s19253_s1 + $0x304] ss:$8 sps:$4 sm:$0xff]  }
  0x89   :  { %2192 = vmatpush1.bf16.msra.mxu1 %v13114_v43  ;;  %v15478_v43 = vld [vmem:[%s19252_s0 + $0x38] sm:$0xff] }
  0x8a   :  { %1015 = vmatmul.mubr.bf16.gmra.mrb[4].mxu0 %v10937_v34  ;;  %2193 = vmatprep.subr.bf16.mxu1 %v13122_v44  ;;  %v13165_v34 = vld [vmem:[%s19256_s4 + $0x3f8] ss:$24 sps:$4 sm:$0xff]  }
  0x8b   :  { %1030 = vmatpush1.bf16.msra.mxu0 %v13012_v36  ;;  %1057 = vmatprep.mubr.bf16.mxu0 %v10932_v37  ;;  %v13054_v36 = vld [vmem:[%s19253_s1 + $0x300] ss:$8 sps:$4 sm:$0xff]   ;;  %v10931_v37 = vcombine.low %v15257_v31, %v15262_v32  ;;  %v13057_v31 = vld [vmem:[%s19253_s1 + $0x310] ss:$8 sps:$4 sm:$0xff]   ;;  %v13065_v32 = vld [vmem:[%s19253_s1 + $0x324] ss:$8 sps:$4 sm:$0xff]  }
  0x8c   :  { %1031 = vmatprep.subr.bf16.mxu0 %v13017_v38  ;;  %v13059_v38 = vld [vmem:[%s19253_s1 + $0x314] ss:$8 sps:$4 sm:$0xff]   ;;  %v13171_v44 = vld [vmem:[%s19256_s4 + $0x458] ss:$24 sps:$4 sm:$0xff]  }
  0x8d   :  { %2194 = vmatpush1.bf16.msra.mxu1 %v13120_v47  ;;  %v13063_v47 = vld [vmem:[%s19253_s1 + $0x320] ss:$8 sps:$4 sm:$0xff]  }
  0x8e   :  { %2195 = vmatprep.subr.bf16.mxu1 %v13128_v48 }
  0x8f   :  { %1032 = vmatpush1.bf16.msra.mxu0 %v13015_v41  ;;  %v13173_v41 = vld [vmem:[%s19256_s4 + $0x45c] ss:$24 sps:$4 sm:$0xff]  }
  0x90   :  { %1033 = vmatprep.subr.bf16.mxu0 %v13020_v42  ;;  %v15473_v42 = vld [vmem:[%s19252_s0 + $0x18] sm:$0xff] }
  0x91   :  { %2196 = vmatpush1.bf16.msra.mxu1 %v13126_v52  ;;  %v10934_v48 = vcombine.high %v15473_v42, %v15478_v43  ;;  %v13179_v52 = vld [vmem:[%s19256_s4 + $0x44] ss:$24 sps:$4 sm:$0xff]  }
  0x92   :  { %2197 = vmatprep.subr.bf16.mxu1 %v13134_v53  ;;  %v13069_v53 = vld [vmem:[%s19253_s1 + $0x330] ss:$8 sps:$4 sm:$0xff]  }
  0x93   :  { %1034 = vmatpush1.bf16.msra.mxu0 %v13018_v45  ;;  %v13176_v45 = vld [vmem:[%s19256_s4 + $0x14] ss:$24 sps:$4 sm:$0xff]  }
  0x94   :  { %1035 = vmatprep.subr.bf16.mxu0 %v13023_v46  ;;  %v10939_v46 = vcombine.low %v53_v30, %v57_v33  ;;  %v13129_v30 = vld [vmem:[%s19253_s1 + $0x3d0] ss:$8 sps:$4 sm:$0xff]   ;;  %v13137_v33 = vld [vmem:[%s19253_s1 + $0x3e4] ss:$8 sps:$4 sm:$0xff]  }
  0x95   :  { %2198 = vmatpush1.bf16.msra.mxu1 %v13132_v58  ;;  %v13182_v58 = vld [vmem:[%s19256_s4 + $0x74] ss:$24 sps:$4 sm:$0xff]  }
  0x96   :  { %2199 = vmatprep.subr.bf16.mxu1 %v13140_v59  ;;  %v13075_v59 = vld [vmem:[%s19253_s1 + $0x340] ss:$8 sps:$4 sm:$0xff]  }
  0x97   :  { %1036 = vmatpush1.bf16.msra.mxu0 %v13021_v49  ;;  %v13071_v49 = vld [vmem:[%s19253_s1 + $0x334] ss:$8 sps:$4 sm:$0xff]  }
  0x98   :  { %1037 = vmatprep.subr.bf16.mxu0 %v13026_v51  ;;  %v13174_v51 = vld [vmem:[%s19256_s4 + $0x10] ss:$24 sps:$4 sm:$0xff]  }
  0x99   :  { %2200 = vmatpush1.bf16.msra.mxu1 %v13138_v62  ;;  %v13081_v62 = vld [vmem:[%s19253_s1 + $0x350] ss:$8 sps:$4 sm:$0xff]  }
  0x9a   :  { %2201 = vmatprep.subr.bf16.mxu1 %v13146_v63  ;;  %v13089_v63 = vld [vmem:[%s19253_s1 + $0x364] ss:$8 sps:$4 sm:$0xff]  }
  0x9b   :  { %1038 = vmatpush1.bf16.msra.mxu0 %v13024_v55  ;;  %v13077_v55 = vld [vmem:[%s19253_s1 + $0x344] ss:$8 sps:$4 sm:$0xff]  }
  0x9c   :  { %1039 = vmatprep.subr.bf16.mxu0 %v13029_v57  ;;  %v13177_v57 = vld [vmem:[%s19256_s4 + $0x40] ss:$24 sps:$4 sm:$0xff]  }
  0x9d   :  { %2202 = vmatpush1.bf16.msra.mxu1 %v13144_v3  ;;  %v13095_v3 = vld [vmem:[%s19253_s1 + $0x374] ss:$8 sps:$4 sm:$0xff]  }
  0x9e   :  { %2203 = vmatprep.subr.bf16.mxu1 %v13149_v5  ;;  %v13191_v5 = vld [vmem:[%s19256_s4 + $0x104] ss:$24 sps:$4 sm:$0xff]  }
  0x9f   :  { %1040 = vmatpush1.bf16.msra.mxu0 %v13027_v60  ;;  %v13180_v60 = vld [vmem:[%s19256_s4 + $0x70] ss:$24 sps:$4 sm:$0xff]  }
  0xa0   :  { %1041 = vmatprep.subr.bf16.mxu0 %v13032_v61  ;;  %v13185_v61 = vld [vmem:[%s19256_s4 + $0xa4] ss:$24 sps:$4 sm:$0xff]  }
  0xa1   :  { %2204 = vmatpush1.bf16.msra.mxu1 %v13147_v6  ;;  %v13093_v6 = vld [vmem:[%s19253_s1 + $0x370] ss:$8 sps:$4 sm:$0xff]  }
  0xa2   :  { %2226 = vmatprep.subr.bf16.mxu1 %v13152_v7  ;;  %v13101_v7 = vld [vmem:[%s19253_s1 + $0x384] ss:$8 sps:$4 sm:$0xff]  }
  0xa3   :  { %1042 = vmatpush1.bf16.msra.mxu0 %v13030_v0  ;;  %v13183_v0 = vld [vmem:[%s19256_s4 + $0xa0] ss:$24 sps:$4 sm:$0xff]  }
  0xa4   :  { %1043 = vmatprep.subr.bf16.mxu0 %v13035_v1  ;;  %2206 = vmatmul.mubr.bf16.vlgmr.msra.gmra.mrb[8].mxu1 %v15000_v9  ;;  %v13156_v9 = vld [vmem:[%s19256_s4 + $0x368] ss:$24 sps:$4 sm:$0xff]   ;;  %v14684_v1 = vld [vmem:[%s19255_s3 + $0x4] ss:$12 sps:$4 sm:$0xff]  }
  0xa5   :  { %2227 = vmatpush1.bf16.msra.mxu1 %v13150_v11  ;;  %2215 = vmatprep.mubr.bf16.mxu1 %v15017_v14  ;;  %v13050_v14 = vld [vmem:[%s19253_s1 + $0x2e4] ss:$8 sps:$4 sm:$0xff]   ;;  %v13099_v11 = vld [vmem:[%s19253_s1 + $0x380] ss:$8 sps:$4 sm:$0xff]  }
  0xa6   :  { %2228 = vmatprep.subr.bf16.mxu1 %v13155_v12  ;;  %v13107_v12 = vld [vmem:[%s19253_s1 + $0x394] ss:$8 sps:$4 sm:$0xff]  }
  0xa7   :  { %1044 = vmatpush1.bf16.msra.mxu0 %v13033_v54  ;;  %v13188_v54 = vld [vmem:[%s19256_s4 + $0xd4] ss:$24 sps:$4 sm:$0xff]  }
  0xa8   :  { %1045 = vmatprep.subr.bf16.mxu0 %v13038_v4  ;;  %v13186_v4 = vld [vmem:[%s19256_s4 + $0xd0] ss:$24 sps:$4 sm:$0xff]  }
  0xa9   :  { %2229 = vmatpush1.bf16.msra.mxu1 %v13153_v16  ;;  %v13105_v16 = vld [vmem:[%s19253_s1 + $0x390] ss:$8 sps:$4 sm:$0xff]  }
  0xaa   :  { %2230 = vmatprep.subr.bf16.mxu1 %v13158_v17  ;;  %v13113_v17 = vld [vmem:[%s19253_s1 + $0x3a4] ss:$8 sps:$4 sm:$0xff]  }
  0xab   :  { %1046 = vmatpush1.bf16.msra.mxu0 %v13036_v8  ;;  %v13189_v8 = vld [vmem:[%s19256_s4 + $0x100] ss:$24 sps:$4 sm:$0xff]  }
  0xac   :  { %1047 = vmatprep.subr.bf16.mxu0 %v13041_v10  ;;  %2216 = vmatmul.mubr.bf16.gmra.mrb[12].mxu1 %v15042_v21  ;;  %v13167_v21 = vld [vmem:[%s19256_s4 + $0x3fc] ss:$24 sps:$4 sm:$0xff]  }
  0xad   :  { %2231 = vmatpush1.bf16.msra.mxu1 %v13156_v9  ;;  %2258 = vmatprep.mubr.bf16.mxu1 %v19266_v2  ;;  %v13194_v10 = vld [vmem:[%s19256_s4 + $0x134] ss:$24 sps:$4 sm:$0xff]   ;;  %v13111_v9 = vld [vmem:[%s19253_s1 + $0x3a0] ss:$8 sps:$4 sm:$0xff]  }
  0xae   :  { %2232 = vmatprep.subr.bf16.mxu1 %v13161_v20  ;;  %v13119_v20 = vld [vmem:[%s19253_s1 + $0x3b4] ss:$8 sps:$4 sm:$0xff]  }
  0xaf   :  { %1048 = vmatpush1.bf16.msra.mxu0 %v13039_v13  ;;  %v13192_v13 = vld [vmem:[%s19256_s4 + $0x130] ss:$24 sps:$4 sm:$0xff]  }
  0xb0   :  { %1049 = vmatprep.subr.bf16.mxu0 %v13044_v15  ;;  %v13197_v15 = vld [vmem:[%s19256_s4 + $0x164] ss:$24 sps:$4 sm:$0xff]  }
  0xb1   :  { %2233 = vmatpush1.bf16.msra.mxu1 %v13159_v23  ;;  %v13117_v23 = vld [vmem:[%s19253_s1 + $0x3b0] ss:$8 sps:$4 sm:$0xff]  }
  0xb2   :  { %2234 = vmatprep.subr.bf16.mxu1 %v13164_v24  ;;  %v13125_v24 = vld [vmem:[%s19253_s1 + $0x3c4] ss:$8 sps:$4 sm:$0xff]  }
  0xb3   :  { %1050 = vmatpush1.bf16.msra.mxu0 %v13042_v18  ;;  %v13195_v18 = vld [vmem:[%s19256_s4 + $0x160] ss:$24 sps:$4 sm:$0xff]  }
  0xb4   :  { %1051 = vmatprep.subr.bf16.mxu0 %v13047_v19  ;;  %v13200_v19 = vld [vmem:[%s19256_s4 + $0x194] ss:$24 sps:$4 sm:$0xff]  }
  0xb5   :  { %2235 = vmatpush1.bf16.msra.mxu1 %v13162_v27  ;;  %v13123_v27 = vld [vmem:[%s19253_s1 + $0x3c0] ss:$8 sps:$4 sm:$0xff]  }
  0xb6   :  { %2236 = vmatprep.subr.bf16.mxu1 %v13167_v21  ;;  %v13131_v21 = vld [vmem:[%s19253_s1 + $0x3d4] ss:$8 sps:$4 sm:$0xff]  }
  0xb7   :  { %1052 = vmatpush1.bf16.msra.mxu0 %v13045_v22  ;;  %v13198_v22 = vld [vmem:[%s19256_s4 + $0x190] ss:$24 sps:$4 sm:$0xff]  }
  0xb8   :  { %1053 = vmatprep.subr.bf16.mxu0 %v13050_v14  ;;  %v13203_v14 = vld [vmem:[%s19256_s4 + $0x1c4] ss:$24 sps:$4 sm:$0xff]  }
  0xb9   :  { %2237 = vmatpush1.bf16.msra.mxu1 %v13165_v34  ;;  %v13207_v34 = vld [vmem:[%s19256_s4 + $0x220] ss:$24 sps:$4 sm:$0xff]  }
  0xba   :  { %2238 = vmatprep.subr.bf16.mxu1 %v13170_v35  ;;  %v13212_v35 = vld [vmem:[%s19256_s4 + $0x254] ss:$24 sps:$4 sm:$0xff]  }
  0xbb   :  { %1054 = vmatpush1.bf16.msra.mxu0 %v13048_v25  ;;  %v13201_v25 = vld [vmem:[%s19256_s4 + $0x1c0] ss:$24 sps:$4 sm:$0xff]  }
  0xbc   :  { %1055 = vmatprep.subr.bf16.mxu0 %v13053_v26  ;;  %v13206_v26 = vld [vmem:[%s19256_s4 + $0x1f4] ss:$24 sps:$4 sm:$0xff]  }
  0xbd   :  { %2239 = vmatpush1.bf16.msra.mxu1 %v13168_v40  ;;  %v13141_v40 = vld [vmem:[%s19253_s1 + $0x3f0] ss:$8 sps:$4 sm:$0xff]  }
  0xbe   :  { %2240 = vmatprep.subr.bf16.mxu1 %v13173_v41  ;;  %v54_v41 = vld [vmem:[%s19252_s0 + $0x58] sm:$0xff] }
  0xbf   :  { %1056 = vmatpush1.bf16.msra.mxu0 %v13051_v28  ;;  %v13204_v28 = vld [vmem:[%s19256_s4 + $0x1f0] ss:$24 sps:$4 sm:$0xff]  }
  0xc0   :  { %1078 = vmatprep.subr.bf16.mxu0 %v13056_v29  ;;  %v13209_v29 = vld [vmem:[%s19256_s4 + $0x224] ss:$24 sps:$4 sm:$0xff]  }
  0xc1   :  { %2241 = vmatpush1.bf16.msra.mxu1 %v13171_v44  ;;  %v13213_v44 = vld [vmem:[%s19256_s4 + $0x280] ss:$24 sps:$4 sm:$0xff]  }
  0xc2   :  { %1058 = vmatmul.mubr.bf16.vlgmr.msra.gmra.mrb[0].mxu0 %v10931_v37  ;;  %2279 = vmatprep.subr.bf16.mxu1 %v13176_v45  ;;  %v13143_v37 = vld [vmem:[%s19253_s1 + $0x3f4] ss:$8 sps:$4 sm:$0xff]  }
  0xc3   :  { %1079 = vmatpush1.bf16.msra.mxu0 %v13054_v36  ;;  %1067 = vmatprep.mubr.bf16.mxu0 %v10940_v39  ;;  %v13135_v36 = vld [vmem:[%s19253_s1 + $0x3e0] ss:$8 sps:$4 sm:$0xff]   ;;  %v13215_v39 = vld [vmem:[%s19256_s4 + $0x284] ss:$24 sps:$4 sm:$0xff]   ;;  %v13218_v45 = vld [vmem:[%s19256_s4 + $0x2b4] ss:$24 sps:$4 sm:$0xff]  }
  0xc4   :  { %1080 = vmatprep.subr.bf16.mxu0 %v13059_v38  ;;  %2259 = vmatmul.mubr.bf16.vlgmr.msra.gmra.mrb[8].mxu1 %v15130_v50  ;;  %v13083_v50 = vld [vmem:[%s19253_s1 + $0x354] ss:$8 sps:$4 sm:$0xff]   ;;  %v13210_v38 = vld [vmem:[%s19256_s4 + $0x250] ss:$24 sps:$4 sm:$0xff]  }
  0xc5   :  { %2280 = vmatpush1.bf16.msra.mxu1 %v13174_v51  ;;  %2268 = vmatprep.mubr.bf16.mxu1 %v19266_v2  ;;  %v13216_v51 = vld [vmem:[%s19256_s4 + $0x2b0] ss:$24 sps:$4 sm:$0xff]  }
  0xc6   :  { %2281 = vmatprep.subr.bf16.mxu1 %v13179_v52  ;;  %v13221_v52 = vld [vmem:[%s19256_s4 + $0x2e4] ss:$24 sps:$4 sm:$0xff]  }
  0xc7   :  { %1081 = vmatpush1.bf16.msra.mxu0 %v13057_v31  ;;  %v58_v31 = vld [vmem:[%s19252_s0 + $0x78] sm:$0xff] }
  0xc8   :  { %1082 = vmatprep.subr.bf16.mxu0 %v13065_v32  ;;  %v13248_v32 = vld [vmem:[%s19258_s6 + $0x4] ss:$48 sps:$4 sm:$0xff]  }
  0xc9   :  { %2282 = vmatpush1.bf16.msra.mxu1 %v13177_v57  ;;  %v13258_v57 = vld [vmem:[%s19258_s6 + $0xc0] ss:$48 sps:$4 sm:$0xff]  }
  0xca   :  { %1068 = vmatmul.mubr.bf16.gmra.mrb[4].mxu0 %v10939_v46  ;;  %2283 = vmatprep.subr.bf16.mxu1 %v13182_v58  ;;  %v13246_v46 = vld [vmem:[%s19258_s6] ss:$48 sps:$4 sm:$0xff]   ;;  %v10941_v58 = vcombine.low %v54_v41, %v58_v31 }
  0xcb   :  { %1083 = vmatpush1.bf16.msra.mxu0 %v13063_v47  ;;  %1110 = vmatprep.mubr.bf16.mxu0 %v10934_v48  ;;  %v10933_v47 = vcombine.low %v15473_v42, %v15478_v43  ;;  %v13254_v48 = vld [vmem:[%s19258_s6 + $0x64] ss:$48 sps:$4 sm:$0xff]   ;;  %v13252_v42 = vld [vmem:[%s19258_s6 + $0x60] ss:$48 sps:$4 sm:$0xff]  }
  0xcc   :  { %1084 = vmatprep.subr.bf16.mxu0 %v13071_v49  ;;  %2269 = vmatmul.mubr.bf16.gmra.mrb[12].mxu1 %v15149_v56  ;;  %v13087_v56 = vld [vmem:[%s19253_s1 + $0x360] ss:$8 sps:$4 sm:$0xff]   ;;  %v10942_v49 = vcombine.high %v54_v41, %v58_v31  ;;  %v13260_v43 = vld [vmem:[%s19258_s6 + $0xc4] ss:$48 sps:$4 sm:$0xff]   ;;  %v13269_v41 = vld [vmem:[%s19258_s6 + $0x12c] ss:$48 sps:$4 sm:$0xff]  }
  0xcd   :  { %2284 = vmatpush1.bf16.msra.mxu1 %v13180_v60  ;;  %2311 = vmatprep.mubr.bf16.mxu1 %v14684_v1  ;;  %v13227_v60 = vld [vmem:[%s19256_s4 + $0x344] ss:$24 sps:$4 sm:$0xff]   ;;  %v13230_v1 = vld [vmem:[%s19256_s4 + $0x374] ss:$24 sps:$4 sm:$0xff]  }
  0xce   :  { %2285 = vmatprep.subr.bf16.mxu1 %v13185_v61  ;;  %v13264_v61 = vld [vmem:[%s19258_s6 + $0x120] ss:$48 sps:$4 sm:$0xff]  }
  0xcf   :  { %1085 = vmatpush1.bf16.msra.mxu0 %v13069_v53  ;;  %v13219_v53 = vld [vmem:[%s19256_s4 + $0x2e0] ss:$24 sps:$4 sm:$0xff]  }
  0xd0   :  { %1086 = vmatprep.subr.bf16.mxu0 %v13077_v55  ;;  %v13224_v55 = vld [vmem:[%s19256_s4 + $0x314] ss:$24 sps:$4 sm:$0xff]  }
  0xd1   :  { %2286 = vmatpush1.bf16.msra.mxu1 %v13183_v0  ;;  %v14685_v0 = vld [vmem:[%s19255_s3] ss:$12 sps:$4 sm:$0xff]  }
  0xd2   :  { %2287 = vmatprep.subr.bf16.mxu1 %v13188_v54  ;;  %v14686_v54 = vld [vmem:[%s19255_s3 + $0x1c] ss:$12 sps:$4 sm:$0xff]  }
  0xd3   :  { %1087 = vmatpush1.bf16.msra.mxu0 %v13075_v59  ;;  %v13266_v59 = vld [vmem:[%s19258_s6 + $0x124] ss:$48 sps:$4 sm:$0xff]  }
  0xd4   :  { %1088 = vmatprep.subr.bf16.mxu0 %v13083_v50  ;;  %v13222_v50 = vld [vmem:[%s19256_s4 + $0x310] ss:$24 sps:$4 sm:$0xff]  }
  0xd5   :  { %2288 = vmatpush1.bf16.msra.mxu1 %v13186_v4  ;;  %v13228_v4 = vld [vmem:[%s19256_s4 + $0x370] ss:$24 sps:$4 sm:$0xff]  }
  0xd6   :  { %2289 = vmatprep.subr.bf16.mxu1 %v13191_v5  ;;  %v13233_v5 = vld [vmem:[%s19256_s4 + $0x3a4] ss:$24 sps:$4 sm:$0xff]  }
  0xd7   :  { %1089 = vmatpush1.bf16.msra.mxu0 %v13081_v62  ;;  %v13272_v62 = vld [vmem:[%s19258_s6 + $0x184] ss:$48 sps:$4 sm:$0xff]  }
  0xd8   :  { %1090 = vmatprep.subr.bf16.mxu0 %v13089_v63  ;;  %v13225_v63 = vld [vmem:[%s19256_s4 + $0x340] ss:$24 sps:$4 sm:$0xff]  }
  0xd9   :  { %2290 = vmatpush1.bf16.msra.mxu1 %v13189_v8  ;;  %v13231_v8 = vld [vmem:[%s19256_s4 + $0x3a0] ss:$24 sps:$4 sm:$0xff]  }
  0xda   :  { %2291 = vmatprep.subr.bf16.mxu1 %v13194_v10  ;;  %v13236_v10 = vld [vmem:[%s19256_s4 + $0x3d4] ss:$24 sps:$4 sm:$0xff]  }
  0xdb   :  { %1091 = vmatpush1.bf16.msra.mxu0 %v13087_v56  ;;  %v13270_v56 = vld [vmem:[%s19258_s6 + $0x180] ss:$48 sps:$4 sm:$0xff]  }
  0xdc   :  { %1092 = vmatprep.subr.bf16.mxu0 %v13095_v3  ;;  %v13278_v3 = vld [vmem:[%s19258_s6 + $0x1e4] ss:$48 sps:$4 sm:$0xff]  }
  0xdd   :  { %2292 = vmatpush1.bf16.msra.mxu1 %v13192_v13  ;;  %v13290_v13 = vld [vmem:[%s19258_s6 + $0x2a4] ss:$48 sps:$4 sm:$0xff]  }
  0xde   :  { %2293 = vmatprep.subr.bf16.mxu1 %v13197_v15  ;;  %v13234_v15 = vld [vmem:[%s19256_s4 + $0x3d0] ss:$24 sps:$4 sm:$0xff]  }
  0xdf   :  { %1093 = vmatpush1.bf16.msra.mxu0 %v13093_v6  ;;  %v13276_v6 = vld [vmem:[%s19258_s6 + $0x1e0] ss:$48 sps:$4 sm:$0xff]  }
  0xe0   :  { %1094 = vmatprep.subr.bf16.mxu0 %v13101_v7  ;;  %v13284_v7 = vld [vmem:[%s19258_s6 + $0x244] ss:$48 sps:$4 sm:$0xff]  }
  0xe1   :  { %2294 = vmatpush1.bf16.msra.mxu1 %v13195_v18  ;;  %v13296_v18 = vld [vmem:[%s19258_s6 + $0x304] ss:$48 sps:$4 sm:$0xff]  }
  0xe2   :  { %2295 = vmatprep.subr.bf16.mxu1 %v13200_v19  ;;  %v13237_v19 = vld [vmem:[%s19256_s4 + $0x400] ss:$24 sps:$4 sm:$0xff]  }
  0xe3   :  { %1095 = vmatpush1.bf16.msra.mxu0 %v13099_v11  ;;  %v14687_v11 = vld [vmem:[%s19255_s3 + $0x18] ss:$12 sps:$4 sm:$0xff]  }
  0xe4   :  { %1096 = vmatprep.subr.bf16.mxu0 %v13107_v12  ;;  %v13282_v12 = vld [vmem:[%s19258_s6 + $0x240] ss:$48 sps:$4 sm:$0xff]  }
  0xe5   :  { %2296 = vmatpush1.bf16.msra.mxu1 %v13198_v22  ;;  %v13302_v22 = vld [vmem:[%s19258_s6 + $0x364] ss:$48 sps:$4 sm:$0xff]  }
  0xe6   :  { %2297 = vmatprep.subr.bf16.mxu1 %v13203_v14  ;;  %v13240_v14 = vld [vmem:[%s19256_s4 + $0x430] ss:$24 sps:$4 sm:$0xff]  }
  0xe7   :  { %1097 = vmatpush1.bf16.msra.mxu0 %v13105_v16  ;;  %v13239_v16 = vld [vmem:[%s19256_s4 + $0x404] ss:$24 sps:$4 sm:$0xff]  }
  0xe8   :  { %1098 = vmatprep.subr.bf16.mxu0 %v13113_v17  ;;  %v13288_v17 = vld [vmem:[%s19258_s6 + $0x2a0] ss:$48 sps:$4 sm:$0xff]  }
  0xe9   :  { %2298 = vmatpush1.bf16.msra.mxu1 %v13201_v25  ;;  %v13308_v25 = vld [vmem:[%s19258_s6 + $0x3c4] ss:$48 sps:$4 sm:$0xff]  }
  0xea   :  { %2299 = vmatprep.subr.bf16.mxu1 %v13206_v26  ;;  %v13243_v26 = vld [vmem:[%s19256_s4 + $0x460] ss:$24 sps:$4 sm:$0xff]  }
  0xeb   :  { %1099 = vmatpush1.bf16.msra.mxu0 %v13111_v9  ;;  %v13242_v9 = vld [vmem:[%s19256_s4 + $0x434] ss:$24 sps:$4 sm:$0xff]  }
  0xec   :  { %1100 = vmatprep.subr.bf16.mxu0 %v13119_v20  ;;  %v13294_v20 = vld [vmem:[%s19258_s6 + $0x300] ss:$48 sps:$4 sm:$0xff]  }
  0xed   :  { %2300 = vmatpush1.bf16.msra.mxu1 %v13204_v28  ;;  %v19265_v28 = vlaneseq }
  0xee   :  { %2301 = vmatprep.subr.bf16.mxu1 %v13209_v29  ;;  %v13249_v29 = vld [vmem:[%s19258_s6 + $0x8] ss:$48 sps:$4 sm:$0xff]  }
  0xef   :  { %1101 = vmatpush1.bf16.msra.mxu0 %v13117_v23  ;;  %v13245_v23 = vld [vmem:[%s19256_s4 + $0x464] ss:$24 sps:$4 sm:$0xff]  }
  0xf0   :  { %1102 = vmatprep.subr.bf16.mxu0 %v13125_v24  ;;  %v13300_v24 = vld [vmem:[%s19258_s6 + $0x360] ss:$48 sps:$4 sm:$0xff]  }
  0xf1   :  { %2302 = vmatpush1.bf16.msra.mxu1 %v13207_v34  ;;  %v13255_v34 = vld [vmem:[%s19258_s6 + $0x68] ss:$48 sps:$4 sm:$0xff]  }
  0xf2   :  { %2303 = vmatprep.subr.bf16.mxu1 %v13212_v35  ;;  %v14688_v35 = vld [vmem:[%s19255_s3 + $0x8] ss:$12 sps:$4 sm:$0xff]  }
  0xf3   :  { %1103 = vmatpush1.bf16.msra.mxu0 %v13123_v27  ;;  %v13251_v27 = vld [vmem:[%s19258_s6 + $0xc] ss:$48 sps:$4 sm:$0xff]  }
  0xf4   :  { %1104 = vmatprep.subr.bf16.mxu0 %v13131_v21  ;;  %v13306_v21 = vld [vmem:[%s19258_s6 + $0x3c0] ss:$48 sps:$4 sm:$0xff]  }
  0xf5   :  { %2304 = vmatpush1.bf16.msra.mxu1 %v13210_v38 }
  0xf6   :  { %2305 = vmatprep.subr.bf16.mxu1 %v13215_v39 }
  0xf7   :  { %1105 = vmatpush1.bf16.msra.mxu0 %v13129_v30  ;;  %v13257_v30 = vld [vmem:[%s19258_s6 + $0x6c] ss:$48 sps:$4 sm:$0xff]  }
  0xf8   :  { %1106 = vmatprep.subr.bf16.mxu0 %v13137_v33  ;;  %v15810_v33 = vshrl.u32 %v19265_v28, 7 }
  0xf9   :  { %2306 = vmatpush1.bf16.msra.mxu1 %v13213_v44  ;;  %v13267_v44 = vld [vmem:[%s19258_s6 + $0x128] ss:$48 sps:$4 sm:$0xff]  }
  0xfa   :  { %2307 = vmatprep.subr.bf16.mxu1 %v13218_v45  ;;  %19289 = vst [vmem:[#allocation6_spill] sm:$0xff] %v15810_v33  ;;  %v15828_v38 = vsub.s32 0, %v15810_v33  ;;  %v15831_v39 = vsub.s32 1, %v15810_v33  ;;  %v14689_v45 = vld [vmem:[%s19255_s3 + $0x20] ss:$12 sps:$4 sm:$0xff]  }
  0xfb   :  { %1107 = vmatpush1.bf16.msra.mxu0 %v13135_v36  ;;  %v13263_v36 = vld [vmem:[%s19258_s6 + $0xcc] ss:$48 sps:$4 sm:$0xff]  }
  0xfc   :  { %1108 = vmatprep.subr.bf16.mxu0 %v13143_v37  ;;  %v15824_v37 = vld [vmem:[%s19257_s5] sm:$0x3f] }
  0xfd   :  { %2308 = vmatpush1.bf16.msra.mxu1 %v13216_v51  ;;  %v1288_v31 = vrot.slane %v15824_v37, %v15828_v38 }
  0xfe   :  { %2309 = vmatprep.subr.bf16.mxu1 %v13221_v52 }
  0xff   :  { %1109 = vmatpush1.bf16.msra.mxu0 %v13141_v40  ;;  %v13261_v40 = vld [vmem:[%s19258_s6 + $0xc8] ss:$48 sps:$4 sm:$0xff]  }
 0x100   :  { %4826 = vmatprep.subr.bf16.mxu0 %v13248_v32  ;;  %v1292_v32 = vrot.slane %v15824_v37, %v15831_v39 }
 0x101   :  { %2310 = vmatpush1.bf16.msra.mxu1 %v13219_v53  ;;  %v13281_v53 = vld [vmem:[%s19258_s6 + $0x1ec] ss:$48 sps:$4 sm:$0xff]  }
 0x102   :  { %1111 = vmatmul.mubr.bf16.vlgmr.msra.gmra.mrb[0].mxu0 %v10933_v47  ;;  %2332 = vmatprep.subr.bf16.mxu1 %v13224_v55 }
 0x103   :  { %1120 = vmatprep.mubr.bf16.mxu0 %v10942_v49  ;;  %4827 = vmatpush1.bf16.msra.mxu0 %v13246_v46  ;;  %v13275_v46 = vld [vmem:[%s19258_s6 + $0x18c] ss:$48 sps:$4 sm:$0xff]  }
 0x104   :  { %4828 = vmatprep.subr.bf16.mxu0 %v13254_v48  ;;  %2312 = vmatmul.mubr.bf16.vlgmr.msra.gmra.mrb[16].mxu1 %v14685_v0 }
 0x105   :  { %2333 = vmatpush1.bf16.msra.mxu1 %v13222_v50  ;;  %2321 = vmatprep.mubr.bf16.mxu1 %v14686_v54  ;;  %v13287_v50 = vld [vmem:[%s19258_s6 + $0x24c] ss:$48 sps:$4 sm:$0xff]   ;;  %v13285_v54 = vld [vmem:[%s19258_s6 + $0x248] ss:$48 sps:$4 sm:$0xff]  }
 0x106   :  { %2334 = vmatprep.subr.bf16.mxu1 %v13227_v60 }
 0x107   :  { %4829 = vmatpush1.bf16.msra.mxu0 %v13252_v42  ;;  %v13273_v42 = vld [vmem:[%s19258_s6 + $0x188] ss:$48 sps:$4 sm:$0xff]  }
 0x108   :  { %4830 = vmatprep.subr.bf16.mxu0 %v13260_v43 }
 0x109   :  { %2335 = vmatpush1.bf16.msra.mxu1 %v13225_v63 }
 0x10a   :  { %1121 = vmatmul.mubr.bf16.gmra.mrb[4].mxu0 %v10941_v58  ;;  %2336 = vmatprep.subr.bf16.mxu1 %v13230_v1 }
 0x10b   :  { %4831 = vmatpush1.bf16.msra.mxu0 %v13258_v57 }
 0x10c   :  { %4832 = vmatprep.subr.bf16.mxu0 %v13266_v59  ;;  %2322 = vmatmul.mubr.bf16.gmra.mrb[20].mxu1 %v14687_v11  ;;  %v13279_v59 = vld [vmem:[%s19258_s6 + $0x1e8] ss:$48 sps:$4 sm:$0xff]  }
 0x10d   :  { %2337 = vmatpush1.bf16.msra.mxu1 %v13228_v4  ;;  %2364 = vmatprep.mubr.bf16.mxu1 %v19266_v2  ;;  %v13297_v11 = vld [vmem:[%s19258_s6 + $0x308] ss:$48 sps:$4 sm:$0xff]  }
 0x10e   :  { %2338 = vmatprep.subr.bf16.mxu1 %v13233_v5 }
 0x10f   :  { %4833 = vmatpush1.bf16.msra.mxu0 %v13264_v61 }
 0x110   :  { %4834 = vmatprep.subr.bf16.mxu0 %v13272_v62 }
 0x111   :  { %2339 = vmatpush1.bf16.msra.mxu1 %v13231_v8  ;;  %v13299_v8 = vld [vmem:[%s19258_s6 + $0x30c] ss:$48 sps:$4 sm:$0xff]  }
 0x112   :  { %2340 = vmatprep.subr.bf16.mxu1 %v13236_v10 }
 0x113   :  { %4835 = vmatpush1.bf16.msra.mxu0 %v13270_v56 }
 0x114   :  { %4836 = vmatprep.subr.bf16.mxu0 %v13278_v3  ;;  %v13293_v3 = vld [vmem:[%s19258_s6 + $0x2ac] ss:$48 sps:$4 sm:$0xff]  }
 0x115   :  { %2341 = vmatpush1.bf16.msra.mxu1 %v13234_v15  ;;  %v13312_v15 = vld [vmem:[%s19258_s6 + $0x420] ss:$48 sps:$4 sm:$0xff]  }
 0x116   :  { %2342 = vmatprep.subr.bf16.mxu1 %v13239_v16  ;;  %v13303_v16 = vld [vmem:[%s19258_s6 + $0x368] ss:$48 sps:$4 sm:$0xff]  }
 0x117   :  { %4837 = vmatpush1.bf16.msra.mxu0 %v13276_v6 }
 0x118   :  { %4838 = vmatprep.subr.bf16.mxu0 %v13284_v7  ;;  %v13291_v7 = vld [vmem:[%s19258_s6 + $0x2a8] ss:$48 sps:$4 sm:$0xff]  }
 0x119   :  { %2343 = vmatpush1.bf16.msra.mxu1 %v13237_v19  ;;  %v13318_v19 = vld [vmem:[%s19258_s6 + $0x480] ss:$48 sps:$4 sm:$0xff]  }
 0x11a   :  { %2344 = vmatprep.subr.bf16.mxu1 %v13242_v9  ;;  %v13309_v9 = vld [vmem:[%s19258_s6 + $0x3c8] ss:$48 sps:$4 sm:$0xff]  }
 0x11b   :  { %4839 = vmatpush1.bf16.msra.mxu0 %v13282_v12  ;;  %v13314_v12 = vld [vmem:[%s19258_s6 + $0x424] ss:$48 sps:$4 sm:$0xff]  }
 0x11c   :  { %4840 = vmatprep.subr.bf16.mxu0 %v13290_v13  ;;  %v13305_v13 = vld [vmem:[%s19258_s6 + $0x36c] ss:$48 sps:$4 sm:$0xff]  }
 0x11d   :  { %2345 = vmatpush1.bf16.msra.mxu1 %v13240_v14  ;;  %v13324_v14 = vld [vmem:[%s19258_s6 + $0x4e0] ss:$48 sps:$4 sm:$0xff]  }
 0x11e   :  { %2346 = vmatprep.subr.bf16.mxu1 %v13245_v23  ;;  %v13315_v23 = vld [vmem:[%s19258_s6 + $0x428] ss:$48 sps:$4 sm:$0xff]  }
 0x11f   :  { %4841 = vmatpush1.bf16.msra.mxu0 %v13288_v17  ;;  %v13320_v17 = vld [vmem:[%s19258_s6 + $0x484] ss:$48 sps:$4 sm:$0xff]  }
 0x120   :  { %4842 = vmatprep.subr.bf16.mxu0 %v13296_v18  ;;  %v13311_v18 = vld [vmem:[%s19258_s6 + $0x3cc] ss:$48 sps:$4 sm:$0xff]  }
 0x121   :  { %2347 = vmatpush1.bf16.msra.mxu1 %v13243_v26  ;;  %v13330_v26 = vld [vmem:[%s19258_s6 + $0x540] ss:$48 sps:$4 sm:$0xff]  }
 0x122   :  { %4932 = vmatprep.subr.bf16.mxu1 %v13251_v27  ;;  %v13321_v27 = vld [vmem:[%s19258_s6 + $0x488] ss:$48 sps:$4 sm:$0xff]  }
 0x123   :  { %4843 = vmatpush1.bf16.msra.mxu0 %v13294_v20  ;;  %v13326_v20 = vld [vmem:[%s19258_s6 + $0x4e4] ss:$48 sps:$4 sm:$0xff]  }
 0x124   :  { %4844 = vmatprep.subr.bf16.mxu0 %v13302_v22  ;;  %2365 = vmatmul.mubr.bf16.vlgmr.msra.gmra.mrb[16].mxu1 %v14688_v35  ;;  %v13317_v22 = vld [vmem:[%s19258_s6 + $0x42c] ss:$48 sps:$4 sm:$0xff]   ;;  %v13344_v35 = vld [vmem:[%s19258_s6 + $0x604] ss:$48 sps:$4 sm:$0xff]  }
 0x125   :  { %2374 = vmatprep.mubr.bf16.mxu1 %v19266_v2  ;;  %4933 = vmatpush1.bf16.msra.mxu1 %v13249_v29  ;;  %v13329_v29 = vld [vmem:[%s19258_s6 + $0x4ec] ss:$48 sps:$4 sm:$0xff]  }
 0x126   :  { %4934 = vmatprep.subr.bf16.mxu1 %v13257_v30  ;;  %v13336_v30 = vld [vmem:[%s19258_s6 + $0x5a0] ss:$48 sps:$4 sm:$0xff]  }
 0x127   :  { %4845 = vmatpush1.bf16.msra.mxu0 %v13300_v24  ;;  %v13332_v24 = vld [vmem:[%s19258_s6 + $0x544] ss:$48 sps:$4 sm:$0xff]  }
 0x128   :  { %4846 = vmatprep.subr.bf16.mxu0 %v13308_v25  ;;  %v13323_v25 = vld [vmem:[%s19258_s6 + $0x48c] ss:$48 sps:$4 sm:$0xff]  }
 0x129   :  { %4935 = vmatpush1.bf16.msra.mxu1 %v13255_v34  ;;  %v13327_v34 = vld [vmem:[%s19258_s6 + $0x4e8] ss:$48 sps:$4 sm:$0xff]  }
 0x12a   :  { %4936 = vmatprep.subr.bf16.mxu1 %v13263_v36  ;;  %v13335_v36 = vld [vmem:[%s19258_s6 + $0x54c] ss:$48 sps:$4 sm:$0xff]  }
 0x12b   :  { %4847 = vmatpush1.bf16.msra.mxu0 %v13306_v21  ;;  %v13338_v21 = vld [vmem:[%s19258_s6 + $0x5a4] ss:$48 sps:$4 sm:$0xff]  }
 0x12c   :  { %2375 = vmatmul.mubr.bf16.gmra.mrb[20].mxu1 %v14689_v45  ;;  %4848 = vmatprep.subr.bf16.mxu0 %v13314_v12 }
 0x12d   :  { %4937 = vmatpush1.bf16.msra.mxu1 %v13261_v40  ;;  %v13333_v40 = vld [vmem:[%s19258_s6 + $0x548] ss:$48 sps:$4 sm:$0xff]  }
 0x12e   :  { %4938 = vmatprep.subr.bf16.mxu1 %v13269_v41  ;;  %v13341_v41 = vld [vmem:[%s19258_s6 + $0x5ac] ss:$48 sps:$4 sm:$0xff]  }
 0x12f   :  { %4849 = vmatpush1.bf16.msra.mxu0 %v13312_v15 }
 0x130   :  { %4850 = vmatprep.subr.bf16.mxu0 %v13320_v17 }
 0x131   :  { %4939 = vmatpush1.bf16.msra.mxu1 %v13267_v44 }
 0x132   :  { %4940 = vmatprep.subr.bf16.mxu1 %v13275_v46 }
 0x133   :  { %4851 = vmatpush1.bf16.msra.mxu0 %v13318_v19  ;;  %v13342_v19 = vld [vmem:[%s19258_s6 + $0x600] ss:$48 sps:$4 sm:$0xff]  }
 0x134   :  { %4852 = vmatprep.subr.bf16.mxu0 %v13326_v20 }
 0x135   :  { %4941 = vmatpush1.bf16.msra.mxu1 %v13273_v42 }
 0x136   :  { %v2154_v47 = vpop.f32.mrb[0].mxu1  ;;  %4942 = vmatprep.subr.bf16.mxu1 %v13281_v53 }
 0x137   :  { %v15852_v48 = vadd.f32 %v2154_v47, %v1288_v31  ;;  %v2156_v49 = vpop.f32.mrb[1].mxu1  ;;  %4853 = vmatpush1.bf16.msra.mxu0 %v13324_v14  ;;  %v13353_v14 = vld [vmem:[%s19258_s6 + $0x66c] ss:$48 sps:$4 sm:$0xff]  }
 0x138   :  { %v15854_v51 = vadd.f32 %v2156_v49, %v1292_v32  ;;  %v2158_v52 = vpop.f32.mrb[2].mxu1  ;;  %4854 = vmatprep.subr.bf16.mxu0 %v13332_v24  ;;  %v15990_v49 = vsub.s32 3, %v15810_v33 }
 0x139   :  { %v2160_v43 = vpop.f32.mrb[3].mxu1  ;;  %v15862_v55 = vadd.f32 %v2158_v52, %v1288_v31  ;;  %4943 = vmatpush1.bf16.msra.mxu1 %v13279_v59 }
 0x13a   :  { %v15864_v57 = vadd.f32 %v2160_v43, %v1292_v32  ;;  %v2385_v58 = vadd.f32 %v15854_v51, %v15852_v48  ;;  %4944 = vmatprep.subr.bf16.mxu1 %v13287_v50  ;;  %v15994_v52 = vrot.slane %v15824_v37, %v15990_v49 }
 0x13b   :  { %4855 = vmatpush1.bf16.msra.mxu0 %v13330_v26 }
 0x13c   :  { %2386 = vadd.xlane.f32.xlu0 %v2385_v58  ;;  %v2388_v61 = vadd.f32 %v15864_v57, %v15862_v55  ;;  %4856 = vmatprep.subr.bf16.mxu0 %v13338_v21 }
 0x13d   :  { %4945 = vmatpush1.bf16.msra.mxu1 %v13285_v54 }
 0x13e   :  { %v2164_v60 = vpop.f32.mrb[4].mxu1  ;;  %4946 = vmatprep.subr.bf16.mxu1 %v13293_v3 }
 0x13f   :  { %v15876_v62 = vadd.f32 %v2164_v60, %v1288_v31  ;;  %v2166_v63 = vpop.f32.mrb[5].mxu1  ;;  %4857 = vmatpush1.bf16.msra.mxu0 %v13336_v30  ;;  %v13348_v30 = vld [vmem:[%s19258_s6 + $0x660] ss:$48 sps:$4 sm:$0xff]  }
 0x140   :  { %v15878_v0 = vadd.f32 %v2166_v63, %v1292_v32  ;;  %v2168_v1 = vpop.f32.mrb[6].mxu1  ;;  %2389 = vadd.xlane.f32.xlu0 %v2388_v61  ;;  %4879 = vmatprep.subr.bf16.mxu0 %v13344_v35  ;;  %v187_v61 = vld [vmem:[%s19254_s2] sm:$0x3] }
 0x141   :  { %v2170_v56 = vpop.f32.mrb[7].mxu1  ;;  %v15886_v4 = vadd.f32 %v2168_v1, %v1288_v31  ;;  %4947 = vmatpush1.bf16.msra.mxu1 %v13291_v7  ;;  %v13339_v31 = vld [vmem:[%s19258_s6 + $0x5a8] ss:$48 sps:$4 sm:$0xff]   ;;  %v196_v37 = vrot.slane %v187_v61, %v15831_v39  ;;  %v192_v63 = vrot.slane %v187_v61, %v15828_v38 }
 0x142   :  { %v15888_v5 = vadd.f32 %v2170_v56, %v1292_v32  ;;  %v2391_v6 = vadd.f32 %v15878_v0, %v15876_v62  ;;  %4948 = vmatprep.subr.bf16.mxu1 %v13299_v8  ;;  %v13347_v32 = vld [vmem:[%s19258_s6 + $0x60c] ss:$48 sps:$4 sm:$0xff]  }
 0x144   :  { %2392 = vadd.xlane.f32.xlu1 %v2391_v6  ;;  %v2394_v10 = vadd.f32 %v15888_v5, %v15886_v4 }
 0x145   :  { %4949 = vmatpush1.bf16.msra.mxu1 %v13297_v11 }
 0x146   :  { %4950 = vmatprep.subr.bf16.mxu1 %v13305_v13 }
 0x148   :  { %2395 = vadd.xlane.f32.xlu1 %v2394_v10 }
 0x149   :  { %4951 = vmatpush1.bf16.msra.mxu1 %v13303_v16 }
 0x14a   :  { %4952 = vmatprep.subr.bf16.mxu1 %v13311_v18 }
 0x14d   :  { %4953 = vmatpush1.bf16.msra.mxu1 %v13309_v9  ;;  %v13345_v9 = vld [vmem:[%s19258_s6 + $0x608] ss:$48 sps:$4 sm:$0xff]  }
 0x14e   :  { %4954 = vmatprep.subr.bf16.mxu1 %v13317_v22  ;;  %v13350_v22 = vld [vmem:[%s19258_s6 + $0x664] ss:$48 sps:$4 sm:$0xff]  }
 0x151   :  { %4955 = vmatpush1.bf16.msra.mxu1 %v13315_v23 }
 0x152   :  { %4956 = vmatprep.subr.bf16.mxu1 %v13323_v25 }
 0x155   :  { %4957 = vmatpush1.bf16.msra.mxu1 %v13321_v27 }
 0x156   :  { %4958 = vmatprep.subr.bf16.mxu1 %v13329_v29 }
 0x159   :  { %4959 = vmatpush1.bf16.msra.mxu1 %v13327_v34  ;;  %v13351_v34 = vld [vmem:[%s19258_s6 + $0x668] ss:$48 sps:$4 sm:$0xff]  }
 0x15a   :  { %4960 = vmatprep.subr.bf16.mxu1 %v13335_v36 }
 0x15d   :  { %4961 = vmatpush1.bf16.msra.mxu1 %v13333_v40 }
 0x15e   :  { %4962 = vmatprep.subr.bf16.mxu1 %v13341_v41 }
 0x161   :  { %4963 = vmatpush1.bf16.msra.mxu1 %v13339_v31  ;;  %v13356_v31 = vld [vmem:[%s19258_s6 + $0x6c4] ss:$48 sps:$4 sm:$0xff]  }
 0x162   :  { %4985 = vmatprep.subr.bf16.mxu1 %v13347_v32  ;;  %v13359_v32 = vld [vmem:[%s19258_s6 + $0x6cc] ss:$48 sps:$4 sm:$0xff]  }
 0x197   :  { %v15981_v44 = vpop.f32.mrb[8].mxu1 }
 0x198   :  { %v15983_v45 = vpop.f32.mrb[9].mxu1 }
 0x199   :  { %v15985_v46 = vpop.f32.mrb[10].mxu1 }
 0x19a   :  { %v15987_v47 = vpop.f32.mrb[11].mxu1 }
 0x19f   :  { %v15996_v42 = vpop.f32.mrb[12].mxu1 }
 0x1a0   :  { %v2272_v43 = vpop.f32.mrb[13].mxu1 }
 0x1a1   :  { %v15999_v53 = vadd.f32 %v2272_v43, %v15994_v52  ;;  %v16001_v58 = vpop.f32.mrb[14].mxu1 }
 0x1a2   :  { %v2276_v59 = vpop.f32.mrb[15].mxu1 }
 0x1a3   :  { %v16004_v50 = vadd.f32 %v2276_v59, %v15994_v52 }
 0x1c9   :  { %v2387_v60 = vpop.xlane.xlu0 %2386 }
 0x1ca   :  { %v16013_v13 = vmul.f32 0.00390625, %v2387_v60 }
 0x1cd   :  { %v2390_v1 = vpop.xlane.xlu0 %2389 }
 0x1ce   :  { %v16011_v8 = vmul.f32 0.00390625, %v2390_v1 }
 0x1d0   :  { %v16078_v1 = vadd.f32 %v15864_v57, %v16011_v8  ;;  %v13362_v57 = vld [vmem:[%s19258_s6 + $0x724] ss:$48 sps:$4 sm:$0xff]  }
 0x1d1   :  { %v2393_v3 = vpop.xlane.xlu1 %2392 }
 0x1d2   :  { %v16065_v43 = vmul.f32 0.00390625, %v2393_v3  ;;  %19297 = vst [vmem:[#allocation14_spill] sm:$0xff] %v16078_v1 }
 0x1d5   :  { %v1112_v54 = vpop.f32.mrb[0].mxu0  ;;  %v2396_v23 = vpop.xlane.xlu1 %2395 }
 0x1d6   :  { %v1114_v56 = vpop.f32.mrb[1].mxu0  ;;  %v12523_v10 = vadd.f32 %v1112_v54, %v192_v63  ;;  %v16055_v35 = vmul.f32 0.00390625, %v2396_v23  ;;  %v13377_v23 = vld [vmem:[%s19258_s6 + $0x7ec] ss:$48 sps:$4 sm:$0xff]  }
 0x1d7   :  { %v12524_v6 = vadd.f32 %v1114_v56, %v196_v37  ;;  %v1116_v7 = vpop.f32.mrb[2].mxu0  ;;  %v13357_v56 = vld [vmem:[%s19258_s6 + $0x6c8] ss:$48 sps:$4 sm:$0xff]  }
 0x1d8   :  { %v12525_v11 = vadd.f32 %v1116_v7, %v192_v63  ;;  %v1118_v12 = vpop.f32.mrb[3].mxu0  ;;  %v16031_v20 = vadd.f32 %v12523_v10, %v16013_v13  ;;  %v16101_v7 = vadd.f32 %v15854_v51, %v16013_v13  ;;  %v13360_v51 = vld [vmem:[%s19258_s6 + $0x720] ss:$48 sps:$4 sm:$0xff]  }
 0x1d9   :  { %v12526_v15 = vadd.f32 %v1118_v12, %v196_v37  ;;  %v16019_v17 = vadd.f32 %v12524_v6, %v16013_v13  ;;  %v13365_v6 = vld [vmem:[%s19258_s6 + $0x72c] ss:$48 sps:$4 sm:$0xff]   ;;  %v13363_v12 = vld [vmem:[%s19258_s6 + $0x728] ss:$48 sps:$4 sm:$0xff]  }
 0x1da   :  { %v16016_v16 = vadd.f32 %v12525_v11, %v16011_v8  ;;  %19293 = vst [vmem:[#allocation10_spill] sm:$0xff] %v16031_v20  ;;  %19299 = vst [vmem:[#allocation16_spill] sm:$0xff] %v16101_v7  ;;  %v16111_v11 = vpack.c.bf16 %v16078_v1, %v16101_v7 }
 0x1db   :  { %19291 = vst [vmem:[#allocation8_spill] sm:$0xff] %v16019_v17  ;;  %v16022_v18 = vadd.f32 %v12526_v15, %v16011_v8  ;;  %v13368_v15 = vld [vmem:[%s19258_s6 + $0x784] ss:$48 sps:$4 sm:$0xff]  }
 0x1dc   :  { %19290 = vst [vmem:[#allocation7_spill] sm:$0xff] %v16016_v16  ;;  %v16045_v26 = vpack.c.bf16 %v16016_v16, %v16031_v20 }
 0x1dd   :  { %19292 = vst [vmem:[#allocation9_spill] sm:$0xff] %v16022_v18  ;;  %v16041_v24 = vpack.c.bf16 %v16022_v18, %v16019_v17  ;;  %v1122_v25 = vpop.f32.mrb[4].mxu0 }
 0x1de   :  { %v1124_v27 = vpop.f32.mrb[5].mxu0  ;;  %v12527_v36 = vadd.f32 %v1122_v25, %v192_v63  ;;  %v13372_v25 = vld [vmem:[%s19258_s6 + $0x7e0] ss:$48 sps:$4 sm:$0xff]  }
 0x1df   :  { %v12528_v21 = vadd.f32 %v1124_v27, %v196_v37  ;;  %v1126_v29 = vpop.f32.mrb[6].mxu0  ;;  %4858 = vmatprep.mubr.bf16.mxu0 %v16041_v24  ;;  %4964 = vmatprep.mubr.bf16.mxu1 %v16041_v24  ;;  %v13375_v27 = vld [vmem:[%s19258_s6 + $0x7e8] ss:$48 sps:$4 sm:$0xff]  }
 0x1e0   :  { %v12529_v40 = vadd.f32 %v1126_v29, %v192_v63  ;;  %v1128_v41 = vpop.f32.mrb[7].mxu0  ;;  %4859 = vmatmul.mubr.bf16.vlgmr.msra.gmra.mrb[8].mxu0 %v16045_v26  ;;  %4965 = vmatmul.mubr.bf16.vlgmr.msra.gmra.mrb[24].mxu1 %v16045_v26  ;;  %v16081_v54 = vadd.f32 %v12527_v36, %v16065_v43  ;;  %v13383_v29 = vld [vmem:[%s19258_s6 + $0x84c] ss:$48 sps:$4 sm:$0xff]   ;;  %v13386_v36 = vld [vmem:[%s19258_s6 + $0x8a4] ss:$48 sps:$4 sm:$0xff]  }
 0x1e1   :  { %v12530_v59 = vadd.f32 %v1128_v41, %v196_v37  ;;  %4880 = vmatpush1.bf16.msra.mxu0 %v13342_v19  ;;  %4986 = vmatpush1.bf16.msra.mxu1 %v13345_v9  ;;  %v16071_v61 = vadd.f32 %v12528_v21, %v16065_v43  ;;  %v13354_v37 = vld [vmem:[%s19258_s6 + $0x6c0] ss:$48 sps:$4 sm:$0xff]   ;;  %v13371_v19 = vld [vmem:[%s19258_s6 + $0x78c] ss:$48 sps:$4 sm:$0xff]   ;;  %v13380_v21 = vld [vmem:[%s19258_s6 + $0x844] ss:$48 sps:$4 sm:$0xff]  }
 0x1e2   :  { %v16068_v60 = vadd.f32 %v12529_v40, %v16055_v35  ;;  %4881 = vmatprep.subr.bf16.mxu0 %v13350_v22  ;;  %4987 = vmatprep.subr.bf16.mxu1 %v13353_v14  ;;  %19298 = vst [vmem:[#allocation15_spill] sm:$0xff] %v16081_v54  ;;  %v13366_v9 = vld [vmem:[%s19258_s6 + $0x780] ss:$48 sps:$4 sm:$0xff]   ;;  %v13369_v22 = vld [vmem:[%s19258_s6 + $0x788] ss:$48 sps:$4 sm:$0xff]  }
 0x1e3   :  { %19295 = vst [vmem:[#allocation12_spill] sm:$0xff] %v16071_v61  ;;  %v16074_v63 = vadd.f32 %v12530_v59, %v16055_v35  ;;  %v13374_v14 = vld [vmem:[%s19258_s6 + $0x7e4] ss:$48 sps:$4 sm:$0xff]   ;;  %v13389_v40 = vld [vmem:[%s19258_s6 + $0x8ac] ss:$48 sps:$4 sm:$0xff]  }
 0x1e4   :  { %19294 = vst [vmem:[#allocation11_spill] sm:$0xff] %v16068_v60  ;;  %v16105_v10 = vpack.c.bf16 %v16068_v60, %v16081_v54  ;;  %v13384_v41 = vld [vmem:[%s19258_s6 + $0x8a0] ss:$48 sps:$4 sm:$0xff]   ;;  %v13395_v59 = vld [vmem:[%s19258_s6 + $0x90c] ss:$48 sps:$4 sm:$0xff]  }
 0x1e5   :  { %19296 = vst [vmem:[#allocation13_spill] sm:$0xff] %v16074_v63  ;;  %v16091_v3 = vpack.c.bf16 %v16074_v63, %v16071_v61  ;;  %4882 = vmatpush1.bf16.msra.mxu0 %v13348_v30  ;;  %4988 = vmatpush1.bf16.msra.mxu1 %v13351_v34  ;;  %v13378_v30 = vld [vmem:[%s19258_s6 + $0x840] ss:$48 sps:$4 sm:$0xff]   ;;  %v13381_v34 = vld [vmem:[%s19258_s6 + $0x848] ss:$48 sps:$4 sm:$0xff]  }
 0x1e6   :  { %4883 = vmatprep.subr.bf16.mxu0 %v13356_v31  ;;  %4989 = vmatprep.subr.bf16.mxu1 %v13359_v32  ;;  %v13387_v31 = vld [vmem:[%s19258_s6 + $0x8a8] ss:$48 sps:$4 sm:$0xff]   ;;  %v13392_v32 = vld [vmem:[%s19258_s6 + $0x904] ss:$48 sps:$4 sm:$0xff]  }
 0x1e7   :  { %4868 = vmatprep.mubr.bf16.mxu0 %v16091_v3  ;;  %4974 = vmatprep.mubr.bf16.mxu1 %v16091_v3 }
 0x1e8   :  { %4869 = vmatmul.mubr.bf16.gmra.mrb[12].mxu0 %v16105_v10  ;;  %4975 = vmatmul.mubr.bf16.gmra.mrb[28].mxu1 %v16105_v10 }
 0x1e9   :  { %4884 = vmatpush1.bf16.msra.mxu0 %v13354_v37  ;;  %4990 = vmatpush1.bf16.msra.mxu1 %v13357_v56  ;;  %v13390_v37 = vld [vmem:[%s19258_s6 + $0x900] ss:$48 sps:$4 sm:$0xff]   ;;  %v13393_v56 = vld [vmem:[%s19258_s6 + $0x908] ss:$48 sps:$4 sm:$0xff]  }
 0x1ea   :  { %4911 = vmatprep.mubr.bf16.mxu0 %v16111_v11  ;;  %5017 = vmatprep.mubr.bf16.mxu1 %v16111_v11 }
 0x1eb   :  { %4885 = vmatprep.subr.bf16.mxu0 %v13362_v57  ;;  %4991 = vmatprep.subr.bf16.mxu1 %v13365_v6  ;;  %v13398_v57 = vld [vmem:[%s19258_s6 + $0x964] ss:$48 sps:$4 sm:$0xff]   ;;  %v13401_v6 = vld [vmem:[%s19258_s6 + $0x96c] ss:$48 sps:$4 sm:$0xff]  }
 0x1ed   :  { %4886 = vmatpush1.bf16.msra.mxu0 %v13360_v51  ;;  %4992 = vmatpush1.bf16.msra.mxu1 %v13363_v12  ;;  %v13396_v51 = vld [vmem:[%s19258_s6 + $0x960] ss:$48 sps:$4 sm:$0xff]   ;;  %v13399_v12 = vld [vmem:[%s19258_s6 + $0x968] ss:$48 sps:$4 sm:$0xff]  }
 0x1ee   :  { %4887 = vmatprep.subr.bf16.mxu0 %v13368_v15  ;;  %4993 = vmatprep.subr.bf16.mxu1 %v13371_v19  ;;  %v13404_v19 = vld [vmem:[%s19258_s6 + $0x9c4] ss:$48 sps:$4 sm:$0xff]  }
 0x1f1   :  { %4888 = vmatpush1.bf16.msra.mxu0 %v13366_v9  ;;  %4994 = vmatpush1.bf16.msra.mxu1 %v13369_v22  ;;  %v13407_v9 = vld [vmem:[%s19258_s6 + $0x9cc] ss:$48 sps:$4 sm:$0xff]  }
 0x1f2   :  { %4889 = vmatprep.subr.bf16.mxu0 %v13374_v14  ;;  %4995 = vmatprep.subr.bf16.mxu1 %v13377_v23 }
 0x1f5   :  { %4890 = vmatpush1.bf16.msra.mxu0 %v13372_v25  ;;  %4996 = vmatpush1.bf16.msra.mxu1 %v13375_v27  ;;  %v13402_v25 = vld [vmem:[%s19258_s6 + $0x9c0] ss:$48 sps:$4 sm:$0xff]   ;;  %v13405_v27 = vld [vmem:[%s19258_s6 + $0x9c8] ss:$48 sps:$4 sm:$0xff]  }
 0x1f6   :  { %4891 = vmatprep.subr.bf16.mxu0 %v13380_v21  ;;  %4997 = vmatprep.subr.bf16.mxu1 %v13383_v29  ;;  %v13410_v21 = vld [vmem:[%s19258_s6 + $0xa24] ss:$48 sps:$4 sm:$0xff]   ;;  %v13413_v29 = vld [vmem:[%s19258_s6 + $0xa2c] ss:$48 sps:$4 sm:$0xff]  }
 0x1f7   :  { %v16195_v15 = vpop.f32.mrb[16].mxu1 }
 0x1f8   :  { %v16203_v22 = vpop.f32.mrb[17].mxu1 }
 0x1f9   :  { %4892 = vmatpush1.bf16.msra.mxu0 %v13378_v30  ;;  %4998 = vmatpush1.bf16.msra.mxu1 %v13381_v34  ;;  %v16205_v14 = vpop.f32.mrb[18].mxu1  ;;  %v13408_v30 = vld [vmem:[%s19258_s6 + $0xa20] ss:$48 sps:$4 sm:$0xff]   ;;  %v13411_v34 = vld [vmem:[%s19258_s6 + $0xa28] ss:$48 sps:$4 sm:$0xff]  }
 0x1fa   :  { %4893 = vmatprep.subr.bf16.mxu0 %v13386_v36  ;;  %4999 = vmatprep.subr.bf16.mxu1 %v13389_v40  ;;  %v16207_v23 = vpop.f32.mrb[19].mxu1  ;;  %v13416_v40 = vld [vmem:[%s19258_s6 + $0xa84] ss:$48 sps:$4 sm:$0xff]  }
 0x1fd   :  { %4894 = vmatpush1.bf16.msra.mxu0 %v13384_v41  ;;  %5000 = vmatpush1.bf16.msra.mxu1 %v13387_v31  ;;  %v13419_v41 = vld [vmem:[%s19258_s6 + $0xa8c] ss:$48 sps:$4 sm:$0xff]  }
 0x1fe   :  { %4895 = vmatprep.subr.bf16.mxu0 %v13392_v32  ;;  %5001 = vmatprep.subr.bf16.mxu1 %v13395_v59 }
 0x1ff   :  { %v16227_v36 = vpop.f32.mrb[20].mxu1 }
 0x200   :  { %19300 = vst [vmem:[#allocation17_spill] sm:$0xff] %v16227_v36  ;;  %v16235_v31 = vpop.f32.mrb[21].mxu1 }
 0x201   :  { %4896 = vmatpush1.bf16.msra.mxu0 %v13390_v37  ;;  %5002 = vmatpush1.bf16.msra.mxu1 %v13393_v56  ;;  %v16237_v32 = vpop.f32.mrb[22].mxu1  ;;  %v13414_v37 = vld [vmem:[%s19258_s6 + $0xa80] ss:$48 sps:$4 sm:$0xff]   ;;  %v13417_v56 = vld [vmem:[%s19258_s6 + $0xa88] ss:$48 sps:$4 sm:$0xff]  }
 0x202   :  { %4897 = vmatprep.subr.bf16.mxu0 %v13398_v57  ;;  %5003 = vmatprep.subr.bf16.mxu1 %v13401_v6  ;;  %19301 = vst [vmem:[#allocation18_spill] sm:$0xff] %v16237_v32  ;;  %v16239_v59 = vpop.f32.mrb[23].mxu1  ;;  %v13422_v57 = vld [vmem:[%s19258_s6 + $0xae4] ss:$48 sps:$4 sm:$0xff]   ;;  %v13425_v6 = vld [vmem:[%s19258_s6 + $0xaec] ss:$48 sps:$4 sm:$0xff]  }
 0x203   :  { %19302 = vst [vmem:[#allocation19_spill] sm:$0xff] %v16239_v59 }
 0x205   :  { %4898 = vmatpush1.bf16.msra.mxu0 %v13396_v51  ;;  %5004 = vmatpush1.bf16.msra.mxu1 %v13399_v12  ;;  %v13420_v51 = vld [vmem:[%s19258_s6 + $0xae0] ss:$48 sps:$4 sm:$0xff]   ;;  %v13423_v12 = vld [vmem:[%s19258_s6 + $0xae8] ss:$48 sps:$4 sm:$0xff]  }
 0x206   :  { %4899 = vmatprep.subr.bf16.mxu0 %v13404_v19  ;;  %5005 = vmatprep.subr.bf16.mxu1 %v13407_v9  ;;  %v13428_v19 = vld [vmem:[%s19258_s6 + $0xb44] ss:$48 sps:$4 sm:$0xff]   ;;  %v13431_v9 = vld [vmem:[%s19258_s6 + $0xb4c] ss:$48 sps:$4 sm:$0xff]  }
 0x209   :  { %4900 = vmatpush1.bf16.msra.mxu0 %v13402_v25  ;;  %5006 = vmatpush1.bf16.msra.mxu1 %v13405_v27  ;;  %v13426_v25 = vld [vmem:[%s19258_s6 + $0xb40] ss:$48 sps:$4 sm:$0xff]   ;;  %v13429_v27 = vld [vmem:[%s19258_s6 + $0xb48] ss:$48 sps:$4 sm:$0xff]  }
 0x20a   :  { %4901 = vmatprep.subr.bf16.mxu0 %v13410_v21  ;;  %5007 = vmatprep.subr.bf16.mxu1 %v13413_v29  ;;  %v13434_v21 = vld [vmem:[%s19258_s6 + $0xba4] ss:$48 sps:$4 sm:$0xff]   ;;  %v13437_v29 = vld [vmem:[%s19258_s6 + $0xbac] ss:$48 sps:$4 sm:$0xff]  }
 0x20d   :  { %4902 = vmatpush1.bf16.msra.mxu0 %v13408_v30  ;;  %5008 = vmatpush1.bf16.msra.mxu1 %v13411_v34  ;;  %v13432_v30 = vld [vmem:[%s19258_s6 + $0xba0] ss:$48 sps:$4 sm:$0xff]   ;;  %v13435_v34 = vld [vmem:[%s19258_s6 + $0xba8] ss:$48 sps:$4 sm:$0xff]  }
 0x20e   :  { %4903 = vmatprep.subr.bf16.mxu0 %v13416_v40  ;;  %5009 = vmatprep.subr.bf16.mxu1 %v13419_v41  ;;  %v13440_v40 = vld [vmem:[%s19258_s6 + $0x14] ss:$48 sps:$4 sm:$0xff]   ;;  %v13443_v41 = vld [vmem:[%s19258_s6 + $0x1c] ss:$48 sps:$4 sm:$0xff]  }
 0x211   :  { %4904 = vmatpush1.bf16.msra.mxu0 %v13414_v37  ;;  %5010 = vmatpush1.bf16.msra.mxu1 %v13417_v56  ;;  %v16291_v37 = vadd.f32 %v15862_v55, %v16011_v8  ;;  %v16295_v56 = vadd.f32 %v15888_v5, %v16055_v35  ;;  %v16309_v55 = vadd.f32 %v15878_v0, %v16065_v43  ;;  %v13446_v5 = vld [vmem:[%s19258_s6 + $0x74] ss:$48 sps:$4 sm:$0xff]  }
 0x212   :  { %4905 = vmatprep.subr.bf16.mxu0 %v13422_v57  ;;  %5011 = vmatprep.subr.bf16.mxu1 %v13425_v6  ;;  %v16299_v57 = vadd.f32 %v15852_v48, %v16013_v13  ;;  %v13438_v6 = vld [vmem:[%s19258_s6 + $0x10] ss:$48 sps:$4 sm:$0xff]   ;;  %v13449_v48 = vld [vmem:[%s19258_s6 + $0x7c] ss:$48 sps:$4 sm:$0xff]  }
 0x213   :  { %19303 = vst [vmem:[#allocation20_spill] sm:$0xff] %v16291_v37  ;;  %19304 = vst [vmem:[#allocation21_spill] sm:$0xff] %v16295_v56  ;;  %v16323_v0 = vpack.c.bf16 %v16295_v56, %v16309_v55  ;;  %v13444_v13 = vld [vmem:[%s19258_s6 + $0x70] ss:$48 sps:$4 sm:$0xff]  }
 0x214   :  { %19305 = vst [vmem:[#allocation22_spill] sm:$0xff] %v16299_v57  ;;  %19306 = vst [vmem:[#allocation23_spill] sm:$0xff] %v16309_v55  ;;  %v16319_v8 = vpack.c.bf16 %v16291_v37, %v16299_v57 }
 0x215   :  { %4906 = vmatpush1.bf16.msra.mxu0 %v13420_v51  ;;  %5012 = vmatpush1.bf16.msra.mxu1 %v13423_v12  ;;  %v13441_v51 = vld [vmem:[%s19258_s6 + $0x18] ss:$48 sps:$4 sm:$0xff]  }
 0x216   :  { %4907 = vmatprep.subr.bf16.mxu0 %v13428_v19  ;;  %5013 = vmatprep.subr.bf16.mxu1 %v13431_v9  ;;  %v13447_v12 = vld [vmem:[%s19258_s6 + $0x78] ss:$48 sps:$4 sm:$0xff]   ;;  %v13452_v19 = vld [vmem:[%s19258_s6 + $0xd4] ss:$48 sps:$4 sm:$0xff]   ;;  %v13455_v9 = vld [vmem:[%s19258_s6 + $0xdc] ss:$48 sps:$4 sm:$0xff]  }
 0x219   :  { %4908 = vmatpush1.bf16.msra.mxu0 %v13426_v25  ;;  %5014 = vmatpush1.bf16.msra.mxu1 %v13429_v27  ;;  %v16343_v25 = vadd.f32 %v15886_v4, %v16055_v35  ;;  %v16347_v27 = vadd.f32 %v15876_v62, %v16065_v43  ;;  %v13458_v4 = vld [vmem:[%s19258_s6 + $0x134] ss:$48 sps:$4 sm:$0xff]   ;;  %v13461_v35 = vld [vmem:[%s19258_s6 + $0x13c] ss:$48 sps:$4 sm:$0xff]   ;;  %v13456_v43 = vld [vmem:[%s19258_s6 + $0x130] ss:$48 sps:$4 sm:$0xff]  }
 0x21a   :  { %4909 = vmatprep.subr.bf16.mxu0 %v13434_v21  ;;  %5015 = vmatprep.subr.bf16.mxu1 %v13437_v29  ;;  %v13450_v21 = vld [vmem:[%s19258_s6 + $0xd0] ss:$48 sps:$4 sm:$0xff]   ;;  %v13453_v29 = vld [vmem:[%s19258_s6 + $0xd8] ss:$48 sps:$4 sm:$0xff]  }
 0x21b   :  { %19307 = vst [vmem:[#allocation24_spill] sm:$0xff] %v16343_v25  ;;  %19308 = vst [vmem:[#allocation25_spill] sm:$0xff] %v16347_v27  ;;  %v16363_v62 = vpack.c.bf16 %v16343_v25, %v16347_v27 }
 0x21d   :  { %4910 = vmatpush1.bf16.msra.mxu0 %v13432_v30  ;;  %5016 = vmatpush1.bf16.msra.mxu1 %v13435_v34  ;;  %v13459_v30 = vld [vmem:[%s19258_s6 + $0x138] ss:$48 sps:$4 sm:$0xff]   ;;  %v13464_v34 = vld [vmem:[%s19258_s6 + $0x194] ss:$48 sps:$4 sm:$0xff]  }
 0x21e   :  { %5038 = vmatprep.subr.bf16.mxu0 %v13440_v40  ;;  %5144 = vmatprep.subr.bf16.mxu1 %v13443_v41  ;;  %v13467_v40 = vld [vmem:[%s19258_s6 + $0x19c] ss:$48 sps:$4 sm:$0xff]   ;;  %v13462_v41 = vld [vmem:[%s19258_s6 + $0x190] ss:$48 sps:$4 sm:$0xff]  }
 0x220   :  { %4912 = vmatmul.mubr.bf16.vlgmr.msra.gmra.mrb[8].mxu0 %v16319_v8  ;;  %5018 = vmatmul.mubr.bf16.vlgmr.msra.gmra.mrb[24].mxu1 %v16319_v8 }
 0x221   :  { %4921 = vmatprep.mubr.bf16.mxu0 %v16323_v0  ;;  %5027 = vmatprep.mubr.bf16.mxu1 %v16323_v0 }
 0x222   :  { %5039 = vmatpush1.bf16.msra.mxu0 %v13438_v6  ;;  %5145 = vmatpush1.bf16.msra.mxu1 %v13441_v51  ;;  %v13465_v6 = vld [vmem:[%s19258_s6 + $0x198] ss:$48 sps:$4 sm:$0xff]   ;;  %v13470_v51 = vld [vmem:[%s19258_s6 + $0x1f4] ss:$48 sps:$4 sm:$0xff]  }
 0x223   :  { %5040 = vmatprep.subr.bf16.mxu0 %v13446_v5  ;;  %5146 = vmatprep.subr.bf16.mxu1 %v13449_v48  ;;  %v13473_v5 = vld [vmem:[%s19258_s6 + $0x1fc] ss:$48 sps:$4 sm:$0xff]   ;;  %v13468_v48 = vld [vmem:[%s19258_s6 + $0x1f0] ss:$48 sps:$4 sm:$0xff]  }
 0x226   :  { %5041 = vmatpush1.bf16.msra.mxu0 %v13444_v13  ;;  %5147 = vmatpush1.bf16.msra.mxu1 %v13447_v12  ;;  %v13471_v13 = vld [vmem:[%s19258_s6 + $0x1f8] ss:$48 sps:$4 sm:$0xff]   ;;  %v13476_v12 = vld [vmem:[%s19258_s6 + $0x254] ss:$48 sps:$4 sm:$0xff]  }
 0x227   :  { %5042 = vmatprep.subr.bf16.mxu0 %v13452_v19  ;;  %5148 = vmatprep.subr.bf16.mxu1 %v13455_v9  ;;  %v13479_v19 = vld [vmem:[%s19258_s6 + $0x25c] ss:$48 sps:$4 sm:$0xff]   ;;  %v13474_v9 = vld [vmem:[%s19258_s6 + $0x250] ss:$48 sps:$4 sm:$0xff]  }
 0x228   :  { %4922 = vmatmul.mubr.bf16.gmra.mrb[12].mxu0 %v16363_v62  ;;  %5028 = vmatmul.mubr.bf16.gmra.mrb[28].mxu1 %v16363_v62 }
 0x229   :  { %5070 = vmatprep.mubr.bf16.mxu0 %v16041_v24  ;;  %5176 = vmatprep.mubr.bf16.mxu1 %v16041_v24 }
 0x22a   :  { %5043 = vmatpush1.bf16.msra.mxu0 %v13450_v21  ;;  %5149 = vmatpush1.bf16.msra.mxu1 %v13453_v29  ;;  %v13477_v21 = vld [vmem:[%s19258_s6 + $0x258] ss:$48 sps:$4 sm:$0xff]   ;;  %v13482_v29 = vld [vmem:[%s19258_s6 + $0x2b4] ss:$48 sps:$4 sm:$0xff]  }
 0x22b   :  { %5044 = vmatprep.subr.bf16.mxu0 %v13458_v4  ;;  %5150 = vmatprep.subr.bf16.mxu1 %v13461_v35  ;;  %v13485_v4 = vld [vmem:[%s19258_s6 + $0x2bc] ss:$48 sps:$4 sm:$0xff]   ;;  %v13480_v35 = vld [vmem:[%s19258_s6 + $0x2b0] ss:$48 sps:$4 sm:$0xff]  }
 0x22e   :  { %5045 = vmatpush1.bf16.msra.mxu0 %v13456_v43  ;;  %5151 = vmatpush1.bf16.msra.mxu1 %v13459_v30  ;;  %v13483_v43 = vld [vmem:[%s19258_s6 + $0x2b8] ss:$48 sps:$4 sm:$0xff]   ;;  %v13488_v30 = vld [vmem:[%s19258_s6 + $0x314] ss:$48 sps:$4 sm:$0xff]  }
 0x22f   :  { %5046 = vmatprep.subr.bf16.mxu0 %v13464_v34  ;;  %5152 = vmatprep.subr.bf16.mxu1 %v13467_v40  ;;  %v13491_v34 = vld [vmem:[%s19258_s6 + $0x31c] ss:$48 sps:$4 sm:$0xff]   ;;  %v13486_v40 = vld [vmem:[%s19258_s6 + $0x310] ss:$48 sps:$4 sm:$0xff]  }
 0x232   :  { %5047 = vmatpush1.bf16.msra.mxu0 %v13462_v41  ;;  %5153 = vmatpush1.bf16.msra.mxu1 %v13465_v6  ;;  %v13489_v41 = vld [vmem:[%s19258_s6 + $0x318] ss:$48 sps:$4 sm:$0xff]   ;;  %v13494_v6 = vld [vmem:[%s19258_s6 + $0x374] ss:$48 sps:$4 sm:$0xff]  }
 0x233   :  { %5048 = vmatprep.subr.bf16.mxu0 %v13470_v51  ;;  %5154 = vmatprep.subr.bf16.mxu1 %v13473_v5  ;;  %v13497_v51 = vld [vmem:[%s19258_s6 + $0x37c] ss:$48 sps:$4 sm:$0xff]   ;;  %v13492_v5 = vld [vmem:[%s19258_s6 + $0x370] ss:$48 sps:$4 sm:$0xff]  }
 0x236   :  { %5049 = vmatpush1.bf16.msra.mxu0 %v13468_v48  ;;  %5155 = vmatpush1.bf16.msra.mxu1 %v13471_v13  ;;  %v13495_v48 = vld [vmem:[%s19258_s6 + $0x378] ss:$48 sps:$4 sm:$0xff]   ;;  %v13500_v13 = vld [vmem:[%s19258_s6 + $0x3d4] ss:$48 sps:$4 sm:$0xff]  }
 0x237   :  { %5050 = vmatprep.subr.bf16.mxu0 %v13476_v12  ;;  %5156 = vmatprep.subr.bf16.mxu1 %v13479_v19  ;;  %v13503_v12 = vld [vmem:[%s19258_s6 + $0x3dc] ss:$48 sps:$4 sm:$0xff]   ;;  %v13498_v19 = vld [vmem:[%s19258_s6 + $0x3d0] ss:$48 sps:$4 sm:$0xff]  }
 0x23a   :  { %5051 = vmatpush1.bf16.msra.mxu0 %v13474_v9  ;;  %5157 = vmatpush1.bf16.msra.mxu1 %v13477_v21  ;;  %v13501_v9 = vld [vmem:[%s19258_s6 + $0x3d8] ss:$48 sps:$4 sm:$0xff]   ;;  %v13506_v21 = vld [vmem:[%s19258_s6 + $0x434] ss:$48 sps:$4 sm:$0xff]  }
 0x23b   :  { %5052 = vmatprep.subr.bf16.mxu0 %v13482_v29  ;;  %5158 = vmatprep.subr.bf16.mxu1 %v13485_v4  ;;  %v13509_v29 = vld [vmem:[%s19258_s6 + $0x43c] ss:$48 sps:$4 sm:$0xff]   ;;  %v13504_v4 = vld [vmem:[%s19258_s6 + $0x430] ss:$48 sps:$4 sm:$0xff]  }
 0x23e   :  { %5053 = vmatpush1.bf16.msra.mxu0 %v13480_v35  ;;  %5159 = vmatpush1.bf16.msra.mxu1 %v13483_v43  ;;  %v13507_v35 = vld [vmem:[%s19258_s6 + $0x438] ss:$48 sps:$4 sm:$0xff]   ;;  %v13512_v43 = vld [vmem:[%s19258_s6 + $0x494] ss:$48 sps:$4 sm:$0xff]  }
 0x23f   :  { %5054 = vmatprep.subr.bf16.mxu0 %v13488_v30  ;;  %5160 = vmatprep.subr.bf16.mxu1 %v13491_v34  ;;  %v13515_v30 = vld [vmem:[%s19258_s6 + $0x49c] ss:$48 sps:$4 sm:$0xff]   ;;  %v13510_v34 = vld [vmem:[%s19258_s6 + $0x490] ss:$48 sps:$4 sm:$0xff]  }
 0x242   :  { %5055 = vmatpush1.bf16.msra.mxu0 %v13486_v40  ;;  %5161 = vmatpush1.bf16.msra.mxu1 %v13489_v41  ;;  %v13513_v40 = vld [vmem:[%s19258_s6 + $0x498] ss:$48 sps:$4 sm:$0xff]   ;;  %v13518_v41 = vld [vmem:[%s19258_s6 + $0x4f4] ss:$48 sps:$4 sm:$0xff]  }
 0x243   :  { %5056 = vmatprep.subr.bf16.mxu0 %v13494_v6  ;;  %5162 = vmatprep.subr.bf16.mxu1 %v13497_v51  ;;  %v13521_v6 = vld [vmem:[%s19258_s6 + $0x4fc] ss:$48 sps:$4 sm:$0xff]  }
 0x246   :  { %5057 = vmatpush1.bf16.msra.mxu0 %v13492_v5  ;;  %5163 = vmatpush1.bf16.msra.mxu1 %v13495_v48 }
 0x247   :  { %5058 = vmatprep.subr.bf16.mxu0 %v13500_v13  ;;  %5164 = vmatprep.subr.bf16.mxu1 %v13503_v12 }
 0x24a   :  { %5059 = vmatpush1.bf16.msra.mxu0 %v13498_v19  ;;  %5165 = vmatpush1.bf16.msra.mxu1 %v13501_v9 }
 0x24b   :  { %5060 = vmatprep.subr.bf16.mxu0 %v13506_v21  ;;  %5166 = vmatprep.subr.bf16.mxu1 %v13509_v29 }
 0x24e   :  { %5061 = vmatpush1.bf16.msra.mxu0 %v13504_v4  ;;  %5167 = vmatpush1.bf16.msra.mxu1 %v13507_v35 }
 0x24f   :  { %5062 = vmatprep.subr.bf16.mxu0 %v13512_v43  ;;  %5168 = vmatprep.subr.bf16.mxu1 %v13515_v30 }
 0x250   :  { %17 = vsyncpa [#allocation4], 0  ;;  %v13516_v51 = vld [vmem:[%s19258_s6 + $0x4f0] ss:$48 sps:$4 sm:$0xff]   ;;  %v13519_v5 = vld [vmem:[%s19258_s6 + $0x4f8] ss:$48 sps:$4 sm:$0xff]  }
 0x251   :  { %v13524_v48 = vld [vmem:[%s19258_s6 + $0x554] ss:$48 sps:$4 sm:$0xff]   ;;  %v13527_v13 = vld [vmem:[%s19258_s6 + $0x55c] ss:$48 sps:$4 sm:$0xff]   ;;  %v13522_v12 = vld [vmem:[%s19258_s6 + $0x550] ss:$48 sps:$4 sm:$0xff]  }
 0x252   :  { %5063 = vmatpush1.bf16.msra.mxu0 %v13510_v34  ;;  %5169 = vmatpush1.bf16.msra.mxu1 %v13513_v40  ;;  %v13525_v19 = vld [vmem:[%s19258_s6 + $0x558] ss:$48 sps:$4 sm:$0xff]   ;;  %v13530_v9 = vld [vmem:[%s19258_s6 + $0x5b4] ss:$48 sps:$4 sm:$0xff]   ;;  %v13533_v21 = vld [vmem:[%s19258_s6 + $0x5bc] ss:$48 sps:$4 sm:$0xff]  }
 0x253   :  { %5064 = vmatprep.subr.bf16.mxu0 %v13518_v41  ;;  %5170 = vmatprep.subr.bf16.mxu1 %v13521_v6  ;;  %v13528_v29 = vld [vmem:[%s19258_s6 + $0x5b0] ss:$48 sps:$4 sm:$0xff]   ;;  %v13531_v4 = vld [vmem:[%s19258_s6 + $0x5b8] ss:$48 sps:$4 sm:$0xff]   ;;  %v13536_v35 = vld [vmem:[%s19258_s6 + $0x614] ss:$48 sps:$4 sm:$0xff]  }
 0x254   :  { %v13539_v43 = vld [vmem:[%s19258_s6 + $0x61c] ss:$48 sps:$4 sm:$0xff]   ;;  %v13534_v30 = vld [vmem:[%s19258_s6 + $0x610] ss:$48 sps:$4 sm:$0xff]   ;;  %v13537_v34 = vld [vmem:[%s19258_s6 + $0x618] ss:$48 sps:$4 sm:$0xff]  }
 0x255   :  { %v13542_v40 = vld [vmem:[%s19258_s6 + $0x674] ss:$48 sps:$4 sm:$0xff]   ;;  %v13545_v41 = vld [vmem:[%s19258_s6 + $0x67c] ss:$48 sps:$4 sm:$0xff]   ;;  %v13540_v6 = vld [vmem:[%s19258_s6 + $0x670] ss:$48 sps:$4 sm:$0xff]  }
 0x256   :  { %5065 = vmatpush1.bf16.msra.mxu0 %v13516_v51  ;;  %5171 = vmatpush1.bf16.msra.mxu1 %v13519_v5  ;;  %v13543_v51 = vld [vmem:[%s19258_s6 + $0x678] ss:$48 sps:$4 sm:$0xff]   ;;  %v13548_v5 = vld [vmem:[%s19258_s6 + $0x6d4] ss:$48 sps:$4 sm:$0xff]   ;;  %v13767_v28 = vld [vmem:[%s19258_s6 + $0x86c] ss:$48 sps:$4 sm:$0xff]  }
 0x257   :  { %5066 = vmatprep.subr.bf16.mxu0 %v13524_v48  ;;  %5172 = vmatprep.subr.bf16.mxu1 %v13527_v13  ;;  %v13551_v48 = vld [vmem:[%s19258_s6 + $0x6dc] ss:$48 sps:$4 sm:$0xff]   ;;  %v13546_v13 = vld [vmem:[%s19258_s6 + $0x6d0] ss:$48 sps:$4 sm:$0xff]   ;;  %vm5646_vm0 = vcmask 130048   ;;  %vm9470_vm1 = vcmask 1041409  }
 0x258   :  { %v13779_v27 = vld [vmem:[%s19258_s6 + $0x92c] ss:$48 sps:$4 sm:$0xff]   ;;  %vm9472_vm2 = vcmask 1043459   ;;  %vm9474_vm3 = vcmask 1045509   ;;  %vm9476_vm4 = vcmask 1047559   ;;  %vm9503_vm5 = vcmask 1041408  }
 0x259   :  { %vm10759_vm8 = vcmask 1042432   ;;  %vm10911_vm15 = vcmask 17408  }
 0x25a   :  { %5067 = vmatpush1.bf16.msra.mxu0 %v13522_v12  ;;  %5173 = vmatpush1.bf16.msra.mxu1 %v13525_v19  ;;  %v13549_v12 = vld [vmem:[%s19258_s6 + $0x6d8] ss:$48 sps:$4 sm:$0xff]   ;;  %v13554_v19 = vld [vmem:[%s19258_s6 + $0x734] ss:$48 sps:$4 sm:$0xff]  }
 0x25b   :  { %5068 = vmatprep.subr.bf16.mxu0 %v13530_v9  ;;  %5174 = vmatprep.subr.bf16.mxu1 %v13533_v21  ;;  %v13557_v9 = vld [vmem:[%s19258_s6 + $0x73c] ss:$48 sps:$4 sm:$0xff]   ;;  %v13552_v21 = vld [vmem:[%s19258_s6 + $0x730] ss:$48 sps:$4 sm:$0xff]  }
 0x25e   :  { %5069 = vmatpush1.bf16.msra.mxu0 %v13528_v29  ;;  %5175 = vmatpush1.bf16.msra.mxu1 %v13531_v4  ;;  %v13555_v29 = vld [vmem:[%s19258_s6 + $0x738] ss:$48 sps:$4 sm:$0xff]   ;;  %v13560_v4 = vld [vmem:[%s19258_s6 + $0x794] ss:$48 sps:$4 sm:$0xff]  }
 0x25f   :  { %5091 = vmatprep.subr.bf16.mxu0 %v13536_v35  ;;  %5197 = vmatprep.subr.bf16.mxu1 %v13539_v43  ;;  %v13563_v35 = vld [vmem:[%s19258_s6 + $0x79c] ss:$48 sps:$4 sm:$0xff]   ;;  %v13558_v43 = vld [vmem:[%s19258_s6 + $0x790] ss:$48 sps:$4 sm:$0xff]  }
 0x261   :  { %5071 = vmatmul.mubr.bf16.vlgmr.msra.gmra.mrb[16].mxu0 %v16045_v26  ;;  %5177 = vmatmul.mubr.bf16.vlgmr.msra.gmra.mrb[32].mxu1 %v16045_v26 }
 0x262   :  { %5080 = vmatprep.mubr.bf16.mxu0 %v16091_v3  ;;  %5092 = vmatpush1.bf16.msra.mxu0 %v13534_v30  ;;  %v13561_v30 = vld [vmem:[%s19258_s6 + $0x798] ss:$48 sps:$4 sm:$0xff]  }
 0x263   :  { %5186 = vmatprep.mubr.bf16.mxu1 %v16091_v3  ;;  %5198 = vmatpush1.bf16.msra.mxu1 %v13537_v34  ;;  %v13566_v34 = vld [vmem:[%s19258_s6 + $0x7f4] ss:$48 sps:$4 sm:$0xff]  }
 0x264   :  { %5093 = vmatprep.subr.bf16.mxu0 %v13542_v40  ;;  %5199 = vmatprep.subr.bf16.mxu1 %v13545_v41  ;;  %v13569_v40 = vld [vmem:[%s19258_s6 + $0x7fc] ss:$48 sps:$4 sm:$0xff]   ;;  %v13564_v41 = vld [vmem:[%s19258_s6 + $0x7f0] ss:$48 sps:$4 sm:$0xff]  }
 0x266   :  { %5094 = vmatpush1.bf16.msra.mxu0 %v13540_v6  ;;  %v13567_v6 = vld [vmem:[%s19258_s6 + $0x7f8] ss:$48 sps:$4 sm:$0xff]  }
 0x267   :  { %5200 = vmatpush1.bf16.msra.mxu1 %v13543_v51  ;;  %5095 = vmatprep.subr.bf16.mxu0 %v13548_v5  ;;  %v13572_v51 = vld [vmem:[%s19258_s6 + $0x854] ss:$48 sps:$4 sm:$0xff]   ;;  %v13575_v5 = vld [vmem:[%s19258_s6 + $0x85c] ss:$48 sps:$4 sm:$0xff]  }
 0x268   :  { %5201 = vmatprep.subr.bf16.mxu1 %v13551_v48  ;;  %v13570_v48 = vld [vmem:[%s19258_s6 + $0x850] ss:$48 sps:$4 sm:$0xff]  }
 0x269   :  { %5081 = vmatmul.mubr.bf16.gmra.mrb[20].mxu0 %v16105_v10  ;;  %5187 = vmatmul.mubr.bf16.gmra.mrb[36].mxu1 %v16105_v10 }
 0x26a   :  { %5096 = vmatpush1.bf16.msra.mxu0 %v13546_v13  ;;  %5123 = vmatprep.mubr.bf16.mxu0 %v16111_v11  ;;  %v13573_v13 = vld [vmem:[%s19258_s6 + $0x858] ss:$48 sps:$4 sm:$0xff]  }
 0x26b   :  { %5202 = vmatpush1.bf16.msra.mxu1 %v13549_v12  ;;  %5229 = vmatprep.mubr.bf16.mxu1 %v16111_v11  ;;  %v13578_v12 = vld [vmem:[%s19258_s6 + $0x8b4] ss:$48 sps:$4 sm:$0xff]  }
 0x26c   :  { %5097 = vmatprep.subr.bf16.mxu0 %v13554_v19  ;;  %5203 = vmatprep.subr.bf16.mxu1 %v13557_v9  ;;  %v13581_v19 = vld [vmem:[%s19258_s6 + $0x8bc] ss:$48 sps:$4 sm:$0xff]   ;;  %v13576_v9 = vld [vmem:[%s19258_s6 + $0x8b0] ss:$48 sps:$4 sm:$0xff]  }
 0x26e   :  { %5098 = vmatpush1.bf16.msra.mxu0 %v13552_v21  ;;  %v13579_v21 = vld [vmem:[%s19258_s6 + $0x8b8] ss:$48 sps:$4 sm:$0xff]  }
 0x26f   :  { %5204 = vmatpush1.bf16.msra.mxu1 %v13555_v29  ;;  %5099 = vmatprep.subr.bf16.mxu0 %v13560_v4  ;;  %v13584_v29 = vld [vmem:[%s19258_s6 + $0x914] ss:$48 sps:$4 sm:$0xff]   ;;  %v13587_v4 = vld [vmem:[%s19258_s6 + $0x91c] ss:$48 sps:$4 sm:$0xff]  }
 0x270   :  { %5205 = vmatprep.subr.bf16.mxu1 %v13563_v35  ;;  %v13582_v35 = vld [vmem:[%s19258_s6 + $0x910] ss:$48 sps:$4 sm:$0xff]  }
 0x272   :  { %5100 = vmatpush1.bf16.msra.mxu0 %v13558_v43  ;;  %v13585_v43 = vld [vmem:[%s19258_s6 + $0x918] ss:$48 sps:$4 sm:$0xff]  }
 0x273   :  { %5206 = vmatpush1.bf16.msra.mxu1 %v13561_v30  ;;  %5101 = vmatprep.subr.bf16.mxu0 %v13566_v34  ;;  %v13590_v30 = vld [vmem:[%s19258_s6 + $0x974] ss:$48 sps:$4 sm:$0xff]   ;;  %v13593_v34 = vld [vmem:[%s19258_s6 + $0x97c] ss:$48 sps:$4 sm:$0xff]  }
 0x274   :  { %5207 = vmatprep.subr.bf16.mxu1 %v13569_v40  ;;  %v13588_v40 = vld [vmem:[%s19258_s6 + $0x970] ss:$48 sps:$4 sm:$0xff]  }
 0x276   :  { %5102 = vmatpush1.bf16.msra.mxu0 %v13564_v41  ;;  %v13591_v41 = vld [vmem:[%s19258_s6 + $0x978] ss:$48 sps:$4 sm:$0xff]  }
 0x277   :  { %5208 = vmatpush1.bf16.msra.mxu1 %v13567_v6  ;;  %5103 = vmatprep.subr.bf16.mxu0 %v13572_v51  ;;  %v13596_v6 = vld [vmem:[%s19258_s6 + $0x9d4] ss:$48 sps:$4 sm:$0xff]   ;;  %v13599_v51 = vld [vmem:[%s19258_s6 + $0x9dc] ss:$48 sps:$4 sm:$0xff]  }
 0x278   :  { %5209 = vmatprep.subr.bf16.mxu1 %v13575_v5  ;;  %v13594_v5 = vld [vmem:[%s19258_s6 + $0x9d0] ss:$48 sps:$4 sm:$0xff]  }
 0x27a   :  { %5104 = vmatpush1.bf16.msra.mxu0 %v13570_v48  ;;  %v13597_v48 = vld [vmem:[%s19258_s6 + $0x9d8] ss:$48 sps:$4 sm:$0xff]  }
 0x27b   :  { %5210 = vmatpush1.bf16.msra.mxu1 %v13573_v13  ;;  %5105 = vmatprep.subr.bf16.mxu0 %v13578_v12  ;;  %v13602_v13 = vld [vmem:[%s19258_s6 + $0xa34] ss:$48 sps:$4 sm:$0xff]   ;;  %v13605_v12 = vld [vmem:[%s19258_s6 + $0xa3c] ss:$48 sps:$4 sm:$0xff]  }
 0x27c   :  { %5211 = vmatprep.subr.bf16.mxu1 %v13581_v19  ;;  %v13600_v19 = vld [vmem:[%s19258_s6 + $0xa30] ss:$48 sps:$4 sm:$0xff]  }
 0x27e   :  { %5106 = vmatpush1.bf16.msra.mxu0 %v13576_v9  ;;  %v13603_v9 = vld [vmem:[%s19258_s6 + $0xa38] ss:$48 sps:$4 sm:$0xff]  }
 0x27f   :  { %5212 = vmatpush1.bf16.msra.mxu1 %v13579_v21  ;;  %5107 = vmatprep.subr.bf16.mxu0 %v13584_v29  ;;  %v13608_v21 = vld [vmem:[%s19258_s6 + $0xa94] ss:$48 sps:$4 sm:$0xff]   ;;  %v13611_v29 = vld [vmem:[%s19258_s6 + $0xa9c] ss:$48 sps:$4 sm:$0xff]  }
 0x280   :  { %5213 = vmatprep.subr.bf16.mxu1 %v13587_v4  ;;  %v13606_v4 = vld [vmem:[%s19258_s6 + $0xa90] ss:$48 sps:$4 sm:$0xff]  }
 0x282   :  { %5108 = vmatpush1.bf16.msra.mxu0 %v13582_v35  ;;  %v13609_v35 = vld [vmem:[%s19258_s6 + $0xa98] ss:$48 sps:$4 sm:$0xff]  }
 0x283   :  { %5214 = vmatpush1.bf16.msra.mxu1 %v13585_v43  ;;  %5109 = vmatprep.subr.bf16.mxu0 %v13590_v30  ;;  %v13614_v43 = vld [vmem:[%s19258_s6 + $0xaf4] ss:$48 sps:$4 sm:$0xff]   ;;  %v13617_v30 = vld [vmem:[%s19258_s6 + $0xafc] ss:$48 sps:$4 sm:$0xff]  }
 0x284   :  { %5215 = vmatprep.subr.bf16.mxu1 %v13593_v34  ;;  %v13612_v34 = vld [vmem:[%s19258_s6 + $0xaf0] ss:$48 sps:$4 sm:$0xff]  }
 0x286   :  { %5110 = vmatpush1.bf16.msra.mxu0 %v13588_v40  ;;  %v13615_v40 = vld [vmem:[%s19258_s6 + $0xaf8] ss:$48 sps:$4 sm:$0xff]  }
 0x287   :  { %5216 = vmatpush1.bf16.msra.mxu1 %v13591_v41  ;;  %5111 = vmatprep.subr.bf16.mxu0 %v13596_v6  ;;  %v13620_v41 = vld [vmem:[%s19258_s6 + $0xb54] ss:$48 sps:$4 sm:$0xff]   ;;  %v13623_v6 = vld [vmem:[%s19258_s6 + $0xb5c] ss:$48 sps:$4 sm:$0xff]  }
 0x288   :  { %5217 = vmatprep.subr.bf16.mxu1 %v13599_v51  ;;  %v13618_v51 = vld [vmem:[%s19258_s6 + $0xb50] ss:$48 sps:$4 sm:$0xff]  }
 0x28a   :  { %5112 = vmatpush1.bf16.msra.mxu0 %v13594_v5  ;;  %v13621_v5 = vld [vmem:[%s19258_s6 + $0xb58] ss:$48 sps:$4 sm:$0xff]  }
 0x28b   :  { %5218 = vmatpush1.bf16.msra.mxu1 %v13597_v48  ;;  %5113 = vmatprep.subr.bf16.mxu0 %v13602_v13  ;;  %v13626_v48 = vld [vmem:[%s19258_s6 + $0xbb4] ss:$48 sps:$4 sm:$0xff]   ;;  %v13629_v13 = vld [vmem:[%s19258_s6 + $0xbbc] ss:$48 sps:$4 sm:$0xff]  }
 0x28c   :  { %5219 = vmatprep.subr.bf16.mxu1 %v13605_v12  ;;  %v13624_v12 = vld [vmem:[%s19258_s6 + $0xbb0] ss:$48 sps:$4 sm:$0xff]  }
 0x28e   :  { %5114 = vmatpush1.bf16.msra.mxu0 %v13600_v19  ;;  %v13627_v19 = vld [vmem:[%s19258_s6 + $0xbb8] ss:$48 sps:$4 sm:$0xff]  }
 0x28f   :  { %5220 = vmatpush1.bf16.msra.mxu1 %v13603_v9  ;;  %5115 = vmatprep.subr.bf16.mxu0 %v13608_v21  ;;  %v13632_v9 = vld [vmem:[%s19258_s6 + $0x24] ss:$48 sps:$4 sm:$0xff]   ;;  %v13635_v21 = vld [vmem:[%s19258_s6 + $0x2c] ss:$48 sps:$4 sm:$0xff]  }
 0x290   :  { %5221 = vmatprep.subr.bf16.mxu1 %v13611_v29  ;;  %v13630_v29 = vld [vmem:[%s19258_s6 + $0x20] ss:$48 sps:$4 sm:$0xff]  }
 0x292   :  { %5116 = vmatpush1.bf16.msra.mxu0 %v13606_v4  ;;  %v13633_v4 = vld [vmem:[%s19258_s6 + $0x28] ss:$48 sps:$4 sm:$0xff]  }
 0x293   :  { %5222 = vmatpush1.bf16.msra.mxu1 %v13609_v35  ;;  %5117 = vmatprep.subr.bf16.mxu0 %v13614_v43  ;;  %v13638_v35 = vld [vmem:[%s19258_s6 + $0x84] ss:$48 sps:$4 sm:$0xff]   ;;  %v13641_v43 = vld [vmem:[%s19258_s6 + $0x8c] ss:$48 sps:$4 sm:$0xff]  }
 0x294   :  { %5223 = vmatprep.subr.bf16.mxu1 %v13617_v30  ;;  %v13636_v30 = vld [vmem:[%s19258_s6 + $0x80] ss:$48 sps:$4 sm:$0xff]  }
 0x296   :  { %5118 = vmatpush1.bf16.msra.mxu0 %v13612_v34  ;;  %v13639_v34 = vld [vmem:[%s19258_s6 + $0x88] ss:$48 sps:$4 sm:$0xff]  }
 0x297   :  { %5224 = vmatpush1.bf16.msra.mxu1 %v13615_v40  ;;  %5119 = vmatprep.subr.bf16.mxu0 %v13620_v41  ;;  %v13644_v40 = vld [vmem:[%s19258_s6 + $0xe4] ss:$48 sps:$4 sm:$0xff]   ;;  %v13647_v41 = vld [vmem:[%s19258_s6 + $0xec] ss:$48 sps:$4 sm:$0xff]  }
 0x298   :  { %5225 = vmatprep.subr.bf16.mxu1 %v13623_v6  ;;  %v13642_v6 = vld [vmem:[%s19258_s6 + $0xe0] ss:$48 sps:$4 sm:$0xff]  }
 0x29a   :  { %5120 = vmatpush1.bf16.msra.mxu0 %v13618_v51  ;;  %v13645_v51 = vld [vmem:[%s19258_s6 + $0xe8] ss:$48 sps:$4 sm:$0xff]  }
 0x29b   :  { %5226 = vmatpush1.bf16.msra.mxu1 %v13621_v5  ;;  %5121 = vmatprep.subr.bf16.mxu0 %v13626_v48  ;;  %v13650_v5 = vld [vmem:[%s19258_s6 + $0x144] ss:$48 sps:$4 sm:$0xff]   ;;  %v13653_v48 = vld [vmem:[%s19258_s6 + $0x14c] ss:$48 sps:$4 sm:$0xff]  }
 0x29c   :  { %5227 = vmatprep.subr.bf16.mxu1 %v13629_v13  ;;  %v13648_v13 = vld [vmem:[%s19258_s6 + $0x140] ss:$48 sps:$4 sm:$0xff]  }
 0x29e   :  { %5122 = vmatpush1.bf16.msra.mxu0 %v13624_v12  ;;  %v13651_v12 = vld [vmem:[%s19258_s6 + $0x148] ss:$48 sps:$4 sm:$0xff]  }
 0x29f   :  { %5228 = vmatpush1.bf16.msra.mxu1 %v13627_v19  ;;  %5250 = vmatprep.subr.bf16.mxu0 %v13632_v9  ;;  %v13656_v19 = vld [vmem:[%s19258_s6 + $0x1a4] ss:$48 sps:$4 sm:$0xff]   ;;  %v13659_v9 = vld [vmem:[%s19258_s6 + $0x1ac] ss:$48 sps:$4 sm:$0xff]  }
 0x2a0   :  { %5356 = vmatprep.subr.bf16.mxu1 %v13635_v21  ;;  %v13657_v21 = vld [vmem:[%s19258_s6 + $0x1a8] ss:$48 sps:$4 sm:$0xff]  }
 0x2a1   :  { %5124 = vmatmul.mubr.bf16.vlgmr.msra.gmra.mrb[16].mxu0 %v16319_v8 }
 0x2a2   :  { %5230 = vmatmul.mubr.bf16.vlgmr.msra.gmra.mrb[32].mxu1 %v16319_v8  ;;  %5133 = vmatprep.mubr.bf16.mxu0 %v16323_v0 }
 0x2a3   :  { %5239 = vmatprep.mubr.bf16.mxu1 %v16323_v0  ;;  %5251 = vmatpush1.bf16.msra.mxu0 %v13630_v29  ;;  %v13662_v29 = vld [vmem:[%s19258_s6 + $0x204] ss:$48 sps:$4 sm:$0xff]  }
 0x2a4   :  { %5357 = vmatpush1.bf16.msra.mxu1 %v13633_v4  ;;  %5252 = vmatprep.subr.bf16.mxu0 %v13638_v35  ;;  %v13665_v4 = vld [vmem:[%s19258_s6 + $0x20c] ss:$48 sps:$4 sm:$0xff]   ;;  %v13660_v35 = vld [vmem:[%s19258_s6 + $0x200] ss:$48 sps:$4 sm:$0xff]  }
 0x2a5   :  { %5358 = vmatprep.subr.bf16.mxu1 %v13641_v43  ;;  %v13663_v43 = vld [vmem:[%s19258_s6 + $0x208] ss:$48 sps:$4 sm:$0xff]  }
 0x2a7   :  { %5253 = vmatpush1.bf16.msra.mxu0 %v13636_v30  ;;  %v13668_v30 = vld [vmem:[%s19258_s6 + $0x264] ss:$48 sps:$4 sm:$0xff]  }
 0x2a8   :  { %5359 = vmatpush1.bf16.msra.mxu1 %v13639_v34  ;;  %5254 = vmatprep.subr.bf16.mxu0 %v13644_v40  ;;  %v13671_v34 = vld [vmem:[%s19258_s6 + $0x26c] ss:$48 sps:$4 sm:$0xff]   ;;  %v13666_v40 = vld [vmem:[%s19258_s6 + $0x260] ss:$48 sps:$4 sm:$0xff]  }
 0x2a9   :  { %5134 = vmatmul.mubr.bf16.gmra.mrb[20].mxu0 %v16363_v62  ;;  %5360 = vmatprep.subr.bf16.mxu1 %v13647_v41  ;;  %v13669_v41 = vld [vmem:[%s19258_s6 + $0x268] ss:$48 sps:$4 sm:$0xff]  }
 0x2aa   :  { %5240 = vmatmul.mubr.bf16.gmra.mrb[36].mxu1 %v16363_v62  ;;  %5282 = vmatprep.mubr.bf16.mxu0 %v16041_v24 }
 0x2ab   :  { %5255 = vmatpush1.bf16.msra.mxu0 %v13642_v6  ;;  %5388 = vmatprep.mubr.bf16.mxu1 %v16041_v24  ;;  %v13654_v24 = vld [vmem:[%s19258_s6 + $0x1a0] ss:$48 sps:$4 sm:$0xff]   ;;  %v13674_v6 = vld [vmem:[%s19258_s6 + $0x2c4] ss:$48 sps:$4 sm:$0xff]  }
 0x2ac   :  { %5361 = vmatpush1.bf16.msra.mxu1 %v13645_v51  ;;  %5256 = vmatprep.subr.bf16.mxu0 %v13650_v5  ;;  %v13677_v51 = vld [vmem:[%s19258_s6 + $0x2cc] ss:$48 sps:$4 sm:$0xff]   ;;  %v13672_v5 = vld [vmem:[%s19258_s6 + $0x2c0] ss:$48 sps:$4 sm:$0xff]  }
 0x2ad   :  { %5362 = vmatprep.subr.bf16.mxu1 %v13653_v48  ;;  %v13675_v48 = vld [vmem:[%s19258_s6 + $0x2c8] ss:$48 sps:$4 sm:$0xff]  }
 0x2af   :  { %5257 = vmatpush1.bf16.msra.mxu0 %v13648_v13  ;;  %v13680_v13 = vld [vmem:[%s19258_s6 + $0x324] ss:$48 sps:$4 sm:$0xff]  }
 0x2b0   :  { %5363 = vmatpush1.bf16.msra.mxu1 %v13651_v12  ;;  %5258 = vmatprep.subr.bf16.mxu0 %v13656_v19  ;;  %v13683_v12 = vld [vmem:[%s19258_s6 + $0x32c] ss:$48 sps:$4 sm:$0xff]   ;;  %v13678_v19 = vld [vmem:[%s19258_s6 + $0x320] ss:$48 sps:$4 sm:$0xff]  }
 0x2b1   :  { %5364 = vmatprep.subr.bf16.mxu1 %v13659_v9  ;;  %v13681_v9 = vld [vmem:[%s19258_s6 + $0x328] ss:$48 sps:$4 sm:$0xff]  }
 0x2b3   :  { %5259 = vmatpush1.bf16.msra.mxu0 %v13654_v24  ;;  %v13686_v24 = vld [vmem:[%s19258_s6 + $0x384] ss:$48 sps:$4 sm:$0xff]  }
 0x2b4   :  { %5365 = vmatpush1.bf16.msra.mxu1 %v13657_v21  ;;  %5260 = vmatprep.subr.bf16.mxu0 %v13662_v29  ;;  %v13689_v21 = vld [vmem:[%s19258_s6 + $0x38c] ss:$48 sps:$4 sm:$0xff]   ;;  %v13684_v29 = vld [vmem:[%s19258_s6 + $0x380] ss:$48 sps:$4 sm:$0xff]  }
 0x2b5   :  { %5366 = vmatprep.subr.bf16.mxu1 %v13665_v4  ;;  %v13687_v4 = vld [vmem:[%s19258_s6 + $0x388] ss:$48 sps:$4 sm:$0xff]  }
 0x2b7   :  { %5261 = vmatpush1.bf16.msra.mxu0 %v13660_v35  ;;  %v13692_v35 = vld [vmem:[%s19258_s6 + $0x3e4] ss:$48 sps:$4 sm:$0xff]  }
 0x2b8   :  { %5367 = vmatpush1.bf16.msra.mxu1 %v13663_v43  ;;  %5262 = vmatprep.subr.bf16.mxu0 %v13668_v30  ;;  %v13695_v43 = vld [vmem:[%s19258_s6 + $0x3ec] ss:$48 sps:$4 sm:$0xff]   ;;  %v13690_v30 = vld [vmem:[%s19258_s6 + $0x3e0] ss:$48 sps:$4 sm:$0xff]  }
 0x2b9   :  { %5368 = vmatprep.subr.bf16.mxu1 %v13671_v34  ;;  %v13693_v34 = vld [vmem:[%s19258_s6 + $0x3e8] ss:$48 sps:$4 sm:$0xff]  }
 0x2bb   :  { %5263 = vmatpush1.bf16.msra.mxu0 %v13666_v40  ;;  %v13698_v40 = vld [vmem:[%s19258_s6 + $0x444] ss:$48 sps:$4 sm:$0xff]  }
 0x2bc   :  { %5369 = vmatpush1.bf16.msra.mxu1 %v13669_v41  ;;  %5264 = vmatprep.subr.bf16.mxu0 %v13674_v6  ;;  %v13701_v41 = vld [vmem:[%s19258_s6 + $0x44c] ss:$48 sps:$4 sm:$0xff]   ;;  %v13696_v6 = vld [vmem:[%s19258_s6 + $0x440] ss:$48 sps:$4 sm:$0xff]  }
 0x2bd   :  { %5370 = vmatprep.subr.bf16.mxu1 %v13677_v51  ;;  %v13699_v51 = vld [vmem:[%s19258_s6 + $0x448] ss:$48 sps:$4 sm:$0xff]  }
 0x2bf   :  { %5265 = vmatpush1.bf16.msra.mxu0 %v13672_v5  ;;  %v13704_v5 = vld [vmem:[%s19258_s6 + $0x4a4] ss:$48 sps:$4 sm:$0xff]  }
 0x2c0   :  { %5371 = vmatpush1.bf16.msra.mxu1 %v13675_v48  ;;  %5266 = vmatprep.subr.bf16.mxu0 %v13680_v13  ;;  %v13707_v48 = vld [vmem:[%s19258_s6 + $0x4ac] ss:$48 sps:$4 sm:$0xff]   ;;  %v13702_v13 = vld [vmem:[%s19258_s6 + $0x4a0] ss:$48 sps:$4 sm:$0xff]  }
 0x2c1   :  { %5372 = vmatprep.subr.bf16.mxu1 %v13683_v12  ;;  %v13705_v12 = vld [vmem:[%s19258_s6 + $0x4a8] ss:$48 sps:$4 sm:$0xff]  }
 0x2c3   :  { %5267 = vmatpush1.bf16.msra.mxu0 %v13678_v19  ;;  %v13710_v19 = vld [vmem:[%s19258_s6 + $0x504] ss:$48 sps:$4 sm:$0xff]  }
 0x2c4   :  { %5373 = vmatpush1.bf16.msra.mxu1 %v13681_v9  ;;  %5268 = vmatprep.subr.bf16.mxu0 %v13686_v24  ;;  %v13713_v9 = vld [vmem:[%s19258_s6 + $0x50c] ss:$48 sps:$4 sm:$0xff]   ;;  %v13708_v24 = vld [vmem:[%s19258_s6 + $0x500] ss:$48 sps:$4 sm:$0xff]  }
 0x2c5   :  { %5374 = vmatprep.subr.bf16.mxu1 %v13689_v21  ;;  %v13711_v21 = vld [vmem:[%s19258_s6 + $0x508] ss:$48 sps:$4 sm:$0xff]  }
 0x2c7   :  { %5269 = vmatpush1.bf16.msra.mxu0 %v13684_v29  ;;  %v13716_v29 = vld [vmem:[%s19258_s6 + $0x564] ss:$48 sps:$4 sm:$0xff]  }
 0x2c8   :  { %5375 = vmatpush1.bf16.msra.mxu1 %v13687_v4  ;;  %5270 = vmatprep.subr.bf16.mxu0 %v13692_v35  ;;  %v13719_v4 = vld [vmem:[%s19258_s6 + $0x56c] ss:$48 sps:$4 sm:$0xff]   ;;  %v13714_v35 = vld [vmem:[%s19258_s6 + $0x560] ss:$48 sps:$4 sm:$0xff]  }
 0x2c9   :  { %5376 = vmatprep.subr.bf16.mxu1 %v13695_v43  ;;  %v13717_v43 = vld [vmem:[%s19258_s6 + $0x568] ss:$48 sps:$4 sm:$0xff]  }
 0x2cb   :  { %5271 = vmatpush1.bf16.msra.mxu0 %v13690_v30  ;;  %v13722_v30 = vld [vmem:[%s19258_s6 + $0x5c4] ss:$48 sps:$4 sm:$0xff]  }
 0x2cc   :  { %5377 = vmatpush1.bf16.msra.mxu1 %v13693_v34  ;;  %5272 = vmatprep.subr.bf16.mxu0 %v13698_v40  ;;  %v13725_v34 = vld [vmem:[%s19258_s6 + $0x5cc] ss:$48 sps:$4 sm:$0xff]   ;;  %v13720_v40 = vld [vmem:[%s19258_s6 + $0x5c0] ss:$48 sps:$4 sm:$0xff]  }
 0x2cd   :  { %5378 = vmatprep.subr.bf16.mxu1 %v13701_v41  ;;  %v13723_v41 = vld [vmem:[%s19258_s6 + $0x5c8] ss:$48 sps:$4 sm:$0xff]  }
 0x2cf   :  { %5273 = vmatpush1.bf16.msra.mxu0 %v13696_v6  ;;  %v13728_v6 = vld [vmem:[%s19258_s6 + $0x624] ss:$48 sps:$4 sm:$0xff]  }
 0x2d0   :  { %5379 = vmatpush1.bf16.msra.mxu1 %v13699_v51  ;;  %5274 = vmatprep.subr.bf16.mxu0 %v13704_v5  ;;  %v13731_v51 = vld [vmem:[%s19258_s6 + $0x62c] ss:$48 sps:$4 sm:$0xff]   ;;  %v13726_v5 = vld [vmem:[%s19258_s6 + $0x620] ss:$48 sps:$4 sm:$0xff]  }
 0x2d1   :  { %5380 = vmatprep.subr.bf16.mxu1 %v13707_v48  ;;  %v13729_v48 = vld [vmem:[%s19258_s6 + $0x628] ss:$48 sps:$4 sm:$0xff]  }
 0x2d3   :  { %5275 = vmatpush1.bf16.msra.mxu0 %v13702_v13  ;;  %v13734_v13 = vld [vmem:[%s19258_s6 + $0x684] ss:$48 sps:$4 sm:$0xff]  }
 0x2d4   :  { %5381 = vmatpush1.bf16.msra.mxu1 %v13705_v12  ;;  %5276 = vmatprep.subr.bf16.mxu0 %v13710_v19  ;;  %v13737_v12 = vld [vmem:[%s19258_s6 + $0x68c] ss:$48 sps:$4 sm:$0xff]   ;;  %v13732_v19 = vld [vmem:[%s19258_s6 + $0x680] ss:$48 sps:$4 sm:$0xff]  }
 0x2d5   :  { %5382 = vmatprep.subr.bf16.mxu1 %v13713_v9  ;;  %v13735_v9 = vld [vmem:[%s19258_s6 + $0x688] ss:$48 sps:$4 sm:$0xff]  }
 0x2d7   :  { %5277 = vmatpush1.bf16.msra.mxu0 %v13708_v24  ;;  %v13740_v24 = vld [vmem:[%s19258_s6 + $0x6e4] ss:$48 sps:$4 sm:$0xff]  }
 0x2d8   :  { %5383 = vmatpush1.bf16.msra.mxu1 %v13711_v21  ;;  %5278 = vmatprep.subr.bf16.mxu0 %v13716_v29  ;;  %v13741_v21 = vld [vmem:[%s19258_s6 + $0x6e8] ss:$48 sps:$4 sm:$0xff]   ;;  %v13746_v29 = vld [vmem:[%s19258_s6 + $0x744] ss:$48 sps:$4 sm:$0xff]  }
 0x2d9   :  { %5384 = vmatprep.subr.bf16.mxu1 %v13719_v4  ;;  %v13749_v4 = vld [vmem:[%s19258_s6 + $0x74c] ss:$48 sps:$4 sm:$0xff]  }
 0x2db   :  { %5279 = vmatpush1.bf16.msra.mxu0 %v13714_v35  ;;  %v13744_v35 = vld [vmem:[%s19258_s6 + $0x740] ss:$48 sps:$4 sm:$0xff]  }
 0x2dc   :  { %5385 = vmatpush1.bf16.msra.mxu1 %v13717_v43  ;;  %5280 = vmatprep.subr.bf16.mxu0 %v13722_v30  ;;  %v13747_v43 = vld [vmem:[%s19258_s6 + $0x748] ss:$48 sps:$4 sm:$0xff]   ;;  %v13752_v30 = vld [vmem:[%s19258_s6 + $0x7a4] ss:$48 sps:$4 sm:$0xff]  }
 0x2dd   :  { %5386 = vmatprep.subr.bf16.mxu1 %v13725_v34  ;;  %v16987_v34 = vsub.s32 2, %v15810_v33 }
 0x2df   :  { %5281 = vmatpush1.bf16.msra.mxu0 %v13720_v40  ;;  %v13750_v40 = vld [vmem:[%s19258_s6 + $0x7a0] ss:$48 sps:$4 sm:$0xff]  }
 0x2e0   :  { %5387 = vmatpush1.bf16.msra.mxu1 %v13723_v41  ;;  %5303 = vmatprep.subr.bf16.mxu0 %v13728_v6  ;;  %v13753_v41 = vld [vmem:[%s19258_s6 + $0x7a8] ss:$48 sps:$4 sm:$0xff]   ;;  %v13758_v6 = vld [vmem:[%s19258_s6 + $0x804] ss:$48 sps:$4 sm:$0xff]  }
 0x2e1   :  { %5409 = vmatprep.subr.bf16.mxu1 %v13731_v51 }
 0x2e2   :  { %5283 = vmatmul.mubr.bf16.vlgmr.msra.gmra.mrb[24].mxu0 %v16045_v26 }
 0x2e3   :  { %5389 = vmatmul.mubr.bf16.vlgmr.msra.gmra.mrb[40].mxu1 %v16045_v26  ;;  %5292 = vmatprep.mubr.bf16.mxu0 %v16091_v3  ;;  %v13743_v26 = vld [vmem:[%s19258_s6 + $0x6ec] ss:$48 sps:$4 sm:$0xff]  }
 0x2e4   :  { %5304 = vmatpush1.bf16.msra.mxu0 %v13726_v5  ;;  %5398 = vmatprep.mubr.bf16.mxu1 %v16091_v3  ;;  %v13738_v3 = vld [vmem:[%s19258_s6 + $0x6e0] ss:$48 sps:$4 sm:$0xff]  }
 0x2e5   :  { %5410 = vmatpush1.bf16.msra.mxu1 %v13729_v48  ;;  %5305 = vmatprep.subr.bf16.mxu0 %v13734_v13  ;;  %v13761_v48 = vld [vmem:[%s19258_s6 + $0x80c] ss:$48 sps:$4 sm:$0xff]  }
 0x2e6   :  { %5411 = vmatprep.subr.bf16.mxu1 %v13737_v12 }
 0x2e8   :  { %5306 = vmatpush1.bf16.msra.mxu0 %v13732_v19 }
 0x2e9   :  { %5412 = vmatpush1.bf16.msra.mxu1 %v13735_v9  ;;  %5307 = vmatprep.subr.bf16.mxu0 %v13740_v24 }
 0x2ea   :  { %5293 = vmatmul.mubr.bf16.gmra.mrb[28].mxu0 %v16105_v10  ;;  %5413 = vmatprep.subr.bf16.mxu1 %v13743_v26 }
 0x2eb   :  { %5399 = vmatmul.mubr.bf16.gmra.mrb[44].mxu1 %v16105_v10  ;;  %5335 = vmatprep.mubr.bf16.mxu0 %v16111_v11  ;;  %v13755_v10 = vld [vmem:[%s19258_s6 + $0x7ac] ss:$48 sps:$4 sm:$0xff]  }
 0x2ec   :  { %5308 = vmatpush1.bf16.msra.mxu0 %v13738_v3  ;;  %5441 = vmatprep.mubr.bf16.mxu1 %v16111_v11  ;;  %v16984_v11 = vld [vmem:[%s19259_s7] sm:$0xff] }
 0x2ed   :  { %5414 = vmatpush1.bf16.msra.mxu1 %v13741_v21  ;;  %5309 = vmatprep.subr.bf16.mxu0 %v13746_v29  ;;  %v2849_v51 = vrot.slane %v16984_v11, %v15828_v38  ;;  %v2857_v5 = vrot.slane %v16984_v11, %v16987_v34  ;;  %v2853_v19 = vrot.slane %v16984_v11, %v15831_v39  ;;  %v13756_v3 = vld [vmem:[%s19258_s6 + $0x800] ss:$48 sps:$4 sm:$0xff]   ;;  %v13759_v21 = vld [vmem:[%s19258_s6 + $0x808] ss:$48 sps:$4 sm:$0xff]  }
 0x2ee   :  { %5415 = vmatprep.subr.bf16.mxu1 %v13749_v4  ;;  %v2861_v9 = vrot.slane %v16984_v11, %v15990_v49 }
 0x2f0   :  { %5310 = vmatpush1.bf16.msra.mxu0 %v13744_v35  ;;  %v13764_v35 = vld [vmem:[%s19258_s6 + $0x864] ss:$48 sps:$4 sm:$0xff]  }
 0x2f1   :  { %5416 = vmatpush1.bf16.msra.mxu1 %v13747_v43  ;;  %5311 = vmatprep.subr.bf16.mxu0 %v13752_v30 }
 0x2f2   :  { %5417 = vmatprep.subr.bf16.mxu1 %v13755_v10 }
 0x2f3   :  { %v4913_v13 = vpop.f32.mrb[8].mxu0  ;;  %v5019_v12 = vpop.f32.mrb[24].mxu1 }
 0x2f4   :  { %5312 = vmatpush1.bf16.msra.mxu0 %v13750_v40  ;;  %v4915_v24 = vpop.f32.mrb[9].mxu0  ;;  %v5021_v26 = vpop.f32.mrb[25].mxu1  ;;  %v17018_v43 = vadd.f32 %v4913_v13, %v2849_v51  ;;  %v17020_v30 = vadd.f32 %v5019_v12, %v2857_v5 }
 0x2f5   :  { %5418 = vmatpush1.bf16.msra.mxu1 %v13753_v41  ;;  %5313 = vmatprep.subr.bf16.mxu0 %v13758_v6  ;;  %v4917_v29 = vpop.f32.mrb[10].mxu0  ;;  %v5023_v4 = vpop.f32.mrb[26].mxu1  ;;  %v17029_v2 = vadd.f32 %v4915_v24, %v2853_v19  ;;  %v17031_v56 = vadd.f32 %v5021_v26, %v2861_v9 }
 0x2f6   :  { %5419 = vmatprep.subr.bf16.mxu1 %v13761_v48  ;;  %v17022_v10 = vadd.f32 %v4917_v29, %v2849_v51  ;;  %v17024_v40 = vadd.f32 %v5023_v4, %v2857_v5  ;;  %v4919_v41 = vpop.f32.mrb[11].mxu0  ;;  %v5025_v6 = vpop.f32.mrb[27].mxu1  ;;  %v13762_v29 = vld [vmem:[%s19258_s6 + $0x860] ss:$48 sps:$4 sm:$0xff]   ;;  %v13765_v4 = vld [vmem:[%s19258_s6 + $0x868] ss:$48 sps:$4 sm:$0xff]  }
 0x2f7   :  { %v17033_v63 = vadd.f32 %v4919_v41, %v2853_v19  ;;  %v17035_v13 = vadd.f32 %v5025_v6, %v2861_v9 }
 0x2f8   :  { %5314 = vmatpush1.bf16.msra.mxu0 %v13756_v3  ;;  %v13770_v3 = vld [vmem:[%s19258_s6 + $0x8c4] ss:$48 sps:$4 sm:$0xff]  }
 0x2f9   :  { %5420 = vmatpush1.bf16.msra.mxu1 %v13759_v21  ;;  %5315 = vmatprep.subr.bf16.mxu0 %v13764_v35  ;;  %v13773_v21 = vld [vmem:[%s19258_s6 + $0x8cc] ss:$48 sps:$4 sm:$0xff]   ;;  %v13768_v35 = vld [vmem:[%s19258_s6 + $0x8c0] ss:$48 sps:$4 sm:$0xff]  }
 0x2fa   :  { %5421 = vmatprep.subr.bf16.mxu1 %v13767_v28  ;;  %v13771_v28 = vld [vmem:[%s19258_s6 + $0x8c8] ss:$48 sps:$4 sm:$0xff]  }
 0x2fb   :  { %v4923_v41 = vpop.f32.mrb[12].mxu0  ;;  %v5029_v6 = vpop.f32.mrb[28].mxu1 }
 0x2fc   :  { %5316 = vmatpush1.bf16.msra.mxu0 %v13762_v29  ;;  %v4925_v12 = vpop.f32.mrb[13].mxu0  ;;  %v5031_v48 = vpop.f32.mrb[29].mxu1  ;;  %v13776_v29 = vld [vmem:[%s19258_s6 + $0x924] ss:$48 sps:$4 sm:$0xff]   ;;  %v17068_v25 = vadd.f32 %v4923_v41, %v2849_v51  ;;  %v17070_v60 = vadd.f32 %v5029_v6, %v2857_v5  ;;  %v13783_v6 = vld [vmem:[%s19258_s6 + $0x988] ss:$48 sps:$4 sm:$0xff]  }
 0x2fd   :  { %5422 = vmatpush1.bf16.msra.mxu1 %v13765_v4  ;;  %v17060_v26 = vadd.f32 %v4925_v12, %v2853_v19  ;;  %5317 = vmatprep.subr.bf16.mxu0 %v13770_v3  ;;  %v4927_v24 = vpop.f32.mrb[14].mxu0  ;;  %v5033_v55 = vpop.f32.mrb[30].mxu1  ;;  %v17079_v54 = vadd.f32 %v5031_v48, %v2861_v9  ;;  %v13782_v48 = vld [vmem:[%s19258_s6 + $0x984] ss:$48 sps:$4 sm:$0xff]  }
 0x2fe   :  { %5423 = vmatprep.subr.bf16.mxu1 %v13773_v21  ;;  %v17072_v61 = vadd.f32 %v4927_v24, %v2849_v51  ;;  %v17074_v12 = vadd.f32 %v5033_v55, %v2857_v5  ;;  %v4929_v4 = vpop.f32.mrb[15].mxu0  ;;  %v5035_v3 = vpop.f32.mrb[31].mxu1  ;;  %v13774_v55 = vld [vmem:[%s19258_s6 + $0x920] ss:$48 sps:$4 sm:$0xff]   ;;  %v13785_v24 = vld [vmem:[%s19258_s6 + $0x98c] ss:$48 sps:$4 sm:$0xff]  }
 0x2ff   :  { %v17081_v1 = vadd.f32 %v4929_v4, %v2853_v19  ;;  %v17083_v18 = vadd.f32 %v5035_v3, %v2861_v9  ;;  %v13777_v9 = vld [vmem:[%s19258_s6 + $0x928] ss:$48 sps:$4 sm:$0xff]   ;;  %v13780_v21 = vld [vmem:[%s19258_s6 + $0x980] ss:$48 sps:$4 sm:$0xff]   ;;  %v13794_v4 = vld [vmem:[%s19258_s6 + $0xa44] ss:$48 sps:$4 sm:$0xff]  }
 0x300   :  { %5318 = vmatpush1.bf16.msra.mxu0 %v13768_v35  ;;  %v13788_v35 = vld [vmem:[%s19258_s6 + $0x9e4] ss:$48 sps:$4 sm:$0xff]   ;;  %v13797_v3 = vld [vmem:[%s19258_s6 + $0xa4c] ss:$48 sps:$4 sm:$0xff]  }
 0x301   :  { %5424 = vmatpush1.bf16.msra.mxu1 %v13771_v28  ;;  %5319 = vmatprep.subr.bf16.mxu0 %v13776_v29  ;;  %v13786_v28 = vld [vmem:[%s19258_s6 + $0x9e0] ss:$48 sps:$4 sm:$0xff]   ;;  %v13789_v29 = vld [vmem:[%s19258_s6 + $0x9e8] ss:$48 sps:$4 sm:$0xff]  }
 0x302   :  { %5425 = vmatprep.subr.bf16.mxu1 %v13779_v27  ;;  %v13791_v27 = vld [vmem:[%s19258_s6 + $0x9ec] ss:$48 sps:$4 sm:$0xff]  }
 0x304   :  { %5320 = vmatpush1.bf16.msra.mxu0 %v13774_v55  ;;  %v13792_v55 = vld [vmem:[%s19258_s6 + $0xa40] ss:$48 sps:$4 sm:$0xff]  }
 0x305   :  { %5426 = vmatpush1.bf16.msra.mxu1 %v13777_v9  ;;  %5321 = vmatprep.subr.bf16.mxu0 %v13782_v48  ;;  %v13795_v9 = vld [vmem:[%s19258_s6 + $0xa48] ss:$48 sps:$4 sm:$0xff]   ;;  %v13800_v48 = vld [vmem:[%s19258_s6 + $0xaa4] ss:$48 sps:$4 sm:$0xff]  }
 0x306   :  { %5427 = vmatprep.subr.bf16.mxu1 %v13785_v24  ;;  %v13803_v24 = vld [vmem:[%s19258_s6 + $0xaac] ss:$48 sps:$4 sm:$0xff]  }
 0x308   :  { %5322 = vmatpush1.bf16.msra.mxu0 %v13780_v21  ;;  %v13798_v21 = vld [vmem:[%s19258_s6 + $0xaa0] ss:$48 sps:$4 sm:$0xff]  }
 0x309   :  { %5428 = vmatpush1.bf16.msra.mxu1 %v13783_v6  ;;  %5323 = vmatprep.subr.bf16.mxu0 %v13788_v35  ;;  %v13801_v6 = vld [vmem:[%s19258_s6 + $0xaa8] ss:$48 sps:$4 sm:$0xff]   ;;  %v13806_v35 = vld [vmem:[%s19258_s6 + $0xb04] ss:$48 sps:$4 sm:$0xff]  }
 0x30a   :  { %5429 = vmatprep.subr.bf16.mxu1 %v13791_v27  ;;  %v13809_v27 = vld [vmem:[%s19258_s6 + $0xb0c] ss:$48 sps:$4 sm:$0xff]  }
 0x30c   :  { %5324 = vmatpush1.bf16.msra.mxu0 %v13786_v28  ;;  %v13804_v28 = vld [vmem:[%s19258_s6 + $0xb00] ss:$48 sps:$4 sm:$0xff]  }
 0x30d   :  { %5430 = vmatpush1.bf16.msra.mxu1 %v13789_v29  ;;  %5325 = vmatprep.subr.bf16.mxu0 %v13794_v4  ;;  %v13807_v29 = vld [vmem:[%s19258_s6 + $0xb08] ss:$48 sps:$4 sm:$0xff]   ;;  %v13812_v4 = vld [vmem:[%s19258_s6 + $0xb64] ss:$48 sps:$4 sm:$0xff]  }
 0x30e   :  { %5431 = vmatprep.subr.bf16.mxu1 %v13797_v3  ;;  %v13815_v3 = vld [vmem:[%s19258_s6 + $0xb6c] ss:$48 sps:$4 sm:$0xff]  }
 0x310   :  { %5326 = vmatpush1.bf16.msra.mxu0 %v13792_v55  ;;  %v13810_v55 = vld [vmem:[%s19258_s6 + $0xb60] ss:$48 sps:$4 sm:$0xff]  }
 0x311   :  { %5432 = vmatpush1.bf16.msra.mxu1 %v13795_v9  ;;  %5327 = vmatprep.subr.bf16.mxu0 %v13800_v48  ;;  %v13813_v9 = vld [vmem:[%s19258_s6 + $0xb68] ss:$48 sps:$4 sm:$0xff]   ;;  %v13818_v48 = vld [vmem:[%s19258_s6 + $0xbc4] ss:$48 sps:$4 sm:$0xff]  }
 0x312   :  { %5433 = vmatprep.subr.bf16.mxu1 %v13803_v24  ;;  %v13821_v24 = vld [vmem:[%s19258_s6 + $0xbcc] ss:$48 sps:$4 sm:$0xff]  }
 0x314   :  { %5328 = vmatpush1.bf16.msra.mxu0 %v13798_v21  ;;  %v13816_v21 = vld [vmem:[%s19258_s6 + $0xbc0] ss:$48 sps:$4 sm:$0xff]  }
 0x315   :  { %5434 = vmatpush1.bf16.msra.mxu1 %v13801_v6  ;;  %5329 = vmatprep.subr.bf16.mxu0 %v13806_v35  ;;  %v13819_v6 = vld [vmem:[%s19258_s6 + $0xbc8] ss:$48 sps:$4 sm:$0xff]   ;;  %v19309_v35 = vpack.c.bf16 %v17033_v63, %v17029_v2 }
 0x316   :  { %5435 = vmatprep.subr.bf16.mxu1 %v13809_v27  ;;  %v19310_v27 = vmov 0  }
 0x318   :  { %5330 = vmatpush1.bf16.msra.mxu0 %v13804_v28  ;;  %v19279_v28 = vsub.s32 6, %v15810_v33 }
 0x319   :  { %5436 = vmatpush1.bf16.msra.mxu1 %v13807_v29  ;;  %5331 = vmatprep.subr.bf16.mxu0 %v13812_v4  ;;  %v17195_v29 = vsub.s32 4, %v15810_v33  ;;  %v17199_v4 = vsub.s32 5, %v15810_v33 }
 0x31a   :  { %5437 = vmatprep.subr.bf16.mxu1 %v13815_v3  ;;  %v2873_v2 = vrot.slane %v16984_v11, %v19279_v28 }
 0x31b   :  { %v2869_v63 = vrot.slane %v16984_v11, %v17199_v4 }
 0x31c   :  { %5332 = vmatpush1.bf16.msra.mxu0 %v13810_v55 }
 0x31d   :  { %5438 = vmatpush1.bf16.msra.mxu1 %v13813_v9  ;;  %5333 = vmatprep.subr.bf16.mxu0 %v13818_v48 }
 0x31e   :  { %5439 = vmatprep.subr.bf16.mxu1 %v13821_v24 }
 0x320   :  { %5334 = vmatpush1.bf16.msra.mxu0 %v13816_v21 }
 0x321   :  { %5440 = vmatpush1.bf16.msra.mxu1 %v13819_v6 }
 0x323   :  { %5336 = vmatmul.mubr.bf16.vlgmr.msra.gmra.mrb[24].mxu0 %v16319_v8 }
 0x324   :  { %5442 = vmatmul.mubr.bf16.vlgmr.msra.gmra.mrb[40].mxu1 %v16319_v8  ;;  %5345 = vmatprep.mubr.bf16.mxu0 %v16323_v0  ;;  %v19287_v8 = vsub.s32 7, %v15810_v33 }
 0x325   :  { %5451 = vmatprep.mubr.bf16.mxu1 %v16323_v0  ;;  %v2865_v0 = vrot.slane %v16984_v11, %v17195_v29 }
 0x326   :  { %v2877_v9 = vrot.slane %v16984_v11, %v19287_v8 }
 0x32b   :  { %5346 = vmatmul.mubr.bf16.gmra.mrb[28].mxu0 %v16363_v62 }
 0x32c   :  { %5452 = vmatmul.mubr.bf16.gmra.mrb[44].mxu1 %v16363_v62  ;;  %5510 = vmatprep.mubr.bf16.mxu0 %v19309_v35 }
 0x32d   :  { %5779 = vmatprep.mubr.bf16.mxu1 %v19310_v27 }
 0x374   :  { %v5125_v62 = vpop.f32.mrb[16].mxu0 }
 0x375   :  { %v5231_v3 = vpop.f32.mrb[32].mxu1  ;;  %v5127_v55 = vpop.f32.mrb[17].mxu0  ;;  %v12571_v21 = vadd.f32 %v5125_v62, %v2865_v0 }
 0x376   :  { %v5233_v48 = vpop.f32.mrb[33].mxu1  ;;  %v5129_v24 = vpop.f32.mrb[18].mxu0  ;;  %v12579_v19 = vadd.f32 %v5231_v3, %v2873_v2  ;;  %v12572_v41 = vadd.f32 %v5127_v55, %v2869_v63 }
 0x377   :  { %v12573_v6 = vadd.f32 %v5129_v24, %v2865_v0  ;;  %v5235_v35 = vpop.f32.mrb[34].mxu1  ;;  %v5131_v51 = vpop.f32.mrb[19].mxu0  ;;  %v12580_v37 = vadd.f32 %v5233_v48, %v2877_v9 }
 0x378   :  { %v12581_v5 = vadd.f32 %v5235_v35, %v2873_v2  ;;  %v12574_v7 = vadd.f32 %v5131_v51, %v2869_v63  ;;  %v5237_v28 = vpop.f32.mrb[35].mxu1 }
 0x379   :  { %v5470_v16 = vpack.c.bf16 %v12573_v6, %v12571_v21  ;;  %v12582_v17 = vadd.f32 %v5237_v28, %v2877_v9 }
 0x37a   :  { %v5472_v57 = vpack.c.bf16 %v12581_v5, %v12579_v19  ;;  %v5471_v20 = vpack.c.bf16 %v12574_v7, %v12572_v41 }
 0x37b   :  { %v5473_v32 = vpack.c.bf16 %v12582_v17, %v12580_v37 }
 0x37c   :  { %v5135_v33 = vpop.f32.mrb[20].mxu0  ;;  %5478 = vmatprep.subr.bf16.mxu0 %v5471_v20 }
 0x37d   :  { %v5241_v11 = vpop.f32.mrb[36].mxu1  ;;  %v5137_v8 = vpop.f32.mrb[21].mxu0  ;;  %5479 = vmatpush1.bf16.xpose.msra.mxu0 %v5470_v16  ;;  %v12575_v36 = vadd.f32 %v5135_v33, %v2865_v0  ;;  %v19311_v16 = vpack.c.bf16 %v17022_v10, %v17018_v43  ;;  %v19312_v33 = vpack.c.bf16 %v17035_v13, %v17031_v56  ;;  %v19316_v56 = vpack.c.bf16 %v17083_v18, %v17079_v54 }
 0x37e   :  { %v5243_v62 = vpop.f32.mrb[37].mxu1  ;;  %v5139_v24 = vpop.f32.mrb[22].mxu0  ;;  %5519 = vmatprep.subr.bf16.mxu0 %v5473_v32  ;;  %v12583_v51 = vadd.f32 %v5241_v11, %v2873_v2  ;;  %v12576_v59 = vadd.f32 %v5137_v8, %v2869_v63  ;;  %v19313_v32 = vpack.c.bf16 %v17024_v40, %v17020_v30 }
 0x37f   :  { %v12577_v3 = vadd.f32 %v5139_v24, %v2865_v0  ;;  %v5245_v55 = vpop.f32.mrb[38].mxu1  ;;  %v5141_v35 = vpop.f32.mrb[23].mxu0  ;;  %v12584_v5 = vadd.f32 %v5243_v62, %v2877_v9 }
 0x380   :  { %v12585_v48 = vadd.f32 %v5245_v55, %v2873_v2  ;;  %v12578_v21 = vadd.f32 %v5141_v35, %v2869_v63  ;;  %v5247_v28 = vpop.f32.mrb[39].mxu1 }
 0x381   :  { %v5474_v7 = vpack.c.bf16 %v12577_v3, %v12575_v36  ;;  %v12586_v17 = vadd.f32 %v5247_v28, %v2877_v9  ;;  %v19314_v36 = vpack.c.bf16 %v17081_v1, %v17060_v26  ;;  %v2835_v1 = vld [vmem:[%s19259_s7 + $0x8] sm:$0xf] }
 0x382   :  { %v5476_v37 = vpack.c.bf16 %v12585_v48, %v12583_v51  ;;  %v5475_v20 = vpack.c.bf16 %v12578_v21, %v12576_v59  ;;  %v19315_v59 = vpack.c.bf16 %v17072_v61, %v17068_v25  ;;  %v2881_v43 = vrot.slane %v2835_v1, %v15828_v38 }
 0x383   :  { %v5477_v41 = vpack.c.bf16 %v12586_v17, %v12584_v5  ;;  %v2889_v61 = vrot.slane %v2835_v1, %v16987_v34  ;;  %v2885_v25 = vrot.slane %v2835_v1, %v15831_v39  ;;  %v2893_v54 = vrot.slane %v2835_v1, %v15990_v49 }
 0x384   :  { %5511 = vmatmul.mubr.bf16.vlgmr.msra.gmra.mrb[32].mxu0 %v19311_v16 }
 0x385   :  { %5520 = vmatpush1.bf16.xpose.msra.mxu0 %v5472_v57  ;;  %5551 = vmatprep.mubr.bf16.mxu0 %v19312_v33  ;;  %v19317_v57 = vpack.c.bf16 %v17074_v12, %v17070_v60 }
 0x386   :  { %5560 = vmatprep.subr.bf16.mxu0 %v5475_v20 }
 0x390   :  { %5552 = vmatmul.mubr.bf16.vlgmr.msra.gmra.mrb[32].mxu0 %v19313_v32 }
 0x391   :  { %5561 = vmatpush1.bf16.xpose.msra.mxu0 %v5474_v7  ;;  %5592 = vmatprep.mubr.bf16.mxu0 %v19314_v36 }
 0x392   :  { %5601 = vmatprep.subr.bf16.mxu0 %v5477_v41 }
 0x398   :  { %5593 = vmatmul.mubr.bf16.vlgmr.msra.gmra.mrb[36].mxu0 %v19315_v59 }
 0x399   :  { %5602 = vmatpush1.bf16.xpose.msra.mxu0 %v5476_v37  ;;  %5633 = vmatprep.mubr.bf16.mxu0 %v19316_v56 }
 0x3a4   :  { %5634 = vmatmul.mubr.bf16.vlgmr.msra.gmra.mrb[36].mxu0 %v19317_v57 }
 0x3a5   :  { %5736 = vmatprep.mubr.bf16.mxu0 %v19310_v27 }
 0x3f6   :  { %v5337_v30 = vpop.f32.mrb[24].mxu0 }
 0x3f7   :  { %v5443_v10 = vpop.f32.mrb[40].mxu1  ;;  %v5339_v18 = vpop.f32.mrb[25].mxu0  ;;  %v12587_v13 = vadd.f32 %v5337_v30, %v2881_v43 }
 0x3f8   :  { %v5445_v40 = vpop.f32.mrb[41].mxu1  ;;  %v5341_v60 = vpop.f32.mrb[26].mxu0  ;;  %v12595_v8 = vadd.f32 %v5443_v10, %v2889_v61  ;;  %v12588_v0 = vadd.f32 %v5339_v18, %v2885_v25 }
 0x3f9   :  { %v12589_v26 = vadd.f32 %v5341_v60, %v2881_v43  ;;  %v5447_v12 = vpop.f32.mrb[42].mxu1  ;;  %v5343_v19 = vpop.f32.mrb[27].mxu0  ;;  %v12596_v6 = vadd.f32 %v5445_v40, %v2893_v54 }
 0x3fa   :  { %v12597_v2 = vadd.f32 %v5447_v12, %v2889_v61  ;;  %v12590_v63 = vadd.f32 %v5343_v19, %v2885_v25  ;;  %v5449_v9 = vpop.f32.mrb[43].mxu1 }
 0x3fb   :  { %v5693_v11 = vpack.c.bf16 %v12589_v26, %v12587_v13  ;;  %v12598_v62 = vadd.f32 %v5449_v9, %v2893_v54 }
 0x3fc   :  { %v5695_v24 = vpack.c.bf16 %v12597_v2, %v12595_v8  ;;  %v5694_v3 = vpack.c.bf16 %v12590_v63, %v12588_v0 }
 0x3fd   :  { %v5696_v55 = vpack.c.bf16 %v12598_v62, %v12596_v6 }
 0x3fe   :  { %v5347_v35 = vpop.f32.mrb[28].mxu0  ;;  %5704 = vmatprep.subr.bf16.mxu0 %v5694_v3 }
 0x3ff   :  { %v17240_v51 = vadd.f32 %v5347_v35, %v2881_v43  ;;  %v5453_v48 = vpop.f32.mrb[44].mxu1  ;;  %5747 = vmatprep.subr.bf16.mxu1 %v5696_v55  ;;  %v5349_v21 = vpop.f32.mrb[29].mxu0  ;;  %5705 = vmatpush1.bf16.msra.mxu0 %v5693_v11 }
 0x400   :  { %v17242_v28 = vadd.f32 %v5453_v48, %v2889_v61  ;;  %v5455_v5 = vpop.f32.mrb[45].mxu1  ;;  %5748 = vmatpush1.bf16.msra.mxu1 %v5695_v24  ;;  %v5351_v7 = vpop.f32.mrb[30].mxu0  ;;  %v12592_v41 = vadd.f32 %v5349_v21, %v2885_v25 }
 0x401   :  { %v17244_v17 = vadd.f32 %v5351_v7, %v2881_v43  ;;  %v5457_v37 = vpop.f32.mrb[46].mxu1  ;;  %v5353_v20 = vpop.f32.mrb[31].mxu0  ;;  %v12600_v36 = vadd.f32 %v5455_v5, %v2893_v54 }
 0x402   :  { %v17246_v16 = vadd.f32 %v5457_v37, %v2889_v61  ;;  %v12594_v33 = vadd.f32 %v5353_v20, %v2885_v25  ;;  %v5459_v32 = vpop.f32.mrb[47].mxu1 }
 0x403   :  { %v5697_v59 = vpack.c.bf16 %v17244_v17, %v17240_v51  ;;  %v12602_v56 = vadd.f32 %v5459_v32, %v2893_v54  ;;  %v17278_v51 = vadd.f32 %v15983_v45, %v15994_v52  ;;  %v13830_v45 = vld [vmem:[%s19258_s6 + $0xc64] ss:$48 sps:$4 sm:$0xff]  }
 0x404   :  { %v5699_v57 = vpack.c.bf16 %v17246_v16, %v17242_v28  ;;  %v5698_v1 = vpack.c.bf16 %v12594_v33, %v12592_v41  ;;  %v17282_v28 = vadd.f32 %v15987_v47, %v15994_v52  ;;  %v13833_v47 = vld [vmem:[%s19258_s6 + $0xc6c] ss:$48 sps:$4 sm:$0xff]  }
 0x405   :  { %v5700_v30 = vpack.c.bf16 %v12602_v56, %v12600_v36 }
 0x406   :  { %5793 = vmatprep.subr.bf16.mxu0 %v5698_v1  ;;  %v17298_v52 = vpack.c.bf16 %v17282_v28, %v17278_v51 }
 0x407   :  { %5836 = vmatprep.subr.bf16.mxu1 %v5700_v30 }
 0x463   :  { %v5553_v43 = vpop.f32.mrb[32].mxu0 }
 0x464   :  { %v5642_v10 = vmul.f32 0.044194173, %v5553_v43  ;;  %v5555_v18 = vpop.f32.mrb[33].mxu0 }
 0x465   :  { %v5556_v61 = vpop.f32.mrb[34].mxu0 }
 0x466   :  { %v5643_v40 = vmul.f32 0.044194173, %v5556_v61  ;;  %v5558_v25 = vpop.f32.mrb[35].mxu0  ;;  %v5647_v60 = vsel %vm5646_vm0, %v5642_v10, -inf }
 0x467   :  { %5648 = vmax.xlane.f32.xlu0 %v5647_v60  ;;  %v13824_v60 = vld [vmem:[%s19258_s6 + $0xc04] ss:$48 sps:$4 sm:$0xff]  }
 0x468   :  { %v5650_v13 = vsel %vm5646_vm0, %v5643_v40, -inf }
 0x469   :  { %5651 = vmax.xlane.f32.xlu1 %v5650_v13  ;;  %v13827_v13 = vld [vmem:[%s19258_s6 + $0xc0c] ss:$48 sps:$4 sm:$0xff]  }
 0x477   :  { %v5635_v54 = vpop.f32.mrb[36].mxu0 }
 0x478   :  { %v5644_v26 = vmul.f32 0.044194173, %v5635_v54  ;;  %v5637_v12 = vpop.f32.mrb[37].mxu0 }
 0x479   :  { %v5638_v19 = vpop.f32.mrb[38].mxu0 }
 0x47a   :  { %v5645_v8 = vmul.f32 0.044194173, %v5638_v19  ;;  %v5640_v0 = vpop.f32.mrb[39].mxu0  ;;  %v5653_v2 = vsel %vm5646_vm0, %v5644_v26, -inf }
 0x47b   :  { %5654 = vmax.xlane.f32.xlu0 %v5653_v2  ;;  %v13828_v0 = vld [vmem:[%s19258_s6 + $0xc60] ss:$48 sps:$4 sm:$0xff]   ;;  %v13831_v2 = vld [vmem:[%s19258_s6 + $0xc68] ss:$48 sps:$4 sm:$0xff]  }
 0x47c   :  { %v5656_v63 = vsel %vm5646_vm0, %v5645_v8, -inf }
 0x47d   :  { %5657 = vmax.xlane.f32.xlu1 %v5656_v63  ;;  %v13836_v63 = vld [vmem:[%s19258_s6 + $0xcc4] ss:$48 sps:$4 sm:$0xff]  }
 0x4f4   :  { %v5649_v9 = vpop.xlane.xlu0 %5648 }
 0x4f5   :  { %v5659_v6 = vsub.f32 %v5642_v10, %v5649_v9  ;;  %v13839_v9 = vld [vmem:[%s19258_s6 + $0xccc] ss:$48 sps:$4 sm:$0xff]  }
 0x4f6   :  { %v5652_v11 = vpop.xlane.xlu1 %5651 }
 0x4f7   :  { %v5663_v62 = vmul.f32 1.442695, %v5659_v6  ;;  %v5660_v24 = vsub.f32 %v5643_v40, %v5652_v11  ;;  %v13834_v6 = vld [vmem:[%s19258_s6 + $0xcc0] ss:$48 sps:$4 sm:$0xff]   ;;  %v13837_v11 = vld [vmem:[%s19258_s6 + $0xcc8] ss:$48 sps:$4 sm:$0xff]  }
 0x4f9   :  { %14592 = vpow2.f32 %v5663_v62  ;;  %v5665_v3 = vmul.f32 1.442695, %v5660_v24  ;;  %v13842_v62 = vld [vmem:[%s19258_s6 + $0xd24] ss:$48 sps:$4 sm:$0xff]   ;;  %v13845_v24 = vld [vmem:[%s19258_s6 + $0xd2c] ss:$48 sps:$4 sm:$0xff]  }
 0x4fb   :  { %14594 = vpow2.f32 %v5665_v3  ;;  %v13840_v3 = vld [vmem:[%s19258_s6 + $0xd20] ss:$48 sps:$4 sm:$0xff]  }
 0x503   :  { %v14593_v55 = vpop.eup %14592 }
 0x504   :  { %v5671_v35 = vsel %vm5646_vm0, %v14593_v55, 0.0 }
 0x505   :  { %v14595_v48 = vpop.eup %14594  ;;  %5672 = vadd.xlane.f32.xlu0 %v5671_v35  ;;  %v13848_v35 = vld [vmem:[%s19258_s6 + $0xd84] ss:$48 sps:$4 sm:$0xff]  }
 0x506   :  { %v5674_v21 = vsel %vm5646_vm0, %v14595_v48, 0.0 }
 0x507   :  { %5675 = vadd.xlane.f32.xlu1 %v5674_v21  ;;  %v13846_v21 = vld [vmem:[%s19258_s6 + $0xd80] ss:$48 sps:$4 sm:$0xff]  }
 0x508   :  { %v5655_v5 = vpop.xlane.xlu0 %5654 }
 0x509   :  { %v5661_v7 = vsub.f32 %v5644_v26, %v5655_v5  ;;  %v13849_v5 = vld [vmem:[%s19258_s6 + $0xd88] ss:$48 sps:$4 sm:$0xff]  }
 0x50a   :  { %v5658_v37 = vpop.xlane.xlu1 %5657 }
 0x50b   :  { %v5667_v20 = vmul.f32 1.442695, %v5661_v7  ;;  %v5662_v41 = vsub.f32 %v5645_v8, %v5658_v37  ;;  %v13854_v7 = vld [vmem:[%s19258_s6 + $0xde4] ss:$48 sps:$4 sm:$0xff]   ;;  %v13857_v37 = vld [vmem:[%s19258_s6 + $0xdec] ss:$48 sps:$4 sm:$0xff]  }
 0x50d   :  { %14596 = vpow2.f32 %v5667_v20  ;;  %v5669_v33 = vmul.f32 1.442695, %v5662_v41  ;;  %v13852_v20 = vld [vmem:[%s19258_s6 + $0xde0] ss:$48 sps:$4 sm:$0xff]   ;;  %v13855_v41 = vld [vmem:[%s19258_s6 + $0xde8] ss:$48 sps:$4 sm:$0xff]  }
 0x50f   :  { %14598 = vpow2.f32 %v5669_v33  ;;  %v13860_v33 = vld [vmem:[%s19258_s6 + $0xe44] ss:$48 sps:$4 sm:$0xff]  }
 0x517   :  { %v14597_v32 = vpop.eup %14596 }
 0x518   :  { %v5677_v36 = vsel %vm5646_vm0, %v14597_v32, 0.0 }
 0x519   :  { %v14599_v56 = vpop.eup %14598  ;;  %5678 = vadd.xlane.f32.xlu0 %v5677_v36  ;;  %v13858_v36 = vld [vmem:[%s19258_s6 + $0xe40] ss:$48 sps:$4 sm:$0xff]  }
 0x51a   :  { %v5680_v1 = vsel %vm5646_vm0, %v14599_v56, 0.0 }
 0x51b   :  { %5681 = vadd.xlane.f32.xlu1 %v5680_v1  ;;  %v13866_v1 = vld [vmem:[%s19258_s6 + $0xea4] ss:$48 sps:$4 sm:$0xff]  }
 0x592   :  { %v5673_v30 = vpop.xlane.xlu0 %5672 }
 0x593   :  { %14600 = vrcp.f32 %v5673_v30  ;;  %v13869_v30 = vld [vmem:[%s19258_s6 + $0xeac] ss:$48 sps:$4 sm:$0xff]  }
 0x594   :  { %v5676_v43 = vpop.xlane.xlu1 %5675 }
 0x595   :  { %14602 = vrcp.f32 %v5676_v43  ;;  %v13864_v43 = vld [vmem:[%s19258_s6 + $0xea0] ss:$48 sps:$4 sm:$0xff]  }
 0x59d   :  { %v14601_v10 = vpop.eup %14600 }
 0x59e   :  { %v5687_v61 = vmul.f32 %v14601_v10, %v14593_v55  ;;  %v13843_v55 = vld [vmem:[%s19258_s6 + $0xd28] ss:$48 sps:$4 sm:$0xff]  }
 0x59f   :  { %v14603_v18 = vpop.eup %14602  ;;  %v13867_v10 = vld [vmem:[%s19258_s6 + $0xea8] ss:$48 sps:$4 sm:$0xff]  }
 0x5a0   :  { %v5688_v40 = vmul.f32 %v14603_v18, %v14595_v48  ;;  %v13851_v48 = vld [vmem:[%s19258_s6 + $0xd8c] ss:$48 sps:$4 sm:$0xff]   ;;  %v13872_v18 = vld [vmem:[%s19258_s6 + $0xf04] ss:$48 sps:$4 sm:$0xff]  }
 0x5a2   :  { %v5691_v25 = vpack.c.bf16 %v5688_v40, %v5687_v61  ;;  %v13875_v61 = vld [vmem:[%s19258_s6 + $0xf0c] ss:$48 sps:$4 sm:$0xff]   ;;  %v13870_v40 = vld [vmem:[%s19258_s6 + $0xf00] ss:$48 sps:$4 sm:$0xff]  }
 0x5a4   :  { %11605 = vmatmul.mubr.msk.bf16.vlgmr.msra.gmra.mrb[40].mxu0 %vm5646_vm0, %v5691_v25  ;;  %11606 = vmatmul.mubr.msk.bf16.vlgmr.msra.gmra.mrb[48].mxu1 %vm5646_vm0, %v5691_v25  ;;  %v13873_v25 = vld [vmem:[%s19258_s6 + $0xf08] ss:$48 sps:$4 sm:$0xff]  }
 0x5a5   :  { %5794 = vmatpush1.bf16.msra.mxu0 %v5697_v59  ;;  %5837 = vmatpush1.bf16.msra.mxu1 %v5699_v57  ;;  %v13822_v59 = vld [vmem:[%s19258_s6 + $0xc00] ss:$48 sps:$4 sm:$0xff]   ;;  %v13825_v57 = vld [vmem:[%s19258_s6 + $0xc08] ss:$48 sps:$4 sm:$0xff]  }
 0x5a6   :  { %v5679_v54 = vpop.xlane.xlu0 %5678  ;;  %5825 = vmatprep.mubr.bf16.mxu0 %v19310_v27  ;;  %5868 = vmatprep.mubr.bf16.mxu1 %v19310_v27 }
 0x5a7   :  { %14604 = vrcp.f32 %v5679_v54  ;;  %8257 = vmatprep.subr.bf16.mxu0 %v13824_v60  ;;  %8363 = vmatprep.subr.bf16.mxu1 %v13827_v13  ;;  %v13878_v60 = vld [vmem:[%s19258_s6 + $0xf64] ss:$48 sps:$4 sm:$0xff]   ;;  %v13881_v13 = vld [vmem:[%s19258_s6 + $0xf6c] ss:$48 sps:$4 sm:$0xff]   ;;  %v13876_v54 = vld [vmem:[%s19258_s6 + $0xf60] ss:$48 sps:$4 sm:$0xff]  }
 0x5a8   :  { %v5682_v26 = vpop.xlane.xlu1 %5681 }
 0x5a9   :  { %14606 = vrcp.f32 %v5682_v26  ;;  %v13879_v26 = vld [vmem:[%s19258_s6 + $0xf68] ss:$48 sps:$4 sm:$0xff]  }
 0x5b1   :  { %v14605_v12 = vpop.eup %14604 }
 0x5b2   :  { %v5689_v17 = vmul.f32 %v14605_v12, %v14597_v32  ;;  %v13863_v32 = vld [vmem:[%s19258_s6 + $0xe4c] ss:$48 sps:$4 sm:$0xff]   ;;  %v13884_v12 = vld [vmem:[%s19258_s6 + $0xfc4] ss:$48 sps:$4 sm:$0xff]  }
 0x5b3   :  { %v14607_v19 = vpop.eup %14606 }
 0x5b4   :  { %v5690_v16 = vmul.f32 %v14607_v19, %v14599_v56  ;;  %v13861_v56 = vld [vmem:[%s19258_s6 + $0xe48] ss:$48 sps:$4 sm:$0xff]   ;;  %v13887_v19 = vld [vmem:[%s19258_s6 + $0xfcc] ss:$48 sps:$4 sm:$0xff]  }
 0x5b6   :  { %v5692_v8 = vpack.c.bf16 %v5690_v16, %v5689_v17  ;;  %v13882_v17 = vld [vmem:[%s19258_s6 + $0xfc0] ss:$48 sps:$4 sm:$0xff]   ;;  %v13885_v16 = vld [vmem:[%s19258_s6 + $0xfc8] ss:$48 sps:$4 sm:$0xff]  }
 0x5b8   :  { %11607 = vmatmul.mubr.msk.bf16.vlgmr.msra.gmra.mrb[44].mxu0 %vm5646_vm0, %v5692_v8  ;;  %11608 = vmatmul.mubr.msk.bf16.vlgmr.msra.gmra.mrb[52].mxu1 %vm5646_vm0, %v5692_v8  ;;  %v13888_v8 = vld [vmem:[%s19258_s6 + $0x1020] ss:$48 sps:$4 sm:$0xff]  }
 0x5b9   :  { %8258 = vmatpush1.bf16.msra.mxu0 %v13822_v59  ;;  %8364 = vmatpush1.bf16.msra.mxu1 %v13825_v57  ;;  %v13890_v59 = vld [vmem:[%s19258_s6 + $0x1024] ss:$48 sps:$4 sm:$0xff]   ;;  %v13893_v57 = vld [vmem:[%s19258_s6 + $0x102c] ss:$48 sps:$4 sm:$0xff]  }
 0x5ba   :  { %8289 = vmatprep.mubr.bf16.mxu0 %v17298_v52  ;;  %8395 = vmatprep.mubr.bf16.mxu1 %v17298_v52 }
 0x5bb   :  { %8259 = vmatprep.subr.bf16.mxu0 %v13830_v45  ;;  %8365 = vmatprep.subr.bf16.mxu1 %v13833_v47  ;;  %v13891_v45 = vld [vmem:[%s19258_s6 + $0x1028] ss:$48 sps:$4 sm:$0xff]   ;;  %v13896_v47 = vld [vmem:[%s19258_s6 + $0x1084] ss:$48 sps:$4 sm:$0xff]  }
 0x5bd   :  { %8260 = vmatpush1.bf16.msra.mxu0 %v13828_v0  ;;  %8366 = vmatpush1.bf16.msra.mxu1 %v13831_v2  ;;  %v13899_v0 = vld [vmem:[%s19258_s6 + $0x108c] ss:$48 sps:$4 sm:$0xff]   ;;  %v13894_v2 = vld [vmem:[%s19258_s6 + $0x1080] ss:$48 sps:$4 sm:$0xff]  }
 0x5be   :  { %8261 = vmatprep.subr.bf16.mxu0 %v13836_v63  ;;  %8367 = vmatprep.subr.bf16.mxu1 %v13839_v9  ;;  %v13897_v63 = vld [vmem:[%s19258_s6 + $0x1088] ss:$48 sps:$4 sm:$0xff]   ;;  %v13902_v9 = vld [vmem:[%s19258_s6 + $0x10e4] ss:$48 sps:$4 sm:$0xff]  }
 0x5c1   :  { %8262 = vmatpush1.bf16.msra.mxu0 %v13834_v6  ;;  %8368 = vmatpush1.bf16.msra.mxu1 %v13837_v11  ;;  %v13905_v6 = vld [vmem:[%s19258_s6 + $0x10ec] ss:$48 sps:$4 sm:$0xff]   ;;  %v13900_v11 = vld [vmem:[%s19258_s6 + $0x10e0] ss:$48 sps:$4 sm:$0xff]  }
 0x5c2   :  { %8263 = vmatprep.subr.bf16.mxu0 %v13842_v62  ;;  %8369 = vmatprep.subr.bf16.mxu1 %v13845_v24  ;;  %v13903_v62 = vld [vmem:[%s19258_s6 + $0x10e8] ss:$48 sps:$4 sm:$0xff]   ;;  %v13908_v24 = vld [vmem:[%s19258_s6 + $0x1144] ss:$48 sps:$4 sm:$0xff]  }
 0x5c5   :  { %8264 = vmatpush1.bf16.msra.mxu0 %v13840_v3  ;;  %8370 = vmatpush1.bf16.msra.mxu1 %v13843_v55  ;;  %v13911_v3 = vld [vmem:[%s19258_s6 + $0x114c] ss:$48 sps:$4 sm:$0xff]   ;;  %v13906_v55 = vld [vmem:[%s19258_s6 + $0x1140] ss:$48 sps:$4 sm:$0xff]  }
 0x5c6   :  { %8265 = vmatprep.subr.bf16.mxu0 %v13848_v35  ;;  %8371 = vmatprep.subr.bf16.mxu1 %v13851_v48  ;;  %v13909_v35 = vld [vmem:[%s19258_s6 + $0x1148] ss:$48 sps:$4 sm:$0xff]   ;;  %v17469_v48 = vld [vmem:[%s19257_s5] sm:$0x3f] }
 0x5c9   :  { %8266 = vmatpush1.bf16.msra.mxu0 %v13846_v21  ;;  %8372 = vmatpush1.bf16.msra.mxu1 %v13849_v5  ;;  %v1296_v21 = vrot.slane %v17469_v48, %v16987_v34  ;;  %v13914_v5 = vld [vmem:[%s19258_s6 + $0x11a4] ss:$48 sps:$4 sm:$0xff]  }
 0x5ca   :  { %8267 = vmatprep.subr.bf16.mxu0 %v13854_v7  ;;  %8373 = vmatprep.subr.bf16.mxu1 %v13857_v37  ;;  %v13917_v7 = vld [vmem:[%s19258_s6 + $0x11ac] ss:$48 sps:$4 sm:$0xff]   ;;  %v13912_v37 = vld [vmem:[%s19258_s6 + $0x11a0] ss:$48 sps:$4 sm:$0xff]  }
 0x5cd   :  { %8268 = vmatpush1.bf16.msra.mxu0 %v13852_v20  ;;  %8374 = vmatpush1.bf16.msra.mxu1 %v13855_v41  ;;  %v13915_v20 = vld [vmem:[%s19258_s6 + $0x11a8] ss:$48 sps:$4 sm:$0xff]   ;;  %v17486_v41 = vadd.f32 %v15981_v44, %v1296_v21  ;;  %v13918_v44 = vld [vmem:[%s19258_s6 + $0x1200] ss:$48 sps:$4 sm:$0xff]  }
 0x5ce   :  { %8269 = vmatprep.subr.bf16.mxu0 %v13860_v33  ;;  %8375 = vmatprep.subr.bf16.mxu1 %v13863_v32  ;;  %v17489_v33 = vadd.f32 %v15985_v46, %v1296_v21  ;;  %v13920_v32 = vld [vmem:[%s19258_s6 + $0x1204] ss:$48 sps:$4 sm:$0xff]  }
 0x5d0   :  { %v17502_v46 = vpack.c.bf16 %v17489_v33, %v17486_v41 }
 0x5d1   :  { %8270 = vmatpush1.bf16.msra.mxu0 %v13858_v36  ;;  %8376 = vmatpush1.bf16.msra.mxu1 %v13861_v56  ;;  %v13923_v36 = vld [vmem:[%s19258_s6 + $0x120c] ss:$48 sps:$4 sm:$0xff]   ;;  %v13921_v56 = vld [vmem:[%s19258_s6 + $0x1208] ss:$48 sps:$4 sm:$0xff]  }
 0x5d2   :  { %8271 = vmatprep.subr.bf16.mxu0 %v13866_v1  ;;  %8377 = vmatprep.subr.bf16.mxu1 %v13869_v30  ;;  %v17509_v1 = vpack.c.bf16 %v16004_v50, %v15999_v53  ;;  %v17513_v30 = vrot.slane %v17469_v48, %v17199_v4 }
 0x5d5   :  { %8272 = vmatpush1.bf16.msra.mxu0 %v13864_v43  ;;  %8378 = vmatpush1.bf16.msra.mxu1 %v13867_v10  ;;  %v13926_v43 = vld [vmem:[%s19258_s6 + $0x1264] ss:$48 sps:$4 sm:$0xff]   ;;  %v13929_v10 = vld [vmem:[%s19258_s6 + $0x126c] ss:$48 sps:$4 sm:$0xff]  }
 0x5d6   :  { %8273 = vmatprep.subr.bf16.mxu0 %v13872_v18  ;;  %8379 = vmatprep.subr.bf16.mxu1 %v13875_v61  ;;  %v13924_v18 = vld [vmem:[%s19258_s6 + $0x1260] ss:$48 sps:$4 sm:$0xff]   ;;  %v17528_v61 = vadd.f32 %v15996_v42, %v1296_v21  ;;  %v17546_v42 = vadd.f32 %v16207_v23, %v17513_v30 }
 0x5d9   :  { %8274 = vmatpush1.bf16.msra.mxu0 %v13870_v40  ;;  %8380 = vmatpush1.bf16.msra.mxu1 %v13873_v25  ;;  %v17531_v40 = vadd.f32 %v16001_v58, %v1296_v21  ;;  %v13927_v25 = vld [vmem:[%s19258_s6 + $0x1268] ss:$48 sps:$4 sm:$0xff]   ;;  %v13935_v58 = vld [vmem:[%s19258_s6 + $0x12cc] ss:$48 sps:$4 sm:$0xff]   ;;  %v13968_v21 = vld [vmem:[%s19258_s6 + $0x1504] ss:$48 sps:$4 sm:$0xff]  }
 0x5da   :  { %8275 = vmatprep.subr.bf16.mxu0 %v13878_v60  ;;  %8381 = vmatprep.subr.bf16.mxu1 %v13881_v13  ;;  %v13932_v60 = vld [vmem:[%s19258_s6 + $0x12c4] ss:$48 sps:$4 sm:$0xff]   ;;  %v17542_v13 = vadd.f32 %v16203_v22, %v17513_v30  ;;  %v13933_v22 = vld [vmem:[%s19258_s6 + $0x12c8] ss:$48 sps:$4 sm:$0xff]  }
 0x5dc   :  { %v17563_v23 = vpack.c.bf16 %v17546_v42, %v17542_v13 }
 0x5dd   :  { %8276 = vmatpush1.bf16.msra.mxu0 %v13876_v54  ;;  %8382 = vmatpush1.bf16.msra.mxu1 %v13879_v26  ;;  %v13930_v54 = vld [vmem:[%s19258_s6 + $0x12c0] ss:$48 sps:$4 sm:$0xff]   ;;  %v17556_v26 = vpack.c.bf16 %v17531_v40, %v17528_v61 }
 0x5de   :  { %8277 = vmatprep.subr.bf16.mxu0 %v13884_v12  ;;  %8383 = vmatprep.subr.bf16.mxu1 %v13887_v19  ;;  %v13938_v12 = vld [vmem:[%s19258_s6 + $0x1324] ss:$48 sps:$4 sm:$0xff]   ;;  %v13941_v19 = vld [vmem:[%s19258_s6 + $0x132c] ss:$48 sps:$4 sm:$0xff]  }
 0x5e1   :  { %8278 = vmatpush1.bf16.msra.mxu0 %v13882_v17  ;;  %8384 = vmatpush1.bf16.msra.mxu1 %v13885_v16  ;;  %v13936_v17 = vld [vmem:[%s19258_s6 + $0x1320] ss:$48 sps:$4 sm:$0xff]   ;;  %v13939_v16 = vld [vmem:[%s19258_s6 + $0x1328] ss:$48 sps:$4 sm:$0xff]  }
 0x5e2   :  { %8279 = vmatprep.subr.bf16.mxu0 %v13890_v59  ;;  %8385 = vmatprep.subr.bf16.mxu1 %v13893_v57  ;;  %v13944_v59 = vld [vmem:[%s19258_s6 + $0x1384] ss:$48 sps:$4 sm:$0xff]   ;;  %v13947_v57 = vld [vmem:[%s19258_s6 + $0x138c] ss:$48 sps:$4 sm:$0xff]  }
 0x5e5   :  { %8280 = vmatpush1.bf16.msra.mxu0 %v13888_v8  ;;  %8386 = vmatpush1.bf16.msra.mxu1 %v13891_v45  ;;  %v13942_v8 = vld [vmem:[%s19258_s6 + $0x1380] ss:$48 sps:$4 sm:$0xff]   ;;  %v13945_v45 = vld [vmem:[%s19258_s6 + $0x1388] ss:$48 sps:$4 sm:$0xff]  }
 0x5e6   :  { %8281 = vmatprep.subr.bf16.mxu0 %v13896_v47  ;;  %8387 = vmatprep.subr.bf16.mxu1 %v13899_v0  ;;  %v13950_v47 = vld [vmem:[%s19258_s6 + $0x13e4] ss:$48 sps:$4 sm:$0xff]   ;;  %v13953_v0 = vld [vmem:[%s19258_s6 + $0x13ec] ss:$48 sps:$4 sm:$0xff]  }
 0x5e9   :  { %8282 = vmatpush1.bf16.msra.mxu0 %v13894_v2  ;;  %8388 = vmatpush1.bf16.msra.mxu1 %v13897_v63  ;;  %v13948_v2 = vld [vmem:[%s19258_s6 + $0x13e0] ss:$48 sps:$4 sm:$0xff]   ;;  %v13951_v63 = vld [vmem:[%s19258_s6 + $0x13e8] ss:$48 sps:$4 sm:$0xff]  }
 0x5ea   :  { %8283 = vmatprep.subr.bf16.mxu0 %v13902_v9  ;;  %8389 = vmatprep.subr.bf16.mxu1 %v13905_v6  ;;  %v13956_v9 = vld [vmem:[%s19258_s6 + $0x1444] ss:$48 sps:$4 sm:$0xff]   ;;  %v13959_v6 = vld [vmem:[%s19258_s6 + $0x144c] ss:$48 sps:$4 sm:$0xff]  }
 0x5ed   :  { %8284 = vmatpush1.bf16.msra.mxu0 %v13900_v11  ;;  %8390 = vmatpush1.bf16.msra.mxu1 %v13903_v62  ;;  %v13954_v11 = vld [vmem:[%s19258_s6 + $0x1440] ss:$48 sps:$4 sm:$0xff]   ;;  %v13957_v62 = vld [vmem:[%s19258_s6 + $0x1448] ss:$48 sps:$4 sm:$0xff]  }
 0x5ee   :  { %8285 = vmatprep.subr.bf16.mxu0 %v13908_v24  ;;  %8391 = vmatprep.subr.bf16.mxu1 %v13911_v3  ;;  %v13962_v24 = vld [vmem:[%s19258_s6 + $0x14a4] ss:$48 sps:$4 sm:$0xff]   ;;  %v13965_v3 = vld [vmem:[%s19258_s6 + $0x14ac] ss:$48 sps:$4 sm:$0xff]  }
 0x5f1   :  { %8286 = vmatpush1.bf16.msra.mxu0 %v13906_v55  ;;  %8392 = vmatpush1.bf16.msra.mxu1 %v13909_v35  ;;  %v13960_v55 = vld [vmem:[%s19258_s6 + $0x14a0] ss:$48 sps:$4 sm:$0xff]   ;;  %v13963_v35 = vld [vmem:[%s19258_s6 + $0x14a8] ss:$48 sps:$4 sm:$0xff]  }
 0x5f2   :  { %8287 = vmatprep.subr.bf16.mxu0 %v13914_v5  ;;  %8393 = vmatprep.subr.bf16.mxu1 %v13917_v7  ;;  %v13971_v5 = vld [vmem:[%s19258_s6 + $0x150c] ss:$48 sps:$4 sm:$0xff]   ;;  %v13966_v7 = vld [vmem:[%s19258_s6 + $0x1500] ss:$48 sps:$4 sm:$0xff]  }
 0x5f5   :  { %8288 = vmatpush1.bf16.msra.mxu0 %v13912_v37  ;;  %8394 = vmatpush1.bf16.msra.mxu1 %v13915_v20  ;;  %v13969_v37 = vld [vmem:[%s19258_s6 + $0x1508] ss:$48 sps:$4 sm:$0xff]   ;;  %v13974_v20 = vld [vmem:[%s19258_s6 + $0x1564] ss:$48 sps:$4 sm:$0xff]  }
 0x5f6   :  { %8310 = vmatprep.subr.bf16.mxu0 %v13920_v32  ;;  %8416 = vmatprep.subr.bf16.mxu1 %v13923_v36  ;;  %v13977_v32 = vld [vmem:[%s19258_s6 + $0x156c] ss:$48 sps:$4 sm:$0xff]   ;;  %v13972_v36 = vld [vmem:[%s19258_s6 + $0x1560] ss:$48 sps:$4 sm:$0xff]  }
 0x5f8   :  { %8290 = vmatmul.mubr.bf16.vlgmr.msra.gmra.mrb[48].mxu0 %v17502_v46  ;;  %8396 = vmatmul.mubr.bf16.vlgmr.msra.gmra.mrb[56].mxu1 %v17502_v46 }
 0x5f9   :  { %8299 = vmatprep.mubr.bf16.mxu0 %v17509_v1  ;;  %8311 = vmatpush1.bf16.msra.mxu0 %v13918_v44  ;;  %v13975_v44 = vld [vmem:[%s19258_s6 + $0x1568] ss:$48 sps:$4 sm:$0xff]  }
 0x5fa   :  { %8405 = vmatprep.mubr.bf16.mxu1 %v17509_v1  ;;  %8417 = vmatpush1.bf16.msra.mxu1 %v13921_v56  ;;  %v13980_v56 = vld [vmem:[%s19258_s6 + $0x15c4] ss:$48 sps:$4 sm:$0xff]  }
 0x5fb   :  { %8312 = vmatprep.subr.bf16.mxu0 %v13926_v43  ;;  %8418 = vmatprep.subr.bf16.mxu1 %v13929_v10  ;;  %v13983_v43 = vld [vmem:[%s19258_s6 + $0x15cc] ss:$48 sps:$4 sm:$0xff]   ;;  %v13978_v10 = vld [vmem:[%s19258_s6 + $0x15c0] ss:$48 sps:$4 sm:$0xff]  }
 0x5fd   :  { %8313 = vmatpush1.bf16.msra.mxu0 %v13924_v18  ;;  %v13981_v18 = vld [vmem:[%s19258_s6 + $0x15c8] ss:$48 sps:$4 sm:$0xff]  }
 0x5fe   :  { %8419 = vmatpush1.bf16.msra.mxu1 %v13927_v25  ;;  %8314 = vmatprep.subr.bf16.mxu0 %v13932_v60  ;;  %v13986_v25 = vld [vmem:[%s19258_s6 + $0x1624] ss:$48 sps:$4 sm:$0xff]   ;;  %v13989_v60 = vld [vmem:[%s19258_s6 + $0x162c] ss:$48 sps:$4 sm:$0xff]  }
 0x5ff   :  { %8420 = vmatprep.subr.bf16.mxu1 %v13935_v58  ;;  %v13984_v58 = vld [vmem:[%s19258_s6 + $0x1620] ss:$48 sps:$4 sm:$0xff]  }
 0x600   :  { %8300 = vmatmul.mubr.bf16.gmra.mrb[52].mxu0 %v17556_v26  ;;  %8406 = vmatmul.mubr.bf16.gmra.mrb[60].mxu1 %v17556_v26 }
 0x601   :  { %8315 = vmatpush1.bf16.msra.mxu0 %v13930_v54  ;;  %8342 = vmatprep.mubr.bf16.mxu0 %v17563_v23  ;;  %v13987_v54 = vld [vmem:[%s19258_s6 + $0x1628] ss:$48 sps:$4 sm:$0xff]  }
 0x602   :  { %8421 = vmatpush1.bf16.msra.mxu1 %v13933_v22  ;;  %8448 = vmatprep.mubr.bf16.mxu1 %v17563_v23  ;;  %v13992_v22 = vld [vmem:[%s19258_s6 + $0x1684] ss:$48 sps:$4 sm:$0xff]  }
 0x603   :  { %8316 = vmatprep.subr.bf16.mxu0 %v13938_v12  ;;  %8422 = vmatprep.subr.bf16.mxu1 %v13941_v19  ;;  %v13995_v12 = vld [vmem:[%s19258_s6 + $0x168c] ss:$48 sps:$4 sm:$0xff]   ;;  %v13990_v19 = vld [vmem:[%s19258_s6 + $0x1680] ss:$48 sps:$4 sm:$0xff]  }
 0x605   :  { %8317 = vmatpush1.bf16.msra.mxu0 %v13936_v17  ;;  %v13993_v17 = vld [vmem:[%s19258_s6 + $0x1688] ss:$48 sps:$4 sm:$0xff]  }
 0x606   :  { %8423 = vmatpush1.bf16.msra.mxu1 %v13939_v16  ;;  %8318 = vmatprep.subr.bf16.mxu0 %v13944_v59  ;;  %v13998_v16 = vld [vmem:[%s19258_s6 + $0x16e4] ss:$48 sps:$4 sm:$0xff]   ;;  %v14001_v59 = vld [vmem:[%s19258_s6 + $0x16ec] ss:$48 sps:$4 sm:$0xff]  }
 0x607   :  { %8424 = vmatprep.subr.bf16.mxu1 %v13947_v57  ;;  %v13996_v57 = vld [vmem:[%s19258_s6 + $0x16e0] ss:$48 sps:$4 sm:$0xff]  }
 0x609   :  { %8319 = vmatpush1.bf16.msra.mxu0 %v13942_v8  ;;  %v13999_v8 = vld [vmem:[%s19258_s6 + $0x16e8] ss:$48 sps:$4 sm:$0xff]  }
 0x60a   :  { %8425 = vmatpush1.bf16.msra.mxu1 %v13945_v45  ;;  %8320 = vmatprep.subr.bf16.mxu0 %v13950_v47  ;;  %v14004_v45 = vld [vmem:[%s19258_s6 + $0x1744] ss:$48 sps:$4 sm:$0xff]   ;;  %v14007_v47 = vld [vmem:[%s19258_s6 + $0x174c] ss:$48 sps:$4 sm:$0xff]  }
 0x60b   :  { %8426 = vmatprep.subr.bf16.mxu1 %v13953_v0  ;;  %v14002_v0 = vld [vmem:[%s19258_s6 + $0x1740] ss:$48 sps:$4 sm:$0xff]  }
 0x60d   :  { %8321 = vmatpush1.bf16.msra.mxu0 %v13948_v2  ;;  %v1304_v2 = vrot.slane %v17469_v48, %v17195_v29  ;;  %v14008_v48 = vld [vmem:[%s19258_s6 + $0x17a0] ss:$48 sps:$4 sm:$0xff]  }
 0x60e   :  { %8427 = vmatpush1.bf16.msra.mxu1 %v13951_v63  ;;  %8322 = vmatprep.subr.bf16.mxu0 %v13956_v9  ;;  %v14005_v63 = vld [vmem:[%s19258_s6 + $0x1748] ss:$48 sps:$4 sm:$0xff]   ;;  %v14010_v9 = vld [vmem:[%s19258_s6 + $0x17a4] ss:$48 sps:$4 sm:$0xff]  }
 0x60f   :  { %8428 = vmatprep.subr.bf16.mxu1 %v13959_v6  ;;  %v14013_v6 = vld [vmem:[%s19258_s6 + $0x17ac] ss:$48 sps:$4 sm:$0xff]  }
 0x611   :  { %8323 = vmatpush1.bf16.msra.mxu0 %v13954_v11  ;;  %v17725_v11 = vadd.f32 %v16195_v15, %v1304_v2  ;;  %v19318_v15 = vld [vmem:[#allocation19_spill] sm:$0xff] }
 0x612   :  { %8429 = vmatpush1.bf16.msra.mxu1 %v13957_v62  ;;  %8324 = vmatprep.subr.bf16.mxu0 %v13962_v24  ;;  %v17728_v62 = vadd.f32 %v16205_v14, %v1304_v2  ;;  %v14011_v24 = vld [vmem:[%s19258_s6 + $0x17a8] ss:$48 sps:$4 sm:$0xff]   ;;  %v14019_v14 = vld [vmem:[%s19258_s6 + $0xc1c] ss:$48 sps:$4 sm:$0xff]  }
 0x613   :  { %8430 = vmatprep.subr.bf16.mxu1 %v13965_v3  ;;  %v14016_v3 = vld [vmem:[%s19258_s6 + $0xc14] ss:$48 sps:$4 sm:$0xff]  }
 0x615   :  { %8325 = vmatpush1.bf16.msra.mxu0 %v13960_v55  ;;  %v17738_v55 = vadd.f32 %v16235_v31, %v17513_v30  ;;  %v14014_v31 = vld [vmem:[%s19258_s6 + $0xc10] ss:$48 sps:$4 sm:$0xff]  }
 0x616   :  { %8431 = vmatpush1.bf16.msra.mxu1 %v13963_v35  ;;  %8326 = vmatprep.subr.bf16.mxu0 %v13968_v21  ;;  %v17742_v35 = vadd.f32 %v19318_v15, %v17513_v30  ;;  %v17749_v21 = vpack.c.bf16 %v17728_v62, %v17725_v11  ;;  %v14059_v15 = vld [vmem:[%s19258_s6 + $0xeb8] ss:$48 sps:$4 sm:$0xff]  }
 0x617   :  { %8432 = vmatprep.subr.bf16.mxu1 %v13971_v5  ;;  %v14017_v5 = vld [vmem:[%s19258_s6 + $0xc18] ss:$48 sps:$4 sm:$0xff]  }
 0x618   :  { %v17756_v30 = vpack.c.bf16 %v17742_v35, %v17738_v55 }
 0x619   :  { %8327 = vmatpush1.bf16.msra.mxu0 %v13966_v7  ;;  %v14022_v7 = vld [vmem:[%s19258_s6 + $0xc74] ss:$48 sps:$4 sm:$0xff]  }
 0x61a   :  { %8433 = vmatpush1.bf16.msra.mxu1 %v13969_v37  ;;  %8328 = vmatprep.subr.bf16.mxu0 %v13974_v20  ;;  %v14025_v37 = vld [vmem:[%s19258_s6 + $0xc7c] ss:$48 sps:$4 sm:$0xff]  }
 0x61b   :  { %8434 = vmatprep.subr.bf16.mxu1 %v13977_v32  ;;  %v19319_v20 = vld [vmem:[#allocation17_spill] sm:$0xff] }
 0x61c   :  { %v17771_v32 = vadd.f32 %v19319_v20, %v1304_v2  ;;  %v14073_v20 = vld [vmem:[%s19258_s6 + $0xf7c] ss:$48 sps:$4 sm:$0xff]  }
 0x61d   :  { %8329 = vmatpush1.bf16.msra.mxu0 %v13972_v36  ;;  %v19320_v36 = vld [vmem:[#allocation18_spill] sm:$0xff] }
 0x61e   :  { %8435 = vmatpush1.bf16.msra.mxu1 %v13975_v44  ;;  %8330 = vmatprep.subr.bf16.mxu0 %v13980_v56  ;;  %v17774_v44 = vadd.f32 %v19320_v36, %v1304_v2  ;;  %v14020_v56 = vld [vmem:[%s19258_s6 + $0xc70] ss:$48 sps:$4 sm:$0xff]   ;;  %v14052_v2 = vld [vmem:[%s19258_s6 + $0xe54] ss:$48 sps:$4 sm:$0xff]  }
 0x61f   :  { %8436 = vmatprep.subr.bf16.mxu1 %v13983_v43  ;;  %v14023_v43 = vld [vmem:[%s19258_s6 + $0xc78] ss:$48 sps:$4 sm:$0xff]   ;;  %v14068_v36 = vld [vmem:[%s19258_s6 + $0xf70] ss:$48 sps:$4 sm:$0xff]  }
 0x621   :  { %8331 = vmatpush1.bf16.msra.mxu0 %v13978_v10  ;;  %v14028_v10 = vld [vmem:[%s19258_s6 + $0xcd4] ss:$48 sps:$4 sm:$0xff]  }
 0x622   :  { %8437 = vmatpush1.bf16.msra.mxu1 %v13981_v18  ;;  %8332 = vmatprep.subr.bf16.mxu0 %v13986_v25  ;;  %v14031_v18 = vld [vmem:[%s19258_s6 + $0xcdc] ss:$48 sps:$4 sm:$0xff]   ;;  %v17791_v25 = vpack.c.bf16 %v17774_v44, %v17771_v32 }
 0x623   :  { %8438 = vmatprep.subr.bf16.mxu1 %v13989_v60  ;;  %v14026_v60 = vld [vmem:[%s19258_s6 + $0xcd0] ss:$48 sps:$4 sm:$0xff]  }
 0x625   :  { %8333 = vmatpush1.bf16.msra.mxu0 %v13984_v58  ;;  %v14029_v58 = vld [vmem:[%s19258_s6 + $0xcd8] ss:$48 sps:$4 sm:$0xff]  }
 0x626   :  { %8439 = vmatpush1.bf16.msra.mxu1 %v13987_v54  ;;  %8334 = vmatprep.subr.bf16.mxu0 %v13992_v22  ;;  %v14034_v54 = vld [vmem:[%s19258_s6 + $0xd34] ss:$48 sps:$4 sm:$0xff]   ;;  %v14037_v22 = vld [vmem:[%s19258_s6 + $0xd3c] ss:$48 sps:$4 sm:$0xff]  }
 0x627   :  { %8440 = vmatprep.subr.bf16.mxu1 %v13995_v12  ;;  %v14032_v12 = vld [vmem:[%s19258_s6 + $0xd30] ss:$48 sps:$4 sm:$0xff]  }
 0x629   :  { %8335 = vmatpush1.bf16.msra.mxu0 %v13990_v19  ;;  %v14035_v19 = vld [vmem:[%s19258_s6 + $0xd38] ss:$48 sps:$4 sm:$0xff]  }
 0x62a   :  { %8441 = vmatpush1.bf16.msra.mxu1 %v13993_v17  ;;  %8336 = vmatprep.subr.bf16.mxu0 %v13998_v16  ;;  %v14040_v17 = vld [vmem:[%s19258_s6 + $0xd94] ss:$48 sps:$4 sm:$0xff]   ;;  %v14043_v16 = vld [vmem:[%s19258_s6 + $0xd9c] ss:$48 sps:$4 sm:$0xff]  }
 0x62b   :  { %8442 = vmatprep.subr.bf16.mxu1 %v14001_v59  ;;  %v14038_v59 = vld [vmem:[%s19258_s6 + $0xd90] ss:$48 sps:$4 sm:$0xff]  }
 0x62d   :  { %8337 = vmatpush1.bf16.msra.mxu0 %v13996_v57  ;;  %v14041_v57 = vld [vmem:[%s19258_s6 + $0xd98] ss:$48 sps:$4 sm:$0xff]  }
 0x62e   :  { %8443 = vmatpush1.bf16.msra.mxu1 %v13999_v8  ;;  %8338 = vmatprep.subr.bf16.mxu0 %v14004_v45  ;;  %v14046_v8 = vld [vmem:[%s19258_s6 + $0xdf4] ss:$48 sps:$4 sm:$0xff]   ;;  %v14049_v45 = vld [vmem:[%s19258_s6 + $0xdfc] ss:$48 sps:$4 sm:$0xff]  }
 0x62f   :  { %8444 = vmatprep.subr.bf16.mxu1 %v14007_v47  ;;  %v14044_v47 = vld [vmem:[%s19258_s6 + $0xdf0] ss:$48 sps:$4 sm:$0xff]  }
 0x631   :  { %8339 = vmatpush1.bf16.msra.mxu0 %v14002_v0  ;;  %v14047_v0 = vld [vmem:[%s19258_s6 + $0xdf8] ss:$48 sps:$4 sm:$0xff]  }
 0x632   :  { %8445 = vmatpush1.bf16.msra.mxu1 %v14005_v63  ;;  %8340 = vmatprep.subr.bf16.mxu0 %v14010_v9  ;;  %v14055_v63 = vld [vmem:[%s19258_s6 + $0xe5c] ss:$48 sps:$4 sm:$0xff]   ;;  %v14050_v9 = vld [vmem:[%s19258_s6 + $0xe50] ss:$48 sps:$4 sm:$0xff]  }
 0x633   :  { %8446 = vmatprep.subr.bf16.mxu1 %v14013_v6  ;;  %v14053_v6 = vld [vmem:[%s19258_s6 + $0xe58] ss:$48 sps:$4 sm:$0xff]  }
 0x635   :  { %8341 = vmatpush1.bf16.msra.mxu0 %v14008_v48  ;;  %v14058_v48 = vld [vmem:[%s19258_s6 + $0xeb4] ss:$48 sps:$4 sm:$0xff]  }
 0x636   :  { %8447 = vmatpush1.bf16.msra.mxu1 %v14011_v24  ;;  %8469 = vmatprep.subr.bf16.mxu0 %v14016_v3  ;;  %v14061_v24 = vld [vmem:[%s19258_s6 + $0xebc] ss:$48 sps:$4 sm:$0xff]   ;;  %v14056_v3 = vld [vmem:[%s19258_s6 + $0xeb0] ss:$48 sps:$4 sm:$0xff]  }
 0x637   :  { %8575 = vmatprep.subr.bf16.mxu1 %v14019_v14  ;;  %v14064_v14 = vld [vmem:[%s19258_s6 + $0xf14] ss:$48 sps:$4 sm:$0xff]  }
 0x638   :  { %8343 = vmatmul.mubr.bf16.vlgmr.msra.gmra.mrb[48].mxu0 %v17749_v21 }
 0x639   :  { %8449 = vmatmul.mubr.bf16.vlgmr.msra.gmra.mrb[56].mxu1 %v17749_v21  ;;  %8352 = vmatprep.mubr.bf16.mxu0 %v17756_v30 }
 0x63a   :  { %8458 = vmatprep.mubr.bf16.mxu1 %v17756_v30  ;;  %8470 = vmatpush1.bf16.msra.mxu0 %v14014_v31  ;;  %v14067_v31 = vld [vmem:[%s19258_s6 + $0xf1c] ss:$48 sps:$4 sm:$0xff]  }
 0x63b   :  { %8576 = vmatpush1.bf16.msra.mxu1 %v14017_v5  ;;  %8471 = vmatprep.subr.bf16.mxu0 %v14022_v7  ;;  %v14062_v5 = vld [vmem:[%s19258_s6 + $0xf10] ss:$48 sps:$4 sm:$0xff]   ;;  %v14065_v7 = vld [vmem:[%s19258_s6 + $0xf18] ss:$48 sps:$4 sm:$0xff]  }
 0x63c   :  { %8577 = vmatprep.subr.bf16.mxu1 %v14025_v37  ;;  %v14070_v37 = vld [vmem:[%s19258_s6 + $0xf74] ss:$48 sps:$4 sm:$0xff]  }
 0x63e   :  { %8472 = vmatpush1.bf16.msra.mxu0 %v14020_v56  ;;  %v14071_v56 = vld [vmem:[%s19258_s6 + $0xf78] ss:$48 sps:$4 sm:$0xff]  }
 0x63f   :  { %8578 = vmatpush1.bf16.msra.mxu1 %v14023_v43  ;;  %8473 = vmatprep.subr.bf16.mxu0 %v14028_v10  ;;  %v14076_v43 = vld [vmem:[%s19258_s6 + $0xfd4] ss:$48 sps:$4 sm:$0xff]   ;;  %v14079_v10 = vld [vmem:[%s19258_s6 + $0xfdc] ss:$48 sps:$4 sm:$0xff]  }
 0x640   :  { %8353 = vmatmul.mubr.bf16.gmra.mrb[52].mxu0 %v17791_v25  ;;  %8579 = vmatprep.subr.bf16.mxu1 %v14031_v18  ;;  %v14074_v18 = vld [vmem:[%s19258_s6 + $0xfd0] ss:$48 sps:$4 sm:$0xff]  }
 0x641   :  { %8459 = vmatmul.mubr.bf16.gmra.mrb[60].mxu1 %v17791_v25  ;;  %8501 = vmatprep.mubr.bf16.mxu0 %v17298_v52 }
 0x642   :  { %8474 = vmatpush1.bf16.msra.mxu0 %v14026_v60  ;;  %8607 = vmatprep.mubr.bf16.mxu1 %v17298_v52  ;;  %v14077_v60 = vld [vmem:[%s19258_s6 + $0xfd8] ss:$48 sps:$4 sm:$0xff]  }
 0x643   :  { %8580 = vmatpush1.bf16.msra.mxu1 %v14029_v58  ;;  %8475 = vmatprep.subr.bf16.mxu0 %v14034_v54  ;;  %v14082_v58 = vld [vmem:[%s19258_s6 + $0x1034] ss:$48 sps:$4 sm:$0xff]   ;;  %v14085_v54 = vld [vmem:[%s19258_s6 + $0x103c] ss:$48 sps:$4 sm:$0xff]  }
 0x644   :  { %8581 = vmatprep.subr.bf16.mxu1 %v14037_v22  ;;  %v14080_v22 = vld [vmem:[%s19258_s6 + $0x1030] ss:$48 sps:$4 sm:$0xff]  }
 0x646   :  { %8476 = vmatpush1.bf16.msra.mxu0 %v14032_v12  ;;  %v14083_v12 = vld [vmem:[%s19258_s6 + $0x1038] ss:$48 sps:$4 sm:$0xff]  }
 0x647   :  { %8582 = vmatpush1.bf16.msra.mxu1 %v14035_v19  ;;  %8477 = vmatprep.subr.bf16.mxu0 %v14040_v17  ;;  %v14088_v19 = vld [vmem:[%s19258_s6 + $0x1094] ss:$48 sps:$4 sm:$0xff]   ;;  %v14091_v17 = vld [vmem:[%s19258_s6 + $0x109c] ss:$48 sps:$4 sm:$0xff]  }
 0x648   :  { %8583 = vmatprep.subr.bf16.mxu1 %v14043_v16  ;;  %v14086_v16 = vld [vmem:[%s19258_s6 + $0x1090] ss:$48 sps:$4 sm:$0xff]  }
 0x64a   :  { %8478 = vmatpush1.bf16.msra.mxu0 %v14038_v59  ;;  %v14089_v59 = vld [vmem:[%s19258_s6 + $0x1098] ss:$48 sps:$4 sm:$0xff]  }
 0x64b   :  { %8584 = vmatpush1.bf16.msra.mxu1 %v14041_v57  ;;  %8479 = vmatprep.subr.bf16.mxu0 %v14046_v8  ;;  %v14094_v57 = vld [vmem:[%s19258_s6 + $0x10f4] ss:$48 sps:$4 sm:$0xff]   ;;  %v14097_v8 = vld [vmem:[%s19258_s6 + $0x10fc] ss:$48 sps:$4 sm:$0xff]  }
 0x64c   :  { %8585 = vmatprep.subr.bf16.mxu1 %v14049_v45  ;;  %v14092_v45 = vld [vmem:[%s19258_s6 + $0x10f0] ss:$48 sps:$4 sm:$0xff]  }
 0x64e   :  { %8480 = vmatpush1.bf16.msra.mxu0 %v14044_v47  ;;  %v14095_v47 = vld [vmem:[%s19258_s6 + $0x10f8] ss:$48 sps:$4 sm:$0xff]  }
 0x64f   :  { %8586 = vmatpush1.bf16.msra.mxu1 %v14047_v0  ;;  %8481 = vmatprep.subr.bf16.mxu0 %v14052_v2  ;;  %v14100_v0 = vld [vmem:[%s19258_s6 + $0x1154] ss:$48 sps:$4 sm:$0xff]   ;;  %v14103_v2 = vld [vmem:[%s19258_s6 + $0x115c] ss:$48 sps:$4 sm:$0xff]  }
 0x650   :  { %8587 = vmatprep.subr.bf16.mxu1 %v14055_v63  ;;  %v14098_v63 = vld [vmem:[%s19258_s6 + $0x1150] ss:$48 sps:$4 sm:$0xff]  }
 0x652   :  { %8482 = vmatpush1.bf16.msra.mxu0 %v14050_v9  ;;  %v14101_v9 = vld [vmem:[%s19258_s6 + $0x1158] ss:$48 sps:$4 sm:$0xff]  }
 0x653   :  { %8588 = vmatpush1.bf16.msra.mxu1 %v14053_v6  ;;  %8483 = vmatprep.subr.bf16.mxu0 %v14058_v48  ;;  %v14106_v6 = vld [vmem:[%s19258_s6 + $0x11b4] ss:$48 sps:$4 sm:$0xff]   ;;  %v14109_v48 = vld [vmem:[%s19258_s6 + $0x11bc] ss:$48 sps:$4 sm:$0xff]  }
 0x654   :  { %8589 = vmatprep.subr.bf16.mxu1 %v14061_v24  ;;  %v14104_v24 = vld [vmem:[%s19258_s6 + $0x11b0] ss:$48 sps:$4 sm:$0xff]  }
 0x656   :  { %8484 = vmatpush1.bf16.msra.mxu0 %v14056_v3  ;;  %v14107_v3 = vld [vmem:[%s19258_s6 + $0x11b8] ss:$48 sps:$4 sm:$0xff]  }
 0x657   :  { %8590 = vmatpush1.bf16.msra.mxu1 %v14059_v15  ;;  %8485 = vmatprep.subr.bf16.mxu0 %v14064_v14  ;;  %v14112_v15 = vld [vmem:[%s19258_s6 + $0x1214] ss:$48 sps:$4 sm:$0xff]   ;;  %v14115_v14 = vld [vmem:[%s19258_s6 + $0x121c] ss:$48 sps:$4 sm:$0xff]  }
 0x658   :  { %8591 = vmatprep.subr.bf16.mxu1 %v14067_v31 }
 0x65a   :  { %8486 = vmatpush1.bf16.msra.mxu0 %v14062_v5 }
 0x65b   :  { %8592 = vmatpush1.bf16.msra.mxu1 %v14065_v7  ;;  %8487 = vmatprep.subr.bf16.mxu0 %v14070_v37  ;;  %v14110_v7 = vld [vmem:[%s19258_s6 + $0x1210] ss:$48 sps:$4 sm:$0xff]   ;;  %v14113_v37 = vld [vmem:[%s19258_s6 + $0x1218] ss:$48 sps:$4 sm:$0xff]  }
 0x65c   :  { %8593 = vmatprep.subr.bf16.mxu1 %v14073_v20 }
 0x65e   :  { %8488 = vmatpush1.bf16.msra.mxu0 %v14068_v36 }
 0x65f   :  { %8594 = vmatpush1.bf16.msra.mxu1 %v14071_v56  ;;  %8489 = vmatprep.subr.bf16.mxu0 %v14076_v43  ;;  %v14118_v56 = vld [vmem:[%s19258_s6 + $0x1274] ss:$48 sps:$4 sm:$0xff]  }
 0x660   :  { %8595 = vmatprep.subr.bf16.mxu1 %v14079_v10  ;;  %v19321_v43 = vld [vmem:[#allocation10_spill] sm:$0xff] }
 0x662   :  { %8490 = vmatpush1.bf16.msra.mxu0 %v14074_v18  ;;  %v19322_v18 = vld [vmem:[#allocation22_spill] sm:$0xff] }
 0x663   :  { %8596 = vmatpush1.bf16.msra.mxu1 %v14077_v60  ;;  %8491 = vmatprep.subr.bf16.mxu0 %v14082_v58 }
 0x664   :  { %8597 = vmatprep.subr.bf16.mxu1 %v14085_v54 }
 0x666   :  { %8492 = vmatpush1.bf16.msra.mxu0 %v14080_v22  ;;  %v14121_v22 = vld [vmem:[%s19258_s6 + $0x127c] ss:$48 sps:$4 sm:$0xff]  }
 0x667   :  { %8598 = vmatpush1.bf16.msra.mxu1 %v14083_v12  ;;  %8493 = vmatprep.subr.bf16.mxu0 %v14088_v19  ;;  %v19323_v12 = vld [vmem:[#allocation8_spill] sm:$0xff] }
 0x668   :  { %8599 = vmatprep.subr.bf16.mxu1 %v14091_v17  ;;  %v19324_v17 = vld [vmem:[#allocation7_spill] sm:$0xff] }
 0x66a   :  { %8494 = vmatpush1.bf16.msra.mxu0 %v14086_v16 }
 0x66b   :  { %8600 = vmatpush1.bf16.msra.mxu1 %v14089_v59  ;;  %8495 = vmatprep.subr.bf16.mxu0 %v14094_v57  ;;  %v19325_v59 = vld [vmem:[#allocation20_spill] sm:$0xff] }
 0x66c   :  { %8601 = vmatprep.subr.bf16.mxu1 %v14097_v8 }
 0x66e   :  { %8496 = vmatpush1.bf16.msra.mxu0 %v14092_v45 }
 0x66f   :  { %8602 = vmatpush1.bf16.msra.mxu1 %v14095_v47  ;;  %8497 = vmatprep.subr.bf16.mxu0 %v14100_v0  ;;  %v19326_v47 = vld [vmem:[#allocation16_spill] sm:$0xff] }
 0x670   :  { %8603 = vmatprep.subr.bf16.mxu1 %v14103_v2  ;;  %v19327_v2 = vld [vmem:[#allocation9_spill] sm:$0xff] }
 0x672   :  { %8498 = vmatpush1.bf16.msra.mxu0 %v14098_v63 }
 0x673   :  { %8604 = vmatpush1.bf16.msra.mxu1 %v14101_v9  ;;  %8499 = vmatprep.subr.bf16.mxu0 %v14106_v6  ;;  %v19328_v9 = vld [vmem:[#allocation14_spill] sm:$0xff] }
 0x674   :  { %8605 = vmatprep.subr.bf16.mxu1 %v14109_v48  ;;  %v14116_v48 = vld [vmem:[%s19258_s6 + $0x1270] ss:$48 sps:$4 sm:$0xff]  }
 0x676   :  { %8500 = vmatpush1.bf16.msra.mxu0 %v14104_v24 }
 0x677   :  { %8606 = vmatpush1.bf16.msra.mxu1 %v14107_v3  ;;  %v5738_v31 = vpop.f32.mrb[40].mxu0  ;;  %v5781_v5 = vpop.f32.mrb[48].mxu1  ;;  %8522 = vmatprep.subr.bf16.mxu0 %v14112_v15  ;;  %v14119_v15 = vld [vmem:[%s19258_s6 + $0x1278] ss:$48 sps:$4 sm:$0xff]  }
 0x678   :  { %8628 = vmatprep.subr.bf16.mxu1 %v14115_v14  ;;  %v5740_v20 = vpop.f32.mrb[41].mxu0  ;;  %v5783_v36 = vpop.f32.mrb[49].mxu1  ;;  %v5739_v10 = vadd.f32 %v5738_v31, %v19321_v43  ;;  %v5782_v60 = vadd.f32 %v5781_v5, %v19322_v18  ;;  %v14124_v14 = vld [vmem:[%s19258_s6 + $0x12d4] ss:$48 sps:$4 sm:$0xff]  }
 0x679   :  { %8502 = vmatmul.mubr.bf16.vlgmr.msra.gmra.mrb[56].mxu0 %v17502_v46  ;;  %v5742_v58 = vpop.f32.mrb[42].mxu0  ;;  %v5785_v54 = vpop.f32.mrb[50].mxu1  ;;  %v5741_v19 = vadd.f32 %v5740_v20, %v19323_v12  ;;  %v5784_v0 = vadd.f32 %v5783_v36, %v19326_v47  ;;  %v14133_v12 = vld [vmem:[%s19258_s6 + $0x133c] ss:$48 sps:$4 sm:$0xff]   ;;  %v14131_v47 = vld [vmem:[%s19258_s6 + $0x1338] ss:$48 sps:$4 sm:$0xff]  }
 0x67a   :  { %8608 = vmatmul.mubr.bf16.vlgmr.msra.gmra.mrb[64].mxu1 %v17502_v46  ;;  %8511 = vmatprep.mubr.bf16.mxu0 %v17509_v1  ;;  %v5743_v16 = vadd.f32 %v5742_v58, %v19324_v17  ;;  %v5786_v57 = vadd.f32 %v5785_v54, %v19325_v59  ;;  %v5744_v8 = vpop.f32.mrb[43].mxu0  ;;  %v5787_v45 = vpop.f32.mrb[51].mxu1  ;;  %v14130_v58 = vld [vmem:[%s19258_s6 + $0x1334] ss:$48 sps:$4 sm:$0xff]  }
 0x67b   :  { %8523 = vmatpush1.bf16.msra.mxu0 %v14110_v7  ;;  %8617 = vmatprep.mubr.bf16.mxu1 %v17509_v1  ;;  %v5745_v63 = vadd.f32 %v5744_v8, %v19327_v2  ;;  %v5788_v6 = vadd.f32 %v5787_v45, %v19328_v9  ;;  %v14127_v7 = vld [vmem:[%s19258_s6 + $0x12dc] ss:$48 sps:$4 sm:$0xff]  }
 0x67c   :  { %8629 = vmatpush1.bf16.msra.mxu1 %v14113_v37  ;;  %v9309_v24 = vadd.f32 %v5743_v16, %v5739_v10  ;;  %v9323_v3 = vadd.f32 %v5786_v57, %v5782_v60  ;;  %8524 = vmatprep.subr.bf16.mxu0 %v14118_v56  ;;  %v14122_v56 = vld [vmem:[%s19258_s6 + $0x12d0] ss:$48 sps:$4 sm:$0xff]   ;;  %v14125_v60 = vld [vmem:[%s19258_s6 + $0x12d8] ss:$48 sps:$4 sm:$0xff]   ;;  %v14139_v9 = vld [vmem:[%s19258_s6 + $0x139c] ss:$48 sps:$4 sm:$0xff]  }
 0x67d   :  { %v9316_v31 = vadd.f32 %v5745_v63, %v5741_v19  ;;  %v9330_v5 = vadd.f32 %v5788_v6, %v5784_v0  ;;  %8630 = vmatprep.subr.bf16.mxu1 %v14121_v22  ;;  %v14128_v57 = vld [vmem:[%s19258_s6 + $0x1330] ss:$48 sps:$4 sm:$0xff]   ;;  %v14136_v0 = vld [vmem:[%s19258_s6 + $0x1394] ss:$48 sps:$4 sm:$0xff]  }
 0x67e   :  { %v9310_v20 = vrot.slane %v9309_v24, 4  ;;  %v9324_v37 = vrot.slane %v9323_v3, 4 }
 0x67f   :  { %v9317_v36 = vrot.slane %v9316_v31, 4  ;;  %v9331_v43 = vrot.slane %v9330_v5, 4  ;;  %8525 = vmatpush1.bf16.msra.mxu0 %v14116_v48 }
 0x680   :  { %v9311_v10 = vadd.f32 %v9310_v20, %v9309_v24  ;;  %v9325_v18 = vadd.f32 %v9324_v37, %v9323_v3  ;;  %8631 = vmatpush1.bf16.msra.mxu1 %v14119_v15  ;;  %8526 = vmatprep.subr.bf16.mxu0 %v14124_v14  ;;  %v14134_v15 = vld [vmem:[%s19258_s6 + $0x1390] ss:$48 sps:$4 sm:$0xff]  }
 0x681   :  { %v9318_v54 = vadd.f32 %v9317_v36, %v9316_v31  ;;  %v9332_v22 = vadd.f32 %v9331_v43, %v9330_v5  ;;  %8512 = vmatmul.mubr.bf16.gmra.mrb[60].mxu0 %v17556_v26  ;;  %8632 = vmatprep.subr.bf16.mxu1 %v14127_v7  ;;  %v14137_v5 = vld [vmem:[%s19258_s6 + $0x1398] ss:$48 sps:$4 sm:$0xff]   ;;  %v14142_v7 = vld [vmem:[%s19258_s6 + $0x13f4] ss:$48 sps:$4 sm:$0xff]   ;;  %v14140_v36 = vld [vmem:[%s19258_s6 + $0x13f0] ss:$48 sps:$4 sm:$0xff]  }
 0x682   :  { %v9312_v19 = vrot.slane %v9311_v10, 2  ;;  %v9326_v17 = vrot.slane %v9325_v18, 2  ;;  %8618 = vmatmul.mubr.bf16.gmra.mrb[68].mxu1 %v17556_v26  ;;  %8554 = vmatprep.mubr.bf16.mxu0 %v17563_v23  ;;  %v14145_v43 = vld [vmem:[%s19258_s6 + $0x13fc] ss:$48 sps:$4 sm:$0xff]  }
 0x683   :  { %v9319_v16 = vrot.slane %v9318_v54, 2  ;;  %v9333_v59 = vrot.slane %v9332_v22, 2  ;;  %8527 = vmatpush1.bf16.msra.mxu0 %v14122_v56  ;;  %8660 = vmatprep.mubr.bf16.mxu1 %v17563_v23 }
 0x684   :  { %v9313_v8 = vadd.f32 %v9312_v19, %v9311_v10  ;;  %v9327_v45 = vadd.f32 %v9326_v17, %v9325_v18  ;;  %8633 = vmatpush1.bf16.msra.mxu1 %v14125_v60  ;;  %8528 = vmatprep.subr.bf16.mxu0 %v14130_v58  ;;  %v14143_v18 = vld [vmem:[%s19258_s6 + $0x13f8] ss:$48 sps:$4 sm:$0xff]   ;;  %v14148_v60 = vld [vmem:[%s19258_s6 + $0x1454] ss:$48 sps:$4 sm:$0xff]   ;;  %v14151_v19 = vld [vmem:[%s19258_s6 + $0x145c] ss:$48 sps:$4 sm:$0xff]  }
 0x685   :  { %v9320_v2 = vadd.f32 %v9319_v16, %v9318_v54  ;;  %v9334_v63 = vadd.f32 %v9333_v59, %v9332_v22  ;;  %8634 = vmatprep.subr.bf16.mxu1 %v14133_v12 }
 0x686   :  { %v9314_v6 = vrot.slane %v9313_v8, 1  ;;  %v9328_v48 = vrot.slane %v9327_v45, 1 }
 0x687   :  { %v9321_v24 = vrot.slane %v9320_v2, 1  ;;  %v9335_v3 = vrot.slane %v9334_v63, 1  ;;  %8529 = vmatpush1.bf16.msra.mxu0 %v14128_v57 }
 0x688   :  { %v9315_v14 = vadd.f32 %v9314_v6, %v9313_v8  ;;  %v9329_v31 = vadd.f32 %v9328_v48, %v9327_v45  ;;  %8635 = vmatpush1.bf16.msra.mxu1 %v14131_v47  ;;  %8530 = vmatprep.subr.bf16.mxu0 %v14136_v0  ;;  %v19329_v47 = vld [vmem:[#allocation15_spill] sm:$0xff]  ;;  %v19331_v48 = vld [vmem:[#allocation12_spill] sm:$0xff] }
 0x689   :  { %v9322_v20 = vadd.f32 %v9321_v24, %v9320_v2  ;;  %v9336_v37 = vadd.f32 %v9335_v3, %v9334_v63  ;;  %8636 = vmatprep.subr.bf16.mxu1 %v14139_v9  ;;  %v19330_v2 = vld [vmem:[#allocation25_spill] sm:$0xff]  ;;  %v19332_v3 = vld [vmem:[#allocation11_spill] sm:$0xff] }
 0x68a   :  { %v12383_v56 = vmul.f32 -0.0625, %v9315_v14  ;;  %v12385_v10 = vmul.f32 -0.0625, %v9329_v31  ;;  %v19333_v14 = vld [vmem:[#allocation24_spill] sm:$0xff] }
 0x68b   :  { %v12384_v58 = vmul.f32 -0.0625, %v9322_v20  ;;  %v12386_v54 = vmul.f32 -0.0625, %v9336_v37  ;;  %8531 = vmatpush1.bf16.msra.mxu0 %v14134_v15  ;;  %v5827_v22 = vpop.f32.mrb[44].mxu0  ;;  %v5870_v12 = vpop.f32.mrb[52].mxu1  ;;  %v19334_v20 = vld [vmem:[#allocation23_spill] sm:$0xff] }
 0x68c   :  { %v9383_v17 = vmul.f32 1.442695, %v12383_v56  ;;  %v9387_v16 = vmul.f32 1.442695, %v12385_v10  ;;  %8637 = vmatpush1.bf16.msra.mxu1 %v14137_v5  ;;  %8532 = vmatprep.subr.bf16.mxu0 %v14142_v7  ;;  %v5829_v59 = vpop.f32.mrb[45].mxu0  ;;  %v5872_v57 = vpop.f32.mrb[53].mxu1  ;;  %v5828_v0 = vadd.f32 %v5827_v22, %v19329_v47  ;;  %v5871_v63 = vadd.f32 %v5870_v12, %v19330_v2 }
 0x68d   :  { %v9385_v8 = vmul.f32 1.442695, %v12384_v58  ;;  %v9389_v45 = vmul.f32 1.442695, %v12386_v54  ;;  %8638 = vmatprep.subr.bf16.mxu1 %v14145_v43  ;;  %v5831_v9 = vpop.f32.mrb[46].mxu0  ;;  %v5874_v6 = vpop.f32.mrb[54].mxu1  ;;  %v5830_v24 = vadd.f32 %v5829_v59, %v19331_v48  ;;  %v5873_v37 = vadd.f32 %v5872_v57, %v19334_v20 }
 0x68e   :  { %14608 = vpow2.f32 %v9383_v17  ;;  %v5832_v15 = vadd.f32 %v5831_v9, %v19332_v3  ;;  %v5875_v31 = vadd.f32 %v5874_v6, %v19333_v14  ;;  %v5833_v5 = vpop.f32.mrb[47].mxu0  ;;  %v5876_v7 = vpop.f32.mrb[55].mxu1  ;;  %v19335_v56 = vld [vmem:[#allocation13_spill] sm:$0xff] }
 0x68f   :  { %14610 = vpow2.f32 %v9387_v16  ;;  %8533 = vmatpush1.bf16.msra.mxu0 %v14140_v36  ;;  %v5834_v10 = vadd.f32 %v5833_v5, %v19335_v56  ;;  %v19336_v58 = vld [vmem:[#allocation21_spill] sm:$0xff]  ;;  %v14154_v36 = vld [vmem:[%s19258_s6 + $0x14b4] ss:$48 sps:$4 sm:$0xff]  }
 0x690   :  { %v5877_v54 = vadd.f32 %v5876_v7, %v19336_v58  ;;  %v14146_v43 = vld [vmem:[%s19258_s6 + $0x1450] ss:$48 sps:$4 sm:$0xff]   ;;  %14612 = vpow2.f32 %v9385_v8  ;;  %8639 = vmatpush1.bf16.msra.mxu1 %v14143_v18  ;;  %v9337_v22 = vadd.f32 %v5832_v15, %v5828_v0  ;;  %v9351_v12 = vadd.f32 %v5875_v31, %v5871_v63  ;;  %8534 = vmatprep.subr.bf16.mxu0 %v14148_v60  ;;  %v14149_v17 = vld [vmem:[%s19258_s6 + $0x1458] ss:$48 sps:$4 sm:$0xff]   ;;  %v14157_v57 = vld [vmem:[%s19258_s6 + $0x14bc] ss:$48 sps:$4 sm:$0xff]  }
 0x691   :  { %14614 = vpow2.f32 %v9389_v45  ;;  %v9344_v16 = vadd.f32 %v5834_v10, %v5830_v24  ;;  %8640 = vmatprep.subr.bf16.mxu1 %v14151_v19  ;;  %v14152_v0 = vld [vmem:[%s19258_s6 + $0x14b0] ss:$48 sps:$4 sm:$0xff]   ;;  %v14155_v19 = vld [vmem:[%s19258_s6 + $0x14b8] ss:$48 sps:$4 sm:$0xff]   ;;  %v14160_v45 = vld [vmem:[%s19258_s6 + $0x1514] ss:$48 sps:$4 sm:$0xff]  }
 0x692   :  { %v9358_v59 = vadd.f32 %v5877_v54, %v5873_v37  ;;  %v9338_v18 = vrot.slane %v9337_v22, 4  ;;  %v9352_v8 = vrot.slane %v9351_v12, 4  ;;  %v14163_v48 = vld [vmem:[%s19258_s6 + $0x151c] ss:$48 sps:$4 sm:$0xff]   ;;  %v14158_v31 = vld [vmem:[%s19258_s6 + $0x1510] ss:$48 sps:$4 sm:$0xff]  }
 0x693   :  { %v9345_v47 = vrot.slane %v9344_v16, 4  ;;  %8535 = vmatpush1.bf16.msra.mxu0 %v14146_v43  ;;  %v14161_v37 = vld [vmem:[%s19258_s6 + $0x1518] ss:$48 sps:$4 sm:$0xff]   ;;  %v14166_v56 = vld [vmem:[%s19258_s6 + $0x1574] ss:$48 sps:$4 sm:$0xff]  }
 0x694   :  { %v9359_v60 = vrot.slane %v9358_v59, 4  ;;  %v9339_v2 = vadd.f32 %v9338_v18, %v9337_v22  ;;  %v9353_v63 = vadd.f32 %v9352_v8, %v9351_v12  ;;  %8641 = vmatpush1.bf16.msra.mxu1 %v14149_v17  ;;  %8536 = vmatprep.subr.bf16.mxu0 %v14154_v36  ;;  %v14169_v22 = vld [vmem:[%s19258_s6 + $0x157c] ss:$48 sps:$4 sm:$0xff]  }
 0x695   :  { %v9346_v9 = vadd.f32 %v9345_v47, %v9344_v16  ;;  %8642 = vmatprep.subr.bf16.mxu1 %v14157_v57  ;;  %v14164_v47 = vld [vmem:[%s19258_s6 + $0x1570] ss:$48 sps:$4 sm:$0xff]  }
 0x696   :  { %v9360_v6 = vadd.f32 %v9359_v60, %v9358_v59  ;;  %v9340_v24 = vrot.slane %v9339_v2, 2  ;;  %v9354_v3 = vrot.slane %v9353_v63, 2 }
 0x697   :  { %v9347_v15 = vrot.slane %v9346_v9, 2  ;;  %8537 = vmatpush1.bf16.msra.mxu0 %v14152_v0 }
 0x698   :  { %v9361_v14 = vrot.slane %v9360_v6, 2  ;;  %v14609_v5 = vpop.eup %14608  ;;  %v9341_v7 = vadd.f32 %v9340_v24, %v9339_v2  ;;  %v9355_v20 = vadd.f32 %v9354_v3, %v9353_v63  ;;  %8643 = vmatpush1.bf16.msra.mxu1 %v14155_v19  ;;  %8538 = vmatprep.subr.bf16.mxu0 %v14160_v45  ;;  %v14167_v63 = vld [vmem:[%s19258_s6 + $0x1578] ss:$48 sps:$4 sm:$0xff]   ;;  %v14172_v19 = vld [vmem:[%s19258_s6 + $0x15d4] ss:$48 sps:$4 sm:$0xff]  }
 0x699   :  { %v14611_v10 = vpop.eup %14610  ;;  %v9399_v58 = vadd.f32 1.0, %v14609_v5  ;;  %v9348_v54 = vadd.f32 %v9347_v15, %v9346_v9  ;;  %8644 = vmatprep.subr.bf16.mxu1 %v14163_v48  ;;  %v14716_v48 = vmov 1983009808   ;;  %v14170_v5 = vld [vmem:[%s19258_s6 + $0x15d0] ss:$48 sps:$4 sm:$0xff]  }
 0x69a   :  { %v9362_v43 = vadd.f32 %v9361_v14, %v9360_v6  ;;  %v14613_v12 = vpop.eup %14612  ;;  %v9401_v17 = vadd.f32 1.0, %v14611_v10  ;;  %v9342_v36 = vrot.slane %v9341_v7, 1  ;;  %v9356_v16 = vrot.slane %v9355_v20, 1  ;;  %v14175_v6 = vld [vmem:[%s19258_s6 + $0x15dc] ss:$48 sps:$4 sm:$0xff]  }
 0x69b   :  { %v14615_v59 = vpop.eup %14614  ;;  %14616 = vrcp.f32 %v9399_v58  ;;  %v9400_v57 = vadd.f32 1.0, %v14613_v12  ;;  %v9349_v18 = vrot.slane %v9348_v54, 1  ;;  %8539 = vmatpush1.bf16.msra.mxu0 %v14158_v31  ;;  %v9434_v24 = vunpack.c.l.s4 %v14716_v48  ;;  %v14179_v12 = vld [vmem:[%s19258_s6 + $0x1638] ss:$48 sps:$4 sm:$0xff]   ;;  %v14188_v48 = vld [vmem:[%s19258_s6 + $0x16f0] ss:$48 sps:$4 sm:$0xff]  }
 0x69c   :  { %v9363_v8 = vrot.slane %v9362_v43, 1  ;;  %14618 = vrcp.f32 %v9401_v17  ;;  %v9402_v60 = vadd.f32 1.0, %v14615_v59  ;;  %v9343_v0 = vadd.f32 %v9342_v36, %v9341_v7  ;;  %8645 = vmatpush1.bf16.msra.mxu1 %v14161_v37  ;;  %8540 = vmatprep.subr.bf16.mxu0 %v14166_v56  ;;  %v14173_v7 = vld [vmem:[%s19258_s6 + $0x15d8] ss:$48 sps:$4 sm:$0xff]   ;;  %v14178_v56 = vld [vmem:[%s19258_s6 + $0x1634] ss:$48 sps:$4 sm:$0xff]  }
 0x69d   :  { %v9357_v2 = vadd.f32 %v9356_v16, %v9355_v20  ;;  %14620 = vrcp.f32 %v9400_v57  ;;  %v9350_v45 = vadd.f32 %v9349_v18, %v9348_v54  ;;  %8646 = vmatprep.subr.bf16.mxu1 %v14169_v22  ;;  %v14181_v54 = vld [vmem:[%s19258_s6 + $0x163c] ss:$48 sps:$4 sm:$0xff]   ;;  %v14176_v22 = vld [vmem:[%s19258_s6 + $0x1630] ss:$48 sps:$4 sm:$0xff]   ;;  %v14184_v17 = vld [vmem:[%s19258_s6 + $0x1694] ss:$48 sps:$4 sm:$0xff]  }
 0x69e   :  { %v9364_v9 = vadd.f32 %v9363_v8, %v9362_v43  ;;  %14622 = vrcp.f32 %v9402_v60  ;;  %v12387_v3 = vmul.f32 -0.0625, %v9343_v0  ;;  %v9435_v43 = vunpack.c.0.s8 %v9434_v24  ;;  %v14187_v16 = vld [vmem:[%s19258_s6 + $0x169c] ss:$48 sps:$4 sm:$0xff]   ;;  %v19337_v57 = vld [vmem:[#allocation6_spill] sm:$0xff] }
 0x69f   :  { %v12389_v15 = vmul.f32 -0.0625, %v9357_v2  ;;  %v12388_v14 = vmul.f32 -0.0625, %v9350_v45  ;;  %8541 = vmatpush1.bf16.msra.mxu0 %v14164_v47  ;;  %v14182_v47 = vld [vmem:[%s19258_s6 + $0x1690] ss:$48 sps:$4 sm:$0xff]   ;;  %v14185_v2 = vld [vmem:[%s19258_s6 + $0x1698] ss:$48 sps:$4 sm:$0xff]  }
 0x6a0   :  { %v12390_v31 = vmul.f32 -0.0625, %v9364_v9  ;;  %v9391_v20 = vmul.f32 1.442695, %v12387_v3  ;;  %8647 = vmatpush1.bf16.msra.mxu1 %v14167_v63  ;;  %8542 = vmatprep.subr.bf16.mxu0 %v14172_v19  ;;  %v18134_v18 = vsub.s32 %v9435_v43, %v19337_v57  ;;  %v14190_v63 = vld [vmem:[%s19258_s6 + $0x16f4] ss:$48 sps:$4 sm:$0xff]  }
 0x6a1   :  { %v9395_v37 = vmul.f32 1.442695, %v12389_v15  ;;  %v9393_v10 = vmul.f32 1.442695, %v12388_v14  ;;  %8648 = vmatprep.subr.bf16.mxu1 %v14175_v6  ;;  %v14193_v45 = vld [vmem:[%s19258_s6 + $0x16fc] ss:$48 sps:$4 sm:$0xff]  }
 0x6a2   :  { %v9397_v58 = vmul.f32 1.442695, %v12390_v31  ;;  %14624 = vpow2.f32 %v9391_v20  ;;  %v14191_v3 = vld [vmem:[%s19258_s6 + $0x16f8] ss:$48 sps:$4 sm:$0xff]   ;;  %v14196_v15 = vld [vmem:[%s19258_s6 + $0x1754] ss:$48 sps:$4 sm:$0xff]  }
 0x6a3   :  { %14626 = vpow2.f32 %v9395_v37  ;;  %8543 = vmatpush1.bf16.msra.mxu0 %v14170_v5  ;;  %v14199_v5 = vld [vmem:[%s19258_s6 + $0x175c] ss:$48 sps:$4 sm:$0xff]   ;;  %v14197_v43 = vld [vmem:[%s19258_s6 + $0x1758] ss:$48 sps:$4 sm:$0xff]  }
 0x6a4   :  { %14628 = vpow2.f32 %v9393_v10  ;;  %8649 = vmatpush1.bf16.msra.mxu1 %v14173_v7  ;;  %8544 = vmatprep.subr.bf16.mxu0 %v14178_v56 }
 0x6a5   :  { %v14617_v36 = vpop.eup %14616  ;;  %14630 = vpow2.f32 %v9397_v58  ;;  %8650 = vmatprep.subr.bf16.mxu1 %v14181_v54  ;;  %v14194_v58 = vld [vmem:[%s19258_s6 + $0x1750] ss:$48 sps:$4 sm:$0xff]  }
 0x6a6   :  { %v14619_v59 = vpop.eup %14618 }
 0x6a7   :  { %v14621_v8 = vpop.eup %14620  ;;  %8545 = vmatpush1.bf16.msra.mxu0 %v14176_v22  ;;  %v14202_v22 = vld [vmem:[%s19258_s6 + $0x17b4] ss:$48 sps:$4 sm:$0xff]  }
 0x6a8   :  { %v14623_v60 = vpop.eup %14622  ;;  %v9431_v0 = vcombine.low %v14617_v36, %v14621_v8  ;;  %8651 = vmatpush1.bf16.msra.mxu1 %v14179_v12  ;;  %8546 = vmatprep.subr.bf16.mxu0 %v14184_v17  ;;  %v14205_v12 = vld [vmem:[%s19258_s6 + $0x17bc] ss:$48 sps:$4 sm:$0xff]   ;;  %v14200_v17 = vld [vmem:[%s19258_s6 + $0x17b0] ss:$48 sps:$4 sm:$0xff]   ;;  %v14203_v36 = vld [vmem:[%s19258_s6 + $0x17b8] ss:$48 sps:$4 sm:$0xff]  }
 0x6a9   :  { %v9432_v19 = vcombine.low %v14619_v59, %v14623_v60  ;;  %8652 = vmatprep.subr.bf16.mxu1 %v14187_v16  ;;  %v14208_v16 = vld [vmem:[%s19258_s6 + $0xc24] ss:$48 sps:$4 sm:$0xff]   ;;  %v14211_v59 = vld [vmem:[%s19258_s6 + $0xc2c] ss:$48 sps:$4 sm:$0xff]   ;;  %v14206_v8 = vld [vmem:[%s19258_s6 + $0xc20] ss:$48 sps:$4 sm:$0xff]  }
 0x6aa   :  { %v18149_v9 = vrot.slane %v9431_v0, %v18134_v18  ;;  %v14209_v60 = vld [vmem:[%s19258_s6 + $0xc28] ss:$48 sps:$4 sm:$0xff]   ;;  %v14214_v0 = vld [vmem:[%s19258_s6 + $0xc84] ss:$48 sps:$4 sm:$0xff]  }
 0x6ab   :  { %v18152_v6 = vrot.slane %v9432_v19, %v18134_v18  ;;  %8547 = vmatpush1.bf16.msra.mxu0 %v14182_v47 }
 0x6ac   :  { %v14625_v24 = vpop.eup %14624  ;;  %8653 = vmatpush1.bf16.msra.mxu1 %v14185_v2  ;;  %8548 = vmatprep.subr.bf16.mxu0 %v14190_v63  ;;  %v14217_v63 = vld [vmem:[%s19258_s6 + $0xc8c] ss:$48 sps:$4 sm:$0xff]  }
 0x6ad   :  { %v14627_v14 = vpop.eup %14626  ;;  %v9403_v31 = vadd.f32 1.0, %v14625_v24  ;;  %8654 = vmatprep.subr.bf16.mxu1 %v14193_v45  ;;  %v9447_v7 = vcombine.low %v18149_v9, %v18152_v6  ;;  %v14212_v24 = vld [vmem:[%s19258_s6 + $0xc80] ss:$48 sps:$4 sm:$0xff]   ;;  %v14233_v9 = vld [vmem:[%s19258_s6 + $0xda8] ss:$48 sps:$4 sm:$0xff]  }
 0x6ae   :  { %v14629_v20 = vpop.eup %14628  ;;  %v9405_v37 = vadd.f32 1.0, %v14627_v14  ;;  %v14220_v14 = vld [vmem:[%s19258_s6 + $0xce4] ss:$48 sps:$4 sm:$0xff]  }
 0x6af   :  { %v14631_v56 = vpop.eup %14630  ;;  %14632 = vrcp.f32 %v9403_v31  ;;  %v9404_v10 = vadd.f32 1.0, %v14629_v20  ;;  %8549 = vmatpush1.bf16.msra.mxu0 %v14188_v48  ;;  %v14223_v31 = vld [vmem:[%s19258_s6 + $0xcec] ss:$48 sps:$4 sm:$0xff]   ;;  %v14238_v6 = vld [vmem:[%s19258_s6 + $0xe04] ss:$48 sps:$4 sm:$0xff]  }
 0x6b0   :  { %14634 = vrcp.f32 %v9405_v37  ;;  %v9406_v54 = vadd.f32 1.0, %v14631_v56  ;;  %8655 = vmatpush1.bf16.msra.mxu1 %v14191_v3  ;;  %8550 = vmatprep.subr.bf16.mxu0 %v14196_v15  ;;  %v14215_v15 = vld [vmem:[%s19258_s6 + $0xc88] ss:$48 sps:$4 sm:$0xff]   ;;  %v14218_v37 = vld [vmem:[%s19258_s6 + $0xce0] ss:$48 sps:$4 sm:$0xff]  }
 0x6b1   :  { %14636 = vrcp.f32 %v9404_v10  ;;  %8656 = vmatprep.subr.bf16.mxu1 %v14199_v5  ;;  %v14221_v56 = vld [vmem:[%s19258_s6 + $0xce8] ss:$48 sps:$4 sm:$0xff]   ;;  %v14226_v10 = vld [vmem:[%s19258_s6 + $0xd44] ss:$48 sps:$4 sm:$0xff]  }
 0x6b2   :  { %14638 = vrcp.f32 %v9406_v54  ;;  %v14229_v54 = vld [vmem:[%s19258_s6 + $0xd4c] ss:$48 sps:$4 sm:$0xff]  }
 0x6b3   :  { %8551 = vmatpush1.bf16.msra.mxu0 %v14194_v58 }
 0x6b4   :  { %8657 = vmatpush1.bf16.msra.mxu1 %v14197_v43  ;;  %8552 = vmatprep.subr.bf16.mxu0 %v14202_v22  ;;  %v14224_v22 = vld [vmem:[%s19258_s6 + $0xd40] ss:$48 sps:$4 sm:$0xff]  }
 0x6b5   :  { %8658 = vmatprep.subr.bf16.mxu1 %v14205_v12  ;;  %v14227_v12 = vld [vmem:[%s19258_s6 + $0xd48] ss:$48 sps:$4 sm:$0xff]  }
 0x6b7   :  { %8553 = vmatpush1.bf16.msra.mxu0 %v14200_v17  ;;  %v14232_v17 = vld [vmem:[%s19258_s6 + $0xda4] ss:$48 sps:$4 sm:$0xff]  }
 0x6b8   :  { %8659 = vmatpush1.bf16.msra.mxu1 %v14203_v36  ;;  %8681 = vmatprep.subr.bf16.mxu0 %v14208_v16  ;;  %v14235_v36 = vld [vmem:[%s19258_s6 + $0xdac] ss:$48 sps:$4 sm:$0xff]  }
 0x6b9   :  { %v14633_v47 = vpop.eup %14632  ;;  %8787 = vmatprep.subr.bf16.mxu1 %v14211_v59 }
 0x6ba   :  { %v14635_v2 = vpop.eup %14634  ;;  %8555 = vmatmul.mubr.bf16.vlgmr.msra.gmra.mrb[56].mxu0 %v17749_v21 }
 0x6bb   :  { %v14637_v19 = vpop.eup %14636  ;;  %8661 = vmatmul.mubr.bf16.vlgmr.msra.gmra.mrb[64].mxu1 %v17749_v21  ;;  %8564 = vmatprep.mubr.bf16.mxu0 %v17756_v30 }
 0x6bc   :  { %v14639_v45 = vpop.eup %14638  ;;  %v9448_v48 = vcombine.low %v14633_v47, %v14637_v19  ;;  %8670 = vmatprep.mubr.bf16.mxu1 %v17756_v30  ;;  %8682 = vmatpush1.bf16.msra.mxu0 %v14206_v8  ;;  %v14230_v8 = vld [vmem:[%s19258_s6 + $0xda0] ss:$48 sps:$4 sm:$0xff]  }
 0x6bd   :  { %v9449_v3 = vcombine.low %v14635_v2, %v14639_v45  ;;  %8788 = vmatpush1.bf16.msra.mxu1 %v14209_v60  ;;  %8683 = vmatprep.subr.bf16.mxu0 %v14214_v0  ;;  %v14236_v60 = vld [vmem:[%s19258_s6 + $0xe00] ss:$48 sps:$4 sm:$0xff]   ;;  %v14239_v0 = vld [vmem:[%s19258_s6 + $0xe08] ss:$48 sps:$4 sm:$0xff]   ;;  %v14244_v2 = vld [vmem:[%s19258_s6 + $0xe64] ss:$48 sps:$4 sm:$0xff]  }
 0x6be   :  { %8789 = vmatprep.subr.bf16.mxu1 %v14217_v63  ;;  %v9456_v5 = vrot.slane %v9448_v48, %v18134_v18  ;;  %v14247_v63 = vld [vmem:[%s19258_s6 + $0xe6c] ss:$48 sps:$4 sm:$0xff]   ;;  %v14242_v19 = vld [vmem:[%s19258_s6 + $0xe60] ss:$48 sps:$4 sm:$0xff]   ;;  %v14245_v45 = vld [vmem:[%s19258_s6 + $0xe68] ss:$48 sps:$4 sm:$0xff]  }
 0x6bf   :  { %v9463_v20 = vrot.slane %v9449_v3, %v18134_v18  ;;  %v14250_v48 = vld [vmem:[%s19258_s6 + $0xec4] ss:$48 sps:$4 sm:$0xff]   ;;  %v14248_v3 = vld [vmem:[%s19258_s6 + $0xec0] ss:$48 sps:$4 sm:$0xff]  }
 0x6c0   :  { %8684 = vmatpush1.bf16.msra.mxu0 %v14212_v24  ;;  %v14253_v24 = vld [vmem:[%s19258_s6 + $0xecc] ss:$48 sps:$4 sm:$0xff]  }
 0x6c1   :  { %8790 = vmatpush1.bf16.msra.mxu1 %v14215_v15  ;;  %8685 = vmatprep.subr.bf16.mxu0 %v14220_v14  ;;  %v9464_v58 = vcombine.low %v9456_v5, %v9463_v20  ;;  %v14251_v15 = vld [vmem:[%s19258_s6 + $0xec8] ss:$48 sps:$4 sm:$0xff]   ;;  %v14256_v14 = vld [vmem:[%s19258_s6 + $0xf24] ss:$48 sps:$4 sm:$0xff]   ;;  %v14254_v5 = vld [vmem:[%s19258_s6 + $0xf20] ss:$48 sps:$4 sm:$0xff]  }
 0x6c2   :  { %8565 = vmatmul.mubr.bf16.gmra.mrb[60].mxu0 %v17791_v25  ;;  %8791 = vmatprep.subr.bf16.mxu1 %v14223_v31  ;;  %v14259_v31 = vld [vmem:[%s19258_s6 + $0xf2c] ss:$48 sps:$4 sm:$0xff]   ;;  %v14257_v20 = vld [vmem:[%s19258_s6 + $0xf28] ss:$48 sps:$4 sm:$0xff]  }
 0x6c3   :  { %8671 = vmatmul.mubr.bf16.gmra.mrb[68].mxu1 %v17791_v25  ;;  %8713 = vmatprep.mubr.bf16.mxu0 %v17298_v52  ;;  %v9469_v43 = vrot.slane %v9464_v58, 7  ;;  %v14263_v58 = vld [vmem:[%s19258_s6 + $0xf88] ss:$48 sps:$4 sm:$0xff]  }
 0x6c4   :  { %8686 = vmatpush1.bf16.msra.mxu0 %v14218_v37  ;;  %8819 = vmatprep.mubr.bf16.mxu1 %v17298_v52  ;;  %v14262_v37 = vld [vmem:[%s19258_s6 + $0xf84] ss:$48 sps:$4 sm:$0xff]  }
 0x6c5   :  { %8792 = vmatpush1.bf16.msra.mxu1 %v14221_v56  ;;  %8687 = vmatprep.subr.bf16.mxu0 %v14226_v10  ;;  %v9471_v52 = vsel %vm9470_vm1, %v9469_v43, %v9447_v7  ;;  %v14241_v7 = vld [vmem:[%s19258_s6 + $0xe0c] ss:$48 sps:$4 sm:$0xff]   ;;  %v14260_v10 = vld [vmem:[%s19258_s6 + $0xf80] ss:$48 sps:$4 sm:$0xff]  }
 0x6c6   :  { %8793 = vmatprep.subr.bf16.mxu1 %v14229_v54  ;;  %v9473_v16 = vsel %vm9472_vm2, %v9469_v43, %v9471_v52  ;;  %v14265_v56 = vld [vmem:[%s19258_s6 + $0xf8c] ss:$48 sps:$4 sm:$0xff]   ;;  %v14268_v54 = vld [vmem:[%s19258_s6 + $0xfe4] ss:$48 sps:$4 sm:$0xff]  }
 0x6c7   :  { %v9475_v59 = vsel %vm9474_vm3, %v9469_v43, %v9473_v16  ;;  %v14277_v52 = vld [vmem:[%s19258_s6 + $0x104c] ss:$48 sps:$4 sm:$0xff]   ;;  %v14275_v16 = vld [vmem:[%s19258_s6 + $0x1048] ss:$48 sps:$4 sm:$0xff]  }
 0x6c8   :  { %8688 = vmatpush1.bf16.msra.mxu0 %v14224_v22  ;;  %v18257_v47 = vsel %vm9476_vm4, %v9469_v43, %v9475_v59  ;;  %v14271_v43 = vld [vmem:[%s19258_s6 + $0xfec] ss:$48 sps:$4 sm:$0xff]   ;;  %v14266_v22 = vld [vmem:[%s19258_s6 + $0xfe0] ss:$48 sps:$4 sm:$0xff]   ;;  %v14280_v59 = vld [vmem:[%s19258_s6 + $0x10a4] ss:$48 sps:$4 sm:$0xff]  }
 0x6c9   :  { %8794 = vmatpush1.bf16.msra.mxu1 %v14227_v12  ;;  %8689 = vmatprep.subr.bf16.mxu0 %v14232_v17  ;;  %v14269_v12 = vld [vmem:[%s19258_s6 + $0xfe8] ss:$48 sps:$4 sm:$0xff]   ;;  %v14274_v17 = vld [vmem:[%s19258_s6 + $0x1044] ss:$48 sps:$4 sm:$0xff]  }
 0x6ca   :  { %8795 = vmatprep.subr.bf16.mxu1 %v14235_v36  ;;  %v14272_v36 = vld [vmem:[%s19258_s6 + $0x1040] ss:$48 sps:$4 sm:$0xff]  }
 0x6cc   :  { %8690 = vmatpush1.bf16.msra.mxu0 %v14230_v8  ;;  %v14283_v8 = vld [vmem:[%s19258_s6 + $0x10ac] ss:$48 sps:$4 sm:$0xff]  }
 0x6cd   :  { %8796 = vmatpush1.bf16.msra.mxu1 %v14233_v9  ;;  %8691 = vmatprep.subr.bf16.mxu0 %v14238_v6  ;;  %v14278_v9 = vld [vmem:[%s19258_s6 + $0x10a0] ss:$48 sps:$4 sm:$0xff]   ;;  %v14281_v6 = vld [vmem:[%s19258_s6 + $0x10a8] ss:$48 sps:$4 sm:$0xff]  }
 0x6ce   :  { %8797 = vmatprep.subr.bf16.mxu1 %v14241_v7  ;;  %v14286_v7 = vld [vmem:[%s19258_s6 + $0x1104] ss:$48 sps:$4 sm:$0xff]  }
 0x6d0   :  { %8692 = vmatpush1.bf16.msra.mxu0 %v14236_v60  ;;  %v14289_v60 = vld [vmem:[%s19258_s6 + $0x110c] ss:$48 sps:$4 sm:$0xff]  }
 0x6d1   :  { %8798 = vmatpush1.bf16.msra.mxu1 %v14239_v0  ;;  %8693 = vmatprep.subr.bf16.mxu0 %v14244_v2  ;;  %v14284_v0 = vld [vmem:[%s19258_s6 + $0x1100] ss:$48 sps:$4 sm:$0xff]   ;;  %v14287_v2 = vld [vmem:[%s19258_s6 + $0x1108] ss:$48 sps:$4 sm:$0xff]  }
 0x6d2   :  { %8799 = vmatprep.subr.bf16.mxu1 %v14247_v63  ;;  %v14292_v63 = vld [vmem:[%s19258_s6 + $0x1164] ss:$48 sps:$4 sm:$0xff]  }
 0x6d4   :  { %8694 = vmatpush1.bf16.msra.mxu0 %v14242_v19  ;;  %v14295_v19 = vld [vmem:[%s19258_s6 + $0x116c] ss:$48 sps:$4 sm:$0xff]  }
 0x6d5   :  { %8800 = vmatpush1.bf16.msra.mxu1 %v14245_v45  ;;  %8695 = vmatprep.subr.bf16.mxu0 %v14250_v48  ;;  %v14290_v45 = vld [vmem:[%s19258_s6 + $0x1160] ss:$48 sps:$4 sm:$0xff]   ;;  %v14293_v48 = vld [vmem:[%s19258_s6 + $0x1168] ss:$48 sps:$4 sm:$0xff]  }
 0x6d6   :  { %8801 = vmatprep.subr.bf16.mxu1 %v14253_v24  ;;  %v14298_v24 = vld [vmem:[%s19258_s6 + $0x11c4] ss:$48 sps:$4 sm:$0xff]  }
 0x6d8   :  { %8696 = vmatpush1.bf16.msra.mxu0 %v14248_v3  ;;  %v14301_v3 = vld [vmem:[%s19258_s6 + $0x11cc] ss:$48 sps:$4 sm:$0xff]  }
 0x6d9   :  { %8802 = vmatpush1.bf16.msra.mxu1 %v14251_v15  ;;  %8697 = vmatprep.subr.bf16.mxu0 %v14256_v14  ;;  %v14296_v15 = vld [vmem:[%s19258_s6 + $0x11c0] ss:$48 sps:$4 sm:$0xff]   ;;  %v14299_v14 = vld [vmem:[%s19258_s6 + $0x11c8] ss:$48 sps:$4 sm:$0xff]  }
 0x6da   :  { %8803 = vmatprep.subr.bf16.mxu1 %v14259_v31  ;;  %v14304_v31 = vld [vmem:[%s19258_s6 + $0x1224] ss:$48 sps:$4 sm:$0xff]  }
 0x6dc   :  { %8698 = vmatpush1.bf16.msra.mxu0 %v14254_v5  ;;  %v14307_v5 = vld [vmem:[%s19258_s6 + $0x122c] ss:$48 sps:$4 sm:$0xff]  }
 0x6dd   :  { %8804 = vmatpush1.bf16.msra.mxu1 %v14257_v20  ;;  %8699 = vmatprep.subr.bf16.mxu0 %v14262_v37  ;;  %v14302_v20 = vld [vmem:[%s19258_s6 + $0x1220] ss:$48 sps:$4 sm:$0xff]   ;;  %v14305_v37 = vld [vmem:[%s19258_s6 + $0x1228] ss:$48 sps:$4 sm:$0xff]  }
 0x6de   :  { %8805 = vmatprep.subr.bf16.mxu1 %v14265_v56  ;;  %v14310_v56 = vld [vmem:[%s19258_s6 + $0x1284] ss:$48 sps:$4 sm:$0xff]  }
 0x6e0   :  { %8700 = vmatpush1.bf16.msra.mxu0 %v14260_v10  ;;  %v14313_v10 = vld [vmem:[%s19258_s6 + $0x128c] ss:$48 sps:$4 sm:$0xff]  }
 0x6e1   :  { %8806 = vmatpush1.bf16.msra.mxu1 %v14263_v58  ;;  %8701 = vmatprep.subr.bf16.mxu0 %v14268_v54  ;;  %v14308_v58 = vld [vmem:[%s19258_s6 + $0x1280] ss:$48 sps:$4 sm:$0xff]   ;;  %v14311_v54 = vld [vmem:[%s19258_s6 + $0x1288] ss:$48 sps:$4 sm:$0xff]  }
 0x6e2   :  { %8807 = vmatprep.subr.bf16.mxu1 %v14271_v43  ;;  %v14316_v43 = vld [vmem:[%s19258_s6 + $0x12e4] ss:$48 sps:$4 sm:$0xff]  }
 0x6e4   :  { %8702 = vmatpush1.bf16.msra.mxu0 %v14266_v22  ;;  %v14317_v22 = vld [vmem:[%s19258_s6 + $0x12e8] ss:$48 sps:$4 sm:$0xff]  }
 0x6e5   :  { %8808 = vmatpush1.bf16.msra.mxu1 %v14269_v12  ;;  %8703 = vmatprep.subr.bf16.mxu0 %v14274_v17  ;;  %v14322_v12 = vld [vmem:[%s19258_s6 + $0x1344] ss:$48 sps:$4 sm:$0xff]   ;;  %v14325_v17 = vld [vmem:[%s19258_s6 + $0x134c] ss:$48 sps:$4 sm:$0xff]  }
 0x6e6   :  { %8809 = vmatprep.subr.bf16.mxu1 %v14277_v52  ;;  %v14320_v52 = vld [vmem:[%s19258_s6 + $0x1340] ss:$48 sps:$4 sm:$0xff]  }
 0x6e8   :  { %8704 = vmatpush1.bf16.msra.mxu0 %v14272_v36  ;;  %v14323_v36 = vld [vmem:[%s19258_s6 + $0x1348] ss:$48 sps:$4 sm:$0xff]  }
 0x6e9   :  { %8810 = vmatpush1.bf16.msra.mxu1 %v14275_v16  ;;  %8705 = vmatprep.subr.bf16.mxu0 %v14280_v59  ;;  %v14328_v16 = vld [vmem:[%s19258_s6 + $0x13a4] ss:$48 sps:$4 sm:$0xff]   ;;  %v14326_v59 = vld [vmem:[%s19258_s6 + $0x13a0] ss:$48 sps:$4 sm:$0xff]  }
 0x6ea   :  { %8811 = vmatprep.subr.bf16.mxu1 %v14283_v8  ;;  %v14329_v8 = vld [vmem:[%s19258_s6 + $0x13a8] ss:$48 sps:$4 sm:$0xff]  }
 0x6ec   :  { %8706 = vmatpush1.bf16.msra.mxu0 %v14278_v9 }
 0x6ed   :  { %8812 = vmatpush1.bf16.msra.mxu1 %v14281_v6  ;;  %8707 = vmatprep.subr.bf16.mxu0 %v14286_v7  ;;  %v14334_v6 = vld [vmem:[%s19258_s6 + $0x1404] ss:$48 sps:$4 sm:$0xff]  }
 0x6ee   :  { %8813 = vmatprep.subr.bf16.mxu1 %v14289_v60 }
 0x6f0   :  { %8708 = vmatpush1.bf16.msra.mxu0 %v14284_v0 }
 0x6f1   :  { %8814 = vmatpush1.bf16.msra.mxu1 %v14287_v2  ;;  %8709 = vmatprep.subr.bf16.mxu0 %v14292_v63  ;;  %v14337_v2 = vld [vmem:[%s19258_s6 + $0x140c] ss:$48 sps:$4 sm:$0xff]  }
 0x6f2   :  { %8815 = vmatprep.subr.bf16.mxu1 %v14295_v19 }
 0x6f4   :  { %8710 = vmatpush1.bf16.msra.mxu0 %v14290_v45 }
 0x6f5   :  { %8816 = vmatpush1.bf16.msra.mxu1 %v14293_v48  ;;  %8711 = vmatprep.subr.bf16.mxu0 %v14298_v24  ;;  %v14332_v24 = vld [vmem:[%s19258_s6 + $0x1400] ss:$48 sps:$4 sm:$0xff]  }
 0x6f6   :  { %8817 = vmatprep.subr.bf16.mxu1 %v14301_v3 }
 0x6f8   :  { %8712 = vmatpush1.bf16.msra.mxu0 %v14296_v15 }
 0x6f9   :  { %8818 = vmatpush1.bf16.msra.mxu1 %v14299_v14  ;;  %8734 = vmatprep.subr.bf16.mxu0 %v14304_v31  ;;  %v14335_v14 = vld [vmem:[%s19258_s6 + $0x1408] ss:$48 sps:$4 sm:$0xff]  }
 0x6fa   :  { %8840 = vmatprep.subr.bf16.mxu1 %v14307_v5 }
 0x6fb   :  { %8714 = vmatmul.mubr.bf16.vlgmr.msra.gmra.mrb[64].mxu0 %v17502_v46 }
 0x6fc   :  { %8820 = vmatmul.mubr.bf16.vlgmr.msra.gmra.mrb[72].mxu1 %v17502_v46  ;;  %8723 = vmatprep.mubr.bf16.mxu0 %v17509_v1  ;;  %v14319_v46 = vld [vmem:[%s19258_s6 + $0x12ec] ss:$48 sps:$4 sm:$0xff]  }
 0x6fd   :  { %8735 = vmatpush1.bf16.msra.mxu0 %v14302_v20  ;;  %8829 = vmatprep.mubr.bf16.mxu1 %v17509_v1  ;;  %v14314_v1 = vld [vmem:[%s19258_s6 + $0x12e0] ss:$48 sps:$4 sm:$0xff]  }
 0x6fe   :  { %8841 = vmatpush1.bf16.msra.mxu1 %v14305_v37  ;;  %8736 = vmatprep.subr.bf16.mxu0 %v14310_v56  ;;  %v14340_v37 = vld [vmem:[%s19258_s6 + $0x1464] ss:$48 sps:$4 sm:$0xff]  }
 0x6ff   :  { %8842 = vmatprep.subr.bf16.mxu1 %v14313_v10 }
 0x701   :  { %8737 = vmatpush1.bf16.msra.mxu0 %v14308_v58 }
 0x702   :  { %8843 = vmatpush1.bf16.msra.mxu1 %v14311_v54  ;;  %8738 = vmatprep.subr.bf16.mxu0 %v14316_v43 }
 0x703   :  { %8724 = vmatmul.mubr.bf16.gmra.mrb[68].mxu0 %v17556_v26  ;;  %8844 = vmatprep.subr.bf16.mxu1 %v14319_v46  ;;  %v14343_v46 = vld [vmem:[%s19258_s6 + $0x146c] ss:$48 sps:$4 sm:$0xff]  }
 0x704   :  { %8830 = vmatmul.mubr.bf16.gmra.mrb[76].mxu1 %v17556_v26  ;;  %8766 = vmatprep.mubr.bf16.mxu0 %v17563_v23  ;;  %v14331_v26 = vld [vmem:[%s19258_s6 + $0x13ac] ss:$48 sps:$4 sm:$0xff]  }
 0x705   :  { %8739 = vmatpush1.bf16.msra.mxu0 %v14314_v1  ;;  %8872 = vmatprep.mubr.bf16.mxu1 %v17563_v23  ;;  %v18459_v23 = vld [vmem:[%s19259_s7 + $0xc] sm:$0xff] }
 0x706   :  { %8845 = vmatpush1.bf16.msra.mxu1 %v14317_v22  ;;  %8740 = vmatprep.subr.bf16.mxu0 %v14322_v12  ;;  %v6280_v9 = vrot.slane %v18459_v23, %v15828_v38  ;;  %v6288_v60 = vrot.slane %v18459_v23, %v16987_v34  ;;  %v6284_v0 = vrot.slane %v18459_v23, %v15831_v39 }
 0x707   :  { %8846 = vmatprep.subr.bf16.mxu1 %v14325_v17  ;;  %v6292_v45 = vrot.slane %v18459_v23, %v15990_v49 }
 0x709   :  { %8741 = vmatpush1.bf16.msra.mxu0 %v14320_v52 }
 0x70a   :  { %8847 = vmatpush1.bf16.msra.mxu1 %v14323_v36  ;;  %8742 = vmatprep.subr.bf16.mxu0 %v14328_v16  ;;  %v14338_v36 = vld [vmem:[%s19258_s6 + $0x1460] ss:$48 sps:$4 sm:$0xff]  }
 0x70b   :  { %8848 = vmatprep.subr.bf16.mxu1 %v14331_v26  ;;  %v8344_v7 = vpop.f32.mrb[48].mxu0  ;;  %v14341_v26 = vld [vmem:[%s19258_s6 + $0x1468] ss:$48 sps:$4 sm:$0xff]  }
 0x70c   :  { %v8450_v63 = vpop.f32.mrb[56].mxu1  ;;  %v8346_v19 = vpop.f32.mrb[49].mxu0  ;;  %v18484_v15 = vadd.f32 %v8344_v7, %v6280_v9 }
 0x70d   :  { %8743 = vmatpush1.bf16.msra.mxu0 %v14326_v59  ;;  %v8452_v48 = vpop.f32.mrb[57].mxu1  ;;  %v8348_v3 = vpop.f32.mrb[50].mxu0  ;;  %v18494_v56 = vadd.f32 %v8450_v63, %v6288_v60  ;;  %v18496_v10 = vadd.f32 %v8346_v19, %v6284_v0  ;;  %v14346_v59 = vld [vmem:[%s19258_s6 + $0x14c4] ss:$48 sps:$4 sm:$0xff]   ;;  %v14344_v19 = vld [vmem:[%s19258_s6 + $0x14c0] ss:$48 sps:$4 sm:$0xff]  }
 0x70e   :  { %8849 = vmatpush1.bf16.msra.mxu1 %v14329_v8  ;;  %8744 = vmatprep.subr.bf16.mxu0 %v14334_v6  ;;  %v18489_v31 = vadd.f32 %v8348_v3, %v6280_v9  ;;  %v8454_v5 = vpop.f32.mrb[58].mxu1  ;;  %v8350_v20 = vpop.f32.mrb[51].mxu0  ;;  %v18505_v1 = vadd.f32 %v8452_v48, %v6292_v45  ;;  %v14349_v6 = vld [vmem:[%s19258_s6 + $0x14cc] ss:$48 sps:$4 sm:$0xff]   ;;  %v14347_v3 = vld [vmem:[%s19258_s6 + $0x14c8] ss:$48 sps:$4 sm:$0xff]  }
 0x70f   :  { %8850 = vmatprep.subr.bf16.mxu1 %v14337_v2  ;;  %v18498_v58 = vadd.f32 %v8454_v5, %v6288_v60  ;;  %v18500_v54 = vadd.f32 %v8350_v20, %v6284_v0  ;;  %v8456_v43 = vpop.f32.mrb[59].mxu1 }
 0x710   :  { %v18509_v12 = vadd.f32 %v8456_v43, %v6292_v45 }
 0x711   :  { %8745 = vmatpush1.bf16.msra.mxu0 %v14332_v24  ;;  %v8894_v52 = vpack.c.bf16 %v18500_v54, %v18496_v10  ;;  %v19339_v10 = vsub.s32 7, %v19337_v57 }
 0x712   :  { %8851 = vmatpush1.bf16.msra.mxu1 %v14335_v14  ;;  %8746 = vmatprep.subr.bf16.mxu0 %v14340_v37  ;;  %v14352_v37 = vld [vmem:[%s19258_s6 + $0x1524] ss:$48 sps:$4 sm:$0xff]  }
 0x713   :  { %8852 = vmatprep.subr.bf16.mxu1 %v14343_v46  ;;  %v8354_v8 = vpop.f32.mrb[52].mxu0  ;;  %v6308_v54 = vrot.slane %v18459_v23, %v19339_v10 }
 0x714   :  { %v8460_v7 = vpop.f32.mrb[60].mxu1  ;;  %v8356_v2 = vpop.f32.mrb[53].mxu0  ;;  %v18532_v24 = vadd.f32 %v8354_v8, %v6280_v9 }
 0x715   :  { %8747 = vmatpush1.bf16.msra.mxu0 %v14338_v36  ;;  %v8462_v63 = vpop.f32.mrb[61].mxu1  ;;  %v8358_v48 = vpop.f32.mrb[54].mxu0  ;;  %v18542_v43 = vadd.f32 %v8460_v7, %v6288_v60  ;;  %v18544_v46 = vadd.f32 %v8356_v2, %v6284_v0  ;;  %v14358_v2 = vld [vmem:[%s19258_s6 + $0x1584] ss:$48 sps:$4 sm:$0xff]  }
 0x716   :  { %8853 = vmatpush1.bf16.msra.mxu1 %v14341_v26  ;;  %8748 = vmatprep.subr.bf16.mxu0 %v14346_v59  ;;  %v18537_v14 = vadd.f32 %v8358_v48, %v6280_v9  ;;  %v8464_v5 = vpop.f32.mrb[62].mxu1  ;;  %v8360_v20 = vpop.f32.mrb[55].mxu0  ;;  %v14355_v9 = vld [vmem:[%s19258_s6 + $0x152c] ss:$48 sps:$4 sm:$0xff]   ;;  %v18553_v8 = vadd.f32 %v8462_v63, %v6292_v45 }
 0x717   :  { %8854 = vmatprep.subr.bf16.mxu1 %v14349_v6  ;;  %v18546_v36 = vadd.f32 %v8464_v5, %v6288_v60  ;;  %v18548_v26 = vadd.f32 %v8360_v20, %v6284_v0  ;;  %v8466_v59 = vpop.f32.mrb[63].mxu1  ;;  %v14350_v0 = vld [vmem:[%s19258_s6 + $0x1520] ss:$48 sps:$4 sm:$0xff]   ;;  %v14361_v63 = vld [vmem:[%s19258_s6 + $0x158c] ss:$48 sps:$4 sm:$0xff]  }
 0x718   :  { %v18557_v17 = vadd.f32 %v8466_v59, %v6292_v45  ;;  %v14353_v45 = vld [vmem:[%s19258_s6 + $0x1528] ss:$48 sps:$4 sm:$0xff]   ;;  %v14364_v5 = vld [vmem:[%s19258_s6 + $0x15e4] ss:$48 sps:$4 sm:$0xff]   ;;  %v14367_v20 = vld [vmem:[%s19258_s6 + $0x15ec] ss:$48 sps:$4 sm:$0xff]  }
 0x719   :  { %8749 = vmatpush1.bf16.msra.mxu0 %v14344_v19  ;;  %v8898_v60 = vpack.c.bf16 %v18548_v26, %v18544_v46  ;;  %v14356_v19 = vld [vmem:[%s19258_s6 + $0x1580] ss:$48 sps:$4 sm:$0xff]   ;;  %v14365_v59 = vld [vmem:[%s19258_s6 + $0x15e8] ss:$48 sps:$4 sm:$0xff]  }
 0x71a   :  { %8855 = vmatpush1.bf16.msra.mxu1 %v14347_v3  ;;  %8750 = vmatprep.subr.bf16.mxu0 %v14352_v37  ;;  %v14359_v3 = vld [vmem:[%s19258_s6 + $0x1588] ss:$48 sps:$4 sm:$0xff]   ;;  %v14362_v37 = vld [vmem:[%s19258_s6 + $0x15e0] ss:$48 sps:$4 sm:$0xff]  }
 0x71b   :  { %8856 = vmatprep.subr.bf16.mxu1 %v14355_v9  ;;  %v14370_v9 = vld [vmem:[%s19258_s6 + $0x1644] ss:$48 sps:$4 sm:$0xff]  }
 0x71d   :  { %8751 = vmatpush1.bf16.msra.mxu0 %v14350_v0  ;;  %v14373_v0 = vld [vmem:[%s19258_s6 + $0x164c] ss:$48 sps:$4 sm:$0xff]  }
 0x71e   :  { %8857 = vmatpush1.bf16.msra.mxu1 %v14353_v45  ;;  %8752 = vmatprep.subr.bf16.mxu0 %v14358_v2  ;;  %v14368_v45 = vld [vmem:[%s19258_s6 + $0x1640] ss:$48 sps:$4 sm:$0xff]   ;;  %v14371_v2 = vld [vmem:[%s19258_s6 + $0x1648] ss:$48 sps:$4 sm:$0xff]  }
 0x71f   :  { %8858 = vmatprep.subr.bf16.mxu1 %v14361_v63  ;;  %v14376_v63 = vld [vmem:[%s19258_s6 + $0x16a4] ss:$48 sps:$4 sm:$0xff]  }
 0x721   :  { %8753 = vmatpush1.bf16.msra.mxu0 %v14356_v19  ;;  %v14379_v19 = vld [vmem:[%s19258_s6 + $0x16ac] ss:$48 sps:$4 sm:$0xff]  }
 0x722   :  { %8859 = vmatpush1.bf16.msra.mxu1 %v14359_v3  ;;  %8754 = vmatprep.subr.bf16.mxu0 %v14364_v5  ;;  %v14374_v3 = vld [vmem:[%s19258_s6 + $0x16a0] ss:$48 sps:$4 sm:$0xff]   ;;  %v14377_v5 = vld [vmem:[%s19258_s6 + $0x16a8] ss:$48 sps:$4 sm:$0xff]  }
 0x723   :  { %8860 = vmatprep.subr.bf16.mxu1 %v14367_v20  ;;  %v14382_v20 = vld [vmem:[%s19258_s6 + $0x1704] ss:$48 sps:$4 sm:$0xff]  }
 0x725   :  { %8755 = vmatpush1.bf16.msra.mxu0 %v14362_v37  ;;  %v14385_v37 = vld [vmem:[%s19258_s6 + $0x170c] ss:$48 sps:$4 sm:$0xff]  }
 0x726   :  { %8861 = vmatpush1.bf16.msra.mxu1 %v14365_v59  ;;  %8756 = vmatprep.subr.bf16.mxu0 %v14370_v9  ;;  %v14380_v59 = vld [vmem:[%s19258_s6 + $0x1700] ss:$48 sps:$4 sm:$0xff]   ;;  %v14383_v9 = vld [vmem:[%s19258_s6 + $0x1708] ss:$48 sps:$4 sm:$0xff]  }
 0x727   :  { %8862 = vmatprep.subr.bf16.mxu1 %v14373_v0  ;;  %v14388_v0 = vld [vmem:[%s19258_s6 + $0x1764] ss:$48 sps:$4 sm:$0xff]  }
 0x729   :  { %8757 = vmatpush1.bf16.msra.mxu0 %v14368_v45  ;;  %v14391_v45 = vld [vmem:[%s19258_s6 + $0x176c] ss:$48 sps:$4 sm:$0xff]  }
 0x72a   :  { %8863 = vmatpush1.bf16.msra.mxu1 %v14371_v2  ;;  %8758 = vmatprep.subr.bf16.mxu0 %v14376_v63  ;;  %v14386_v2 = vld [vmem:[%s19258_s6 + $0x1760] ss:$48 sps:$4 sm:$0xff]   ;;  %v14389_v63 = vld [vmem:[%s19258_s6 + $0x1768] ss:$48 sps:$4 sm:$0xff]  }
 0x72b   :  { %8864 = vmatprep.subr.bf16.mxu1 %v14379_v19  ;;  %v14394_v19 = vld [vmem:[%s19258_s6 + $0x17c4] ss:$48 sps:$4 sm:$0xff]  }
 0x72d   :  { %8759 = vmatpush1.bf16.msra.mxu0 %v14374_v3  ;;  %v14397_v3 = vld [vmem:[%s19258_s6 + $0x17cc] ss:$48 sps:$4 sm:$0xff]  }
 0x72e   :  { %8865 = vmatpush1.bf16.msra.mxu1 %v14377_v5  ;;  %8760 = vmatprep.subr.bf16.mxu0 %v14382_v20  ;;  %v14392_v5 = vld [vmem:[%s19258_s6 + $0x17c0] ss:$48 sps:$4 sm:$0xff]   ;;  %v14395_v20 = vld [vmem:[%s19258_s6 + $0x17c8] ss:$48 sps:$4 sm:$0xff]  }
 0x72f   :  { %8866 = vmatprep.subr.bf16.mxu1 %v14385_v37  ;;  %v6296_v37 = vrot.slane %v18459_v23, %v17195_v29 }
 0x731   :  { %8761 = vmatpush1.bf16.msra.mxu0 %v14380_v59  ;;  %v19338_v59 = vsub.s32 6, %v19337_v57 }
 0x732   :  { %8867 = vmatpush1.bf16.msra.mxu1 %v14383_v9  ;;  %8762 = vmatprep.subr.bf16.mxu0 %v14388_v0  ;;  %v6300_v9 = vrot.slane %v18459_v23, %v17199_v4 }
 0x733   :  { %8868 = vmatprep.subr.bf16.mxu1 %v14391_v45 }
 0x735   :  { %8763 = vmatpush1.bf16.msra.mxu0 %v14386_v2 }
 0x736   :  { %8869 = vmatpush1.bf16.msra.mxu1 %v14389_v63  ;;  %8764 = vmatprep.subr.bf16.mxu0 %v14394_v19 }
 0x737   :  { %8870 = vmatprep.subr.bf16.mxu1 %v14397_v3 }
 0x739   :  { %8765 = vmatpush1.bf16.msra.mxu0 %v14392_v5 }
 0x73a   :  { %8871 = vmatpush1.bf16.msra.mxu1 %v14395_v20 }
 0x73c   :  { %8767 = vmatmul.mubr.bf16.vlgmr.msra.gmra.mrb[64].mxu0 %v17749_v21 }
 0x73d   :  { %8873 = vmatmul.mubr.bf16.vlgmr.msra.gmra.mrb[72].mxu1 %v17749_v21  ;;  %8776 = vmatprep.mubr.bf16.mxu0 %v17756_v30 }
 0x73e   :  { %8882 = vmatprep.mubr.bf16.mxu1 %v17756_v30  ;;  %v6304_v30 = vrot.slane %v18459_v23, %v19338_v59 }
 0x744   :  { %8777 = vmatmul.mubr.bf16.gmra.mrb[68].mxu0 %v17791_v25 }
 0x745   :  { %8883 = vmatmul.mubr.bf16.gmra.mrb[76].mxu1 %v17791_v25  ;;  %8941 = vmatprep.mubr.bf16.mxu0 %v8894_v52 }
 0x746   :  { %9023 = vmatprep.mubr.bf16.mxu1 %v8898_v60 }
 0x78d   :  { %v8556_v21 = vpop.f32.mrb[56].mxu0 }
 0x78e   :  { %v8662_v25 = vpop.f32.mrb[64].mxu1  ;;  %v8558_v0 = vpop.f32.mrb[57].mxu0  ;;  %v12619_v26 = vadd.f32 %v8556_v21, %v6296_v37 }
 0x78f   :  { %v8664_v52 = vpop.f32.mrb[65].mxu1  ;;  %v8560_v46 = vpop.f32.mrb[58].mxu0  ;;  %v12627_v2 = vadd.f32 %v8662_v25, %v6304_v30  ;;  %v12620_v63 = vadd.f32 %v8558_v0, %v6300_v9 }
 0x790   :  { %v12621_v60 = vadd.f32 %v8560_v46, %v6296_v37  ;;  %v8666_v45 = vpop.f32.mrb[66].mxu1  ;;  %v8562_v29 = vpop.f32.mrb[59].mxu0  ;;  %v12628_v20 = vadd.f32 %v8664_v52, %v6308_v54 }
 0x791   :  { %v12629_v19 = vadd.f32 %v8666_v45, %v6304_v30  ;;  %v12622_v3 = vadd.f32 %v8562_v29, %v6300_v9  ;;  %v8668_v5 = vpop.f32.mrb[67].mxu1 }
 0x792   :  { %v8901_v59 = vpack.c.bf16 %v12621_v60, %v12619_v26  ;;  %v12630_v4 = vadd.f32 %v8668_v5, %v6308_v54 }
 0x793   :  { %v8903_v7 = vpack.c.bf16 %v12629_v19, %v12627_v2  ;;  %v8902_v6 = vpack.c.bf16 %v12622_v3, %v12620_v63 }
 0x794   :  { %v8904_v48 = vpack.c.bf16 %v12630_v4, %v12628_v20  ;;  %v19340_v20 = vpack.c.bf16 %v18489_v31, %v18484_v15  ;;  %v19344_v15 = vpack.c.bf16 %v18498_v58, %v18494_v56  ;;  %v19345_v31 = vpack.c.bf16 %v18546_v36, %v18542_v43 }
 0x795   :  { %v8566_v16 = vpop.f32.mrb[60].mxu0  ;;  %8909 = vmatprep.subr.bf16.mxu0 %v8902_v6 }
 0x796   :  { %v8672_v23 = vpop.f32.mrb[68].mxu1  ;;  %v8568_v10 = vpop.f32.mrb[61].mxu0  ;;  %8910 = vmatpush1.bf16.xpose.msra.mxu0 %v8901_v59  ;;  %v12623_v22 = vadd.f32 %v8566_v16, %v6296_v37  ;;  %v19341_v16 = vpack.c.bf16 %v18509_v12, %v18505_v1  ;;  %v11994_v1 = vld [vmem:[%s19259_s7 + $0x14] sm:$0xf] }
 0x797   :  { %v8674_v21 = vpop.f32.mrb[69].mxu1  ;;  %v8570_v46 = vpop.f32.mrb[62].mxu0  ;;  %8950 = vmatprep.subr.bf16.mxu0 %v8904_v48  ;;  %v12631_v29 = vadd.f32 %v8672_v23, %v6304_v30  ;;  %v12624_v57 = vadd.f32 %v8568_v10, %v6300_v9  ;;  %v19342_v48 = vpack.c.bf16 %v18537_v14, %v18532_v24  ;;  %v6316_v56 = vrot.slane %v11994_v1, %v15831_v39 }
 0x798   :  { %v12625_v25 = vadd.f32 %v8570_v46, %v6296_v37  ;;  %v8676_v0 = vpop.f32.mrb[70].mxu1  ;;  %v8572_v45 = vpop.f32.mrb[63].mxu0  ;;  %v12632_v2 = vadd.f32 %v8674_v21, %v6308_v54  ;;  %v6324_v14 = vrot.slane %v11994_v1, %v15990_v49 }
 0x799   :  { %v12633_v52 = vadd.f32 %v8676_v0, %v6304_v30  ;;  %v12626_v26 = vadd.f32 %v8572_v45, %v6300_v9  ;;  %v8678_v60 = vpop.f32.mrb[71].mxu1 }
 0x79a   :  { %v8905_v63 = vpack.c.bf16 %v12625_v25, %v12623_v22  ;;  %v12634_v19 = vadd.f32 %v8678_v60, %v6308_v54  ;;  %v6312_v22 = vrot.slane %v11994_v1, %v15828_v38 }
 0x79b   :  { %v8907_v3 = vpack.c.bf16 %v12633_v52, %v12631_v29  ;;  %v8906_v6 = vpack.c.bf16 %v12626_v26, %v12624_v57  ;;  %v19343_v57 = vpack.c.bf16 %v18557_v17, %v18553_v8  ;;  %v6320_v17 = vrot.slane %v11994_v1, %v16987_v34 }
 0x79c   :  { %v8908_v5 = vpack.c.bf16 %v12634_v19, %v12632_v2 }
 0x79d   :  { %8942 = vmatmul.mubr.bf16.vlgmr.msra.gmra.mrb[72].mxu0 %v19340_v20  ;;  %8991 = vmatprep.subr.bf16.mxu1 %v8906_v6 }
 0x79e   :  { %8951 = vmatpush1.bf16.xpose.msra.mxu0 %v8903_v7  ;;  %8982 = vmatprep.mubr.bf16.mxu0 %v19341_v16 }
 0x79f   :  { %8992 = vmatpush1.bf16.xpose.msra.mxu1 %v8905_v63 }
 0x7a0   :  { %9032 = vmatprep.subr.bf16.mxu1 %v8908_v5 }
 0x7a6   :  { %9024 = vmatmul.mubr.bf16.vlgmr.msra.gmra.mrb[80].mxu1 %v19342_v48 }
 0x7a7   :  { %9033 = vmatpush1.bf16.xpose.msra.mxu1 %v8907_v3  ;;  %9064 = vmatprep.mubr.bf16.mxu1 %v19343_v57 }
 0x7a9   :  { %8983 = vmatmul.mubr.bf16.vlgmr.msra.gmra.mrb[72].mxu0 %v19344_v15 }
 0x7aa   :  { %9166 = vmatprep.mubr.bf16.mxu0 %v19310_v27 }
 0x7b2   :  { %9065 = vmatmul.mubr.bf16.vlgmr.msra.gmra.mrb[80].mxu1 %v19345_v31 }
 0x7b3   :  { %9209 = vmatprep.mubr.bf16.mxu1 %v19310_v27 }
 0x80f   :  { %v8768_v12 = vpop.f32.mrb[64].mxu0 }
 0x810   :  { %v8874_v58 = vpop.f32.mrb[72].mxu1  ;;  %v8770_v24 = vpop.f32.mrb[65].mxu0  ;;  %v12635_v36 = vadd.f32 %v8768_v12, %v6312_v22 }
 0x811   :  { %v8876_v8 = vpop.f32.mrb[73].mxu1  ;;  %v8772_v43 = vpop.f32.mrb[66].mxu0  ;;  %v12643_v9 = vadd.f32 %v8874_v58, %v6320_v17  ;;  %v12636_v54 = vadd.f32 %v8770_v24, %v6316_v56 }
 0x812   :  { %v12637_v7 = vadd.f32 %v8772_v43, %v6312_v22  ;;  %v8878_v37 = vpop.f32.mrb[74].mxu1  ;;  %v8774_v30 = vpop.f32.mrb[67].mxu0  ;;  %v12644_v10 = vadd.f32 %v8876_v8, %v6324_v14 }
 0x813   :  { %v12645_v59 = vadd.f32 %v8878_v37, %v6320_v17  ;;  %v12638_v4 = vadd.f32 %v8774_v30, %v6316_v56  ;;  %v8880_v23 = vpop.f32.mrb[75].mxu1 }
 0x814   :  { %v9123_v21 = vpack.c.bf16 %v12637_v7, %v12635_v36  ;;  %v12646_v46 = vadd.f32 %v8880_v23, %v6324_v14 }
 0x815   :  { %v9125_v25 = vpack.c.bf16 %v12645_v59, %v12643_v9  ;;  %v9124_v0 = vpack.c.bf16 %v12638_v4, %v12636_v54 }
 0x816   :  { %v9126_v45 = vpack.c.bf16 %v12646_v46, %v12644_v10 }
 0x817   :  { %v8778_v29 = vpop.f32.mrb[68].mxu0  ;;  %9134 = vmatprep.subr.bf16.mxu0 %v9124_v0 }
 0x818   :  { %v18704_v52 = vadd.f32 %v8778_v29, %v6312_v22  ;;  %v8884_v26 = vpop.f32.mrb[76].mxu1  ;;  %9177 = vmatprep.subr.bf16.mxu1 %v9126_v45  ;;  %v8780_v60 = vpop.f32.mrb[69].mxu0  ;;  %9135 = vmatpush1.bf16.msra.mxu0 %v9123_v21  ;;  %v9374_v21 = vld [vmem:[%s19262_s10] sm:$0xff] }
 0x819   :  { %v18706_v2 = vadd.f32 %v8884_v26, %v6320_v17  ;;  %v8886_v63 = vpop.f32.mrb[77].mxu1  ;;  %9178 = vmatpush1.bf16.msra.mxu1 %v9125_v25  ;;  %v8782_v19 = vpop.f32.mrb[70].mxu0  ;;  %v12640_v20 = vadd.f32 %v8780_v60, %v6316_v56  ;;  %v18724_v0 = vmul.f32 %v18257_v47, %v9374_v21 }
 0x81a   :  { %v18708_v3 = vadd.f32 %v8782_v19, %v6312_v22  ;;  %v8888_v6 = vpop.f32.mrb[78].mxu1  ;;  %v8784_v5 = vpop.f32.mrb[71].mxu0  ;;  %v12648_v15 = vadd.f32 %v8886_v63, %v6324_v14 }
 0x81b   :  { %v18710_v16 = vadd.f32 %v8888_v6, %v6320_v17  ;;  %v12642_v48 = vadd.f32 %v8784_v5, %v6316_v56  ;;  %v8890_v57 = vpop.f32.mrb[79].mxu1  ;;  %v9480_v63 = vmul.f32 %v18724_v0, %v18724_v0 }
 0x81c   :  { %v9127_v31 = vpack.c.bf16 %v18708_v3, %v18704_v52  ;;  %v12650_v1 = vadd.f32 %v8890_v57, %v6324_v14  ;;  %v14401_v52 = vld [vmem:[%s19260_s8 + $0x8] ss:$16 sps:$4 sm:$0xff]   ;;  %v14406_v3 = vld [vmem:[%s19260_s8 + $0x24] ss:$16 sps:$4 sm:$0xff]  }
 0x81d   :  { %v9129_v12 = vpack.c.bf16 %v18710_v16, %v18706_v2  ;;  %v9128_v58 = vpack.c.bf16 %v12642_v48, %v12640_v20  ;;  %v9489_v6 = vrot.slane %v9480_v63, %v18134_v18  ;;  %v14404_v16 = vld [vmem:[%s19260_s8 + $0x20] ss:$16 sps:$4 sm:$0xff]  }
 0x81e   :  { %v9130_v24 = vpack.c.bf16 %v12650_v1, %v12648_v15 }
 0x81f   :  { %9223 = vmatprep.subr.bf16.mxu0 %v9128_v58  ;;  %v9497_v15 = vcombine.high %v9489_v6, %v9489_v6  ;;  %v9482_v58 = vcombine.high %v9480_v63, %v9480_v63 }
 0x820   :  { %9266 = vmatprep.subr.bf16.mxu1 %v9130_v24 }
 0x87c   :  { %v8984_v22 = vpop.f32.mrb[72].mxu0 }
 0x87d   :  { %v9073_v8 = vmul.f32 0.044194173, %v8984_v22  ;;  %v8986_v43 = vpop.f32.mrb[73].mxu0 }
 0x87e   :  { %v8987_v36 = vpop.f32.mrb[74].mxu0 }
 0x87f   :  { %v9074_v17 = vmul.f32 0.044194173, %v8987_v36  ;;  %v8989_v7 = vpop.f32.mrb[75].mxu0  ;;  %v9077_v56 = vsel %vm5646_vm0, %v9073_v8, -inf  ;;  %v9496_v36 = vrot.slane %v9482_v58, %v18134_v18  ;;  %v14413_v58 = vld [vmem:[%s19260_s8 + $0x48] ss:$16 sps:$4 sm:$0xff]  }
 0x880   :  { %9078 = vmax.xlane.f32.xlu0 %v9077_v56 }
 0x881   :  { %v9080_v37 = vsel %vm5646_vm0, %v9074_v17, -inf  ;;  %v9498_v56 = vcombine.high %v9496_v36, %v9496_v36 }
 0x882   :  { %9081 = vmax.xlane.f32.xlu1 %v9080_v37  ;;  %v9507_v37 = vsel %vm9503_vm5, %v9496_v36, 0.0  ;;  %v14424_v36 = vld [vmem:[%s19260_s8 + $0x84] ss:$16 sps:$4 sm:$0xff]  }
 0x885   :  { %v9066_v14 = vpop.f32.mrb[80].mxu1 }
 0x886   :  { %v9075_v30 = vmul.f32 0.044194173, %v9066_v14  ;;  %v9068_v9 = vpop.f32.mrb[81].mxu1 }
 0x887   :  { %v9069_v54 = vpop.f32.mrb[82].mxu1 }
 0x888   :  { %v9076_v59 = vmul.f32 0.044194173, %v9069_v54  ;;  %v9071_v4 = vpop.f32.mrb[83].mxu1  ;;  %v9083_v23 = vsel %vm5646_vm0, %v9075_v30, -inf }
 0x889   :  { %9084 = vmax.xlane.f32.xlu0 %v9083_v23  ;;  %v9509_v4 = vsel %vm9503_vm5, %v9498_v56, 0.0  ;;  %v14425_v56 = vld [vmem:[%s19260_s8 + $0x88] ss:$16 sps:$4 sm:$0xff]  }
 0x88a   :  { %v9086_v10 = vsel %vm5646_vm0, %v9076_v59, -inf }
 0x88b   :  { %9087 = vmax.xlane.f32.xlu1 %v9086_v10 }
 0x90d   :  { %v9079_v46 = vpop.xlane.xlu0 %9078 }
 0x90e   :  { %v9089_v25 = vsub.f32 %v9073_v8, %v9079_v46  ;;  %v9505_v8 = vsel %vm9503_vm5, %v9497_v15, 0.0  ;;  %v14398_v15 = vld [vmem:[%s19260_s8] ss:$16 sps:$4 sm:$0xff]  }
 0x90f   :  { %v9082_v45 = vpop.xlane.xlu1 %9081 }
 0x910   :  { %v9093_v29 = vmul.f32 1.442695, %v9089_v25  ;;  %v9090_v26 = vsub.f32 %v9074_v17, %v9082_v45  ;;  %v9504_v17 = vsel %vm9503_vm5, %v9489_v6, 0.0  ;;  %v14403_v6 = vld [vmem:[%s19260_s8 + $0xc] ss:$16 sps:$4 sm:$0xff]  }
 0x911   :  { %v9506_v7 = vadd.f32 %v9505_v8, %v9504_v17  ;;  %v14416_v8 = vld [vmem:[%s19260_s8 + $0x60] ss:$16 sps:$4 sm:$0xff]   ;;  %v14427_v17 = vld [vmem:[%s19260_s8 + $0x8c] ss:$16 sps:$4 sm:$0xff]  }
 0x912   :  { %14640 = vpow2.f32 %v9093_v29  ;;  %v9095_v60 = vmul.f32 1.442695, %v9090_v26 }
 0x914   :  { %14642 = vpow2.f32 %v9095_v60 }
 0x916   :  { %v9085_v19 = vpop.xlane.xlu0 %9084 }
 0x917   :  { %v9091_v5 = vsub.f32 %v9075_v30, %v9085_v19  ;;  %v9508_v30 = vadd.f32 %v9507_v37, %v9506_v7  ;;  %v14400_v19 = vld [vmem:[%s19260_s8 + $0x4] ss:$16 sps:$4 sm:$0xff]   ;;  %v14422_v7 = vld [vmem:[%s19260_s8 + $0x80] ss:$16 sps:$4 sm:$0xff]  }
 0x918   :  { %v9088_v20 = vpop.xlane.xlu1 %9087  ;;  %v14430_v37 = vld [vmem:[%s19260_s8 + $0xa4] ss:$16 sps:$4 sm:$0xff]  }
 0x919   :  { %v9097_v48 = vmul.f32 1.442695, %v9091_v5  ;;  %v9092_v57 = vsub.f32 %v9076_v59, %v9088_v20  ;;  %v9510_v23 = vadd.f32 %v9509_v4, %v9508_v30  ;;  %v14428_v30 = vld [vmem:[%s19260_s8 + $0xa0] ss:$16 sps:$4 sm:$0xff]  }
 0x91a   :  { %v14434_v4 = vld [vmem:[%s19260_s8 + $0xc0] ss:$16 sps:$4 sm:$0xff]  }
 0x91b   :  { %14644 = vpow2.f32 %v9097_v48  ;;  %v9099_v47 = vmul.f32 1.442695, %v9092_v57 }
 0x91c   :  { %v14641_v1 = vpop.eup %14640 }
 0x91d   :  { %14646 = vpow2.f32 %v9099_v47  ;;  %v9101_v24 = vsel %vm5646_vm0, %v14641_v1, 0.0  ;;  %v14415_v47 = vld [vmem:[%s19260_s8 + $0x4c] ss:$16 sps:$4 sm:$0xff]  }
 0x91e   :  { %v14643_v22 = vpop.eup %14642  ;;  %9102 = vadd.xlane.f32.xlu0 %v9101_v24  ;;  %v14418_v24 = vld [vmem:[%s19260_s8 + $0x64] ss:$16 sps:$4 sm:$0xff]  }
 0x91f   :  { %v9104_v43 = vsel %vm5646_vm0, %v14643_v22, 0.0 }
 0x920   :  { %9105 = vadd.xlane.f32.xlu1 %v9104_v43  ;;  %v14419_v43 = vld [vmem:[%s19260_s8 + $0x68] ss:$16 sps:$4 sm:$0xff]  }
 0x925   :  { %v14645_v14 = vpop.eup %14644 }
 0x926   :  { %v9107_v9 = vsel %vm5646_vm0, %v14645_v14, 0.0 }
 0x927   :  { %v14647_v54 = vpop.eup %14646  ;;  %9108 = vadd.xlane.f32.xlu0 %v9107_v9  ;;  %v14431_v9 = vld [vmem:[%s19260_s8 + $0xa8] ss:$16 sps:$4 sm:$0xff]  }
 0x928   :  { %v9110_v59 = vsel %vm5646_vm0, %v14647_v54, 0.0 }
 0x929   :  { %9111 = vadd.xlane.f32.xlu1 %v9110_v59  ;;  %v14439_v59 = vld [vmem:[%s19260_s8 + $0xcc] ss:$16 sps:$4 sm:$0xff]  }
 0x92b   :  { %9511 = vadd.xlane.f32.xlu0 %v9510_v23  ;;  %v14437_v23 = vld [vmem:[%s19260_s8 + $0xc8] ss:$16 sps:$4 sm:$0xff]  }
 0x9ab   :  { %v9103_v10 = vpop.xlane.xlu0 %9102 }
 0x9ac   :  { %14648 = vrcp.f32 %v9103_v10  ;;  %v14440_v10 = vld [vmem:[%s19260_s8 + $0xe0] ss:$16 sps:$4 sm:$0xff]  }
 0x9ad   :  { %v9106_v21 = vpop.xlane.xlu1 %9105 }
 0x9ae   :  { %14650 = vrcp.f32 %v9106_v21  ;;  %v14442_v21 = vld [vmem:[%s19260_s8 + $0xe4] ss:$16 sps:$4 sm:$0xff]  }
 0x9b4   :  { %v9109_v46 = vpop.xlane.xlu0 %9108 }
 0x9b5   :  { %14652 = vrcp.f32 %v9109_v46  ;;  %v14443_v46 = vld [vmem:[%s19260_s8 + $0xe8] ss:$16 sps:$4 sm:$0xff]  }
 0x9b6   :  { %v14649_v25 = vpop.eup %14648  ;;  %v9112_v45 = vpop.xlane.xlu1 %9111 }
 0x9b7   :  { %14654 = vrcp.f32 %v9112_v45  ;;  %v9117_v26 = vmul.f32 %v14649_v25, %v14641_v1  ;;  %v14410_v1 = vld [vmem:[%s19260_s8 + $0x40] ss:$16 sps:$4 sm:$0xff]   ;;  %v14445_v25 = vld [vmem:[%s19260_s8 + $0xec] ss:$16 sps:$4 sm:$0xff]   ;;  %v14448_v45 = vld [vmem:[%s19260_s8 + $0x104] ss:$16 sps:$4 sm:$0xff]  }
 0x9b8   :  { %v14651_v29 = vpop.eup %14650 }
 0x9b9   :  { %v9118_v60 = vmul.f32 %v14651_v29, %v14643_v22  ;;  %v14421_v22 = vld [vmem:[%s19260_s8 + $0x6c] ss:$16 sps:$4 sm:$0xff]  }
 0x9ba   :  { %v14451_v29 = vld [vmem:[%s19260_s8 + $0x10c] ss:$16 sps:$4 sm:$0xff]  }
 0x9bb   :  { %v9121_v63 = vpack.c.bf16 %v9118_v60, %v9117_v26  ;;  %v14446_v26 = vld [vmem:[%s19260_s8 + $0x100] ss:$16 sps:$4 sm:$0xff]   ;;  %v14449_v60 = vld [vmem:[%s19260_s8 + $0x108] ss:$16 sps:$4 sm:$0xff]  }
 0x9bd   :  { %12379 = vmatmul.mubr.msk.bf16.vlgmr.msra.gmra.mrb[76].mxu0 %vm5646_vm0, %v9121_v63  ;;  %12380 = vmatmul.mubr.msk.bf16.vlgmr.msra.gmra.mrb[84].mxu1 %vm5646_vm0, %v9121_v63  ;;  %v14454_v63 = vld [vmem:[%s19260_s8 + $0x124] ss:$16 sps:$4 sm:$0xff]  }
 0x9be   :  { %9224 = vmatpush1.bf16.msra.mxu0 %v9127_v31  ;;  %9267 = vmatpush1.bf16.msra.mxu1 %v9129_v12  ;;  %v14407_v31 = vld [vmem:[%s19260_s8 + $0x28] ss:$16 sps:$4 sm:$0xff]   ;;  %v14412_v12 = vld [vmem:[%s19260_s8 + $0x44] ss:$16 sps:$4 sm:$0xff]  }
 0x9bf   :  { %v14653_v5 = vpop.eup %14652  ;;  %9255 = vmatprep.mubr.bf16.mxu0 %v19310_v27  ;;  %9298 = vmatprep.mubr.bf16.mxu1 %v19310_v27  ;;  %v14409_v27 = vld [vmem:[%s19260_s8 + $0x2c] ss:$16 sps:$4 sm:$0xff]  }
 0x9c0   :  { %10422 = vmatprep.subr.bf16.mxu0 %v14400_v19  ;;  %10504 = vmatprep.subr.bf16.mxu1 %v14403_v6  ;;  %v9119_v48 = vmul.f32 %v14653_v5, %v14645_v14  ;;  %v14433_v14 = vld [vmem:[%s19260_s8 + $0xac] ss:$16 sps:$4 sm:$0xff]   ;;  %v14452_v6 = vld [vmem:[%s19260_s8 + $0x120] ss:$16 sps:$4 sm:$0xff]   ;;  %v14455_v5 = vld [vmem:[%s19260_s8 + $0x128] ss:$16 sps:$4 sm:$0xff]  }
 0x9c1   :  { %v14655_v20 = vpop.eup %14654  ;;  %v14457_v19 = vld [vmem:[%s19260_s8 + $0x12c] ss:$16 sps:$4 sm:$0xff]  }
 0x9c2   :  { %v9120_v57 = vmul.f32 %v14655_v20, %v14647_v54  ;;  %v14436_v54 = vld [vmem:[%s19260_s8 + $0xc4] ss:$16 sps:$4 sm:$0xff]  }
 0x9c3   :  { %v14460_v20 = vld [vmem:[%s19260_s8 + $0x144] ss:$16 sps:$4 sm:$0xff]  }
 0x9c4   :  { %v9122_v2 = vpack.c.bf16 %v9120_v57, %v9119_v48  ;;  %v14463_v48 = vld [vmem:[%s19260_s8 + $0x14c] ss:$16 sps:$4 sm:$0xff]   ;;  %v14458_v57 = vld [vmem:[%s19260_s8 + $0x140] ss:$16 sps:$4 sm:$0xff]  }
 0x9c6   :  { %12381 = vmatmul.mubr.msk.bf16.vlgmr.msra.gmra.mrb[80].mxu0 %vm5646_vm0, %v9122_v2  ;;  %12382 = vmatmul.mubr.msk.bf16.vlgmr.msra.gmra.mrb[88].mxu1 %vm5646_vm0, %v9122_v2  ;;  %v14469_v2 = vld [vmem:[%s19260_s8 + $0x16c] ss:$16 sps:$4 sm:$0xff]  }
 0x9c7   :  { %10423 = vmatpush1.bf16.msra.mxu0 %v14398_v15  ;;  %10505 = vmatpush1.bf16.msra.mxu1 %v14401_v52  ;;  %v14461_v15 = vld [vmem:[%s19260_s8 + $0x148] ss:$16 sps:$4 sm:$0xff]   ;;  %v14466_v52 = vld [vmem:[%s19260_s8 + $0x164] ss:$16 sps:$4 sm:$0xff]  }
 0x9c8   :  { %10424 = vmatprep.subr.bf16.mxu0 %v14406_v3  ;;  %10506 = vmatprep.subr.bf16.mxu1 %v14409_v27  ;;  %v14464_v3 = vld [vmem:[%s19260_s8 + $0x160] ss:$16 sps:$4 sm:$0xff]   ;;  %v14467_v27 = vld [vmem:[%s19260_s8 + $0x168] ss:$16 sps:$4 sm:$0xff]  }
 0x9cb   :  { %10425 = vmatpush1.bf16.msra.mxu0 %v14404_v16  ;;  %10507 = vmatpush1.bf16.msra.mxu1 %v14407_v31  ;;  %v14472_v16 = vld [vmem:[%s19260_s8 + $0x184] ss:$16 sps:$4 sm:$0xff]   ;;  %v14475_v31 = vld [vmem:[%s19260_s8 + $0x18c] ss:$16 sps:$4 sm:$0xff]  }
 0x9cc   :  { %10426 = vmatprep.subr.bf16.mxu0 %v14412_v12  ;;  %10508 = vmatprep.subr.bf16.mxu1 %v14415_v47  ;;  %v14470_v12 = vld [vmem:[%s19260_s8 + $0x180] ss:$16 sps:$4 sm:$0xff]   ;;  %v14473_v47 = vld [vmem:[%s19260_s8 + $0x188] ss:$16 sps:$4 sm:$0xff]  }
 0x9cf   :  { %10427 = vmatpush1.bf16.msra.mxu0 %v14410_v1  ;;  %10509 = vmatpush1.bf16.msra.mxu1 %v14413_v58  ;;  %v14478_v1 = vld [vmem:[%s19260_s8 + $0x1a4] ss:$16 sps:$4 sm:$0xff]   ;;  %v14481_v58 = vld [vmem:[%s19260_s8 + $0x1ac] ss:$16 sps:$4 sm:$0xff]  }
 0x9d0   :  { %10428 = vmatprep.subr.bf16.mxu0 %v14418_v24  ;;  %10510 = vmatprep.subr.bf16.mxu1 %v14421_v22  ;;  %v14476_v24 = vld [vmem:[%s19260_s8 + $0x1a0] ss:$16 sps:$4 sm:$0xff]   ;;  %v14479_v22 = vld [vmem:[%s19260_s8 + $0x1a8] ss:$16 sps:$4 sm:$0xff]  }
 0x9d3   :  { %10429 = vmatpush1.bf16.msra.mxu0 %v14416_v8  ;;  %10511 = vmatpush1.bf16.msra.mxu1 %v14419_v43  ;;  %v14484_v8 = vld [vmem:[%s19260_s8 + $0x1c4] ss:$16 sps:$4 sm:$0xff]   ;;  %v14487_v43 = vld [vmem:[%s19260_s8 + $0x1cc] ss:$16 sps:$4 sm:$0xff]  }
 0x9d4   :  { %10430 = vmatprep.subr.bf16.mxu0 %v14424_v36  ;;  %10512 = vmatprep.subr.bf16.mxu1 %v14427_v17  ;;  %v14482_v36 = vld [vmem:[%s19260_s8 + $0x1c0] ss:$16 sps:$4 sm:$0xff]   ;;  %v14485_v17 = vld [vmem:[%s19260_s8 + $0x1c8] ss:$16 sps:$4 sm:$0xff]  }
 0x9d7   :  { %10431 = vmatpush1.bf16.msra.mxu0 %v14422_v7  ;;  %10513 = vmatpush1.bf16.msra.mxu1 %v14425_v56  ;;  %v14490_v7 = vld [vmem:[%s19260_s8 + $0x1e4] ss:$16 sps:$4 sm:$0xff]   ;;  %v14488_v56 = vld [vmem:[%s19260_s8 + $0x1e0] ss:$16 sps:$4 sm:$0xff]  }
 0x9d8   :  { %10432 = vmatprep.subr.bf16.mxu0 %v14430_v37  ;;  %10514 = vmatprep.subr.bf16.mxu1 %v14433_v14  ;;  %v14493_v37 = vld [vmem:[%s19260_s8 + $0x1ec] ss:$16 sps:$4 sm:$0xff]   ;;  %v14491_v14 = vld [vmem:[%s19260_s8 + $0x1e8] ss:$16 sps:$4 sm:$0xff]  }
 0x9db   :  { %10433 = vmatpush1.bf16.msra.mxu0 %v14428_v30  ;;  %10515 = vmatpush1.bf16.msra.mxu1 %v14431_v9  ;;  %v14496_v30 = vld [vmem:[%s19260_s8 + $0x204] ss:$16 sps:$4 sm:$0xff]   ;;  %v14499_v9 = vld [vmem:[%s19260_s8 + $0x20c] ss:$16 sps:$4 sm:$0xff]  }
 0x9dc   :  { %10434 = vmatprep.subr.bf16.mxu0 %v14436_v54  ;;  %10516 = vmatprep.subr.bf16.mxu1 %v14439_v59 }
 0x9df   :  { %10435 = vmatpush1.bf16.msra.mxu0 %v14434_v4  ;;  %10517 = vmatpush1.bf16.msra.mxu1 %v14437_v23 }
 0x9e0   :  { %10436 = vmatprep.subr.bf16.mxu0 %v14442_v21  ;;  %10518 = vmatprep.subr.bf16.mxu1 %v14445_v25 }
 0x9e3   :  { %10437 = vmatpush1.bf16.msra.mxu0 %v14440_v10  ;;  %10519 = vmatpush1.bf16.msra.mxu1 %v14443_v46 }
 0x9e4   :  { %10438 = vmatprep.subr.bf16.mxu0 %v14448_v45  ;;  %10520 = vmatprep.subr.bf16.mxu1 %v14451_v29 }
 0x9e7   :  { %10439 = vmatpush1.bf16.msra.mxu0 %v14446_v26  ;;  %10521 = vmatpush1.bf16.msra.mxu1 %v14449_v60 }
 0x9e8   :  { %10440 = vmatprep.subr.bf16.mxu0 %v14454_v63  ;;  %10522 = vmatprep.subr.bf16.mxu1 %v14457_v19 }
 0x9eb   :  { %10441 = vmatpush1.bf16.msra.mxu0 %v14452_v6  ;;  %10523 = vmatpush1.bf16.msra.mxu1 %v14455_v5 }
 0x9ec   :  { %10442 = vmatprep.subr.bf16.mxu0 %v14460_v20  ;;  %10524 = vmatprep.subr.bf16.mxu1 %v14463_v48 }
 0x9ef   :  { %10443 = vmatpush1.bf16.msra.mxu0 %v14458_v57  ;;  %10525 = vmatpush1.bf16.msra.mxu1 %v14461_v15 }
 0x9f0   :  { %10444 = vmatprep.subr.bf16.mxu0 %v14466_v52  ;;  %10526 = vmatprep.subr.bf16.mxu1 %v14469_v2 }
 0x9f3   :  { %10445 = vmatpush1.bf16.msra.mxu0 %v14464_v3  ;;  %10527 = vmatpush1.bf16.msra.mxu1 %v14467_v27 }
 0x9f4   :  { %10446 = vmatprep.subr.bf16.mxu0 %v14472_v16  ;;  %10528 = vmatprep.subr.bf16.mxu1 %v14475_v31 }
 0x9f7   :  { %10447 = vmatpush1.bf16.msra.mxu0 %v14470_v12  ;;  %10529 = vmatpush1.bf16.msra.mxu1 %v14473_v47 }
 0x9f8   :  { %10448 = vmatprep.subr.bf16.mxu0 %v14478_v1  ;;  %10530 = vmatprep.subr.bf16.mxu1 %v14481_v58 }
 0x9fb   :  { %10449 = vmatpush1.bf16.msra.mxu0 %v14476_v24  ;;  %10531 = vmatpush1.bf16.msra.mxu1 %v14479_v22 }
 0x9fc   :  { %10450 = vmatprep.subr.bf16.mxu0 %v14484_v8  ;;  %10532 = vmatprep.subr.bf16.mxu1 %v14487_v43 }
 0x9ff   :  { %10451 = vmatpush1.bf16.msra.mxu0 %v14482_v36  ;;  %10533 = vmatpush1.bf16.msra.mxu1 %v14485_v17 }
 0xa00   :  { %10452 = vmatprep.subr.bf16.mxu0 %v14490_v7  ;;  %10534 = vmatprep.subr.bf16.mxu1 %v14493_v37 }
 0xa03   :  { %10453 = vmatpush1.bf16.msra.mxu0 %v14488_v56  ;;  %10535 = vmatpush1.bf16.msra.mxu1 %v14491_v14 }
 0xa04   :  { %10463 = vmatprep.subr.bf16.mxu0 %v14496_v30  ;;  %10545 = vmatprep.subr.bf16.mxu1 %v14499_v9 }
 0xa90   :  { %v9168_v54 = vpop.f32.mrb[76].mxu0  ;;  %v9211_v59 = vpop.f32.mrb[84].mxu1 }
 0xa91   :  { %v9170_v4 = vpop.f32.mrb[77].mxu0  ;;  %v9213_v23 = vpop.f32.mrb[85].mxu1  ;;  %v9169_v46 = vadd.f32 %v17486_v41, %v9168_v54  ;;  %v9212_v25 = vadd.f32 %v17725_v11, %v9211_v59 }
 0xa92   :  { %v9172_v10 = vpop.f32.mrb[78].mxu0  ;;  %v9215_v21 = vpop.f32.mrb[86].mxu1  ;;  %v9171_v63 = vadd.f32 %v17278_v51, %v9170_v4  ;;  %v9214_v19 = vadd.f32 %v17542_v13, %v9213_v23 }
 0xa93   :  { %v9173_v45 = vadd.f32 %v17489_v33, %v9172_v10  ;;  %v9216_v29 = vadd.f32 %v17728_v62, %v9215_v21  ;;  %v9174_v26 = vpop.f32.mrb[79].mxu0  ;;  %v9217_v60 = vpop.f32.mrb[87].mxu1 }
 0xa94   :  { %v9175_v6 = vadd.f32 %v17282_v28, %v9174_v26  ;;  %v9218_v5 = vadd.f32 %v17546_v42, %v9217_v60 }
 0xa95   :  { %v9532_v20 = vadd.f32 %v9173_v45, %v9169_v46  ;;  %v9546_v48 = vadd.f32 %v9216_v29, %v9212_v25 }
 0xa96   :  { %v9539_v57 = vadd.f32 %v9175_v6, %v9171_v63  ;;  %v9553_v41 = vadd.f32 %v9218_v5, %v9214_v19 }
 0xa97   :  { %v9533_v15 = vrot.slane %v9532_v20, 4  ;;  %v9547_v11 = vrot.slane %v9546_v48, 4 }
 0xa98   :  { %v9540_v52 = vrot.slane %v9539_v57, 4  ;;  %v9554_v33 = vrot.slane %v9553_v41, 4 }
 0xa99   :  { %v9534_v2 = vadd.f32 %v9533_v15, %v9532_v20  ;;  %v9548_v62 = vadd.f32 %v9547_v11, %v9546_v48  ;;  %v9257_v3 = vpop.f32.mrb[80].mxu0  ;;  %v9300_v27 = vpop.f32.mrb[88].mxu1 }
 0xa9a   :  { %v9541_v16 = vadd.f32 %v9540_v52, %v9539_v57  ;;  %v9555_v51 = vadd.f32 %v9554_v33, %v9553_v41  ;;  %v9258_v13 = vadd.f32 %v17528_v61, %v9257_v3  ;;  %v9301_v28 = vadd.f32 %v17771_v32, %v9300_v27  ;;  %v9259_v31 = vpop.f32.mrb[81].mxu0  ;;  %v9302_v42 = vpop.f32.mrb[89].mxu1 }
 0xa9b   :  { %v9535_v12 = vrot.slane %v9534_v2, 2  ;;  %v9549_v47 = vrot.slane %v9548_v62, 2  ;;  %v9260_v1 = vadd.f32 %v15999_v53, %v9259_v31  ;;  %v9303_v58 = vadd.f32 %v17738_v55, %v9302_v42  ;;  %v9261_v24 = vpop.f32.mrb[82].mxu0  ;;  %v9304_v22 = vpop.f32.mrb[90].mxu1 }
 0xa9c   :  { %v9542_v8 = vrot.slane %v9541_v16, 2  ;;  %v9556_v43 = vrot.slane %v9555_v51, 2  ;;  %v9262_v36 = vadd.f32 %v17531_v40, %v9261_v24  ;;  %v9305_v17 = vadd.f32 %v17774_v44, %v9304_v22  ;;  %v9263_v7 = vpop.f32.mrb[83].mxu0  ;;  %v9306_v61 = vpop.f32.mrb[91].mxu1 }
 0xa9d   :  { %v9536_v56 = vadd.f32 %v9535_v12, %v9534_v2  ;;  %v9550_v32 = vadd.f32 %v9549_v47, %v9548_v62  ;;  %v9264_v37 = vadd.f32 %v16004_v50, %v9263_v7  ;;  %v9307_v14 = vadd.f32 %v17742_v35, %v9306_v61 }
 0xa9e   :  { %v9543_v30 = vadd.f32 %v9542_v8, %v9541_v16  ;;  %v9557_v53 = vadd.f32 %v9556_v43, %v9555_v51  ;;  %v9560_v9 = vadd.f32 %v9262_v36, %v9258_v13  ;;  %v9574_v55 = vadd.f32 %v9305_v17, %v9301_v28 }
 0xa9f   :  { %v9567_v54 = vadd.f32 %v9264_v37, %v9260_v1  ;;  %v9581_v59 = vadd.f32 %v9307_v14, %v9303_v58  ;;  %v9537_v4 = vrot.slane %v9536_v56, 1  ;;  %v9551_v23 = vrot.slane %v9550_v32, 1 }
 0xaa0   :  { %v9561_v10 = vrot.slane %v9560_v9, 4  ;;  %v9575_v40 = vrot.slane %v9574_v55, 4  ;;  %v9544_v21 = vrot.slane %v9543_v30, 1  ;;  %v9558_v44 = vrot.slane %v9557_v53, 1 }
 0xaa1   :  { %v9568_v46 = vrot.slane %v9567_v54, 4  ;;  %v9582_v25 = vrot.slane %v9581_v59, 4  ;;  %v9538_v60 = vadd.f32 %v9537_v4, %v9536_v56  ;;  %v9552_v35 = vadd.f32 %v9551_v23, %v9550_v32 }
 0xaa2   :  { %v9562_v45 = vadd.f32 %v9561_v10, %v9560_v9  ;;  %v9576_v29 = vadd.f32 %v9575_v40, %v9574_v55  ;;  %v9545_v6 = vadd.f32 %v9544_v21, %v9543_v30  ;;  %v9559_v5 = vadd.f32 %v9558_v44, %v9557_v53  ;;  %v14494_v40 = vld [vmem:[%s19260_s8 + $0x200] ss:$16 sps:$4 sm:$0xff]   ;;  %v14497_v21 = vld [vmem:[%s19260_s8 + $0x208] ss:$16 sps:$4 sm:$0xff]  }
 0xaa3   :  { %v9569_v26 = vadd.f32 %v9568_v46, %v9567_v54  ;;  %v9583_v50 = vadd.f32 %v9582_v25, %v9581_v59  ;;  %v9588_v52 = vmul.f32 0.0625, %v9538_v60  ;;  %v9590_v33 = vmul.f32 0.0625, %v9552_v35  ;;  %v14502_v46 = vld [vmem:[%s19260_s8 + $0x224] ss:$16 sps:$4 sm:$0xff]   ;;  %v14505_v25 = vld [vmem:[%s19260_s8 + $0x22c] ss:$16 sps:$4 sm:$0xff]  }
 0xaa4   :  { %v9563_v63 = vrot.slane %v9562_v45, 2  ;;  %v9577_v19 = vrot.slane %v9576_v29, 2  ;;  %v9589_v3 = vmul.f32 0.0625, %v9545_v6  ;;  %v9591_v27 = vmul.f32 0.0625, %v9559_v5  ;;  %v14511_v60 = vld [vmem:[%s19260_s8 + $0x24c] ss:$16 sps:$4 sm:$0xff]  }
 0xaa5   :  { %v9570_v20 = vrot.slane %v9569_v26, 2  ;;  %v9584_v48 = vrot.slane %v9583_v50, 2  ;;  %v9596_v12 = vpack.c.bf16 %v9588_v52, %v9588_v52  ;;  %v9598_v47 = vpack.c.bf16 %v9590_v33, %v9590_v33  ;;  %v14506_v35 = vld [vmem:[%s19260_s8 + $0x240] ss:$16 sps:$4 sm:$0xff]   ;;  %v14517_v6 = vld [vmem:[%s19260_s8 + $0x26c] ss:$16 sps:$4 sm:$0xff]  }
 0xaa6   :  { %v9564_v57 = vadd.f32 %v9563_v63, %v9562_v45  ;;  %v9578_v41 = vadd.f32 %v9577_v19, %v9576_v29  ;;  %v9597_v8 = vpack.c.bf16 %v9589_v3, %v9589_v3  ;;  %v9599_v43 = vpack.c.bf16 %v9591_v27, %v9591_v27  ;;  %v14500_v29 = vld [vmem:[%s19260_s8 + $0x220] ss:$16 sps:$4 sm:$0xff]   ;;  %v14509_v63 = vld [vmem:[%s19260_s8 + $0x248] ss:$16 sps:$4 sm:$0xff]   ;;  %v14514_v19 = vld [vmem:[%s19260_s8 + $0x264] ss:$16 sps:$4 sm:$0xff]  }
 0xaa7   :  { %v9571_v15 = vadd.f32 %v9570_v20, %v9569_v26  ;;  %v9585_v11 = vadd.f32 %v9584_v48, %v9583_v50  ;;  %v9762_v56 = vunpack.c.l.b16 %v9596_v12  ;;  %v9764_v32 = vunpack.c.l.b16 %v9598_v47  ;;  %v14503_v26 = vld [vmem:[%s19260_s8 + $0x228] ss:$16 sps:$4 sm:$0xff]   ;;  %v14508_v50 = vld [vmem:[%s19260_s8 + $0x244] ss:$16 sps:$4 sm:$0xff]   ;;  %v14512_v5 = vld [vmem:[%s19260_s8 + $0x260] ss:$16 sps:$4 sm:$0xff]  }
 0xaa8   :  { %v9565_v2 = vrot.slane %v9564_v57, 1  ;;  %v9579_v62 = vrot.slane %v9578_v41, 1  ;;  %v9763_v30 = vunpack.c.l.b16 %v9597_v8  ;;  %v9765_v9 = vunpack.c.l.b16 %v9599_v43  ;;  %v14515_v20 = vld [vmem:[%s19260_s8 + $0x268] ss:$16 sps:$4 sm:$0xff]   ;;  %v14520_v48 = vld [vmem:[%s19260_s8 + $0x284] ss:$16 sps:$4 sm:$0xff]  }
 0xaa9   :  { %v9572_v16 = vrot.slane %v9571_v15, 1  ;;  %v9586_v51 = vrot.slane %v9585_v11, 1  ;;  %v14529_v52 = vld [vmem:[%s19260_s8 + $0x2ac] ss:$16 sps:$4 sm:$0xff]   ;;  %v14524_v33 = vld [vmem:[%s19260_s8 + $0x2a0] ss:$16 sps:$4 sm:$0xff]  }
 0xaaa   :  { %v9566_v13 = vadd.f32 %v9565_v2, %v9564_v57  ;;  %v9580_v28 = vadd.f32 %v9579_v62, %v9578_v41  ;;  %v14523_v57 = vld [vmem:[%s19260_s8 + $0x28c] ss:$16 sps:$4 sm:$0xff]   ;;  %v14518_v41 = vld [vmem:[%s19260_s8 + $0x280] ss:$16 sps:$4 sm:$0xff]   ;;  %v14527_v2 = vld [vmem:[%s19260_s8 + $0x2a8] ss:$16 sps:$4 sm:$0xff]  }
 0xaab   :  { %v9573_v31 = vadd.f32 %v9572_v16, %v9571_v15  ;;  %v9587_v42 = vadd.f32 %v9586_v51, %v9585_v11  ;;  %v14521_v15 = vld [vmem:[%s19260_s8 + $0x288] ss:$16 sps:$4 sm:$0xff]   ;;  %v14526_v11 = vld [vmem:[%s19260_s8 + $0x2a4] ss:$16 sps:$4 sm:$0xff]   ;;  %v14535_v3 = vld [vmem:[%s19260_s8 + $0x2cc] ss:$16 sps:$4 sm:$0xff]  }
 0xaac   :  { %v9592_v1 = vmul.f32 0.0625, %v9566_v13  ;;  %v9594_v58 = vmul.f32 0.0625, %v9580_v28  ;;  %v14532_v62 = vld [vmem:[%s19260_s8 + $0x2c4] ss:$16 sps:$4 sm:$0xff]   ;;  %v14530_v27 = vld [vmem:[%s19260_s8 + $0x2c0] ss:$16 sps:$4 sm:$0xff]  }
 0xaad   :  { %v9593_v24 = vmul.f32 0.0625, %v9573_v31  ;;  %v9595_v22 = vmul.f32 0.0625, %v9587_v42  ;;  %v14533_v16 = vld [vmem:[%s19260_s8 + $0x2c8] ss:$16 sps:$4 sm:$0xff]   ;;  %v14538_v51 = vld [vmem:[%s19260_s8 + $0x2e4] ss:$16 sps:$4 sm:$0xff]  }
 0xaae   :  { %v9600_v36 = vpack.c.bf16 %v9592_v1, %v9592_v1  ;;  %v9602_v17 = vpack.c.bf16 %v9594_v58, %v9594_v58  ;;  %v14541_v13 = vld [vmem:[%s19260_s8 + $0x2ec] ss:$16 sps:$4 sm:$0xff]   ;;  %v14536_v28 = vld [vmem:[%s19260_s8 + $0x2e0] ss:$16 sps:$4 sm:$0xff]   ;;  %v14539_v31 = vld [vmem:[%s19260_s8 + $0x2e8] ss:$16 sps:$4 sm:$0xff]  }
 0xaaf   :  { %v9601_v7 = vpack.c.bf16 %v9593_v24, %v9593_v24  ;;  %v9603_v61 = vpack.c.bf16 %v9595_v22, %v9595_v22  ;;  %v14544_v42 = vld [vmem:[%s19260_s8 + $0x304] ss:$16 sps:$4 sm:$0xff]   ;;  %v14547_v12 = vld [vmem:[%s19260_s8 + $0x30c] ss:$16 sps:$4 sm:$0xff]   ;;  %v14542_v47 = vld [vmem:[%s19260_s8 + $0x300] ss:$16 sps:$4 sm:$0xff]  }
 0xab0   :  { %v9766_v37 = vunpack.c.l.b16 %v9600_v36  ;;  %v9768_v14 = vunpack.c.l.b16 %v9602_v17  ;;  %v14545_v1 = vld [vmem:[%s19260_s8 + $0x308] ss:$16 sps:$4 sm:$0xff]   ;;  %v14550_v58 = vld [vmem:[%s19260_s8 + $0x324] ss:$16 sps:$4 sm:$0xff]   ;;  %v14553_v24 = vld [vmem:[%s19260_s8 + $0x32c] ss:$16 sps:$4 sm:$0xff]  }
 0xab1   :  { %v9767_v53 = vunpack.c.l.b16 %v9601_v7  ;;  %v9769_v55 = vunpack.c.l.b16 %v9603_v61  ;;  %v14548_v22 = vld [vmem:[%s19260_s8 + $0x320] ss:$16 sps:$4 sm:$0xff]   ;;  %v14551_v8 = vld [vmem:[%s19260_s8 + $0x328] ss:$16 sps:$4 sm:$0xff]   ;;  %v14556_v43 = vld [vmem:[%s19260_s8 + $0x344] ss:$16 sps:$4 sm:$0xff]  }
 0xab2   :  { %v9770_v54 = vsel %vm9470_vm1, %v9766_v37, %v9762_v56  ;;  %v18966_v59 = vsel %vm9470_vm1, %v9768_v14, %v9764_v32  ;;  %v14559_v36 = vld [vmem:[%s19260_s8 + $0x34c] ss:$16 sps:$4 sm:$0xff]   ;;  %v14554_v17 = vld [vmem:[%s19260_s8 + $0x340] ss:$16 sps:$4 sm:$0xff]   ;;  %v14557_v7 = vld [vmem:[%s19260_s8 + $0x348] ss:$16 sps:$4 sm:$0xff]  }
 0xab3   :  { %v9771_v4 = vsel %vm9470_vm1, %v9767_v53, %v9763_v30  ;;  %v9773_v23 = vsel %vm9470_vm1, %v9769_v55, %v9765_v9  ;;  %v9774_v44 = vpack.c.b16 %v9770_v54, %v9770_v54  ;;  %v14562_v61 = vld [vmem:[%s19260_s8 + $0x364] ss:$16 sps:$4 sm:$0xff]   ;;  %v14565_v56 = vld [vmem:[%s19260_s8 + $0x36c] ss:$16 sps:$4 sm:$0xff]   ;;  %v14560_v32 = vld [vmem:[%s19260_s8 + $0x360] ss:$16 sps:$4 sm:$0xff]  }
 0xab4   :  { %v9775_v10 = vpack.c.b16 %v9771_v4, %v9771_v4  ;;  %v9777_v45 = vpack.c.b16 %v9773_v23, %v9773_v23  ;;  %v14563_v37 = vld [vmem:[%s19260_s8 + $0x368] ss:$16 sps:$4 sm:$0xff]   ;;  %v14568_v14 = vld [vmem:[%s19260_s8 + $0x384] ss:$16 sps:$4 sm:$0xff]   ;;  %v14571_v30 = vld [vmem:[%s19260_s8 + $0x38c] ss:$16 sps:$4 sm:$0xff]  }
 0xab5   :  { %v14566_v53 = vld [vmem:[%s19260_s8 + $0x380] ss:$16 sps:$4 sm:$0xff]   ;;  %v14569_v9 = vld [vmem:[%s19260_s8 + $0x388] ss:$16 sps:$4 sm:$0xff]   ;;  %v14574_v55 = vld [vmem:[%s19260_s8 + $0x3a4] ss:$16 sps:$4 sm:$0xff]  }
 0xab6   :  { %10454 = vmatprep.mubr.bf16.mxu0 %v9775_v10  ;;  %10536 = vmatprep.mubr.bf16.mxu1 %v9775_v10  ;;  %v14577_v54 = vld [vmem:[%s19260_s8 + $0x3ac] ss:$16 sps:$4 sm:$0xff]   ;;  %v14572_v4 = vld [vmem:[%s19260_s8 + $0x3a0] ss:$16 sps:$4 sm:$0xff]   ;;  %v14575_v23 = vld [vmem:[%s19260_s8 + $0x3a8] ss:$16 sps:$4 sm:$0xff]  }
 0xab7   :  { %10455 = vmatmul.mubr.bf16.vlgmr.msra.gmra.mrb[84].mxu0 %v9774_v44  ;;  %10537 = vmatmul.mubr.bf16.vlgmr.msra.gmra.mrb[92].mxu1 %v9774_v44  ;;  %v14580_v10 = vld [vmem:[%s19260_s8 + $0x3c4] ss:$16 sps:$4 sm:$0xff]   ;;  %v14581_v44 = vld [vmem:[%s19260_s8 + $0x3c8] ss:$16 sps:$4 sm:$0xff]  }
 0xab8   :  { %10464 = vmatpush1.bf16.msra.mxu0 %v14494_v40  ;;  %10546 = vmatpush1.bf16.msra.mxu1 %v14497_v21  ;;  %v14583_v40 = vld [vmem:[%s19260_s8 + $0x3cc] ss:$16 sps:$4 sm:$0xff]   ;;  %v14578_v21 = vld [vmem:[%s19260_s8 + $0x3c0] ss:$16 sps:$4 sm:$0xff]  }
 0xab9   :  { %10495 = vmatprep.mubr.bf16.mxu0 %v9777_v45  ;;  %10577 = vmatprep.mubr.bf16.mxu1 %v9777_v45  ;;  %v14584_v45 = vld [vmem:[%s19260_s8 + $0x3e0] ss:$16 sps:$4 sm:$0xff]  }
 0xaba   :  { %10465 = vmatprep.subr.bf16.mxu0 %v14502_v46  ;;  %10547 = vmatprep.subr.bf16.mxu1 %v14505_v25  ;;  %v14586_v46 = vld [vmem:[%s19260_s8 + $0x3e4] ss:$16 sps:$4 sm:$0xff]   ;;  %v14589_v25 = vld [vmem:[%s19260_s8 + $0x3ec] ss:$16 sps:$4 sm:$0xff]  }
 0xabc   :  { %10466 = vmatpush1.bf16.msra.mxu0 %v14500_v29  ;;  %10548 = vmatpush1.bf16.msra.mxu1 %v14503_v26  ;;  %v14587_v29 = vld [vmem:[%s19260_s8 + $0x3e8] ss:$16 sps:$4 sm:$0xff]   ;;  %v9776_v26 = vpack.c.b16 %v18966_v59, %v18966_v59 }
 0xabd   :  { %10467 = vmatprep.subr.bf16.mxu0 %v14508_v50  ;;  %10549 = vmatprep.subr.bf16.mxu1 %v14511_v60  ;;  %v9512_v50 = vpop.xlane.xlu0 %9511 }
 0xabe   :  { %14656 = vrsqrt.f32 %v9512_v50  ;;  %vm9515_vm6 = vcmp.eq.f32.partialorder %v9512_v50, inf  ;;  %vm9517_vm7 = vcmp.eq.f32.partialorder %v9512_v50, 0.0 }
 0xac0   :  { %10468 = vmatpush1.bf16.msra.mxu0 %v14506_v35  ;;  %10550 = vmatpush1.bf16.msra.mxu1 %v14509_v63  ;;  %v14717_v63 = vmov 269488144  }
 0xac1   :  { %10469 = vmatprep.subr.bf16.mxu0 %v14514_v19  ;;  %10551 = vmatprep.subr.bf16.mxu1 %v14517_v6  ;;  %v9523_v19 = vunpack.c.l.s4 %v14717_v63 }
 0xac4   :  { %10470 = vmatpush1.bf16.msra.mxu0 %v14512_v5  ;;  %10552 = vmatpush1.bf16.msra.mxu1 %v14515_v20  ;;  %v9518_v5 = vand.u32 2147483648, %v9512_v50  ;;  %v9524_v20 = vunpack.c.0.s8 %v9523_v19  ;;  %v10646_v19 = vld [vmem:[%s19263_s11] sm:$0x77] }
 0xac5   :  { %10471 = vmatprep.subr.bf16.mxu0 %v14520_v48  ;;  %10553 = vmatprep.subr.bf16.mxu1 %v14523_v57  ;;  %v9732_v57 = vld [vmem:[%s19261_s9] sm:$0xf] }
 0xac8   :  { %10472 = vmatpush1.bf16.msra.mxu0 %v14518_v41  ;;  %10554 = vmatpush1.bf16.msra.mxu1 %v14521_v15  ;;  %v14657_v60 = vpop.eup %14656  ;;  %v19346_v41 = vld [vmem:[#allocation6_spill] sm:$0xff] }
 0xac9   :  { %10473 = vmatprep.subr.bf16.mxu0 %v14526_v11  ;;  %10555 = vmatprep.subr.bf16.mxu1 %v14529_v52  ;;  %v9514_v35 = vmul.f32 %v14657_v60, %v9512_v50  ;;  %v9527_v59 = vsub.s32 %v9524_v20, %v19346_v41  ;;  %v9737_v11 = vrot.slane %v9732_v57, %v15828_v38 }
 0xaca   :  { %v9745_v52 = vrot.slane %v9732_v57, %v16987_v34 }
 0xacb   :  { %v9516_v6 = vsel %vm9515_vm6, %v9512_v50, %v9514_v35 }
 0xacc   :  { %10474 = vmatpush1.bf16.msra.mxu0 %v14524_v33  ;;  %10556 = vmatpush1.bf16.msra.mxu1 %v14527_v2  ;;  %v9519_v48 = vsel %vm9517_vm7, %v9518_v5, %v9516_v6  ;;  %v9741_v33 = vrot.slane %v9732_v57, %v15831_v39  ;;  %v9749_v2 = vrot.slane %v9732_v57, %v15990_v49  ;;  %v10647_v6 = vld [vmem:[%s19263_s11 + $0x8] sm:$0x77]  ;;  %s14719_s11 = smov [#allocation3]  }
 0xacd   :  { %10475 = vmatprep.subr.bf16.mxu0 %v14532_v62  ;;  %10557 = vmatprep.subr.bf16.mxu1 %v14535_v3  ;;  %v9520_v15 = vadd.f32 1e-08, %v9519_v48  ;;  %s10919_s27 = sshll.u32 %s14719_s11, 4  ;;  %s10920_s27 = int_to_ptr.vmem [resolvable:$true] %s10919_s27 }
 0xace   :  { %s14691_s2 = scalar_lea.vmem %s10920_s27, 32  ;;  %p14696_p1 = scmp.lt.s32.totalorder %s10920_s27, %s10920_s27 }
 0xacf   :  { %v9528_v62 = vrot.slane %v9520_v15, %v9527_v59  ;;  %p14692_p0 = scmp.ne.s32.totalorder %s10920_s27, %s14691_s2  ;;  %p14697_p2 = scmp.lt.s32.totalorder %s14691_s2, %s14691_s2 }
 0xad0   :  { %10476 = vmatpush1.bf16.msra.mxu0 %v14530_v27  ;;  %10558 = vmatpush1.bf16.msra.mxu1 %v14533_v16 }
 0xad1   :  { %10477 = vmatprep.subr.bf16.mxu0 %v14538_v51  ;;  %10559 = vmatprep.subr.bf16.mxu1 %v14541_v13  ;;  %14658 = vrcp.f32 %v9528_v62  ;;  %p14698_p3 = por %p14697_p2, %p14696_p1 }
 0xad3   :  { %p14699_p4 = pnand %p14698_p3, %p14692_p0 }
 0xad4   :  { %10478 = vmatpush1.bf16.msra.mxu0 %v14536_v28  ;;  %10560 = vmatpush1.bf16.msra.mxu1 %v14539_v31 }
 0xad5   :  { %10479 = vmatprep.subr.bf16.mxu0 %v14544_v42  ;;  %10561 = vmatprep.subr.bf16.mxu1 %v14547_v12 }
 0xad8   :  { %10480 = vmatpush1.bf16.msra.mxu0 %v14542_v47  ;;  %10562 = vmatpush1.bf16.msra.mxu1 %v14545_v1 }
 0xad9   :  { %10481 = vmatprep.subr.bf16.mxu0 %v14550_v58  ;;  %10563 = vmatprep.subr.bf16.mxu1 %v14553_v24 }
 0xadc   :  { %10482 = vmatpush1.bf16.msra.mxu0 %v14548_v22  ;;  %10564 = vmatpush1.bf16.msra.mxu1 %v14551_v8 }
 0xadd   :  { %10483 = vmatprep.subr.bf16.mxu0 %v14556_v43  ;;  %10565 = vmatprep.subr.bf16.mxu1 %v14559_v36  ;;  %v14659_v36 = vpop.eup %14658 }
 0xae0   :  { %10484 = vmatpush1.bf16.msra.mxu0 %v14554_v17  ;;  %10566 = vmatpush1.bf16.msra.mxu1 %v14557_v7 }
 0xae1   :  { %10485 = vmatprep.subr.bf16.mxu0 %v14562_v61  ;;  %10567 = vmatprep.subr.bf16.mxu1 %v14565_v56 }
 0xae4   :  { %10486 = vmatpush1.bf16.msra.mxu0 %v14560_v32  ;;  %10568 = vmatpush1.bf16.msra.mxu1 %v14563_v37  ;;  %v14718_v37 = vmov 1966171168  }
 0xae5   :  { %10487 = vmatprep.subr.bf16.mxu0 %v14568_v14  ;;  %10569 = vmatprep.subr.bf16.mxu1 %v14571_v30  ;;  %v10617_v14 = vunpack.c.l.s4 %v14718_v37 }
 0xae8   :  { %10488 = vmatpush1.bf16.msra.mxu0 %v14566_v53  ;;  %10570 = vmatpush1.bf16.msra.mxu1 %v14569_v9 }
 0xae9   :  { %10489 = vmatprep.subr.bf16.mxu0 %v14574_v55  ;;  %10571 = vmatprep.subr.bf16.mxu1 %v14577_v54  ;;  %v9531_v55 = vmul.f32 %v14659_v36, %v18724_v0  ;;  %v10618_v54 = vunpack.c.0.s8 %v10617_v14 }
 0xaec   :  { %10490 = vmatpush1.bf16.msra.mxu0 %v14572_v4  ;;  %10572 = vmatpush1.bf16.msra.mxu1 %v14575_v23  ;;  %v10778_v4 = vmul.f32 %v9531_v55, %v9531_v55  ;;  %v10621_v23 = vsub.s32 %v10618_v54, %v19346_v41 }
 0xaed   :  { %10491 = vmatprep.subr.bf16.mxu0 %v14580_v10  ;;  %10573 = vmatprep.subr.bf16.mxu1 %v14583_v40 }
 0xaee   :  { %v10787_v40 = vrot.slane %v10778_v4, %v18134_v18 }
 0xaf0   :  { %10492 = vmatpush1.bf16.msra.mxu0 %v14578_v21  ;;  %10574 = vmatpush1.bf16.msra.mxu1 %v14581_v44  ;;  %v10780_v44 = vcombine.high %v10778_v4, %v10778_v4  ;;  %v10795_v50 = vcombine.high %v10787_v40, %v10787_v40 }
 0xaf1   :  { %10493 = vmatprep.subr.bf16.mxu0 %v14586_v46  ;;  %10575 = vmatprep.subr.bf16.mxu1 %v14589_v25  ;;  %v19169_v46 = vrot.slane %v9531_v55, %v10621_v23 }
 0xaf2   :  { %v19172_v0 = vrot.slane %v10780_v44, %v18134_v18  ;;  %v10802_v59 = vsel %vm9503_vm5, %v10795_v50, 0.0 }
 0xaf3   :  { %v19176_v35 = vcombine.high %v19169_v46, %v19169_v46  ;;  %v10714_v5 = vrot.slane %v19169_v46, %v15828_v38  ;;  %v10718_v18 = vrot.slane %v19169_v46, %v15831_v39  ;;  %v10722_v20 = vrot.slane %v19169_v46, %v16987_v34 }
 0xaf4   :  { %10494 = vmatpush1.bf16.msra.mxu0 %v14584_v45  ;;  %10576 = vmatpush1.bf16.msra.mxu1 %v14587_v29  ;;  %v10726_v15 = vrot.slane %v19169_v46, %v15990_v49 }
 0xaf7   :  { %10496 = vmatmul.mubr.bf16.vlgmr.msra.gmra.mrb[84].mxu0 %v9776_v26  ;;  %10578 = vmatmul.mubr.bf16.vlgmr.msra.gmra.mrb[92].mxu1 %v9776_v26 }
 0xbca   :  { %v10497_v3 = vpop.f32.mrb[84].mxu0  ;;  %v10579_v27 = vpop.f32.mrb[92].mxu1 }
 0xbcb   :  { %v12651_v16 = vadd.f32 %v10497_v3, %v9737_v11  ;;  %v12653_v51 = vadd.f32 %v10579_v27, %v9745_v52  ;;  %v10499_v13 = vpop.f32.mrb[85].mxu0  ;;  %v10581_v28 = vpop.f32.mrb[93].mxu1  ;;  %v10796_v11 = vcombine.high %v19172_v0, %v19172_v0  ;;  %v10801_v52 = vsel %vm9503_vm5, %v10787_v40, 0.0 }
 0xbcc   :  { %v12652_v31 = vadd.f32 %v10499_v13, %v9741_v33  ;;  %v12654_v42 = vadd.f32 %v10581_v28, %v9749_v2  ;;  %v10501_v12 = vpop.f32.mrb[86].mxu0  ;;  %v10583_v47 = vpop.f32.mrb[94].mxu1  ;;  %v10804_v33 = vsel %vm9503_vm5, %v19172_v0, 0.0  ;;  %v10730_v2 = vrot.slane %v19176_v35, %v15828_v38 }
 0xbcd   :  { %v12519_v1 = vmul.f32 -1.442695, %v12651_v16  ;;  %v12521_v58 = vmul.f32 -1.442695, %v12653_v51  ;;  %v10502_v24 = vpop.f32.mrb[87].mxu0  ;;  %v10584_v22 = vpop.f32.mrb[95].mxu1  ;;  %v10690_v3 = vcombine.high %v10646_v19, %v10646_v19  ;;  %v10691_v27 = vcombine.high %v10647_v6, %v10647_v6 }
 0xbce   :  { %v12520_v8 = vmul.f32 -1.442695, %v12652_v31  ;;  %v12522_v43 = vmul.f32 -1.442695, %v12654_v42  ;;  %v10803_v51 = vadd.f32 %v10802_v59, %v10801_v52  ;;  %v10734_v13 = vrot.slane %v19176_v35, %v15831_v39 }
 0xbcf   :  { %14660 = vpow2.f32 %v12519_v1  ;;  %v10738_v28 = vrot.slane %v19176_v35, %v16987_v34 }
 0xbd0   :  { %14662 = vpow2.f32 %v12521_v58  ;;  %v10805_v40 = vadd.f32 %v10804_v33, %v10803_v51 }
 0xbd1   :  { %14664 = vpow2.f32 %v12520_v8 }
 0xbd2   :  { %14666 = vpow2.f32 %v12522_v43 }
 0xbd9   :  { %v14661_v17 = vpop.eup %14660 }
 0xbda   :  { %v14663_v7 = vpop.eup %14662  ;;  %v10598_v61 = vadd.f32 1.0, %v14661_v17 }
 0xbdb   :  { %v14665_v56 = vpop.eup %14664  ;;  %v10600_v32 = vadd.f32 1.0, %v14663_v7 }
 0xbdc   :  { %v14667_v30 = vpop.eup %14666  ;;  %14668 = vrcp.f32 %v10598_v61  ;;  %v10599_v53 = vadd.f32 1.0, %v14665_v56 }
 0xbdd   :  { %14670 = vrcp.f32 %v10600_v32  ;;  %v10601_v9 = vadd.f32 1.0, %v14667_v30 }
 0xbde   :  { %14672 = vrcp.f32 %v10599_v53 }
 0xbdf   :  { %14674 = vrcp.f32 %v10601_v9 }
 0xbe6   :  { %v14669_v10 = vpop.eup %14668 }
 0xbe7   :  { %v14671_v21 = vpop.eup %14670 }
 0xbe8   :  { %v14673_v25 = vpop.eup %14672 }
 0xbe9   :  { %v14675_v45 = vpop.eup %14674  ;;  %v10614_v29 = vcombine.low %v14669_v10, %v14673_v25 }
 0xbea   :  { %v10615_v26 = vcombine.low %v14671_v21, %v14675_v45 }
 0xbeb   :  { %v10622_v60 = vrot.slane %v10614_v29, %v10621_v23 }
 0xbec   :  { %v10629_v63 = vrot.slane %v10615_v26, %v10621_v23 }
 0xbee   :  { %v10630_v48 = vcombine.low %v10622_v60, %v10629_v63  ;;  %v10631_v57 = vcombine.high %v10622_v60, %v10629_v63 }
 0xbf0   :  { %v10638_v62 = vrot.slane %v10630_v48, %v10621_v23  ;;  %v10645_v16 = vrot.slane %v10631_v57, %v10621_v23 }
 0xbf2   :  { %v10651_v31 = vrot.slane %v10638_v62, %v15828_v38  ;;  %v10655_v42 = vrot.slane %v10638_v62, %v15831_v39  ;;  %v10659_v12 = vrot.slane %v10638_v62, %v16987_v34  ;;  %v10663_v47 = vrot.slane %v10638_v62, %v15990_v49 }
 0xbf3   :  { %v10667_v1 = vrot.slane %v10645_v16, %v15828_v38  ;;  %v10671_v58 = vrot.slane %v10645_v16, %v15831_v39  ;;  %v10675_v24 = vrot.slane %v10645_v16, %v16987_v34  ;;  %v10679_v22 = vrot.slane %v10645_v16, %v15990_v49 }
 0xbf4   :  { %v10694_v8 = vmul.f32 %v10651_v31, %v10646_v19  ;;  %v10695_v43 = vmul.f32 %v10690_v3, %v10655_v42  ;;  %v10696_v36 = vmul.f32 %v10659_v12, %v10647_v6  ;;  %v10697_v17 = vmul.f32 %v10691_v27, %v10663_v47 }
 0xbf5   :  { %v10698_v7 = vmul.f32 %v10667_v1, %v10646_v19  ;;  %v10699_v61 = vmul.f32 %v10690_v3, %v10671_v58  ;;  %v10700_v56 = vmul.f32 %v10675_v24, %v10647_v6  ;;  %v10701_v32 = vmul.f32 %v10691_v27, %v10679_v22 }
 0xbf6   :  { %v10817_v37 = vmul.f32 %v10694_v8, %v10694_v8  ;;  %v10818_v14 = vmul.f32 %v10695_v43, %v10695_v43  ;;  %v10819_v30 = vmul.f32 %v10696_v36, %v10696_v36  ;;  %v10820_v53 = vmul.f32 %v10697_v17, %v10697_v17 }
 0xbf7   :  { %v10821_v9 = vmul.f32 %v10698_v7, %v10698_v7  ;;  %v10822_v55 = vmul.f32 %v10699_v61, %v10699_v61  ;;  %v10823_v54 = vmul.f32 %v10700_v56, %v10700_v56  ;;  %v10742_v34 = vrot.slane %v19176_v35, %v15990_v49 }
 0xbf8   :  { %v10825_v4 = vsel %vm10759_vm8, %v10817_v37, 0.0  ;;  %v10826_v23 = vsel %vm10759_vm8, %v10818_v14, 0.0  ;;  %v10824_v10 = vmul.f32 %v10701_v32, %v10701_v32  ;;  %v10828_v44 = vsel %vm10759_vm8, %v10819_v30, 0.0 }
 0xbf9   :  { %v10827_v21 = vadd.f32 %v10826_v23, %v10825_v4  ;;  %v10834_v46 = vsel %vm10759_vm8, %v10821_v9, 0.0  ;;  %v10835_v25 = vsel %vm10759_vm8, %v10822_v55, 0.0  ;;  %v10830_v45 = vsel %vm10759_vm8, %v10820_v53, 0.0 }
 0xbfa   :  { %v10836_v29 = vadd.f32 %v10835_v25, %v10834_v46  ;;  %v10751_v26 = vmul.f32 %v10714_v5, %v10694_v8  ;;  %v10752_v50 = vmul.f32 %v10718_v18, %v10695_v43  ;;  %v10837_v49 = vsel %vm10759_vm8, %v10823_v54, 0.0 }
 0xbfb   :  { %v10829_v60 = vadd.f32 %v10828_v44, %v10827_v21  ;;  %v10753_v35 = vmul.f32 %v10722_v20, %v10696_v36  ;;  %v10755_v63 = vmul.f32 %v10730_v2, %v10698_v7  ;;  %v10756_v57 = vmul.f32 %v10734_v13, %v10699_v61 }
 0xbfc   :  { %v10838_v19 = vadd.f32 %v10837_v49, %v10836_v29  ;;  %v10760_v6 = vsel %vm10759_vm8, %v10751_v26, 0.0  ;;  %v10761_v48 = vsel %vm10759_vm8, %v10752_v50, 0.0  ;;  %v10839_v52 = vsel %vm10759_vm8, %v10824_v10, 0.0 }
 0xbfd   :  { %v10831_v59 = vadd.f32 %v10830_v45, %v10829_v60  ;;  %v10754_v33 = vmul.f32 %v10726_v15, %v10697_v17  ;;  %v10762_v62 = vadd.f32 %v10761_v48, %v10760_v6  ;;  %v10763_v5 = vsel %vm10759_vm8, %v10753_v35, 0.0 }
 0xbfe   :  { %v10840_v3 = vadd.f32 %v10839_v52, %v10838_v19  ;;  %v10757_v18 = vmul.f32 %v10738_v28, %v10700_v56  ;;  %v10769_v27 = vsel %vm10759_vm8, %v10755_v63, 0.0  ;;  %v10770_v2 = vsel %vm10759_vm8, %v10756_v57, 0.0 }
 0xbff   :  { %10832 = vadd.xlane.f32.xlu1 %v10831_v59  ;;  %v10764_v20 = vadd.f32 %v10763_v5, %v10762_v62  ;;  %v10806_v16 = vsel %vm9503_vm5, %v10796_v11, 0.0  ;;  %v10758_v51 = vmul.f32 %v10742_v34, %v10701_v32  ;;  %v10771_v13 = vadd.f32 %v10770_v2, %v10769_v27 }
 0xc00   :  { %10841 = vadd.xlane.f32.xlu0 %v10840_v3  ;;  %v10807_v15 = vadd.f32 %v10806_v16, %v10805_v40  ;;  %v10765_v31 = vsel %vm10759_vm8, %v10754_v33, 0.0  ;;  %v10772_v42 = vsel %vm10759_vm8, %v10757_v18, 0.0  ;;  %v19347_v24 = vlaneseq }
 0xc01   :  { %v10766_v28 = vadd.f32 %v10765_v31, %v10764_v20  ;;  %v10773_v12 = vadd.f32 %v10772_v42, %v10771_v13  ;;  %v10774_v47 = vsel %vm10759_vm8, %v10758_v51, 0.0 }
 0xc02   :  { %v10860_v22 = vand.u32 127, %v19347_v24 }
 0xc03   :  { %10808 = vadd.xlane.f32.xlu1 %v10807_v15  ;;  %v10775_v1 = vadd.f32 %v10774_v47, %v10773_v12 }
 0xc04   :  { %10767 = vadd.xlane.f32.xlu0 %v10766_v28  ;;  %v10863_v36 = vsub.s32 %v10860_v22, %v19346_v41 }
 0xc07   :  { %10776 = vadd.xlane.f32.xlu1 %v10775_v1 }
 0xc8c   :  { %v10833_v58 = vpop.xlane.xlu1 %10832 }
 0xc8d   :  { %14676 = vrsqrt.f32 %v10833_v58  ;;  %v10842_v0 = vpop.xlane.xlu0 %10841  ;;  %vm10845_vm9 = vcmp.eq.f32.partialorder %v10833_v58, inf  ;;  %v10848_v7 = vand.u32 2147483648, %v10833_v58  ;;  %vm10847_vm10 = vcmp.eq.f32.partialorder %v10833_v58, 0.0 }
 0xc8e   :  { %14678 = vrsqrt.f32 %v10842_v0  ;;  %vm10852_vm11 = vcmp.eq.f32.partialorder %v10842_v0, inf  ;;  %v10855_v32 = vand.u32 2147483648, %v10842_v0  ;;  %vm10854_vm12 = vcmp.eq.f32.partialorder %v10842_v0, 0.0 }
 0xc90   :  { %v10809_v11 = vpop.xlane.xlu1 %10808 }
 0xc91   :  { %14680 = vrsqrt.f32 %v10809_v11  ;;  %vm10812_vm13 = vcmp.eq.f32.partialorder %v10809_v11, inf  ;;  %v10815_v34 = vand.u32 2147483648, %v10809_v11  ;;  %vm10814_vm14 = vcmp.eq.f32.partialorder %v10809_v11, 0.0  ;;  %v10768_v25 = vpop.xlane.xlu0 %10767 }
 0xc94   :  { %v10777_v45 = vpop.xlane.xlu1 %10776 }
 0xc97   :  { %v14677_v8 = vpop.eup %14676 }
 0xc98   :  { %v14679_v43 = vpop.eup %14678  ;;  %v10844_v17 = vmul.f32 %v14677_v8, %v10833_v58 }
 0xc99   :  { %v10851_v61 = vmul.f32 %v14679_v43, %v10842_v0 }
 0xc9a   :  { %v10846_v56 = vsel %vm10845_vm9, %v10833_v58, %v10844_v17 }
 0xc9b   :  { %v14681_v37 = vpop.eup %14680  ;;  %v10849_v14 = vsel %vm10847_vm10, %v10848_v7, %v10846_v56  ;;  %v10853_v30 = vsel %vm10852_vm11, %v10842_v0, %v10851_v61 }
 0xc9c   :  { %v10864_v53 = vrot.slane %v10849_v14, %v10863_v36  ;;  %v10856_v9 = vsel %vm10854_vm12, %v10855_v32, %v10853_v30  ;;  %v10811_v55 = vmul.f32 %v14681_v37, %v10809_v11 }
 0xc9d   :  { %v10868_v54 = vrot.slane %v10856_v9, %v10863_v36 }
 0xc9e   :  { %v10813_v4 = vsel %vm10812_vm13, %v10809_v11, %v10811_v55 }
 0xc9f   :  { %v10816_v41 = vsel %vm10814_vm14, %v10815_v34, %v10813_v4  ;;  %v10869_v23 = vsel %vm9470_vm1, %v10868_v54, %v10864_v53 }
 0xca0   :  { %v10871_v10 = vmul.f32 %v10869_v23, %v10816_v41 }
 0xca2   :  { %v10872_v40 = vmax.f32 %v10871_v10, 1e-08 }
 0xca4   :  { %14682 = vrcp.f32 %v10872_v40 }
 0xcae   :  { %v14683_v21 = vpop.eup %14682 }
 0xcaf   :  { %v10885_v44 = vrot.slane %v14683_v21, %v15831_v39  ;;  %v10878_v46 = vrot.slane %v14683_v21, %v15828_v38 }
 0xcb1   :  { %10887 = vbcast.lane.b32.xlu1 %v10885_v44, 256  ;;  %10880 = vbcast.lane.b32.xlu0 %v10878_v46, 256 }
 0xd23   :  { %v10881_v29 = vpop.permute.xlu0 %10880  ;;  %v10888_v50 = vpop.permute.xlu1 %10887 }
 0xd24   :  { %v10891_v26 = vmul.f32 %v10881_v29, %v10768_v25  ;;  %v10892_v60 = vmul.f32 %v10888_v50, %v10777_v45 }
 0xd26   :  { %10896 = vperm.xlu1 %12828, %v10891_v26  }
 0xd2a   :  { %10899 = vperm.xlu1 %12828, %v10892_v60  }
 0xda5   :  { %v10897_v49 = vpop.permute.xlu1 %10896 }
 0xda6   :  { %v10904_v63 = vrot.slane %v10897_v49, %v10863_v36 }
 0xda9   :  { %v10900_v35 = vpop.permute.xlu1 %10899 }
 0xdaa   :  { %v10908_v19 = vrot.slane %v10900_v35, %v10863_v36 }
 0xdac   :  { %v10909_v38 = vsel %vm9470_vm1, %v10908_v19, %v10904_v63 }
 0xdad   :  { %10912 = vst.msk [vmem:[#allocation3] sm:$0x3] %vm10911_vm15, %v10909_v38 }
 0xdae   :  { %14702 = shalt.err (!%p14699_p4)
}
 0xdaf   :  { %s14703_s30 = scalar_lea.hbm %s19264_s12, 32 }
 0xdb0   :  { %p14704_p5 = scmp.ne.s32.totalorder %s19264_s12, %s14703_s30  ;;  %p14707_p6 = scmp.lt.u32.totalorder %s14703_s30, %s19264_s12 }
 0xdb2   :  { %p14709_p7 = pnand %p14707_p6, %p14704_p5 }
 0xdb4   :  { %14712 = shalt.err (!%p14709_p7)
}
 0xdb5   :  { %10922 = dma.vmem_to_hbm [thread:$0]  %s10920_s27, 32, %s19264_s12, [#allocation4]  }
 0xdb6   :  { %14713 = dma.done.wait [#allocation4], 32  }
 0xdb7   :  { %14714 = vsyncadd [#allocation4], 4294967264 }
 0xdb8   :  { %10926 = vsyncpa [#allocation4], 1 }

</bundles_post_ra>
